<compile_context>
chip_gen: v6e
topology: v6e:2x2x1
jax: 0.10.0
libtpu: 0.0.40
codegen_flags: <defaults>
</compile_context>

<pallas_src>
import numpy as np
import jax
import jax.numpy as jnp
from jax import lax
from jax.experimental import pallas as pl
from jax.experimental.pallas import tpu as pltpu

jax.config.update("jax_default_matmul_precision", "highest")

# ----------------------------- configuration -----------------------------
B = 2
H = 8
W = 8
N = H * W                 # 64 tokens per image
C = 32                    # channels
NUM_HEADS = 4
HD = C // NUM_HEADS       # 8
HIDDEN = 4 * C            # mlp_ratio = 4  -> 128
LAYER_SCALE = 0.1
LN_EPS = 1e-5
BN_EPS = 1e-5
L2_EPS = 1e-12
_SQRT2 = 1.4142135623730951
_GELU_K = 0.7978845608028654      # sqrt(2/pi)

BN_TOK = B * N            # 128 = all tokens of both images
PAD = 16                  # sublane halo of the conv staging buffer
BUF_ROWS = PAD + BN_TOK + PAD     # 160
HI = lax.Precision.HIGHEST

# ---- weight / constant stack (single (WS_ROWS, 32) DMA), row offsets -------
R_WQKV = 0                 # (96, 32)  wqkv.T with norm1 gamma folded in
R_WPROJ = 96               # (32, 32)  wproj.T
R_W1 = 128                 # (128,32)  w1.T with norm3 gamma folded in
R_W2T = 256                # (128,32)  w2 with mlp-hidden-LN gamma folded in
R_TM = 384                 # (32, 32)  temperature * block-diag head mask
R_TB = 416                 # (32, 32)  0 in-block / -1e30 off-block
R_DW1W = 448               # 9 rows    dw1 taps (ky*3+kx)
R_DW1B = 457
R_BNSC = 458               # folded inference-BN scale
R_BNSH = 459               # folded inference-BN shift
R_DW2W = 460               # 9 rows
R_DW2B = 469
R_MYM = 472                # (128,32) pre-broadcast border masks (dy=-1)
R_MYP = 600                # dy=+1
R_MXM = 728                # dx=-1
R_MXP = 856                # dx=+1
WS_ROWS = 984

# ---- per-channel column table (HIDDEN, CT_COLS): params as (len, 1) columns
CB1F, CBQKV, CBPROJ, CG1, CLN2G, CLN2B, CG2, CB2F, CG3 = range(9)
CT_COLS = 16


# --------------------------- in-kernel helpers ----------------------------
def _gelu(x):
    # tanh-form GELU: the transcendental goes to the EUP slot.
    return 0.5 * x * (1.0 + jnp.tanh(_GELU_K * (x + 0.044715 * x * x * x)))


# ------------------------------ fused kernel -------------------------------
def xca_block_kernel(x_ref, ct_ref, ws_ref, gm_ref, o_ref, buf_ref):
    x = x_ref[...]                                        # (C, B*N) = (32,128)
    ct = ct_ref[...]                                      # (128, 16)

    # ===== stage 1: norm1 (affine folded) + XCAttention + proj + residual ====
    mu1 = jnp.mean(x, axis=0, keepdims=True)
    var1 = jnp.mean((x - mu1) ** 2, axis=0, keepdims=True)
    xh1 = (x - mu1) * lax.rsqrt(var1 + LN_EPS)            # (32,128)

    wqkv = ws_ref[R_WQKV:R_WQKV + 3 * C, :]               # (96,32)
    qkv = jnp.dot(wqkv, xh1, precision=HI,
                  preferred_element_type=jnp.float32)
    qkv = qkv + ct[0:3 * C, CBQKV:CBQKV + 1]              # (96,128)
    q = qkv[0:C, :]
    k = qkv[C:2 * C, :]
    v = qkv[2 * C:3 * C, :]

    tm = ws_ref[R_TM:R_TM + C, :]                         # (32,32)
    tb = ws_ref[R_TB:R_TB + C, :]                         # (32,32)

    x_attn = jnp.zeros((C, BN_TOK), jnp.float32)
    for b in range(B):
        qb = q[:, b * N:(b + 1) * N]                      # (32,64)
        kb = k[:, b * N:(b + 1) * N]
        # F.normalize(dim=-1): per (head,dim) row over this image's tokens.
        qn = qb * lax.rsqrt(jnp.maximum(
            jnp.sum(qb * qb, axis=1, keepdims=True), L2_EPS * L2_EPS))
        kn = kb * lax.rsqrt(jnp.maximum(
            jnp.sum(kb * kb, axis=1, keepdims=True), L2_EPS * L2_EPS))
        # cross-covariance scores for all heads, contraction over tokens (NT).
        s = lax.dot_general(qn, kn, (((1,), (1,)), ((), ())),
                            precision=HI, preferred_element_type=jnp.float32)
        s = s * tm + tb                                   # temp + head mask
        p = jnp.exp(s - jnp.max(s, axis=1, keepdims=True))
        p = p * pl.reciprocal(jnp.sum(p, axis=1, keepdims=True), approx=True)
        for hf in range(2):                               # token halves
            vbs = v[:, b * N + hf * (N // 2): b * N + (hf + 1) * (N // 2)]
            blk = jnp.dot(p, vbs, precision=HI,
                          preferred_element_type=jnp.float32)       # (32,32)
            # torch chunk/transpose/reshape quirk: precomputed 0/1 scatter G.
            gperm = gm_ref[(2 * b + hf) * 32:(2 * b + hf + 1) * 32, :]
            x_attn = x_attn + lax.dot_general(
                blk, gperm, (((0,), (0,)), ((), ())),
                precision=HI, preferred_element_type=jnp.float32)   # (32,128)

    wproj = ws_ref[R_WPROJ:R_WPROJ + C, :]                # (32,32)
    proj = jnp.dot(wproj, x_attn, precision=HI,
                   preferred_element_type=jnp.float32)
    proj = proj + ct[0:C, CBPROJ:CBPROJ + 1]
    x1 = x + ct[0:C, CG1:CG1 + 1] * proj

    # =================== stage 2: norm2 + LPI + residual =====================
    mu2 = jnp.mean(x1, axis=0, keepdims=True)
    var2 = jnp.mean((x1 - mu2) ** 2, axis=0, keepdims=True)
    t2 = (x1 - mu2) * lax.rsqrt(var2 + LN_EPS)
    t2 = t2 * ct[0:C, CLN2G:CLN2G + 1] + ct[0:C, CLN2B:CLN2B + 1]

    eye = gm_ref[BN_TOK:2 * BN_TOK, :]                    # (128,128) identity
    # cm -> tokens-major transpose folded into an MXU matmul (NT with eye).
    t2_tm = lax.dot_general(eye, t2, (((1,), (1,)), ((), ())),
                            precision=HI, preferred_element_type=jnp.float32)

    # zero only the halo rows of the conv staging buffer (once).
    buf_ref[0:PAD, :] = jnp.zeros((PAD, C), jnp.float32)
    buf_ref[PAD + BN_TOK:PAD + BN_TOK + PAD, :] = jnp.zeros((PAD, C),
                                                            jnp.float32)

    # precomputed, pre-broadcast border masks: hoisted, shared by both convs.
    mym = ws_ref[R_MYM:R_MYM + BN_TOK, :]
    myp = ws_ref[R_MYP:R_MYP + BN_TOK, :]
    mxm = ws_ref[R_MXM:R_MXM + BN_TOK, :]
    mxp = ws_ref[R_MXP:R_MXP + BN_TOK, :]

    def dwconv3x3(vals_tm, w_row0):
        # depthwise 3x3, padding=1, on the row-flattened (b, y, x) layout:
        # one aligned store + 9 shifted window loads, borders killed by the
        # precomputed masks (no in-kernel iota / where).
        buf_ref[PAD:PAD + BN_TOK, :] = vals_tm
        acc = jnp.zeros((BN_TOK, C), jnp.float32)
        for dy in range(3):
            for dx in range(3):
                off = (dy - 1) * W + (dx - 1)
                tap = buf_ref[PAD + off:PAD + off + BN_TOK, :]
                if dy == 0:
                    tap = tap * mym
                elif dy == 2:
                    tap = tap * myp
                if dx == 0:
                    tap = tap * mxm
                elif dx == 2:
                    tap = tap * mxp
                acc = acc + tap * ws_ref[w_row0 + dy * 3 + dx, :]
        return acc

    z = dwconv3x3(t2_tm, R_DW1W) + ws_ref[R_DW1B, :]
    z = _gelu(z)
    z = z * ws_ref[R_BNSC, :] + ws_ref[R_BNSH, :]         # inference BN (folded)
    y_tm = dwconv3x3(z, R_DW2W) + ws_ref[R_DW2B, :]

    # tokens-major -> cm transpose, again via the MXU (TN with eye).
    y_cm = lax.dot_general(y_tm, eye, (((0,), (0,)), ((), ())),
                           precision=HI, preferred_element_type=jnp.float32)
    x2 = x1 + ct[0:C, CG2:CG2 + 1] * y_cm

    # ============ stage 3: norm3 (affine folded) + Mlp + residual ============
    mu3 = jnp.mean(x2, axis=0, keepdims=True)
    var3 = jnp.mean((x2 - mu3) ** 2, axis=0, keepdims=True)
    xh3 = (x2 - mu3) * lax.rsqrt(var3 + LN_EPS)

    w1 = ws_ref[R_W1:R_W1 + HIDDEN, :]                    # (128,32)
    hid = jnp.dot(w1, xh3, precision=HI,
                  preferred_element_type=jnp.float32) + ct[:, CB1F:CB1F + 1]
    hid = _gelu(hid)

    muh = jnp.mean(hid, axis=0, keepdims=True)
    varh = jnp.mean((hid - muh) ** 2, axis=0, keepdims=True)
    hhat = (hid - muh) * lax.rsqrt(varh + LN_EPS)         # affine folded in W2

    w2t = ws_ref[R_W2T:R_W2T + HIDDEN, :]                 # (128,32)
    ymlp = lax.dot_general(w2t, hhat, (((0,), (0,)), ((), ())),
                           precision=HI, preferred_element_type=jnp.float32)
    ymlp = ymlp + ct[0:C, CB2F:CB2F + 1]

    o_ref[...] = x2 + ct[0:C, CG3:CG3 + 1] * ymlp         # full-width store


# ------------------------------ wrapper ------------------------------------
@jax.jit
def xca_block(x, pk):
    x_cm = x.reshape(BN_TOK, C).T                         # (32, 128) lane-dense
    vmem = pltpu.MemorySpace.VMEM
    out_cm = pl.pallas_call(
        xca_block_kernel,
        out_shape=jax.ShapeDtypeStruct((C, BN_TOK), jnp.float32),
        in_specs=[pl.BlockSpec(memory_space=vmem) for _ in range(4)],
        out_specs=pl.BlockSpec(memory_space=vmem),
        scratch_shapes=[pltpu.VMEM((BUF_ROWS, C), jnp.float32)],
    )(x_cm, pk["coltab"], pk["wstack"], pk["gmat"])
    return out_cm.T.reshape(B, N, C)


# ----------------------- parameter packing (one time) ----------------------
def pack_params(p):
    """Packs weights channels-major, folds LN affines / BN stats, precomputes
    the permutation / mask / identity constants (all hoisted out of the
    forward pass)."""
    f32 = np.float32
    a = {k: np.asarray(v, f32) for k, v in p.items()}

    # ---- LayerNorm-affine folds (exact algebra) ----
    wqkv_cm = a["wqkv"].T * a["ln1_g"][None, :]                  # (96,32)
    bqkv_f = a["wqkv"].T @ a["ln1_b"] + a["bqkv"]                # (96,)
    w1_cm = a["w1"].T * a["ln3_g"][None, :]                      # (128,32)
    b1_f = a["w1"].T @ a["ln3_b"] + a["b1"]                      # (128,)
    w2t_cm = a["w2"] * a["lnm_g"][:, None]                       # (128,32)
    b2_f = a["w2"].T @ a["lnm_b"] + a["b2"]                      # (32,)

    bn_scale = a["bn_w"] / np.sqrt(a["bn_v"] + BN_EPS)
    bn_shift = a["bn_b"] - a["bn_m"] * bn_scale

    # ---- temperature * block-diag head mask / additive off-block bias ----
    hi = np.arange(C)[:, None] // HD
    hj = np.arange(C)[None, :] // HD
    same = hi == hj
    tmm = np.where(same, np.repeat(a["temp"], HD)[:, None], 0.0).astype(f32)
    tbm = np.where(same, 0.0, -1e30).astype(f32)

    # ---- pre-broadcast conv border masks ----
    r = np.arange(BN_TOK)
    yy = (r // W) % H
    xx = r % W
    bc = lambda m: np.broadcast_to(m.astype(f32)[:, None], (BN_TOK, C))
    mym, myp = bc(yy > 0), bc(yy < H - 1)
    mxm, mxp = bc(xx > 0), bc(xx < W - 1)

    # ---- weight / constant stack ----
    ws = np.zeros((WS_ROWS, C), f32)
    ws[R_WQKV:R_WQKV + 3 * C] = wqkv_cm
    ws[R_WPROJ:R_WPROJ + C] = a["wproj"].T
    ws[R_W1:R_W1 + HIDDEN] = w1_cm
    ws[R_W2T:R_W2T + HIDDEN] = w2t_cm
    ws[R_TM:R_TM + C] = tmm
    ws[R_TB:R_TB + C] = tbm
    ws[R_DW1W:R_DW1W + 9] = a["dw1_w"].reshape(9, C)
    ws[R_DW1B] = a["dw1_b"]
    ws[R_BNSC] = bn_scale
    ws[R_BNSH] = bn_shift
    ws[R_DW2W:R_DW2W + 9] = a["dw2_w"].reshape(9, C)
    ws[R_DW2B] = a["dw2_b"]
    ws[R_MYM:R_MYM + BN_TOK] = mym
    ws[R_MYP:R_MYP + BN_TOK] = myp
    ws[R_MXM:R_MXM + BN_TOK] = mxm
    ws[R_MXP:R_MXP + BN_TOK] = mxp

    # ---- per-channel column table ----
    ct = np.zeros((HIDDEN, CT_COLS), f32)
    ct[:, CB1F] = b1_f
    ct[0:3 * C, CBQKV] = bqkv_f
    ct[0:C, CBPROJ] = a["bproj"]
    ct[0:C, CG1] = a["gamma1"]
    ct[0:C, CLN2G] = a["ln2_g"]
    ct[0:C, CLN2B] = a["ln2_b"]
    ct[0:C, CG2] = a["gamma2"]
    ct[0:C, CB2F] = b2_f
    ct[0:C, CG3] = a["gamma3"]

    # ---- permutation G for torch's (attn@v).transpose(1,2).reshape(B,N,C) ----
    # built by simulating the reshape on source ids (self-verifying).
    src_ids = np.arange(B * NUM_HEADS * HD * N).reshape(1, B, NUM_HEADS, HD, N)
    dst = np.transpose(src_ids, (0, 2, 1, 3, 4)).reshape(B * N, C)
    b_s = dst // (NUM_HEADS * HD * N)
    hh = (dst // (HD * N)) % NUM_HEADS
    dd = (dst // N) % HD
    nn_ = dst % N
    assert np.array_equal(nn_ % (N // 2),
                          np.broadcast_to(np.arange(C), (BN_TOK, C)))
    rows = (N // 2) * (2 * b_s + nn_ // (N // 2)) + HD * hh + dd
    assert np.all(rows == rows[:, :1])
    gm = np.zeros((2 * BN_TOK, BN_TOK), f32)
    gm[rows[:, 0], np.arange(BN_TOK)] = 1.0
    gm[BN_TOK:2 * BN_TOK] = np.eye(BN_TOK, dtype=f32)     # identity for transposes

    return dict(coltab=jnp.asarray(ct), wstack=jnp.asarray(ws),
                gmat=jnp.asarray(gm))


# --------------------------- parameters -------------------------------------
def init_params(key):
    ks = jax.random.split(key, 25)

    def nrm(k, shape, scale=0.05):
        return scale * jax.random.normal(k, shape, dtype=jnp.float32)

    return dict(
        ln1_g=1.0 + nrm(ks[0], (C,)), ln1_b=nrm(ks[1], (C,)),
        # linear weights in math layout (in, out): y = x @ W + b
        wqkv=nrm(ks[2], (C, 3 * C)), bqkv=nrm(ks[3], (3 * C,)),
        temp=jax.random.uniform(ks[4], (NUM_HEADS,), jnp.float32, 0.5, 1.5),
        wproj=nrm(ks[5], (C, C)), bproj=nrm(ks[6], (C,)),
        ln2_g=1.0 + nrm(ks[7], (C,)), ln2_b=nrm(ks[8], (C,)),
        # depthwise conv weights stored as (kh, kw, C)
        dw1_w=nrm(ks[9], (3, 3, C)), dw1_b=nrm(ks[10], (C,)),
        bn_w=1.0 + nrm(ks[11], (C,)), bn_b=nrm(ks[12], (C,)),
        bn_m=nrm(ks[13], (C,)),
        bn_v=jax.random.uniform(ks[14], (C,), jnp.float32, 0.5, 1.5),
        dw2_w=nrm(ks[15], (3, 3, C)), dw2_b=nrm(ks[16], (C,)),
        ln3_g=1.0 + nrm(ks[17], (C,)), ln3_b=nrm(ks[18], (C,)),
        w1=nrm(ks[19], (C, HIDDEN)), b1=nrm(ks[20], (HIDDEN,)),
        lnm_g=1.0 + nrm(ks[21], (HIDDEN,)), lnm_b=nrm(ks[22], (HIDDEN,)),
        w2=nrm(ks[23], (HIDDEN, C)), b2=nrm(ks[24], (C,)),
        gamma1=jnp.full((C,), LAYER_SCALE, jnp.float32),
        gamma2=jnp.full((C,), LAYER_SCALE, jnp.float32),
        gamma3=jnp.full((C,), LAYER_SCALE, jnp.float32),
    )


# --------------------------- pure-JAX reference ------------------------------
def ref_forward(x, p):
    def ln(v, g, b):
        mu = v.mean(-1, keepdims=True)
        var = ((v - mu) ** 2).mean(-1, keepdims=True)
        return (v - mu) / jnp.sqrt(var + LN_EPS) * g + b

    def gelu_exact(v):
        return 0.5 * v * (1.0 + jax.scipy.special.erf(v / _SQRT2))

    # --- XCAttention (torch op order, incl. the chunk/transpose quirk) ---
    t = ln(x, p["ln1_g"], p["ln1_b"])
    qkv = t @ p["wqkv"] + p["bqkv"]                                     # (B,N,3C)
    qkv = jnp.transpose(qkv.reshape(B, N, 3, NUM_HEADS, HD), (2, 0, 3, 1, 4))
    q, k, v = qkv[0], qkv[1], qkv[2]                                    # (B,h,N,hd)
    q = jnp.swapaxes(q, -1, -2)
    k = jnp.swapaxes(k, -1, -2)
    v = jnp.swapaxes(v, -1, -2)                                         # (B,h,hd,N)
    qn = q / jnp.maximum(jnp.sqrt((q * q).sum(-1, keepdims=True)), L2_EPS)
    kn = k / jnp.maximum(jnp.sqrt((k * k).sum(-1, keepdims=True)), L2_EPS)
    attn = (qn @ jnp.swapaxes(kn, -1, -2)) * p["temp"][None, :, None, None]
    attn = jax.nn.softmax(attn, axis=-1)
    av = attn @ v                                                       # (B,h,hd,N)
    x_attn = jnp.transpose(av, (1, 0, 2, 3)).reshape(B, N, C)
    x_attn = x_attn @ p["wproj"] + p["bproj"]
    x = x + p["gamma1"] * x_attn

    # --- LPI ---
    t = ln(x, p["ln2_g"], p["ln2_b"])
    sp = t.reshape(B, H, W, C)
    pad = jnp.pad(sp, ((0, 0), (1, 1), (1, 1), (0, 0)))
    y = sum(pad[:, dy:dy + H, dx:dx + W, :] * p["dw1_w"][dy, dx]
            for dy in range(3) for dx in range(3)) + p["dw1_b"]
    y = gelu_exact(y)
    y = (y - p["bn_m"]) / jnp.sqrt(p["bn_v"] + BN_EPS) * p["bn_w"] + p["bn_b"]
    pad = jnp.pad(y, ((0, 0), (1, 1), (1, 1), (0, 0)))
    y2 = sum(pad[:, dy:dy + H, dx:dx + W, :] * p["dw2_w"][dy, dx]
             for dy in range(3) for dx in range(3)) + p["dw2_b"]
    x = x + p["gamma2"] * y2.reshape(B, N, C)

    # --- Mlp ---
    t = ln(x, p["ln3_g"], p["ln3_b"])
    hdn = gelu_exact(t @ p["w1"] + p["b1"])
    hdn = ln(hdn, p["lnm_g"], p["lnm_b"])
    x = x + p["gamma3"] * (hdn @ p["w2"] + p["b2"])
    return x


# --------------------------------- main --------------------------------------
if __name__ == "__main__":
    key = jax.random.PRNGKey(0)
    kx, kp = jax.random.split(key)
    x = jax.random.normal(kx, (B, N, C), dtype=jnp.float32)
    params = init_params(kp)
    packed = pack_params(params)          # one-time packing / folding

    out = xca_block(x, packed)
    out = jax.block_until_ready(out)

    ref = ref_forward(x, params)
    assert out.shape == (B, N, C)
    err = float(jnp.max(jnp.abs(out - ref)))
    if not err < 1e-3:
        raise AssertionError(f"Pallas output mismatch vs reference, max abs err={err}")
    print("KERNEL_OK")
</pallas_src>

<mosaic_0001>
module attributes {stable_mosaic.version = 11 : i64} {
  func.func @xca_block_kernel(%arg0: memref<32x128xf32, #tpu.memory_space<vmem>>, %arg1: memref<128x16xf32, #tpu.memory_space<vmem>>, %arg2: memref<984x32xf32, #tpu.memory_space<vmem>>, %arg3: memref<256x128xf32, #tpu.memory_space<vmem>>, %arg4: memref<32x128xf32, #tpu.memory_space<vmem>>, %arg5: memref<160x32xf32, #tpu.memory_space<vmem>>) attributes {dimension_semantics = [], scalar_prefetch = 0 : i64, scratch_operands = 1 : i64, tpu.core_type = #tpu.core_type<tc>} {
    %c0 = arith.constant 0 : index
    %c0_0 = arith.constant 0 : index
    %0 = vector.load %arg0[%c0, %c0_0] : memref<32x128xf32, #tpu.memory_space<vmem>>, vector<32x128xf32>
    %c0_1 = arith.constant 0 : index
    %c0_2 = arith.constant 0 : index
    %1 = vector.load %arg1[%c0_1, %c0_2] : memref<128x16xf32, #tpu.memory_space<vmem>>, vector<128x16xf32>
    %cst = arith.constant dense<0.000000e+00> : vector<128xf32>
    %2 = vector.multi_reduction <add>, %0, %cst [0] : vector<32x128xf32> to vector<128xf32>
    %3 = vector.shape_cast %2 : vector<128xf32> to vector<1x128xf32>
    %cst_3 = arith.constant 3.200000e+01 : f32
    %4 = vector.broadcast %cst_3 : f32 to vector<1x128xf32>
    %5 = arith.divf %3, %4 : vector<1x128xf32>
    %6 = vector.broadcast %5 : vector<1x128xf32> to vector<32x128xf32>
    %7 = arith.subf %0, %6 : vector<32x128xf32>
    %8 = arith.mulf %7, %7 : vector<32x128xf32>
    %cst_4 = arith.constant dense<0.000000e+00> : vector<128xf32>
    %9 = vector.multi_reduction <add>, %8, %cst_4 [0] : vector<32x128xf32> to vector<128xf32>
    %10 = vector.shape_cast %9 : vector<128xf32> to vector<1x128xf32>
    %cst_5 = arith.constant 3.200000e+01 : f32
    %11 = vector.broadcast %cst_5 : f32 to vector<1x128xf32>
    %12 = arith.divf %10, %11 : vector<1x128xf32>
    %13 = vector.broadcast %5 : vector<1x128xf32> to vector<32x128xf32>
    %14 = arith.subf %0, %13 : vector<32x128xf32>
    %cst_6 = arith.constant 9.99999974E-6 : f32
    %15 = vector.broadcast %cst_6 : f32 to vector<1x128xf32>
    %16 = arith.addf %12, %15 : vector<1x128xf32>
    %17 = math.rsqrt %16 : vector<1x128xf32>
    %18 = vector.broadcast %17 : vector<1x128xf32> to vector<32x128xf32>
    %19 = arith.mulf %14, %18 : vector<32x128xf32>
    %c0_7 = arith.constant 0 : index
    %c0_8 = arith.constant 0 : index
    %20 = vector.load %arg2[%c0_7, %c0_8] : memref<984x32xf32, #tpu.memory_space<vmem>>, vector<96x32xf32>
    %cst_9 = arith.constant dense<0.000000e+00> : vector<96x128xf32>
    %21 = tpu.matmul %20, %19, %cst_9 {dimension_numbers = #tpu.dot_dimension_numbers<[1], [0], [0], [1], [0, 0, 1, 1], [], []>, precision = #tpu.contract_precision<fp32>} : vector<96x32xf32>, vector<32x128xf32>, vector<96x128xf32> -> vector<96x128xf32>
    %22 = vector.extract_strided_slice %1 {offsets = [0, 1], sizes = [96, 1], strides = [1, 1]} : vector<128x16xf32> to vector<96x1xf32>
    %23 = vector.broadcast %22 : vector<96x1xf32> to vector<96x128xf32>
    %24 = arith.addf %21, %23 : vector<96x128xf32>
    %25 = vector.extract_strided_slice %24 {offsets = [0, 0], sizes = [32, 128], strides = [1, 1]} : vector<96x128xf32> to vector<32x128xf32>
    %26 = vector.extract_strided_slice %24 {offsets = [32, 0], sizes = [32, 128], strides = [1, 1]} : vector<96x128xf32> to vector<32x128xf32>
    %27 = vector.extract_strided_slice %24 {offsets = [64, 0], sizes = [32, 128], strides = [1, 1]} : vector<96x128xf32> to vector<32x128xf32>
    %c384 = arith.constant 384 : index
    %c0_10 = arith.constant 0 : index
    %28 = vector.load %arg2[%c384, %c0_10] : memref<984x32xf32, #tpu.memory_space<vmem>>, vector<32x32xf32>
    %c416 = arith.constant 416 : index
    %c0_11 = arith.constant 0 : index
    %29 = vector.load %arg2[%c416, %c0_11] : memref<984x32xf32, #tpu.memory_space<vmem>>, vector<32x32xf32>
    %cst_12 = arith.constant 0.000000e+00 : f32
    %30 = vector.broadcast %cst_12 : f32 to vector<32x128xf32>
    %31 = vector.extract_strided_slice %25 {offsets = [0, 0], sizes = [32, 64], strides = [1, 1]} : vector<32x128xf32> to vector<32x64xf32>
    %32 = vector.extract_strided_slice %26 {offsets = [0, 0], sizes = [32, 64], strides = [1, 1]} : vector<32x128xf32> to vector<32x64xf32>
    %33 = arith.mulf %31, %31 : vector<32x64xf32>
    %cst_13 = arith.constant dense<0.000000e+00> : vector<32xf32>
    %34 = vector.multi_reduction <add>, %33, %cst_13 [1] : vector<32x64xf32> to vector<32xf32>
    %35 = vector.shape_cast %34 : vector<32xf32> to vector<32x1xf32>
    %cst_14 = arith.constant 1.000000e-24 : f32
    %36 = vector.broadcast %cst_14 : f32 to vector<32x1xf32>
    %37 = arith.maximumf %35, %36 : vector<32x1xf32>
    %38 = math.rsqrt %37 : vector<32x1xf32>
    %39 = vector.broadcast %38 : vector<32x1xf32> to vector<32x64xf32>
    %40 = arith.mulf %31, %39 : vector<32x64xf32>
    %41 = arith.mulf %32, %32 : vector<32x64xf32>
    %cst_15 = arith.constant dense<0.000000e+00> : vector<32xf32>
    %42 = vector.multi_reduction <add>, %41, %cst_15 [1] : vector<32x64xf32> to vector<32xf32>
    %43 = vector.shape_cast %42 : vector<32xf32> to vector<32x1xf32>
    %cst_16 = arith.constant 1.000000e-24 : f32
    %44 = vector.broadcast %cst_16 : f32 to vector<32x1xf32>
    %45 = arith.maximumf %43, %44 : vector<32x1xf32>
    %46 = math.rsqrt %45 : vector<32x1xf32>
    %47 = vector.broadcast %46 : vector<32x1xf32> to vector<32x64xf32>
    %48 = arith.mulf %32, %47 : vector<32x64xf32>
    %cst_17 = arith.constant dense<0.000000e+00> : vector<32x32xf32>
    %49 = tpu.matmul %40, %48, %cst_17 {dimension_numbers = #tpu.dot_dimension_numbers<[1], [1], [0], [0], [0, 0, 1, 0], [], []>, precision = #tpu.contract_precision<fp32>} : vector<32x64xf32>, vector<32x64xf32>, vector<32x32xf32> -> vector<32x32xf32>
    %50 = arith.mulf %49, %28 : vector<32x32xf32>
    %51 = arith.addf %50, %29 : vector<32x32xf32>
    %cst_18 = arith.constant dense<0xFF800000> : vector<32xf32>
    %52 = vector.multi_reduction <maximumf>, %51, %cst_18 [1] : vector<32x32xf32> to vector<32xf32>
    %53 = vector.shape_cast %52 : vector<32xf32> to vector<32x1xf32>
    %54 = vector.broadcast %53 : vector<32x1xf32> to vector<32x32xf32>
    %55 = arith.subf %51, %54 : vector<32x32xf32>
    %56 = math.exp %55 : vector<32x32xf32>
    %cst_19 = arith.constant dense<0.000000e+00> : vector<32xf32>
    %57 = vector.multi_reduction <add>, %56, %cst_19 [1] : vector<32x32xf32> to vector<32xf32>
    %58 = vector.shape_cast %57 : vector<32xf32> to vector<32x1xf32>
    %59 = tpu.reciprocal %58 {approx = true} : vector<32x1xf32> -> vector<32x1xf32>
    %60 = vector.broadcast %59 : vector<32x1xf32> to vector<32x32xf32>
    %61 = arith.mulf %56, %60 : vector<32x32xf32>
    %62 = vector.extract_strided_slice %27 {offsets = [0, 0], sizes = [32, 32], strides = [1, 1]} : vector<32x128xf32> to vector<32x32xf32>
    %cst_20 = arith.constant dense<0.000000e+00> : vector<32x32xf32>
    %63 = tpu.matmul %61, %62, %cst_20 {dimension_numbers = #tpu.dot_dimension_numbers<[1], [0], [0], [1], [0, 0, 1, 1], [], []>, precision = #tpu.contract_precision<fp32>} : vector<32x32xf32>, vector<32x32xf32>, vector<32x32xf32> -> vector<32x32xf32>
    %c0_21 = arith.constant 0 : index
    %c0_22 = arith.constant 0 : index
    %64 = vector.load %arg3[%c0_21, %c0_22] : memref<256x128xf32, #tpu.memory_space<vmem>>, vector<32x128xf32>
    %cst_23 = arith.constant dense<0.000000e+00> : vector<32x128xf32>
    %65 = tpu.matmul %63, %64, %cst_23 {dimension_numbers = #tpu.dot_dimension_numbers<[0], [0], [1], [1], [0, 1, 1, 1], [], []>, precision = #tpu.contract_precision<fp32>} : vector<32x32xf32>, vector<32x128xf32>, vector<32x128xf32> -> vector<32x128xf32>
    %66 = arith.addf %30, %65 : vector<32x128xf32>
    %67 = vector.extract_strided_slice %27 {offsets = [0, 32], sizes = [32, 32], strides = [1, 1]} : vector<32x128xf32> to vector<32x32xf32>
    %cst_24 = arith.constant dense<0.000000e+00> : vector<32x32xf32>
    %68 = tpu.matmul %61, %67, %cst_24 {dimension_numbers = #tpu.dot_dimension_numbers<[1], [0], [0], [1], [0, 0, 1, 1], [], []>, precision = #tpu.contract_precision<fp32>} : vector<32x32xf32>, vector<32x32xf32>, vector<32x32xf32> -> vector<32x32xf32>
    %c32 = arith.constant 32 : index
    %c0_25 = arith.constant 0 : index
    %69 = vector.load %arg3[%c32, %c0_25] : memref<256x128xf32, #tpu.memory_space<vmem>>, vector<32x128xf32>
    %cst_26 = arith.constant dense<0.000000e+00> : vector<32x128xf32>
    %70 = tpu.matmul %68, %69, %cst_26 {dimension_numbers = #tpu.dot_dimension_numbers<[0], [0], [1], [1], [0, 1, 1, 1], [], []>, precision = #tpu.contract_precision<fp32>} : vector<32x32xf32>, vector<32x128xf32>, vector<32x128xf32> -> vector<32x128xf32>
    %71 = arith.addf %66, %70 : vector<32x128xf32>
    %72 = vector.extract_strided_slice %25 {offsets = [0, 64], sizes = [32, 64], strides = [1, 1]} : vector<32x128xf32> to vector<32x64xf32>
    %73 = vector.extract_strided_slice %26 {offsets = [0, 64], sizes = [32, 64], strides = [1, 1]} : vector<32x128xf32> to vector<32x64xf32>
    %74 = arith.mulf %72, %72 : vector<32x64xf32>
    %cst_27 = arith.constant dense<0.000000e+00> : vector<32xf32>
    %75 = vector.multi_reduction <add>, %74, %cst_27 [1] : vector<32x64xf32> to vector<32xf32>
    %76 = vector.shape_cast %75 : vector<32xf32> to vector<32x1xf32>
    %cst_28 = arith.constant 1.000000e-24 : f32
    %77 = vector.broadcast %cst_28 : f32 to vector<32x1xf32>
    %78 = arith.maximumf %76, %77 : vector<32x1xf32>
    %79 = math.rsqrt %78 : vector<32x1xf32>
    %80 = vector.broadcast %79 : vector<32x1xf32> to vector<32x64xf32>
    %81 = arith.mulf %72, %80 : vector<32x64xf32>
    %82 = arith.mulf %73, %73 : vector<32x64xf32>
    %cst_29 = arith.constant dense<0.000000e+00> : vector<32xf32>
    %83 = vector.multi_reduction <add>, %82, %cst_29 [1] : vector<32x64xf32> to vector<32xf32>
    %84 = vector.shape_cast %83 : vector<32xf32> to vector<32x1xf32>
    %cst_30 = arith.constant 1.000000e-24 : f32
    %85 = vector.broadcast %cst_30 : f32 to vector<32x1xf32>
    %86 = arith.maximumf %84, %85 : vector<32x1xf32>
    %87 = math.rsqrt %86 : vector<32x1xf32>
    %88 = vector.broadcast %87 : vector<32x1xf32> to vector<32x64xf32>
    %89 = arith.mulf %73, %88 : vector<32x64xf32>
    %cst_31 = arith.constant dense<0.000000e+00> : vector<32x32xf32>
    %90 = tpu.matmul %81, %89, %cst_31 {dimension_numbers = #tpu.dot_dimension_numbers<[1], [1], [0], [0], [0, 0, 1, 0], [], []>, precision = #tpu.contract_precision<fp32>} : vector<32x64xf32>, vector<32x64xf32>, vector<32x32xf32> -> vector<32x32xf32>
    %91 = arith.mulf %90, %28 : vector<32x32xf32>
    %92 = arith.addf %91, %29 : vector<32x32xf32>
    %cst_32 = arith.constant dense<0xFF800000> : vector<32xf32>
    %93 = vector.multi_reduction <maximumf>, %92, %cst_32 [1] : vector<32x32xf32> to vector<32xf32>
    %94 = vector.shape_cast %93 : vector<32xf32> to vector<32x1xf32>
    %95 = vector.broadcast %94 : vector<32x1xf32> to vector<32x32xf32>
    %96 = arith.subf %92, %95 : vector<32x32xf32>
    %97 = math.exp %96 : vector<32x32xf32>
    %cst_33 = arith.constant dense<0.000000e+00> : vector<32xf32>
    %98 = vector.multi_reduction <add>, %97, %cst_33 [1] : vector<32x32xf32> to vector<32xf32>
    %99 = vector.shape_cast %98 : vector<32xf32> to vector<32x1xf32>
    %100 = tpu.reciprocal %99 {approx = true} : vector<32x1xf32> -> vector<32x1xf32>
    %101 = vector.broadcast %100 : vector<32x1xf32> to vector<32x32xf32>
    %102 = arith.mulf %97, %101 : vector<32x32xf32>
    %103 = vector.extract_strided_slice %27 {offsets = [0, 64], sizes = [32, 32], strides = [1, 1]} : vector<32x128xf32> to vector<32x32xf32>
    %cst_34 = arith.constant dense<0.000000e+00> : vector<32x32xf32>
    %104 = tpu.matmul %102, %103, %cst_34 {dimension_numbers = #tpu.dot_dimension_numbers<[1], [0], [0], [1], [0, 0, 1, 1], [], []>, precision = #tpu.contract_precision<fp32>} : vector<32x32xf32>, vector<32x32xf32>, vector<32x32xf32> -> vector<32x32xf32>
    %c64 = arith.constant 64 : index
    %c0_35 = arith.constant 0 : index
    %105 = vector.load %arg3[%c64, %c0_35] : memref<256x128xf32, #tpu.memory_space<vmem>>, vector<32x128xf32>
    %cst_36 = arith.constant dense<0.000000e+00> : vector<32x128xf32>
    %106 = tpu.matmul %104, %105, %cst_36 {dimension_numbers = #tpu.dot_dimension_numbers<[0], [0], [1], [1], [0, 1, 1, 1], [], []>, precision = #tpu.contract_precision<fp32>} : vector<32x32xf32>, vector<32x128xf32>, vector<32x128xf32> -> vector<32x128xf32>
    %107 = arith.addf %71, %106 : vector<32x128xf32>
    %108 = vector.extract_strided_slice %27 {offsets = [0, 96], sizes = [32, 32], strides = [1, 1]} : vector<32x128xf32> to vector<32x32xf32>
    %cst_37 = arith.constant dense<0.000000e+00> : vector<32x32xf32>
    %109 = tpu.matmul %102, %108, %cst_37 {dimension_numbers = #tpu.dot_dimension_numbers<[1], [0], [0], [1], [0, 0, 1, 1], [], []>, precision = #tpu.contract_precision<fp32>} : vector<32x32xf32>, vector<32x32xf32>, vector<32x32xf32> -> vector<32x32xf32>
    %c96 = arith.constant 96 : index
    %c0_38 = arith.constant 0 : index
    %110 = vector.load %arg3[%c96, %c0_38] : memref<256x128xf32, #tpu.memory_space<vmem>>, vector<32x128xf32>
    %cst_39 = arith.constant dense<0.000000e+00> : vector<32x128xf32>
    %111 = tpu.matmul %109, %110, %cst_39 {dimension_numbers = #tpu.dot_dimension_numbers<[0], [0], [1], [1], [0, 1, 1, 1], [], []>, precision = #tpu.contract_precision<fp32>} : vector<32x32xf32>, vector<32x128xf32>, vector<32x128xf32> -> vector<32x128xf32>
    %112 = arith.addf %107, %111 : vector<32x128xf32>
    %c96_40 = arith.constant 96 : index
    %c0_41 = arith.constant 0 : index
    %113 = vector.load %arg2[%c96_40, %c0_41] : memref<984x32xf32, #tpu.memory_space<vmem>>, vector<32x32xf32>
    %cst_42 = arith.constant dense<0.000000e+00> : vector<32x128xf32>
    %114 = tpu.matmul %113, %112, %cst_42 {dimension_numbers = #tpu.dot_dimension_numbers<[1], [0], [0], [1], [0, 0, 1, 1], [], []>, precision = #tpu.contract_precision<fp32>} : vector<32x32xf32>, vector<32x128xf32>, vector<32x128xf32> -> vector<32x128xf32>
    %115 = vector.extract_strided_slice %1 {offsets = [0, 2], sizes = [32, 1], strides = [1, 1]} : vector<128x16xf32> to vector<32x1xf32>
    %116 = vector.broadcast %115 : vector<32x1xf32> to vector<32x128xf32>
    %117 = arith.addf %114, %116 : vector<32x128xf32>
    %118 = vector.extract_strided_slice %1 {offsets = [0, 3], sizes = [32, 1], strides = [1, 1]} : vector<128x16xf32> to vector<32x1xf32>
    %119 = vector.broadcast %118 : vector<32x1xf32> to vector<32x128xf32>
    %120 = arith.mulf %119, %117 : vector<32x128xf32>
    %121 = arith.addf %0, %120 : vector<32x128xf32>
    %cst_43 = arith.constant dense<0.000000e+00> : vector<128xf32>
    %122 = vector.multi_reduction <add>, %121, %cst_43 [0] : vector<32x128xf32> to vector<128xf32>
    %123 = vector.shape_cast %122 : vector<128xf32> to vector<1x128xf32>
    %cst_44 = arith.constant 3.200000e+01 : f32
    %124 = vector.broadcast %cst_44 : f32 to vector<1x128xf32>
    %125 = arith.divf %123, %124 : vector<1x128xf32>
    %126 = vector.broadcast %125 : vector<1x128xf32> to vector<32x128xf32>
    %127 = arith.subf %121, %126 : vector<32x128xf32>
    %128 = arith.mulf %127, %127 : vector<32x128xf32>
    %cst_45 = arith.constant dense<0.000000e+00> : vector<128xf32>
    %129 = vector.multi_reduction <add>, %128, %cst_45 [0] : vector<32x128xf32> to vector<128xf32>
    %130 = vector.shape_cast %129 : vector<128xf32> to vector<1x128xf32>
    %cst_46 = arith.constant 3.200000e+01 : f32
    %131 = vector.broadcast %cst_46 : f32 to vector<1x128xf32>
    %132 = arith.divf %130, %131 : vector<1x128xf32>
    %133 = vector.broadcast %125 : vector<1x128xf32> to vector<32x128xf32>
    %134 = arith.subf %121, %133 : vector<32x128xf32>
    %cst_47 = arith.constant 9.99999974E-6 : f32
    %135 = vector.broadcast %cst_47 : f32 to vector<1x128xf32>
    %136 = arith.addf %132, %135 : vector<1x128xf32>
    %137 = math.rsqrt %136 : vector<1x128xf32>
    %138 = vector.broadcast %137 : vector<1x128xf32> to vector<32x128xf32>
    %139 = arith.mulf %134, %138 : vector<32x128xf32>
    %140 = vector.extract_strided_slice %1 {offsets = [0, 4], sizes = [32, 1], strides = [1, 1]} : vector<128x16xf32> to vector<32x1xf32>
    %141 = vector.broadcast %140 : vector<32x1xf32> to vector<32x128xf32>
    %142 = arith.mulf %139, %141 : vector<32x128xf32>
    %143 = vector.extract_strided_slice %1 {offsets = [0, 5], sizes = [32, 1], strides = [1, 1]} : vector<128x16xf32> to vector<32x1xf32>
    %144 = vector.broadcast %143 : vector<32x1xf32> to vector<32x128xf32>
    %145 = arith.addf %142, %144 : vector<32x128xf32>
    %c128 = arith.constant 128 : index
    %c0_48 = arith.constant 0 : index
    %146 = vector.load %arg3[%c128, %c0_48] : memref<256x128xf32, #tpu.memory_space<vmem>>, vector<128x128xf32>
    %cst_49 = arith.constant dense<0.000000e+00> : vector<128x32xf32>
    %147 = tpu.matmul %146, %145, %cst_49 {dimension_numbers = #tpu.dot_dimension_numbers<[1], [1], [0], [0], [0, 0, 1, 0], [], []>, precision = #tpu.contract_precision<fp32>} : vector<128x128xf32>, vector<32x128xf32>, vector<128x32xf32> -> vector<128x32xf32>
    %cst_50 = arith.constant 0.000000e+00 : f32
    %148 = vector.broadcast %cst_50 : f32 to vector<16x32xf32>
    %c0_51 = arith.constant 0 : index
    %c0_52 = arith.constant 0 : index
    %149 = vector.load %arg5[%c0_51, %c0_52] : memref<160x32xf32, #tpu.memory_space<vmem>>, vector<16x32xf32>
    tpu.vector_store %arg5[%c0_51, %c0_52], %148 {strides = array<i32>} : memref<160x32xf32, #tpu.memory_space<vmem>>, vector<16x32xf32>,
    %cst_53 = arith.constant 0.000000e+00 : f32
    %150 = vector.broadcast %cst_53 : f32 to vector<16x32xf32>
    %c144 = arith.constant 144 : index
    %c0_54 = arith.constant 0 : index
    %151 = vector.load %arg5[%c144, %c0_54] : memref<160x32xf32, #tpu.memory_space<vmem>>, vector<16x32xf32>
    tpu.vector_store %arg5[%c144, %c0_54], %150 {strides = array<i32>} : memref<160x32xf32, #tpu.memory_space<vmem>>, vector<16x32xf32>,
    %c472 = arith.constant 472 : index
    %c0_55 = arith.constant 0 : index
    %152 = vector.load %arg2[%c472, %c0_55] : memref<984x32xf32, #tpu.memory_space<vmem>>, vector<128x32xf32>
    %c600 = arith.constant 600 : index
    %c0_56 = arith.constant 0 : index
    %153 = vector.load %arg2[%c600, %c0_56] : memref<984x32xf32, #tpu.memory_space<vmem>>, vector<128x32xf32>
    %c728 = arith.constant 728 : index
    %c0_57 = arith.constant 0 : index
    %154 = vector.load %arg2[%c728, %c0_57] : memref<984x32xf32, #tpu.memory_space<vmem>>, vector<128x32xf32>
    %c856 = arith.constant 856 : index
    %c0_58 = arith.constant 0 : index
    %155 = vector.load %arg2[%c856, %c0_58] : memref<984x32xf32, #tpu.memory_space<vmem>>, vector<128x32xf32>
    %c16 = arith.constant 16 : index
    %c0_59 = arith.constant 0 : index
    %156 = vector.load %arg5[%c16, %c0_59] : memref<160x32xf32, #tpu.memory_space<vmem>>, vector<128x32xf32>
    tpu.vector_store %arg5[%c16, %c0_59], %147 {strides = array<i32>} : memref<160x32xf32, #tpu.memory_space<vmem>>, vector<128x32xf32>,
    %cst_60 = arith.constant 0.000000e+00 : f32
    %157 = vector.broadcast %cst_60 : f32 to vector<128x32xf32>
    %c7 = arith.constant 7 : index
    %c0_61 = arith.constant 0 : index
    %158 = vector.load %arg5[%c7, %c0_61] : memref<160x32xf32, #tpu.memory_space<vmem>>, vector<128x32xf32>
    %159 = arith.mulf %158, %152 : vector<128x32xf32>
    %160 = arith.mulf %159, %154 : vector<128x32xf32>
    %c448 = arith.constant 448 : index
    %c0_62 = arith.constant 0 : index
    %161 = vector.load %arg2[%c448, %c0_62] : memref<984x32xf32, #tpu.memory_space<vmem>>, vector<1x32xf32>
    %162 = vector.shape_cast %161 : vector<1x32xf32> to vector<32xf32>
    %163 = vector.shape_cast %162 : vector<32xf32> to vector<1x32xf32>
    %164 = vector.broadcast %163 : vector<1x32xf32> to vector<128x32xf32>
    %165 = arith.mulf %160, %164 : vector<128x32xf32>
    %166 = arith.addf %157, %165 : vector<128x32xf32>
    %c8 = arith.constant 8 : index
    %c0_63 = arith.constant 0 : index
    %167 = vector.load %arg5[%c8, %c0_63] : memref<160x32xf32, #tpu.memory_space<vmem>>, vector<128x32xf32>
    %168 = arith.mulf %167, %152 : vector<128x32xf32>
    %c449 = arith.constant 449 : index
    %c0_64 = arith.constant 0 : index
    %169 = vector.load %arg2[%c449, %c0_64] : memref<984x32xf32, #tpu.memory_space<vmem>>, vector<1x32xf32>
    %170 = vector.shape_cast %169 : vector<1x32xf32> to vector<32xf32>
    %171 = vector.shape_cast %170 : vector<32xf32> to vector<1x32xf32>
    %172 = vector.broadcast %171 : vector<1x32xf32> to vector<128x32xf32>
    %173 = arith.mulf %168, %172 : vector<128x32xf32>
    %174 = arith.addf %166, %173 : vector<128x32xf32>
    %c9 = arith.constant 9 : index
    %c0_65 = arith.constant 0 : index
    %175 = vector.load %arg5[%c9, %c0_65] : memref<160x32xf32, #tpu.memory_space<vmem>>, vector<128x32xf32>
    %176 = arith.mulf %175, %152 : vector<128x32xf32>
    %177 = arith.mulf %176, %155 : vector<128x32xf32>
    %c450 = arith.constant 450 : index
    %c0_66 = arith.constant 0 : index
    %178 = vector.load %arg2[%c450, %c0_66] : memref<984x32xf32, #tpu.memory_space<vmem>>, vector<1x32xf32>
    %179 = vector.shape_cast %178 : vector<1x32xf32> to vector<32xf32>
    %180 = vector.shape_cast %179 : vector<32xf32> to vector<1x32xf32>
    %181 = vector.broadcast %180 : vector<1x32xf32> to vector<128x32xf32>
    %182 = arith.mulf %177, %181 : vector<128x32xf32>
    %183 = arith.addf %174, %182 : vector<128x32xf32>
    %c15 = arith.constant 15 : index
    %c0_67 = arith.constant 0 : index
    %184 = vector.load %arg5[%c15, %c0_67] : memref<160x32xf32, #tpu.memory_space<vmem>>, vector<128x32xf32>
    %185 = arith.mulf %184, %154 : vector<128x32xf32>
    %c451 = arith.constant 451 : index
    %c0_68 = arith.constant 0 : index
    %186 = vector.load %arg2[%c451, %c0_68] : memref<984x32xf32, #tpu.memory_space<vmem>>, vector<1x32xf32>
    %187 = vector.shape_cast %186 : vector<1x32xf32> to vector<32xf32>
    %188 = vector.shape_cast %187 : vector<32xf32> to vector<1x32xf32>
    %189 = vector.broadcast %188 : vector<1x32xf32> to vector<128x32xf32>
    %190 = arith.mulf %185, %189 : vector<128x32xf32>
    %191 = arith.addf %183, %190 : vector<128x32xf32>
    %c16_69 = arith.constant 16 : index
    %c0_70 = arith.constant 0 : index
    %192 = vector.load %arg5[%c16_69, %c0_70] : memref<160x32xf32, #tpu.memory_space<vmem>>, vector<128x32xf32>
    %c452 = arith.constant 452 : index
    %c0_71 = arith.constant 0 : index
    %193 = vector.load %arg2[%c452, %c0_71] : memref<984x32xf32, #tpu.memory_space<vmem>>, vector<1x32xf32>
    %194 = vector.shape_cast %193 : vector<1x32xf32> to vector<32xf32>
    %195 = vector.shape_cast %194 : vector<32xf32> to vector<1x32xf32>
    %196 = vector.broadcast %195 : vector<1x32xf32> to vector<128x32xf32>
    %197 = arith.mulf %192, %196 : vector<128x32xf32>
    %198 = arith.addf %191, %197 : vector<128x32xf32>
    %c17 = arith.constant 17 : index
    %c0_72 = arith.constant 0 : index
    %199 = vector.load %arg5[%c17, %c0_72] : memref<160x32xf32, #tpu.memory_space<vmem>>, vector<128x32xf32>
    %200 = arith.mulf %199, %155 : vector<128x32xf32>
    %c453 = arith.constant 453 : index
    %c0_73 = arith.constant 0 : index
    %201 = vector.load %arg2[%c453, %c0_73] : memref<984x32xf32, #tpu.memory_space<vmem>>, vector<1x32xf32>
    %202 = vector.shape_cast %201 : vector<1x32xf32> to vector<32xf32>
    %203 = vector.shape_cast %202 : vector<32xf32> to vector<1x32xf32>
    %204 = vector.broadcast %203 : vector<1x32xf32> to vector<128x32xf32>
    %205 = arith.mulf %200, %204 : vector<128x32xf32>
    %206 = arith.addf %198, %205 : vector<128x32xf32>
    %c23 = arith.constant 23 : index
    %c0_74 = arith.constant 0 : index
    %207 = vector.load %arg5[%c23, %c0_74] : memref<160x32xf32, #tpu.memory_space<vmem>>, vector<128x32xf32>
    %208 = arith.mulf %207, %153 : vector<128x32xf32>
    %209 = arith.mulf %208, %154 : vector<128x32xf32>
    %c454 = arith.constant 454 : index
    %c0_75 = arith.constant 0 : index
    %210 = vector.load %arg2[%c454, %c0_75] : memref<984x32xf32, #tpu.memory_space<vmem>>, vector<1x32xf32>
    %211 = vector.shape_cast %210 : vector<1x32xf32> to vector<32xf32>
    %212 = vector.shape_cast %211 : vector<32xf32> to vector<1x32xf32>
    %213 = vector.broadcast %212 : vector<1x32xf32> to vector<128x32xf32>
    %214 = arith.mulf %209, %213 : vector<128x32xf32>
    %215 = arith.addf %206, %214 : vector<128x32xf32>
    %c24 = arith.constant 24 : index
    %c0_76 = arith.constant 0 : index
    %216 = vector.load %arg5[%c24, %c0_76] : memref<160x32xf32, #tpu.memory_space<vmem>>, vector<128x32xf32>
    %217 = arith.mulf %216, %153 : vector<128x32xf32>
    %c455 = arith.constant 455 : index
    %c0_77 = arith.constant 0 : index
    %218 = vector.load %arg2[%c455, %c0_77] : memref<984x32xf32, #tpu.memory_space<vmem>>, vector<1x32xf32>
    %219 = vector.shape_cast %218 : vector<1x32xf32> to vector<32xf32>
    %220 = vector.shape_cast %219 : vector<32xf32> to vector<1x32xf32>
    %221 = vector.broadcast %220 : vector<1x32xf32> to vector<128x32xf32>
    %222 = arith.mulf %217, %221 : vector<128x32xf32>
    %223 = arith.addf %215, %222 : vector<128x32xf32>
    %c25 = arith.constant 25 : index
    %c0_78 = arith.constant 0 : index
    %224 = vector.load %arg5[%c25, %c0_78] : memref<160x32xf32, #tpu.memory_space<vmem>>, vector<128x32xf32>
    %225 = arith.mulf %224, %153 : vector<128x32xf32>
    %226 = arith.mulf %225, %155 : vector<128x32xf32>
    %c456 = arith.constant 456 : index
    %c0_79 = arith.constant 0 : index
    %227 = vector.load %arg2[%c456, %c0_79] : memref<984x32xf32, #tpu.memory_space<vmem>>, vector<1x32xf32>
    %228 = vector.shape_cast %227 : vector<1x32xf32> to vector<32xf32>
    %229 = vector.shape_cast %228 : vector<32xf32> to vector<1x32xf32>
    %230 = vector.broadcast %229 : vector<1x32xf32> to vector<128x32xf32>
    %231 = arith.mulf %226, %230 : vector<128x32xf32>
    %232 = arith.addf %223, %231 : vector<128x32xf32>
    %c457 = arith.constant 457 : index
    %c0_80 = arith.constant 0 : index
    %233 = vector.load %arg2[%c457, %c0_80] : memref<984x32xf32, #tpu.memory_space<vmem>>, vector<1x32xf32>
    %234 = vector.shape_cast %233 : vector<1x32xf32> to vector<32xf32>
    %235 = vector.shape_cast %234 : vector<32xf32> to vector<1x32xf32>
    %236 = vector.broadcast %235 : vector<1x32xf32> to vector<128x32xf32>
    %237 = arith.addf %232, %236 : vector<128x32xf32>
    %cst_81 = arith.constant 5.000000e-01 : f32
    %238 = vector.broadcast %cst_81 : f32 to vector<128x32xf32>
    %239 = arith.mulf %238, %237 : vector<128x32xf32>
    %cst_82 = arith.constant 4.471500e-02 : f32
    %240 = vector.broadcast %cst_82 : f32 to vector<128x32xf32>
    %241 = arith.mulf %240, %237 : vector<128x32xf32>
    %242 = arith.mulf %241, %237 : vector<128x32xf32>
    %243 = arith.mulf %242, %237 : vector<128x32xf32>
    %244 = arith.addf %237, %243 : vector<128x32xf32>
    %cst_83 = arith.constant 0.797884583 : f32
    %245 = vector.broadcast %cst_83 : f32 to vector<128x32xf32>
    %246 = arith.mulf %245, %244 : vector<128x32xf32>
    %247 = math.tanh %246 : vector<128x32xf32>
    %cst_84 = arith.constant 1.000000e+00 : f32
    %248 = vector.broadcast %cst_84 : f32 to vector<128x32xf32>
    %249 = arith.addf %248, %247 : vector<128x32xf32>
    %250 = arith.mulf %239, %249 : vector<128x32xf32>
    %c458 = arith.constant 458 : index
    %c0_85 = arith.constant 0 : index
    %251 = vector.load %arg2[%c458, %c0_85] : memref<984x32xf32, #tpu.memory_space<vmem>>, vector<1x32xf32>
    %252 = vector.shape_cast %251 : vector<1x32xf32> to vector<32xf32>
    %253 = vector.shape_cast %252 : vector<32xf32> to vector<1x32xf32>
    %254 = vector.broadcast %253 : vector<1x32xf32> to vector<128x32xf32>
    %255 = arith.mulf %250, %254 : vector<128x32xf32>
    %c459 = arith.constant 459 : index
    %c0_86 = arith.constant 0 : index
    %256 = vector.load %arg2[%c459, %c0_86] : memref<984x32xf32, #tpu.memory_space<vmem>>, vector<1x32xf32>
    %257 = vector.shape_cast %256 : vector<1x32xf32> to vector<32xf32>
    %258 = vector.shape_cast %257 : vector<32xf32> to vector<1x32xf32>
    %259 = vector.broadcast %258 : vector<1x32xf32> to vector<128x32xf32>
    %260 = arith.addf %255, %259 : vector<128x32xf32>
    %c16_87 = arith.constant 16 : index
    %c0_88 = arith.constant 0 : index
    %261 = vector.load %arg5[%c16_87, %c0_88] : memref<160x32xf32, #tpu.memory_space<vmem>>, vector<128x32xf32>
    tpu.vector_store %arg5[%c16_87, %c0_88], %260 {strides = array<i32>} : memref<160x32xf32, #tpu.memory_space<vmem>>, vector<128x32xf32>,
    %cst_89 = arith.constant 0.000000e+00 : f32
    %262 = vector.broadcast %cst_89 : f32 to vector<128x32xf32>
    %c7_90 = arith.constant 7 : index
    %c0_91 = arith.constant 0 : index
    %263 = vector.load %arg5[%c7_90, %c0_91] : memref<160x32xf32, #tpu.memory_space<vmem>>, vector<128x32xf32>
    %264 = arith.mulf %263, %152 : vector<128x32xf32>
    %265 = arith.mulf %264, %154 : vector<128x32xf32>
    %c460 = arith.constant 460 : index
    %c0_92 = arith.constant 0 : index
    %266 = vector.load %arg2[%c460, %c0_92] : memref<984x32xf32, #tpu.memory_space<vmem>>, vector<1x32xf32>
    %267 = vector.shape_cast %266 : vector<1x32xf32> to vector<32xf32>
    %268 = vector.shape_cast %267 : vector<32xf32> to vector<1x32xf32>
    %269 = vector.broadcast %268 : vector<1x32xf32> to vector<128x32xf32>
    %270 = arith.mulf %265, %269 : vector<128x32xf32>
    %271 = arith.addf %262, %270 : vector<128x32xf32>
    %c8_93 = arith.constant 8 : index
    %c0_94 = arith.constant 0 : index
    %272 = vector.load %arg5[%c8_93, %c0_94] : memref<160x32xf32, #tpu.memory_space<vmem>>, vector<128x32xf32>
    %273 = arith.mulf %272, %152 : vector<128x32xf32>
    %c461 = arith.constant 461 : index
    %c0_95 = arith.constant 0 : index
    %274 = vector.load %arg2[%c461, %c0_95] : memref<984x32xf32, #tpu.memory_space<vmem>>, vector<1x32xf32>
    %275 = vector.shape_cast %274 : vector<1x32xf32> to vector<32xf32>
    %276 = vector.shape_cast %275 : vector<32xf32> to vector<1x32xf32>
    %277 = vector.broadcast %276 : vector<1x32xf32> to vector<128x32xf32>
    %278 = arith.mulf %273, %277 : vector<128x32xf32>
    %279 = arith.addf %271, %278 : vector<128x32xf32>
    %c9_96 = arith.constant 9 : index
    %c0_97 = arith.constant 0 : index
    %280 = vector.load %arg5[%c9_96, %c0_97] : memref<160x32xf32, #tpu.memory_space<vmem>>, vector<128x32xf32>
    %281 = arith.mulf %280, %152 : vector<128x32xf32>
    %282 = arith.mulf %281, %155 : vector<128x32xf32>
    %c462 = arith.constant 462 : index
    %c0_98 = arith.constant 0 : index
    %283 = vector.load %arg2[%c462, %c0_98] : memref<984x32xf32, #tpu.memory_space<vmem>>, vector<1x32xf32>
    %284 = vector.shape_cast %283 : vector<1x32xf32> to vector<32xf32>
    %285 = vector.shape_cast %284 : vector<32xf32> to vector<1x32xf32>
    %286 = vector.broadcast %285 : vector<1x32xf32> to vector<128x32xf32>
    %287 = arith.mulf %282, %286 : vector<128x32xf32>
    %288 = arith.addf %279, %287 : vector<128x32xf32>
    %c15_99 = arith.constant 15 : index
    %c0_100 = arith.constant 0 : index
    %289 = vector.load %arg5[%c15_99, %c0_100] : memref<160x32xf32, #tpu.memory_space<vmem>>, vector<128x32xf32>
    %290 = arith.mulf %289, %154 : vector<128x32xf32>
    %c463 = arith.constant 463 : index
    %c0_101 = arith.constant 0 : index
    %291 = vector.load %arg2[%c463, %c0_101] : memref<984x32xf32, #tpu.memory_space<vmem>>, vector<1x32xf32>
    %292 = vector.shape_cast %291 : vector<1x32xf32> to vector<32xf32>
    %293 = vector.shape_cast %292 : vector<32xf32> to vector<1x32xf32>
    %294 = vector.broadcast %293 : vector<1x32xf32> to vector<128x32xf32>
    %295 = arith.mulf %290, %294 : vector<128x32xf32>
    %296 = arith.addf %288, %295 : vector<128x32xf32>
    %c16_102 = arith.constant 16 : index
    %c0_103 = arith.constant 0 : index
    %297 = vector.load %arg5[%c16_102, %c0_103] : memref<160x32xf32, #tpu.memory_space<vmem>>, vector<128x32xf32>
    %c464 = arith.constant 464 : index
    %c0_104 = arith.constant 0 : index
    %298 = vector.load %arg2[%c464, %c0_104] : memref<984x32xf32, #tpu.memory_space<vmem>>, vector<1x32xf32>
    %299 = vector.shape_cast %298 : vector<1x32xf32> to vector<32xf32>
    %300 = vector.shape_cast %299 : vector<32xf32> to vector<1x32xf32>
    %301 = vector.broadcast %300 : vector<1x32xf32> to vector<128x32xf32>
    %302 = arith.mulf %297, %301 : vector<128x32xf32>
    %303 = arith.addf %296, %302 : vector<128x32xf32>
    %c17_105 = arith.constant 17 : index
    %c0_106 = arith.constant 0 : index
    %304 = vector.load %arg5[%c17_105, %c0_106] : memref<160x32xf32, #tpu.memory_space<vmem>>, vector<128x32xf32>
    %305 = arith.mulf %304, %155 : vector<128x32xf32>
    %c465 = arith.constant 465 : index
    %c0_107 = arith.constant 0 : index
    %306 = vector.load %arg2[%c465, %c0_107] : memref<984x32xf32, #tpu.memory_space<vmem>>, vector<1x32xf32>
    %307 = vector.shape_cast %306 : vector<1x32xf32> to vector<32xf32>
    %308 = vector.shape_cast %307 : vector<32xf32> to vector<1x32xf32>
    %309 = vector.broadcast %308 : vector<1x32xf32> to vector<128x32xf32>
    %310 = arith.mulf %305, %309 : vector<128x32xf32>
    %311 = arith.addf %303, %310 : vector<128x32xf32>
    %c23_108 = arith.constant 23 : index
    %c0_109 = arith.constant 0 : index
    %312 = vector.load %arg5[%c23_108, %c0_109] : memref<160x32xf32, #tpu.memory_space<vmem>>, vector<128x32xf32>
    %313 = arith.mulf %312, %153 : vector<128x32xf32>
    %314 = arith.mulf %313, %154 : vector<128x32xf32>
    %c466 = arith.constant 466 : index
    %c0_110 = arith.constant 0 : index
    %315 = vector.load %arg2[%c466, %c0_110] : memref<984x32xf32, #tpu.memory_space<vmem>>, vector<1x32xf32>
    %316 = vector.shape_cast %315 : vector<1x32xf32> to vector<32xf32>
    %317 = vector.shape_cast %316 : vector<32xf32> to vector<1x32xf32>
    %318 = vector.broadcast %317 : vector<1x32xf32> to vector<128x32xf32>
    %319 = arith.mulf %314, %318 : vector<128x32xf32>
    %320 = arith.addf %311, %319 : vector<128x32xf32>
    %c24_111 = arith.constant 24 : index
    %c0_112 = arith.constant 0 : index
    %321 = vector.load %arg5[%c24_111, %c0_112] : memref<160x32xf32, #tpu.memory_space<vmem>>, vector<128x32xf32>
    %322 = arith.mulf %321, %153 : vector<128x32xf32>
    %c467 = arith.constant 467 : index
    %c0_113 = arith.constant 0 : index
    %323 = vector.load %arg2[%c467, %c0_113] : memref<984x32xf32, #tpu.memory_space<vmem>>, vector<1x32xf32>
    %324 = vector.shape_cast %323 : vector<1x32xf32> to vector<32xf32>
    %325 = vector.shape_cast %324 : vector<32xf32> to vector<1x32xf32>
    %326 = vector.broadcast %325 : vector<1x32xf32> to vector<128x32xf32>
    %327 = arith.mulf %322, %326 : vector<128x32xf32>
    %328 = arith.addf %320, %327 : vector<128x32xf32>
    %c25_114 = arith.constant 25 : index
    %c0_115 = arith.constant 0 : index
    %329 = vector.load %arg5[%c25_114, %c0_115] : memref<160x32xf32, #tpu.memory_space<vmem>>, vector<128x32xf32>
    %330 = arith.mulf %329, %153 : vector<128x32xf32>
    %331 = arith.mulf %330, %155 : vector<128x32xf32>
    %c468 = arith.constant 468 : index
    %c0_116 = arith.constant 0 : index
    %332 = vector.load %arg2[%c468, %c0_116] : memref<984x32xf32, #tpu.memory_space<vmem>>, vector<1x32xf32>
    %333 = vector.shape_cast %332 : vector<1x32xf32> to vector<32xf32>
    %334 = vector.shape_cast %333 : vector<32xf32> to vector<1x32xf32>
    %335 = vector.broadcast %334 : vector<1x32xf32> to vector<128x32xf32>
    %336 = arith.mulf %331, %335 : vector<128x32xf32>
    %337 = arith.addf %328, %336 : vector<128x32xf32>
    %c469 = arith.constant 469 : index
    %c0_117 = arith.constant 0 : index
    %338 = vector.load %arg2[%c469, %c0_117] : memref<984x32xf32, #tpu.memory_space<vmem>>, vector<1x32xf32>
    %339 = vector.shape_cast %338 : vector<1x32xf32> to vector<32xf32>
    %340 = vector.shape_cast %339 : vector<32xf32> to vector<1x32xf32>
    %341 = vector.broadcast %340 : vector<1x32xf32> to vector<128x32xf32>
    %342 = arith.addf %337, %341 : vector<128x32xf32>
    %cst_118 = arith.constant dense<0.000000e+00> : vector<32x128xf32>
    %343 = tpu.matmul %342, %146, %cst_118 {dimension_numbers = #tpu.dot_dimension_numbers<[0], [0], [1], [1], [0, 1, 1, 1], [], []>, precision = #tpu.contract_precision<fp32>} : vector<128x32xf32>, vector<128x128xf32>, vector<32x128xf32> -> vector<32x128xf32>
    %344 = vector.extract_strided_slice %1 {offsets = [0, 6], sizes = [32, 1], strides = [1, 1]} : vector<128x16xf32> to vector<32x1xf32>
    %345 = vector.broadcast %344 : vector<32x1xf32> to vector<32x128xf32>
    %346 = arith.mulf %345, %343 : vector<32x128xf32>
    %347 = arith.addf %121, %346 : vector<32x128xf32>
    %cst_119 = arith.constant dense<0.000000e+00> : vector<128xf32>
    %348 = vector.multi_reduction <add>, %347, %cst_119 [0] : vector<32x128xf32> to vector<128xf32>
    %349 = vector.shape_cast %348 : vector<128xf32> to vector<1x128xf32>
    %cst_120 = arith.constant 3.200000e+01 : f32
    %350 = vector.broadcast %cst_120 : f32 to vector<1x128xf32>
    %351 = arith.divf %349, %350 : vector<1x128xf32>
    %352 = vector.broadcast %351 : vector<1x128xf32> to vector<32x128xf32>
    %353 = arith.subf %347, %352 : vector<32x128xf32>
    %354 = arith.mulf %353, %353 : vector<32x128xf32>
    %cst_121 = arith.constant dense<0.000000e+00> : vector<128xf32>
    %355 = vector.multi_reduction <add>, %354, %cst_121 [0] : vector<32x128xf32> to vector<128xf32>
    %356 = vector.shape_cast %355 : vector<128xf32> to vector<1x128xf32>
    %cst_122 = arith.constant 3.200000e+01 : f32
    %357 = vector.broadcast %cst_122 : f32 to vector<1x128xf32>
    %358 = arith.divf %356, %357 : vector<1x128xf32>
    %359 = vector.broadcast %351 : vector<1x128xf32> to vector<32x128xf32>
    %360 = arith.subf %347, %359 : vector<32x128xf32>
    %cst_123 = arith.constant 9.99999974E-6 : f32
    %361 = vector.broadcast %cst_123 : f32 to vector<1x128xf32>
    %362 = arith.addf %358, %361 : vector<1x128xf32>
    %363 = math.rsqrt %362 : vector<1x128xf32>
    %364 = vector.broadcast %363 : vector<1x128xf32> to vector<32x128xf32>
    %365 = arith.mulf %360, %364 : vector<32x128xf32>
    %c128_124 = arith.constant 128 : index
    %c0_125 = arith.constant 0 : index
    %366 = vector.load %arg2[%c128_124, %c0_125] : memref<984x32xf32, #tpu.memory_space<vmem>>, vector<128x32xf32>
    %cst_126 = arith.constant dense<0.000000e+00> : vector<128x128xf32>
    %367 = tpu.matmul %366, %365, %cst_126 {dimension_numbers = #tpu.dot_dimension_numbers<[1], [0], [0], [1], [0, 0, 1, 1], [], []>, precision = #tpu.contract_precision<fp32>} : vector<128x32xf32>, vector<32x128xf32>, vector<128x128xf32> -> vector<128x128xf32>
    %368 = vector.extract_strided_slice %1 {offsets = [0, 0], sizes = [128, 1], strides = [1, 1]} : vector<128x16xf32> to vector<128x1xf32>
    %369 = vector.broadcast %368 : vector<128x1xf32> to vector<128x128xf32>
    %370 = arith.addf %367, %369 : vector<128x128xf32>
    %cst_127 = arith.constant 5.000000e-01 : f32
    %371 = vector.broadcast %cst_127 : f32 to vector<128x128xf32>
    %372 = arith.mulf %371, %370 : vector<128x128xf32>
    %cst_128 = arith.constant 4.471500e-02 : f32
    %373 = vector.broadcast %cst_128 : f32 to vector<128x128xf32>
    %374 = arith.mulf %373, %370 : vector<128x128xf32>
    %375 = arith.mulf %374, %370 : vector<128x128xf32>
    %376 = arith.mulf %375, %370 : vector<128x128xf32>
    %377 = arith.addf %370, %376 : vector<128x128xf32>
    %cst_129 = arith.constant 0.797884583 : f32
    %378 = vector.broadcast %cst_129 : f32 to vector<128x128xf32>
    %379 = arith.mulf %378, %377 : vector<128x128xf32>
    %380 = math.tanh %379 : vector<128x128xf32>
    %cst_130 = arith.constant 1.000000e+00 : f32
    %381 = vector.broadcast %cst_130 : f32 to vector<128x128xf32>
    %382 = arith.addf %381, %380 : vector<128x128xf32>
    %383 = arith.mulf %372, %382 : vector<128x128xf32>
    %cst_131 = arith.constant dense<0.000000e+00> : vector<128xf32>
    %384 = vector.multi_reduction <add>, %383, %cst_131 [0] : vector<128x128xf32> to vector<128xf32>
    %385 = vector.shape_cast %384 : vector<128xf32> to vector<1x128xf32>
    %cst_132 = arith.constant 1.280000e+02 : f32
    %386 = vector.broadcast %cst_132 : f32 to vector<1x128xf32>
    %387 = arith.divf %385, %386 : vector<1x128xf32>
    %388 = vector.broadcast %387 : vector<1x128xf32> to vector<128x128xf32>
    %389 = arith.subf %383, %388 : vector<128x128xf32>
    %390 = arith.mulf %389, %389 : vector<128x128xf32>
    %cst_133 = arith.constant dense<0.000000e+00> : vector<128xf32>
    %391 = vector.multi_reduction <add>, %390, %cst_133 [0] : vector<128x128xf32> to vector<128xf32>
    %392 = vector.shape_cast %391 : vector<128xf32> to vector<1x128xf32>
    %cst_134 = arith.constant 1.280000e+02 : f32
    %393 = vector.broadcast %cst_134 : f32 to vector<1x128xf32>
    %394 = arith.divf %392, %393 : vector<1x128xf32>
    %395 = vector.broadcast %387 : vector<1x128xf32> to vector<128x128xf32>
    %396 = arith.subf %383, %395 : vector<128x128xf32>
    %cst_135 = arith.constant 9.99999974E-6 : f32
    %397 = vector.broadcast %cst_135 : f32 to vector<1x128xf32>
    %398 = arith.addf %394, %397 : vector<1x128xf32>
    %399 = math.rsqrt %398 : vector<1x128xf32>
    %400 = vector.broadcast %399 : vector<1x128xf32> to vector<128x128xf32>
    %401 = arith.mulf %396, %400 : vector<128x128xf32>
    %c256 = arith.constant 256 : index
    %c0_136 = arith.constant 0 : index
    %402 = vector.load %arg2[%c256, %c0_136] : memref<984x32xf32, #tpu.memory_space<vmem>>, vector<128x32xf32>
    %cst_137 = arith.constant dense<0.000000e+00> : vector<32x128xf32>
    %403 = tpu.matmul %402, %401, %cst_137 {dimension_numbers = #tpu.dot_dimension_numbers<[0], [0], [1], [1], [0, 1, 1, 1], [], []>, precision = #tpu.contract_precision<fp32>} : vector<128x32xf32>, vector<128x128xf32>, vector<32x128xf32> -> vector<32x128xf32>
    %404 = vector.extract_strided_slice %1 {offsets = [0, 7], sizes = [32, 1], strides = [1, 1]} : vector<128x16xf32> to vector<32x1xf32>
    %405 = vector.broadcast %404 : vector<32x1xf32> to vector<32x128xf32>
    %406 = arith.addf %403, %405 : vector<32x128xf32>
    %407 = vector.extract_strided_slice %1 {offsets = [0, 8], sizes = [32, 1], strides = [1, 1]} : vector<128x16xf32> to vector<32x1xf32>
    %408 = vector.broadcast %407 : vector<32x1xf32> to vector<32x128xf32>
    %409 = arith.mulf %408, %406 : vector<32x128xf32>
    %410 = arith.addf %347, %409 : vector<32x128xf32>
    %c0_138 = arith.constant 0 : index
    %c0_139 = arith.constant 0 : index
    %411 = vector.load %arg4[%c0_138, %c0_139] : memref<32x128xf32, #tpu.memory_space<vmem>>, vector<32x128xf32>
    tpu.vector_store %arg4[%c0_138, %c0_139], %410 {strides = array<i32>} : memref<32x128xf32, #tpu.memory_space<vmem>>, vector<32x128xf32>,
    return
  }
}

</mosaic_0001>

<bundles_post_ra>
// kernel: xca_block.1
= control target key start
LH: loop header
LB: loop body
LE: loop exit
PB: predicated region body
PF: predicated region fallthrough
CT: control target
= control target key end

     0   :  { %vm144_vm0 = vcmask 261120   ;;  %v17769_v22 = vmov 1   ;;  %vm1151_vm1 = vcmask 523264   ;;  %s17770_s9 = smov 96   ;;  %s17771_s10 = smov 64   ;;  %s24154_s0 = inlined_call_operand.vmem [shape: f32[32,128], index: 0, kind: input, shape index: {}]   ;;  %s24155_s2 = inlined_call_operand.vmem [shape: f32[984,32], index: 2, kind: input, shape index: {}]   ;;  %s24156_s1 = inlined_call_operand.vmem [shape: f32[128,16], index: 1, kind: input, shape index: {}]   ;;  %s24157_s3 = inlined_call_operand.vmem [shape: f32[256,128], index: 3, kind: input, shape index: {}]   ;;  %s24158_s4 = inlined_call_operand.vmem [shape: f32[32,128], index: 4, kind: output, shape index: {}]  }
   0x1   :  { %v17_v0 = vld [vmem:[%s24154_s0] sm:$0xff]  ;;  %v18_v1 = vld [vmem:[%s24154_s0 + $0x8] sm:$0xff]  ;;  %v19_v2 = vld [vmem:[%s24154_s0 + $0x10] sm:$0xff]  ;;  %17519 = vset.pattern.permute.xlu1 %v17769_v22  ;;  %17518 = vset.pattern.permute.xlu0 %v17769_v22  ;;  %s17772_s18 = smov 32  }
   0x2   :  { %v37_v3 = vadd.f32 %v18_v1, %v17_v0  ;;  %v72_v4 = vld [vmem:[%s24155_s2] sm:$0xff]  ;;  %v20_v5 = vld [vmem:[%s24154_s0 + $0x18] sm:$0xff]  ;;  %v26_v20 = vld [vmem:[%s24156_s1 + $0x28] sm:$0xff] }
   0x3   :  { %v146_v6 = vsel %vm144_vm0, %v72_v4, 0  ;;  %v28_v19 = vld [vmem:[%s24156_s1 + $0x38] sm:$0xff]  ;;  %111 = vperm.xlu1 %17519, %v26_v20   ;;  %v27_v24 = vld [vmem:[%s24156_s1 + $0x30] sm:$0xff]  ;;  %v25_v29 = vld [vmem:[%s24156_s1 + $0x20] sm:$0xff] }
   0x4   :  { %v38_v7 = vadd.f32 %v37_v3, %v19_v2  ;;  %v17823_v8 = vand.u32 4294901760, %v146_v6  ;;  %121 = vperm.xlu0 %17518, %v28_v19   ;;  %v21_v33 = vld [vmem:[%s24156_s1] sm:$0xff]  ;;  %v22_v36 = vld [vmem:[%s24156_s1 + $0x8] sm:$0xff]  ;;  %v23_v38 = vld [vmem:[%s24156_s1 + $0x10] sm:$0xff] }
   0x5   :  { %v24_v40 = vld [vmem:[%s24156_s1 + $0x18] sm:$0xff]  ;;  %v73_v48 = vld [vmem:[%s24155_s2 + $0x8] sm:$0xff]  ;;  %v74_v49 = vld [vmem:[%s24155_s2 + $0x10] sm:$0xff] }
   0x6   :  { %v39_v9 = vadd.f32 %v38_v7, %v20_v5  ;;  %v17826_v10 = vsub.f32 %v146_v6, %v17823_v8  ;;  %15619 = vmatprep.mubr.f32.mxu1 %v17823_v8  ;;  %v149_v51 = vsel %vm144_vm0, %v73_v48, 0  ;;  %v152_v52 = vsel %vm144_vm0, %v74_v49, 0  ;;  %v75_v53 = vld [vmem:[%s24155_s2 + $0x18] sm:$0xff]  ;;  %v76_v56 = vld [vmem:[%s24155_s2 + $0x20] sm:$0xff]  ;;  %v77_v57 = vld [vmem:[%s24155_s2 + $0x28] sm:$0xff] }
   0x7   :  { %106 = vperm.xlu1 %17519, %v25_v29   ;;  %v17872_v54 = vand.u32 4294901760, %v149_v51  ;;  %v17874_v55 = vand.u32 4294901760, %v152_v52  ;;  %v155_v58 = vsel %vm144_vm0, %v75_v53, 0  ;;  %v158_v59 = vsel %vm144_vm0, %v76_v56, 0  ;;  %v79_v4 = vld [vmem:[%s24155_s2 + $0x38] sm:$0xff] }
   0x8   :  { %v40_v11 = vrot.slane %v39_v9, 4  ;;  %v252_v12 = vand.u32 4294901760, %v17826_v10  ;;  %116 = vperm.xlu0 %17518, %v27_v24   ;;  %v161_v60 = vsel %vm144_vm0, %v77_v57, 0  ;;  %v17891_v63 = vand.u32 4294901760, %v155_v58 }
   0x9   :  { %v17886_v61 = vsub.f32 %v149_v51, %v17872_v54  ;;  %v17889_v62 = vsub.f32 %v152_v52, %v17874_v55 }
   0xa   :  { %v41_v13 = vadd.f32 %v40_v11, %v39_v9  ;;  %v253_v14 = vsub.f32 %v17826_v10, %v252_v12  ;;  %v17907_v7 = vsub.f32 %v155_v58, %v17891_v63  ;;  %v80_v9 = vld [vmem:[%s24155_s2 + $0x40] sm:$0xff] }
   0xb   :  { %91 = vperm.xlu1 %17519, %v22_v36   ;;  %v272_v6 = vand.u32 4294901760, %v17889_v62  ;;  %v170_v24 = vsel %vm144_vm0, %v80_v9, 0 }
   0xc   :  { %v42_v15 = vrot.slane %v41_v13, 2  ;;  %v254_v16 = vand.u32 4294901760, %v253_v14  ;;  %86 = vperm.xlu0 %17518, %v21_v33  }
   0xd   :  { %v273_v22 = vsub.f32 %v17889_v62, %v272_v6 }
   0xe   :  { %v43_v17 = vadd.f32 %v42_v15, %v41_v13  ;;  %15593 = vmatprep.mubr.f32.mxu0 %v254_v16  ;;  %v167_v16 = vsel %vm144_vm0, %v79_v4, 0 }
   0xf   :  { %101 = vperm.xlu1 %17519, %v24_v40   ;;  %v17963_v40 = vand.u32 4294901760, %v170_v24  ;;  %v274_v48 = vand.u32 4294901760, %v273_v22 }
  0x10   :  { %v44_v18 = vrot.slane %v43_v17, 1  ;;  %96 = vperm.xlu0 %17518, %v23_v38  }
  0x12   :  { %v45_v21 = vadd.f32 %v44_v18, %v43_v17 }
  0x14   :  { %v47_v23 = vmul.f32 0.03125, %v45_v21 }
  0x16   :  { %v17842_v25 = vsub.f32 %v17_v0, %v47_v23  ;;  %v49_v26 = vsub.f32 %v18_v1, %v47_v23  ;;  %v50_v27 = vsub.f32 %v19_v2, %v47_v23  ;;  %v51_v28 = vsub.f32 %v20_v5, %v47_v23  ;;  %v78_v0 = vld [vmem:[%s24155_s2 + $0x30] sm:$0xff] }
  0x17   :  { %v17896_v1 = vand.u32 4294901760, %v158_v59  ;;  %v17898_v2 = vand.u32 4294901760, %v161_v60  ;;  %v164_v3 = vsel %vm144_vm0, %v78_v0, 0  ;;  %v262_v5 = vand.u32 4294901760, %v17886_v61 }
  0x18   :  { %v52_v30 = vmul.f32 %v17842_v25, %v17842_v25  ;;  %v53_v31 = vmul.f32 %v49_v26, %v49_v26  ;;  %v54_v32 = vmul.f32 %v50_v27, %v50_v27  ;;  %v55_v34 = vmul.f32 %v51_v28, %v51_v28 }
  0x19   :  { %v17913_v13 = vsub.f32 %v158_v59, %v17896_v1  ;;  %v17916_v14 = vsub.f32 %v161_v60, %v17898_v2  ;;  %v17918_v15 = vand.u32 4294901760, %v164_v3  ;;  %v263_v21 = vsub.f32 %v17886_v61, %v262_v5 }
  0x1a   :  { %v56_v35 = vadd.f32 %v53_v31, %v52_v30  ;;  %v282_v23 = vand.u32 4294901760, %v17907_v7  ;;  %v18003_v59 = vsub.f32 %v170_v24, %v17963_v40 }
  0x1b   :  { %v292_v31 = vand.u32 4294901760, %v17913_v13  ;;  %v17947_v33 = vsub.f32 %v164_v3, %v17918_v15 }
  0x1c   :  { %v57_v37 = vadd.f32 %v56_v35, %v54_v32  ;;  %v302_v32 = vand.u32 4294901760, %v17916_v14  ;;  %v283_v49 = vsub.f32 %v17907_v7, %v282_v23  ;;  %v332_v24 = vand.u32 4294901760, %v18003_v59 }
  0x1d   :  { %v312_v58 = vand.u32 4294901760, %v17947_v33 }
  0x1e   :  { %v58_v39 = vadd.f32 %v57_v37, %v55_v34  ;;  %v17949_v34 = vand.u32 4294901760, %v167_v16 }
  0x1f   :  { %v313_v22 = vsub.f32 %v17947_v33, %v312_v58 }
  0x20   :  { %v59_v41 = vrot.slane %v58_v39, 4  ;;  %v17990_v51 = vsub.f32 %v167_v16, %v17949_v34  ;;  %v303_v16 = vsub.f32 %v17916_v14, %v302_v32 }
  0x22   :  { %v60_v42 = vadd.f32 %v59_v41, %v58_v39  ;;  %v264_v39 = vand.u32 4294901760, %v263_v21 }
  0x24   :  { %v61_v43 = vrot.slane %v60_v42, 2 }
  0x26   :  { %v62_v44 = vadd.f32 %v61_v43, %v60_v42 }
  0x28   :  { %v63_v45 = vrot.slane %v62_v44, 1 }
  0x2a   :  { %v64_v46 = vadd.f32 %v63_v45, %v62_v44 }
  0x2c   :  { %v65_v47 = vmul.f32 0.03125, %v64_v46 }
  0x2e   :  { %v66_v50 = vadd.f32 1e-05, %v65_v47  ;;  %v83_v47 = vld [vmem:[%s24155_s2 + $0x58] sm:$0xff] }
  0x2f   :  { %v179_v0 = vsel %vm144_vm0, %v83_v47, 0 }
  0x30   :  { %17535 = vrsqrt.f32 %v66_v50  ;;  %v293_v50 = vsub.f32 %v17913_v13, %v292_v31 }
  0x32   :  { %v294_v21 = vand.u32 4294901760, %v293_v50 }
  0x3d   :  { %v17536_v11 = vpop.eup %17535 }
  0x3e   :  { %v71_v17 = vmul.f32 %v17536_v11, %v51_v28  ;;  %v70_v18 = vmul.f32 %v17536_v11, %v50_v27  ;;  %v69_v19 = vmul.f32 %v17536_v11, %v49_v26  ;;  %v68_v20 = vmul.f32 %v17536_v11, %v17842_v25  ;;  %v81_v25 = vld [vmem:[%s24155_s2 + $0x48] sm:$0xff]  ;;  %v82_v28 = vld [vmem:[%s24155_s2 + $0x50] sm:$0xff] }
  0x3f   :  { %v173_v41 = vsel %vm144_vm0, %v81_v25, 0  ;;  %v176_v42 = vsel %vm144_vm0, %v82_v28, 0  ;;  %v284_v11 = vand.u32 4294901760, %v283_v49  ;;  %v333_v49 = vsub.f32 %v18003_v59, %v332_v24 }
  0x40   :  { %v17930_v29 = vand.u32 4294901760, %v71_v17  ;;  %v17932_v30 = vand.u32 4294901760, %v70_v18  ;;  %v17934_v27 = vand.u32 4294901760, %v69_v19  ;;  %v17936_v26 = vand.u32 4294901760, %v68_v20 }
  0x41   :  { %v17998_v57 = vand.u32 4294901760, %v173_v41  ;;  %v18005_v60 = vand.u32 4294901760, %v176_v42 }
  0x42   :  { %15585 = vmatprep.subr.mxu0 %v17930_v29  ;;  %v396_v35 = vsub.f32 %v71_v17, %v17930_v29  ;;  %v17954_v36 = vsub.f32 %v70_v18, %v17932_v30  ;;  %v17957_v37 = vsub.f32 %v69_v19, %v17934_v27  ;;  %v17960_v38 = vsub.f32 %v68_v20, %v17936_v26 }
  0x43   :  { %15586 = vmatpush3.msra.mxu0 %v17930_v29  ;;  %v322_v18 = vand.u32 4294901760, %v17990_v51  ;;  %v18017_v19 = vsub.f32 %v173_v41, %v17998_v57  ;;  %v18019_v20 = vand.u32 4294901760, %v179_v0  ;;  %v18026_v25 = vsub.f32 %v176_v42, %v18005_v60 }
  0x44   :  { %15587 = vmatprep.subr.mxu0 %v17932_v30  ;;  %v17968_v43 = vand.u32 4294901760, %v396_v35  ;;  %v17971_v44 = vand.u32 4294901760, %v17954_v36  ;;  %v17974_v45 = vand.u32 4294901760, %v17957_v37  ;;  %v17977_v46 = vand.u32 4294901760, %v17960_v38 }
  0x45   :  { %15588 = vmatpush3.msra.mxu0 %v17932_v30  ;;  %v323_v41 = vsub.f32 %v17990_v51, %v322_v18  ;;  %v342_v47 = vand.u32 4294901760, %v18017_v19  ;;  %v314_v42 = vand.u32 4294901760, %v313_v22 }
  0x46   :  { %15589 = vmatprep.subr.mxu0 %v17934_v27  ;;  %v398_v52 = vsub.f32 %v396_v35, %v17968_v43  ;;  %v405_v53 = vsub.f32 %v17954_v36, %v17971_v44  ;;  %v412_v56 = vsub.f32 %v17957_v37, %v17974_v45  ;;  %v419_v9 = vsub.f32 %v17960_v38, %v17977_v46 }
  0x47   :  { %15590 = vmatpush3.msra.mxu0 %v17934_v27  ;;  %v324_v50 = vand.u32 4294901760, %v323_v41 }
  0x48   :  { %15591 = vmatprep.subr.mxu0 %v17936_v26  ;;  %v399_v3 = vand.u32 4294901760, %v398_v52  ;;  %v406_v4 = vand.u32 4294901760, %v405_v53  ;;  %v413_v17 = vand.u32 4294901760, %v412_v56  ;;  %v420_v28 = vand.u32 4294901760, %v419_v9 }
  0x49   :  { %15592 = vmatpush3.msra.mxu0 %v17936_v26  ;;  %v343_v52 = vsub.f32 %v18017_v19, %v342_v47  ;;  %v334_v56 = vand.u32 4294901760, %v333_v49 }
  0x4a   :  { %15594 = vmatmul.mubr.f32.vlgmr.msra.gmra.mxu0 %v264_v39  ;;  %15611 = vmatprep.subr.mxu1 %v399_v3  ;;  %v304_v39 = vand.u32 4294901760, %v303_v16 }
  0x4b   :  { %15612 = vmatpush3.msra.mxu1 %v399_v3  ;;  %15596 = vmatprep.mubr.f32.mxu0 %v274_v48  ;;  %v18033_v48 = vsub.f32 %v179_v0, %v18019_v20 }
  0x4c   :  { %15613 = vmatprep.subr.mxu1 %v406_v4  ;;  %15637 = vmatprep.subr.mxu0 %v396_v35 }
  0x4d   :  { %15614 = vmatpush3.msra.mxu1 %v406_v4  ;;  %15638 = vmatpush3.msra.mxu0 %v396_v35  ;;  %v352_v35 = vand.u32 4294901760, %v18026_v25  ;;  %v362_v53 = vand.u32 4294901760, %v18033_v48 }
  0x4e   :  { %15597 = vmatmul.mubr.f32.gmra.mxu0 %v284_v11  ;;  %15615 = vmatprep.subr.mxu1 %v413_v17 }
  0x4f   :  { %15616 = vmatpush3.msra.mxu1 %v413_v17  ;;  %15599 = vmatprep.mubr.f32.mxu0 %v294_v21  ;;  %v353_v0 = vsub.f32 %v18026_v25, %v352_v35  ;;  %v363_v3 = vsub.f32 %v18033_v48, %v362_v53 }
  0x50   :  { %15617 = vmatprep.subr.mxu1 %v420_v28  ;;  %15639 = vmatprep.subr.mxu0 %v17954_v36 }
  0x51   :  { %15618 = vmatpush3.msra.mxu1 %v420_v28  ;;  %15640 = vmatpush3.msra.mxu0 %v17954_v36  ;;  %v344_v36 = vand.u32 4294901760, %v343_v52  ;;  %v354_v4 = vand.u32 4294901760, %v353_v0 }
  0x52   :  { %15600 = vmatmul.mubr.f32.gmra.mxu0 %v304_v39  ;;  %15620 = vmatmul.mubr.f32.vlgmr.msra.gmra.mxu1 %v17872_v54 }
  0x53   :  { %15602 = vmatprep.mubr.f32.mxu0 %v314_v42  ;;  %15622 = vmatprep.mubr.f32.mxu1 %v17874_v55 }
  0x54   :  { %15663 = vmatprep.subr.mxu1 %v17930_v29  ;;  %15641 = vmatprep.subr.mxu0 %v17957_v37 }
  0x55   :  { %15664 = vmatpush3.msra.mxu1 %v17930_v29  ;;  %15642 = vmatpush3.msra.mxu0 %v17957_v37  ;;  %v364_v37 = vand.u32 4294901760, %v363_v3 }
  0x56   :  { %15603 = vmatmul.mubr.f32.gmra.mxu0 %v324_v50  ;;  %15623 = vmatmul.mubr.f32.gmra.mxu1 %v17891_v63 }
  0x57   :  { %15605 = vmatprep.mubr.f32.mxu0 %v334_v56  ;;  %15625 = vmatprep.mubr.f32.mxu1 %v17896_v1 }
  0x58   :  { %15665 = vmatprep.subr.mxu1 %v17932_v30  ;;  %15643 = vmatprep.subr.mxu0 %v17960_v38 }
  0x59   :  { %15666 = vmatpush3.msra.mxu1 %v17932_v30  ;;  %15644 = vmatpush3.msra.mxu0 %v17960_v38 }
  0x5a   :  { %15606 = vmatmul.mubr.f32.gmra.mxu0 %v344_v36  ;;  %15626 = vmatmul.mubr.f32.gmra.mxu1 %v17898_v2 }
  0x5b   :  { %15608 = vmatprep.mubr.f32.mxu0 %v354_v4  ;;  %15628 = vmatprep.mubr.f32.mxu1 %v17918_v15 }
  0x5c   :  { %15667 = vmatprep.subr.mxu1 %v17934_v27  ;;  %15689 = vmatprep.subr.mxu0 %v17968_v43 }
  0x5d   :  { %15668 = vmatpush3.msra.mxu1 %v17934_v27 }
  0x5e   :  { %15609 = vmatmul.mubr.f32.gmra.mxu0 %v364_v37  ;;  %15629 = vmatmul.mubr.f32.gmra.mxu1 %v17949_v34 }
  0x5f   :  { %15631 = vmatprep.mubr.f32.mxu1 %v17963_v40  ;;  %15645 = vmatprep.mubr.f32.mxu0 %v17826_v10 }
  0x60   :  { %15669 = vmatprep.subr.mxu1 %v17936_v26 }
  0x61   :  { %15670 = vmatpush3.msra.mxu1 %v17936_v26 }
  0x62   :  { %15632 = vmatmul.mubr.f32.gmra.mxu1 %v17998_v57  ;;  %15646 = vmatmul.mubr.f32.vlgmr.msra.gmra.mxu0 %v17886_v61 }
  0x63   :  { %15634 = vmatprep.mubr.f32.mxu1 %v18005_v60  ;;  %15648 = vmatprep.mubr.f32.mxu0 %v17889_v62 }
  0x64   :  { %15690 = vmatpush3.msra.mxu0 %v17968_v43  ;;  %15715 = vmatprep.subr.mxu1 %v17930_v29 }
  0x65   :  { %15691 = vmatprep.subr.mxu0 %v17971_v44 }
  0x66   :  { %15635 = vmatmul.mubr.f32.gmra.mxu1 %v18019_v20  ;;  %15649 = vmatmul.mubr.f32.gmra.mxu0 %v17907_v7 }
  0x67   :  { %15651 = vmatprep.mubr.f32.mxu0 %v17913_v13  ;;  %15671 = vmatprep.mubr.f32.mxu1 %v252_v12 }
  0x68   :  { %15692 = vmatpush3.msra.mxu0 %v17971_v44 }
  0x69   :  { %15693 = vmatprep.subr.mxu0 %v17974_v45 }
  0x6a   :  { %15652 = vmatmul.mubr.f32.gmra.mxu0 %v17916_v14  ;;  %15672 = vmatmul.mubr.f32.vlgmr.msra.gmra.mxu1 %v262_v5 }
  0x6b   :  { %15654 = vmatprep.mubr.f32.mxu0 %v17947_v33  ;;  %15674 = vmatprep.mubr.f32.mxu1 %v272_v6 }
  0x6c   :  { %15716 = vmatpush3.msra.mxu1 %v17930_v29  ;;  %15694 = vmatpush3.msra.mxu0 %v17974_v45 }
  0x6d   :  { %15717 = vmatprep.subr.mxu1 %v17932_v30  ;;  %15695 = vmatprep.subr.mxu0 %v17977_v46 }
  0x6e   :  { %15655 = vmatmul.mubr.f32.gmra.mxu0 %v17990_v51  ;;  %15675 = vmatmul.mubr.f32.gmra.mxu1 %v282_v23 }
  0x6f   :  { %15657 = vmatprep.mubr.f32.mxu0 %v18003_v59  ;;  %15677 = vmatprep.mubr.f32.mxu1 %v292_v31 }
  0x70   :  { %15718 = vmatpush3.msra.mxu1 %v17932_v30  ;;  %15696 = vmatpush3.msra.mxu0 %v17977_v46 }
  0x71   :  { %15719 = vmatprep.subr.mxu1 %v17934_v27 }
  0x72   :  { %15658 = vmatmul.mubr.f32.gmra.mxu0 %v18017_v19  ;;  %15678 = vmatmul.mubr.f32.gmra.mxu1 %v302_v32 }
  0x73   :  { %15660 = vmatprep.mubr.f32.mxu0 %v18026_v25  ;;  %15680 = vmatprep.mubr.f32.mxu1 %v312_v58 }
  0x74   :  { %15720 = vmatpush3.msra.mxu1 %v17934_v27 }
  0x75   :  { %15721 = vmatprep.subr.mxu1 %v17936_v26 }
  0x76   :  { %15661 = vmatmul.mubr.f32.gmra.mxu0 %v18033_v48  ;;  %15681 = vmatmul.mubr.f32.gmra.mxu1 %v322_v18 }
  0x77   :  { %15683 = vmatprep.mubr.f32.mxu1 %v332_v24  ;;  %15697 = vmatprep.mubr.f32.mxu0 %v17823_v8 }
  0x78   :  { %15722 = vmatpush3.msra.mxu1 %v17936_v26 }
  0x7a   :  { %15684 = vmatmul.mubr.f32.gmra.mxu1 %v342_v47  ;;  %15698 = vmatmul.mubr.f32.vlgmr.msra.gmra.mxu0 %v17872_v54 }
  0x7b   :  { %15686 = vmatprep.mubr.f32.mxu1 %v352_v35  ;;  %15700 = vmatprep.mubr.f32.mxu0 %v17874_v55 }
  0x7e   :  { %15687 = vmatmul.mubr.f32.gmra.mxu1 %v362_v53  ;;  %15701 = vmatmul.mubr.f32.gmra.mxu0 %v17891_v63 }
  0x7f   :  { %15703 = vmatprep.mubr.f32.mxu0 %v17896_v1  ;;  %15723 = vmatprep.mubr.f32.mxu1 %v17823_v8  ;;  %v18150_v8 = vpop.permute.xlu1 %111  ;;  %v122_v39 = vpop.permute.xlu0 %121 }
  0x82   :  { %15704 = vmatmul.mubr.f32.gmra.mxu0 %v17898_v2  ;;  %15724 = vmatmul.mubr.f32.vlgmr.msra.gmra.mxu1 %v17872_v54 }
  0x83   :  { %15706 = vmatprep.mubr.f32.mxu0 %v17918_v15  ;;  %15726 = vmatprep.mubr.f32.mxu1 %v17874_v55  ;;  %v18152_v10 = vpop.permute.xlu1 %106  ;;  %v117_v50 = vpop.permute.xlu0 %116 }
  0x86   :  { %15707 = vmatmul.mubr.f32.gmra.mxu0 %v17949_v34  ;;  %15727 = vmatmul.mubr.f32.gmra.mxu1 %v17891_v63 }
  0x87   :  { %15729 = vmatprep.mubr.f32.mxu1 %v17896_v1  ;;  %15709 = vmatprep.mubr.f32.mxu0 %v17963_v40  ;;  %v92_v54 = vpop.permute.xlu1 %91  ;;  %v87_v4 = vpop.permute.xlu0 %86 }
  0x8a   :  { %15730 = vmatmul.mubr.f32.gmra.mxu1 %v17898_v2  ;;  %15710 = vmatmul.mubr.f32.gmra.mxu0 %v17998_v57 }
  0x8b   :  { %15732 = vmatprep.mubr.f32.mxu1 %v17918_v15  ;;  %15712 = vmatprep.mubr.f32.mxu0 %v18005_v60  ;;  %v102_v1 = vpop.permute.xlu1 %101 }
  0x8e   :  { %15733 = vmatmul.mubr.f32.gmra.mxu1 %v17949_v34  ;;  %15713 = vmatmul.mubr.f32.gmra.mxu0 %v18019_v20 }
  0x8f   :  { %15735 = vmatprep.mubr.f32.mxu1 %v17963_v40 }
  0x92   :  { %15736 = vmatmul.mubr.f32.gmra.mxu1 %v17998_v57 }
  0x93   :  { %15738 = vmatprep.mubr.f32.mxu1 %v18005_v60 }
  0x96   :  { %15739 = vmatmul.mubr.f32.gmra.mxu1 %v18019_v20 }
 0x10a   :  { %v15595_v12 = vpop.f32.mrf.mxu0 }
 0x10b   :  { %v267_v62 = vadd.f32 %v15595_v12, %v92_v54 }
 0x10c   :  { %v18154_v55 = vpop.f32.mrf.mxu0 }
 0x10e   :  { %v15598_v61 = vpop.f32.mrf.mxu0 }
 0x10f   :  { %v287_v7 = vadd.f32 %v15598_v61, %v102_v1 }
 0x110   :  { %v18156_v63 = vpop.f32.mrf.mxu0 }
 0x112   :  { %v15601_v2 = vpop.f32.mrf.mxu0  ;;  %v15621_v5 = vpop.f32.mrf.mxu1 }
 0x113   :  { %v18158_v6 = vadd.f32 %v15621_v5, %v267_v62  ;;  %v307_v54 = vadd.f32 %v15601_v2, %v18150_v8 }
 0x114   :  { %v296_v13 = vpop.f32.mrf.mxu0  ;;  %v18160_v14 = vpop.f32.mrf.mxu1 }
 0x116   :  { %v15604_v15 = vpop.f32.mrf.mxu0  ;;  %v15624_v23 = vpop.f32.mrf.mxu1 }
 0x117   :  { %v18162_v29 = vadd.f32 %v15624_v23, %v287_v7  ;;  %v327_v61 = vadd.f32 %v15604_v15, %v122_v39  ;;  %v257_v7 = vadd.f32 %v18154_v55, %v87_v4  ;;  %v97_v23 = vpop.permute.xlu0 %96 }
 0x118   :  { %v316_v30 = vpop.f32.mrf.mxu0  ;;  %v18164_v27 = vpop.f32.mrf.mxu1  ;;  %v277_v2 = vadd.f32 %v18156_v63, %v97_v23 }
 0x11a   :  { %v18166_v26 = vpop.f32.mrf.mxu0  ;;  %v15627_v31 = vpop.f32.mrf.mxu1 }
 0x11b   :  { %24411 = vst [vmem:[#allocation3_spill] sm:$0xff] %v18166_v26 }
 0x11c   :  { %v18168_v32 = vpop.f32.mrf.mxu0  ;;  %v481_v33 = vpop.f32.mrf.mxu1 }
 0x11d   :  { %24412 = vst [vmem:[#allocation4_spill] sm:$0xff] %v18168_v32 }
 0x11e   :  { %v18170_v34 = vpop.f32.mrf.mxu0  ;;  %v15630_v38 = vpop.f32.mrf.mxu1 }
 0x120   :  { %v18172_v40 = vpop.f32.mrf.mxu0  ;;  %v493_v43 = vpop.f32.mrf.mxu1 }
 0x122   :  { %v18174_v44 = vpop.f32.mrf.mxu1  ;;  %v18176_v45 = vpop.f32.mrf.mxu0 }
 0x123   :  { %24413 = vst [vmem:[#allocation5_spill] sm:$0xff] %v18174_v44 }
 0x124   :  { %v18178_v46 = vpop.f32.mrf.mxu1  ;;  %v603_v51 = vpop.f32.mrf.mxu0 }
 0x125   :  { %24414 = vst [vmem:[#allocation6_spill] sm:$0xff] %v18178_v46  ;;  %v500_v46 = vadd.f32 %v15630_v38, %v327_v61 }
 0x126   :  { %v18180_v57 = vpop.f32.mrf.mxu1  ;;  %v18182_v58 = vpop.f32.mrf.mxu0 }
 0x128   :  { %v18184_v59 = vpop.f32.mrf.mxu1  ;;  %v617_v60 = vpop.f32.mrf.mxu0 }
 0x12a   :  { %v15653_v9 = vpop.f32.mrf.mxu0  ;;  %v18186_v11 = vpop.f32.mrf.mxu1 }
 0x12c   :  { %v631_v16 = vpop.f32.mrf.mxu0  ;;  %v757_v17 = vpop.f32.mrf.mxu1 }
 0x12e   :  { %v15656_v18 = vpop.f32.mrf.mxu0  ;;  %v18188_v19 = vpop.f32.mrf.mxu1 }
 0x12f   :  { %v653_v8 = vadd.f32 %v15656_v18, %v500_v46 }
 0x130   :  { %v645_v20 = vpop.f32.mrf.mxu0  ;;  %v773_v21 = vpop.f32.mrf.mxu1 }
 0x132   :  { %v18190_v22 = vpop.f32.mrf.mxu0  ;;  %v15679_v24 = vpop.f32.mrf.mxu1 }
 0x133   :  { %24415 = vst [vmem:[#allocation7_spill] sm:$0xff] %v18190_v22 }
 0x134   :  { %v18192_v25 = vpop.f32.mrf.mxu0  ;;  %v789_v28 = vpop.f32.mrf.mxu1 }
 0x135   :  { %24416 = vst [vmem:[#allocation8_spill] sm:$0xff] %v18192_v25  ;;  %v488_v25 = vadd.f32 %v15627_v31, %v307_v54 }
 0x136   :  { %v18194_v41 = vpop.f32.mrf.mxu0  ;;  %v15682_v47 = vpop.f32.mrf.mxu1 }
 0x137   :  { %v814_v4 = vadd.f32 %v15682_v47, %v653_v8 }
 0x138   :  { %v18196_v48 = vpop.f32.mrf.mxu0  ;;  %v805_v42 = vpop.f32.mrf.mxu1 }
 0x139   :  { %24417 = vst [vmem:[#allocation9_spill] sm:$0xff] %v18196_v48  ;;  %v639_v48 = vadd.f32 %v15653_v9, %v488_v25 }
 0x13a   :  { %v18198_v49 = vpop.f32.mrf.mxu1  ;;  %v18200_v35 = vpop.f32.mrf.mxu0 }
 0x13b   :  { %24418 = vst [vmem:[#allocation10_spill] sm:$0xff] %v18198_v49  ;;  %v297_v49 = vadd.f32 %v296_v13, %v18152_v10  ;;  %v798_v55 = vadd.f32 %v15679_v24, %v639_v48 }
 0x13c   :  { %v18202_v52 = vpop.f32.mrf.mxu1  ;;  %v928_v53 = vpop.f32.mrf.mxu0 }
 0x13d   :  { %24419 = vst [vmem:[#allocation11_spill] sm:$0xff] %v18202_v52  ;;  %v317_v52 = vadd.f32 %v316_v30, %v117_v50  ;;  %v482_v15 = vadd.f32 %v481_v33, %v297_v49  ;;  %v470_v30 = vadd.f32 %v18164_v27, %v277_v2 }
 0x13e   :  { %v18204_v56 = vpop.f32.mrf.mxu1  ;;  %v18206_v0 = vpop.f32.mrf.mxu0 }
 0x13f   :  { %24420 = vst [vmem:[#allocation12_spill] sm:$0xff] %v18204_v56  ;;  %v494_v44 = vadd.f32 %v493_v43, %v317_v52  ;;  %v632_v31 = vadd.f32 %v631_v16, %v482_v15  ;;  %v618_v43 = vadd.f32 %v617_v60, %v470_v30 }
 0x140   :  { %v18208_v36 = vpop.f32.mrf.mxu1  ;;  %v940_v3 = vpop.f32.mrf.mxu0 }
 0x141   :  { %24421 = vst [vmem:[#allocation13_spill] sm:$0xff] %v18208_v36  ;;  %v458_v36 = vadd.f32 %v18160_v14, %v257_v7  ;;  %v646_v26 = vadd.f32 %v645_v20, %v494_v44  ;;  %v790_v9 = vadd.f32 %v789_v28, %v632_v31  ;;  %v611_v44 = vadd.f32 %v18176_v45, %v18158_v6 }
 0x142   :  { %v15705_v37 = vpop.f32.mrf.mxu0  ;;  %v15725_v12 = vpop.f32.mrf.mxu1  ;;  %v774_v27 = vadd.f32 %v773_v21, %v618_v43  ;;  %v625_v28 = vadd.f32 %v18182_v58, %v18162_v29 }
 0x143   :  { %v604_v56 = vadd.f32 %v603_v51, %v458_v36  ;;  %v806_v50 = vadd.f32 %v805_v42, %v646_v26  ;;  %v959_v54 = vadd.f32 %v15705_v37, %v798_v55  ;;  %v766_v60 = vadd.f32 %v18186_v11, %v611_v44 }
 0x144   :  { %v952_v62 = vpop.f32.mrf.mxu0  ;;  %v1069_v1 = vpop.f32.mrf.mxu1  ;;  %v782_v49 = vadd.f32 %v18188_v19, %v625_v28 }
 0x145   :  { %v758_v13 = vadd.f32 %v757_v17, %v604_v56  ;;  %v953_v20 = vadd.f32 %v952_v62, %v790_v9  ;;  %v941_v17 = vadd.f32 %v940_v3, %v774_v27  ;;  %v935_v11 = vadd.f32 %v18200_v35, %v766_v60 }
 0x146   :  { %v18211_v5 = vpop.f32.mrf.mxu1  ;;  %v15708_v32 = vpop.f32.mrf.mxu0 }
 0x147   :  { %v971_v14 = vadd.f32 %v15708_v32, %v814_v4  ;;  %v929_v18 = vadd.f32 %v928_v53, %v758_v13  ;;  %v18257_v52 = vadd.f32 %v15725_v12, %v935_v11 }
 0x148   :  { %v1081_v22 = vpop.f32.mrf.mxu1  ;;  %v964_v38 = vpop.f32.mrf.mxu0 }
 0x149   :  { %v965_v63 = vadd.f32 %v964_v38, %v806_v50  ;;  %v18224_v24 = vadd.f32 %v1069_v1, %v929_v18  ;;  %v18248_v47 = vadd.f32 %v1081_v22, %v941_v17  ;;  %v947_v22 = vadd.f32 %v18206_v0, %v782_v49 }
 0x14a   :  { %v15731_v39 = vpop.f32.mrf.mxu1  ;;  %v18279_v36 = vmul.f32 %v18257_v52, %v18257_v52 }
 0x14b   :  { %v18218_v33 = vadd.f32 %v15731_v39, %v959_v54  ;;  %v18254_v42 = vmul.f32 %v18224_v24, %v18224_v24  ;;  %v18270_v53 = vmul.f32 %v18248_v47, %v18248_v47  ;;  %v18273_v19 = vadd.f32 %v18211_v5, %v947_v22 }
 0x14c   :  { %v1093_v10 = vpop.f32.mrf.mxu1  ;;  %v1155_v3 = vsel %vm1151_vm1, %v18279_v36, 0.0 }
 0x14d   :  { %v18233_v25 = vadd.f32 %v1093_v10, %v953_v20  ;;  %v18243_v21 = vmul.f32 %v18218_v33, %v18218_v33  ;;  %v1152_v35 = vsel %vm1151_vm1, %v18254_v42, 0.0  ;;  %v1158_v0 = vsel %vm1151_vm1, %v18270_v53, 0.0 }
 0x14e   :  { %v15734_v46 = vpop.f32.mrf.mxu1  ;;  %v18287_v37 = vmul.f32 %v18273_v19, %v18273_v19 }
 0x14f   :  { %v18220_v51 = vadd.f32 %v15734_v46, %v971_v14  ;;  %v1183_v29 = vsel %vm1151_vm1, %v18243_v21, 0.0  ;;  %v18263_v58 = vmul.f32 %v18233_v25, %v18233_v25 }
 0x150   :  { %v1105_v16 = vpop.f32.mrf.mxu1  ;;  %v1161_v12 = vsel %vm1151_vm1, %v18287_v37, 0.0 }
 0x151   :  { %v18226_v26 = vadd.f32 %v1105_v16, %v965_v63  ;;  %v18230_v32 = vmul.f32 %v18220_v51, %v18220_v51  ;;  %v1180_v56 = vsel %vm1151_vm1, %v18263_v58, 0.0 }
 0x153   :  { %v1189_v6 = vsel %vm1151_vm1, %v18230_v32, 0.0  ;;  %v18239_v45 = vmul.f32 %v18226_v26, %v18226_v26 }
 0x154   :  { %1190 = vadd.xlane.f32.xlu0 %v1189_v6 }
 0x155   :  { %v1186_v48 = vsel %vm1151_vm1, %v18239_v45, 0.0 }
 0x156   :  { %1187 = vadd.xlane.f32.xlu1 %v1186_v48 }
 0x158   :  { %1184 = vadd.xlane.f32.xlu0 %v1183_v29 }
 0x15a   :  { %1153 = vadd.xlane.f32.xlu1 %v1152_v35 }
 0x15c   :  { %1181 = vadd.xlane.f32.xlu0 %v1180_v56 }
 0x15e   :  { %1159 = vadd.xlane.f32.xlu1 %v1158_v0 }
 0x160   :  { %1156 = vadd.xlane.f32.xlu0 %v1155_v3 }
 0x164   :  { %1162 = vadd.xlane.f32.xlu0 %v1161_v12 }
 0x1dd   :  { %v1191_v61 = vpop.xlane.xlu0 %1190 }
 0x1de   :  { %v1195_v62 = vmax.f32 %v1191_v61, 1e-24 }
 0x1df   :  { %v1188_v1 = vpop.xlane.xlu1 %1187 }
 0x1e0   :  { %17537 = vrsqrt.f32 %v1195_v62  ;;  %v1194_v5 = vmax.f32 %v1188_v1, 1e-24 }
 0x1e1   :  { %v1185_v7 = vpop.xlane.xlu0 %1184 }
 0x1e2   :  { %17539 = vrsqrt.f32 %v1194_v5  ;;  %v1193_v23 = vmax.f32 %v1185_v7, 1e-24 }
 0x1e3   :  { %v1154_v8 = vpop.xlane.xlu1 %1153 }
 0x1e4   :  { %17541 = vrsqrt.f32 %v1193_v23  ;;  %v1164_v2 = vmax.f32 %v1154_v8, 1e-24 }
 0x1e5   :  { %v1182_v15 = vpop.xlane.xlu0 %1181 }
 0x1e6   :  { %17543 = vrsqrt.f32 %v1164_v2  ;;  %v1192_v39 = vmax.f32 %v1182_v15, 1e-24 }
 0x1e7   :  { %v1160_v55 = vpop.xlane.xlu1 %1159 }
 0x1e8   :  { %17545 = vrsqrt.f32 %v1192_v39  ;;  %v1166_v4 = vmax.f32 %v1160_v55, 1e-24 }
 0x1e9   :  { %v1157_v30 = vpop.xlane.xlu0 %1156 }
 0x1ea   :  { %17547 = vrsqrt.f32 %v1166_v4  ;;  %v1165_v31 = vmax.f32 %v1157_v30, 1e-24 }
 0x1ec   :  { %17549 = vrsqrt.f32 %v1165_v31 }
 0x1ed   :  { %v17538_v38 = vpop.eup %17537  ;;  %v1163_v10 = vpop.xlane.xlu0 %1162 }
 0x1ee   :  { %v1203_v13 = vmul.f32 %v17538_v38, %v18220_v51  ;;  %v1167_v50 = vmax.f32 %v1163_v10, 1e-24 }
 0x1ef   :  { %v17540_v54 = vpop.eup %17539 }
 0x1f0   :  { %v1226_v14 = vsel %vm1151_vm1, %v1203_v13, 0  ;;  %v1202_v43 = vmul.f32 %v17540_v54, %v18226_v26  ;;  %17551 = vrsqrt.f32 %v1167_v50 }
 0x1f1   :  { %v17542_v9 = vpop.eup %17541  ;;  %v18294_v46 = vand.u32 4294901760, %v1226_v14 }
 0x1f2   :  { %v1223_v18 = vsel %vm1151_vm1, %v1202_v43, 0  ;;  %v1201_v63 = vmul.f32 %v17542_v9, %v18218_v33 }
 0x1f3   :  { %v17544_v44 = vpop.eup %17543  ;;  %v18298_v27 = vand.u32 4294901760, %v1223_v18  ;;  %15741 = vmatprep.subr.mxu0 %v18294_v46  ;;  %v18302_v16 = vsub.f32 %v1226_v14, %v18294_v46 }
 0x1f4   :  { %v1220_v20 = vsel %vm1151_vm1, %v1201_v63, 0  ;;  %15742 = vmatpush3.xpose.msra.mxu0 %v18294_v46  ;;  %v1172_v60 = vmul.f32 %v17544_v44, %v18224_v24 }
 0x1f5   :  { %v17546_v17 = vpop.eup %17545  ;;  %v18307_v6 = vand.u32 4294901760, %v1220_v20  ;;  %15743 = vmatprep.subr.mxu0 %v18298_v27  ;;  %v18311_v28 = vand.u32 4294901760, %v18302_v16  ;;  %v18314_v11 = vsub.f32 %v1223_v18, %v18298_v27 }
 0x1f6   :  { %v1200_v48 = vmul.f32 %v17546_v17, %v18233_v25  ;;  %v1205_v49 = vsel %vm1151_vm1, %v1172_v60, 0 }
 0x1f7   :  { %v17548_v29 = vpop.eup %17547  ;;  %v18318_v22 = vand.u32 4294901760, %v1205_v49  ;;  %v1365_v35 = vsub.f32 %v18302_v16, %v18311_v28  ;;  %v18323_v56 = vand.u32 4294901760, %v18314_v11  ;;  %v18326_v0 = vsub.f32 %v1220_v20, %v18307_v6 }
 0x1f8   :  { %v1217_v3 = vsel %vm1151_vm1, %v1200_v48, 0  ;;  %15744 = vmatpush3.xpose.msra.mxu0 %v18298_v27  ;;  %v1174_v12 = vmul.f32 %v17548_v29, %v18248_v47 }
 0x1f9   :  { %v17550_v61 = vpop.eup %17549  ;;  %v18331_v62 = vand.u32 4294901760, %v1217_v3  ;;  %15745 = vmatprep.subr.mxu0 %v18307_v6  ;;  %15763 = vmatprep.mubr.f32.mxu1 %v18318_v22  ;;  %v1366_v1 = vand.u32 4294901760, %v1365_v35  ;;  %v1372_v5 = vsub.f32 %v18314_v11, %v18323_v56  ;;  %v1298_v7 = vsub.f32 %v1205_v49, %v18318_v22 }
 0x1fa   :  { %v1173_v23 = vmul.f32 %v17550_v61, %v18257_v52  ;;  %v18340_v8 = vand.u32 4294901760, %v18326_v0  ;;  %v1211_v2 = vsel %vm1151_vm1, %v1174_v12, 0 }
 0x1fb   :  { %15755 = vmatprep.subr.mxu1 %v1366_v1  ;;  %v1373_v15 = vand.u32 4294901760, %v1372_v5  ;;  %v1299_v39 = vand.u32 4294901760, %v1298_v7  ;;  %v1384_v55 = vsub.f32 %v1217_v3, %v18331_v62  ;;  %v18344_v4 = vand.u32 4294901760, %v1211_v2 }
 0x1fc   :  { %15746 = vmatpush3.xpose.msra.mxu0 %v18307_v6  ;;  %15756 = vmatpush3.xpose.msra.mxu1 %v1366_v1  ;;  %v1379_v30 = vsub.f32 %v18326_v0, %v18340_v8  ;;  %v1208_v31 = vsel %vm1151_vm1, %v1173_v23, 0 }
 0x1fd   :  { %v17552_v38 = vpop.eup %17551  ;;  %15747 = vmatprep.subr.mxu0 %v18331_v62  ;;  %15757 = vmatprep.subr.mxu1 %v1373_v15  ;;  %v1300_v10 = vsub.f32 %v1298_v7, %v1299_v39  ;;  %v18351_v13 = vand.u32 4294901760, %v1384_v55  ;;  %v18353_v50 = vand.u32 4294901760, %v1208_v31  ;;  %v1318_v54 = vsub.f32 %v1211_v2, %v18344_v4 }
 0x1fe   :  { %v1380_v14 = vand.u32 4294901760, %v1379_v30  ;;  %v1175_v43 = vmul.f32 %v17552_v38, %v18273_v19 }
 0x1ff   :  { %v1301_v9 = vand.u32 4294901760, %v1300_v10  ;;  %v1386_v18 = vsub.f32 %v1384_v55, %v18351_v13  ;;  %v1308_v63 = vsub.f32 %v1208_v31, %v18353_v50  ;;  %v1319_v44 = vand.u32 4294901760, %v1318_v54 }
 0x200   :  { %15748 = vmatpush3.xpose.msra.mxu0 %v18331_v62  ;;  %15758 = vmatpush3.xpose.msra.mxu1 %v1373_v15  ;;  %v1214_v20 = vsel %vm1151_vm1, %v1175_v43, 0 }
 0x201   :  { %15749 = vmatprep.mubr.f32.mxu0 %v1301_v9  ;;  %15759 = vmatprep.subr.mxu1 %v1380_v14  ;;  %v1309_v60 = vand.u32 4294901760, %v1308_v63  ;;  %v18361_v17 = vand.u32 4294901760, %v1214_v20  ;;  %v1320_v48 = vsub.f32 %v1318_v54, %v1319_v44  ;;  %v1387_v49 = vand.u32 4294901760, %v1386_v18 }
 0x202   :  { %15769 = vmatprep.subr.mxu0 %v18302_v16 }
 0x203   :  { %v1310_v29 = vsub.f32 %v1308_v63, %v1309_v60  ;;  %v1328_v35 = vsub.f32 %v1214_v20, %v18361_v17  ;;  %v1321_v61 = vand.u32 4294901760, %v1320_v48 }
 0x204   :  { %15760 = vmatpush3.xpose.msra.mxu1 %v1380_v14 }
 0x205   :  { %15761 = vmatprep.subr.mxu1 %v1387_v49  ;;  %v1311_v3 = vand.u32 4294901760, %v1310_v29  ;;  %v1329_v12 = vand.u32 4294901760, %v1328_v35 }
 0x207   :  { %15750 = vmatmul.mubr.f32.vlgmr.msra.gmra.mxu0 %v1311_v3  ;;  %v1330_v1 = vsub.f32 %v1328_v35, %v1329_v12 }
 0x208   :  { %15770 = vmatpush3.xpose.msra.mxu0 %v18302_v16  ;;  %15752 = vmatprep.mubr.f32.mxu0 %v1321_v61  ;;  %v18409_v16 = vpop.f32.mrf.mxu1 }
 0x209   :  { %15762 = vmatpush3.xpose.msra.mxu1 %v1387_v49  ;;  %15771 = vmatprep.subr.mxu0 %v18314_v11  ;;  %v1331_v5 = vand.u32 4294901760, %v1330_v1 }
 0x20a   :  { %15783 = vmatprep.subr.mxu1 %v18294_v46 }
 0x20b   :  { %15753 = vmatmul.mubr.f32.gmra.mxu0 %v1331_v5 }
 0x20c   :  { %15764 = vmatmul.mubr.f32.vlgmr.msra.gmra.mxu1 %v18353_v50  ;;  %15772 = vmatpush3.xpose.msra.mxu0 %v18314_v11 }
 0x20d   :  { %15766 = vmatprep.mubr.f32.mxu1 %v18344_v4  ;;  %15773 = vmatprep.subr.mxu0 %v18326_v0 }
 0x20e   :  { %15777 = vmatprep.mubr.f32.mxu0 %v1298_v7  ;;  %15784 = vmatpush3.xpose.msra.mxu1 %v18294_v46 }
 0x20f   :  { %15785 = vmatprep.subr.mxu1 %v18298_v27 }
 0x210   :  { %15767 = vmatmul.mubr.f32.gmra.mxu1 %v18361_v17  ;;  %15774 = vmatpush3.xpose.msra.mxu0 %v18326_v0 }
 0x211   :  { %15775 = vmatprep.subr.mxu0 %v1384_v55  ;;  %15791 = vmatprep.mubr.f32.mxu1 %v1299_v39 }
 0x212   :  { %15786 = vmatpush3.xpose.msra.mxu1 %v18298_v27 }
 0x213   :  { %15787 = vmatprep.subr.mxu1 %v18307_v6 }
 0x214   :  { %15776 = vmatpush3.xpose.msra.mxu0 %v1384_v55 }
 0x215   :  { %15797 = vmatprep.subr.mxu0 %v18311_v28 }
 0x216   :  { %15788 = vmatpush3.xpose.msra.mxu1 %v18307_v6 }
 0x217   :  { %15789 = vmatprep.subr.mxu1 %v18331_v62  ;;  %15778 = vmatmul.mubr.f32.vlgmr.msra.gmra.mxu0 %v1308_v63 }
 0x218   :  { %15780 = vmatprep.mubr.f32.mxu0 %v1318_v54  ;;  %15798 = vmatpush3.xpose.msra.mxu0 %v18311_v28  ;;  %v18413_v28 = vpop.f32.mrf.mxu1 }
 0x219   :  { %15799 = vmatprep.subr.mxu0 %v18323_v56 }
 0x21a   :  { %15790 = vmatpush3.xpose.msra.mxu1 %v18331_v62 }
 0x21b   :  { %15811 = vmatprep.subr.mxu1 %v18294_v46  ;;  %15781 = vmatmul.mubr.f32.gmra.mxu0 %v1328_v35  ;;  %v1140_v35 = vld [vmem:[%s24155_s2 + $0x188] sm:$0xff] }
 0x21c   :  { %15800 = vmatpush3.xpose.msra.mxu0 %v18323_v56  ;;  %15805 = vmatprep.mubr.f32.mxu0 %v18318_v22 }
 0x21d   :  { %15792 = vmatmul.mubr.f32.vlgmr.msra.gmra.mxu1 %v1309_v60  ;;  %15801 = vmatprep.subr.mxu0 %v18340_v8 }
 0x21e   :  { %15794 = vmatprep.mubr.f32.mxu1 %v1319_v44  ;;  %15812 = vmatpush3.xpose.msra.mxu1 %v18294_v46  ;;  %v18405_v46 = vpop.f32.mrf.mxu0 }
 0x21f   :  { %15813 = vmatprep.subr.mxu1 %v18298_v27 }
 0x220   :  { %15802 = vmatpush3.xpose.msra.mxu0 %v18340_v8 }
 0x221   :  { %15795 = vmatmul.mubr.f32.gmra.mxu1 %v1329_v12  ;;  %15803 = vmatprep.subr.mxu0 %v18351_v13 }
 0x222   :  { %15814 = vmatpush3.xpose.msra.mxu1 %v18298_v27  ;;  %15819 = vmatprep.mubr.f32.mxu1 %v18318_v22  ;;  %v18407_v27 = vpop.f32.mrf.mxu0  ;;  %v18417_v22 = vpop.f32.mrf.mxu1 }
 0x223   :  { %15815 = vmatprep.subr.mxu1 %v18307_v6 }
 0x224   :  { %15804 = vmatpush3.xpose.msra.mxu0 %v18351_v13  ;;  %v18419_v0 = vpop.f32.mrf.mxu1 }
 0x226   :  { %15816 = vmatpush3.xpose.msra.mxu1 %v18307_v6  ;;  %v18411_v6 = vpop.f32.mrf.mxu0 }
 0x227   :  { %15817 = vmatprep.subr.mxu1 %v18331_v62  ;;  %15806 = vmatmul.mubr.f32.vlgmr.msra.gmra.mxu0 %v18353_v50 }
 0x228   :  { %15808 = vmatprep.mubr.f32.mxu0 %v18344_v4  ;;  %v18415_v11 = vpop.f32.mrf.mxu0 }
 0x22a   :  { %15818 = vmatpush3.xpose.msra.mxu1 %v18331_v62 }
 0x22b   :  { %15809 = vmatmul.mubr.f32.gmra.mxu0 %v18361_v17 }
 0x22d   :  { %15820 = vmatmul.mubr.f32.vlgmr.msra.gmra.mxu1 %v18353_v50 }
 0x22e   :  { %15822 = vmatprep.mubr.f32.mxu1 %v18344_v4 }
 0x231   :  { %15823 = vmatmul.mubr.f32.gmra.mxu1 %v18361_v17 }
 0x2c7   :  { %v15751_v56 = vpop.f32.mrf.mxu0 }
 0x2c9   :  { %v1303_v62 = vpop.f32.mrf.mxu0 }
 0x2cb   :  { %v15754_v23 = vpop.f32.mrf.mxu0 }
 0x2cc   :  { %v15765_v7 = vpop.f32.mrf.mxu1 }
 0x2cd   :  { %v1323_v2 = vpop.f32.mrf.mxu0  ;;  %v1431_v13 = vadd.f32 %v15765_v7, %v15751_v56 }
 0x2ce   :  { %v1424_v8 = vpop.f32.mrf.mxu1 }
 0x2cf   :  { %v1425_v14 = vadd.f32 %v1424_v8, %v1303_v62  ;;  %v1139_v62 = vld [vmem:[%s24155_s2 + $0x180] sm:$0xff] }
 0x2d0   :  { %v15768_v15 = vpop.f32.mrf.mxu1 }
 0x2d1   :  { %v1443_v18 = vadd.f32 %v15768_v15, %v15754_v23  ;;  %v1144_v23 = vld [vmem:[%s24155_s2 + $0x1a8] sm:$0xff] }
 0x2d2   :  { %v1436_v55 = vpop.f32.mrf.mxu1 }
 0x2d3   :  { %v1437_v17 = vadd.f32 %v1436_v55, %v1323_v2  ;;  %v1142_v55 = vld [vmem:[%s24155_s2 + $0x198] sm:$0xff] }
 0x2d7   :  { %v15779_v39 = vpop.f32.mrf.mxu0 }
 0x2d8   :  { %v1530_v43 = vadd.f32 %v15779_v39, %v1431_v13 }
 0x2d9   :  { %v1522_v4 = vpop.f32.mrf.mxu0 }
 0x2da   :  { %v1523_v63 = vadd.f32 %v1522_v4, %v1425_v14  ;;  %v1146_v14 = vld [vmem:[%s24155_s2 + $0x1b8] sm:$0xff] }
 0x2db   :  { %v15782_v31 = vpop.f32.mrf.mxu0 }
 0x2dc   :  { %v1544_v48 = vadd.f32 %v15782_v31, %v1443_v18 }
 0x2dd   :  { %v15793_v30 = vpop.f32.mrf.mxu1  ;;  %v1536_v10 = vpop.f32.mrf.mxu0 }
 0x2de   :  { %v1629_v44 = vadd.f32 %v15793_v30, %v1530_v43  ;;  %v1537_v12 = vadd.f32 %v1536_v10, %v1437_v17  ;;  %v1143_v30 = vld [vmem:[%s24155_s2 + $0x1a0] sm:$0xff] }
 0x2df   :  { %v1620_v38 = vpop.f32.mrf.mxu1 }
 0x2e0   :  { %v1621_v49 = vadd.f32 %v1620_v38, %v1523_v63 }
 0x2e1   :  { %v15796_v50 = vpop.f32.mrf.mxu1 }
 0x2e2   :  { %v1645_v61 = vadd.f32 %v15796_v50, %v1544_v48  ;;  %v1141_v50 = vld [vmem:[%s24155_s2 + $0x190] sm:$0xff] }
 0x2e3   :  { %v1636_v20 = vpop.f32.mrf.mxu1 }
 0x2e4   :  { %v1637_v8 = vadd.f32 %v1636_v20, %v1537_v12  ;;  %v30_v12 = vld [vmem:[%s24156_s1 + $0x48] sm:$0xff] }
 0x2e7   :  { %v15807_v54 = vpop.f32.mrf.mxu0 }
 0x2e8   :  { %v1734_v29 = vadd.f32 %v15807_v54, %v1629_v44  ;;  %v1145_v44 = vld [vmem:[%s24155_s2 + $0x1b0] sm:$0xff] }
 0x2e9   :  { %v1727_v9 = vpop.f32.mrf.mxu0 }
 0x2ea   :  { %v1728_v1 = vadd.f32 %v1727_v9, %v1621_v49 }
 0x2eb   :  { %v15810_v60 = vpop.f32.mrf.mxu0 }
 0x2ec   :  { %v1746_v2 = vadd.f32 %v15810_v60, %v1645_v61  ;;  %v29_v61 = vld [vmem:[%s24156_s1 + $0x40] sm:$0xff] }
 0x2ed   :  { %v15821_v3 = vpop.f32.mrf.mxu1  ;;  %v1739_v56 = vpop.f32.mrf.mxu0 }
 0x2ee   :  { %v1827_v5 = vadd.f32 %v15821_v3, %v1734_v29  ;;  %v1740_v31 = vadd.f32 %v1739_v56, %v1637_v8  ;;  %v31_v3 = vld [vmem:[%s24156_s1 + $0x50] sm:$0xff] }
 0x2ef   :  { %v1820_v7 = vpop.f32.mrf.mxu1 }
 0x2f0   :  { %v1843_v15 = vmul.f32 %v1827_v5, %v1140_v35  ;;  %v1821_v39 = vadd.f32 %v1820_v7, %v1728_v1  ;;  %v32_v35 = vld [vmem:[%s24156_s1 + $0x58] sm:$0xff] }
 0x2f1   :  { %v15824_v4 = vpop.f32.mrf.mxu1 }
 0x2f2   :  { %v1842_v38 = vmul.f32 %v1821_v39, %v1139_v62  ;;  %v1839_v10 = vadd.f32 %v15824_v4, %v1746_v2  ;;  %v1847_v13 = vadd.f32 %v1843_v15, %v1144_v23 }
 0x2f3   :  { %v1832_v54 = vpop.f32.mrf.mxu1 }
 0x2f4   :  { %v1845_v43 = vmul.f32 %v1839_v10, %v1142_v55  ;;  %v1833_v9 = vadd.f32 %v1832_v54, %v1740_v31  ;;  %v1853_v18 = vsel %vm144_vm0, %v1847_v13, -inf  ;;  %v1846_v63 = vadd.f32 %v1842_v38, %v1143_v30 }
 0x2f5   :  { %1854 = vmax.xlane.f32.xlu0 %v1853_v18  ;;  %v24423_v18 = vld [vmem:[#allocation12_spill] sm:$0xff] }
 0x2f6   :  { %v1844_v20 = vmul.f32 %v1833_v9, %v1141_v50  ;;  %v1850_v60 = vsel %vm144_vm0, %v1846_v63, -inf  ;;  %v1849_v17 = vadd.f32 %v1845_v43, %v1146_v14  ;;  %v24422_v43 = vld [vmem:[#allocation3_spill] sm:$0xff] }
 0x2f7   :  { %1851 = vmax.xlane.f32.xlu1 %v1850_v60  ;;  %v24425_v60 = vld [vmem:[#allocation5_spill] sm:$0xff] }
 0x2f8   :  { %v1859_v48 = vsel %vm144_vm0, %v1849_v17, -inf  ;;  %v1848_v49 = vadd.f32 %v1844_v20, %v1145_v44  ;;  %v24424_v44 = vld [vmem:[#allocation9_spill] sm:$0xff] }
 0x2f9   :  { %1860 = vmax.xlane.f32.xlu0 %v1859_v48 }
 0x2fa   :  { %v1856_v29 = vsel %vm144_vm0, %v1848_v49, -inf }
 0x2fb   :  { %1857 = vmax.xlane.f32.xlu1 %v1856_v29  ;;  %v24427_v29 = vld [vmem:[#allocation7_spill] sm:$0xff] }
 0x30c   :  { %141 = vperm.xlu1 %17519, %v32_v35  }
 0x30f   :  { %136 = vperm.xlu0 %17518, %v31_v3  }
 0x310   :  { %131 = vperm.xlu1 %17519, %v30_v12  }
 0x314   :  { %126 = vperm.xlu1 %17519, %v29_v61  }
 0x37e   :  { %v1855_v1 = vpop.xlane.xlu0 %1854 }
 0x37f   :  { %v1863_v5 = vsub.f32 %v1847_v13, %v1855_v1 }
 0x380   :  { %v1852_v56 = vpop.xlane.xlu1 %1851 }
 0x381   :  { %v1868_v62 = vmul.f32 1.442695, %v1863_v5  ;;  %v1862_v7 = vsub.f32 %v1846_v63, %v1852_v56  ;;  %v24429_v5 = vld [vmem:[#allocation10_spill] sm:$0xff] }
 0x382   :  { %v1861_v23 = vpop.xlane.xlu0 %1860 }
 0x383   :  { %17553 = vpow2.f32 %v1868_v62  ;;  %v1866_v8 = vmul.f32 1.442695, %v1862_v7  ;;  %v1865_v2 = vsub.f32 %v1849_v17, %v1861_v23  ;;  %v24430_v62 = vld [vmem:[#allocation6_spill] sm:$0xff] }
 0x384   :  { %v1858_v15 = vpop.xlane.xlu1 %1857 }
 0x385   :  { %17555 = vpow2.f32 %v1866_v8  ;;  %v1864_v39 = vsub.f32 %v1848_v49, %v1858_v15  ;;  %v1872_v4 = vmul.f32 1.442695, %v1865_v2  ;;  %v24431_v2 = vld [vmem:[#allocation8_spill] sm:$0xff] }
 0x387   :  { %v1870_v55 = vmul.f32 1.442695, %v1864_v39 }
 0x388   :  { %v142_v30 = vpop.permute.xlu1 %141 }
 0x389   :  { %17557 = vpow2.f32 %v1870_v55  ;;  %v367_v31 = vadd.f32 %v18170_v34, %v142_v30  ;;  %v24432_v55 = vld [vmem:[#allocation11_spill] sm:$0xff] }
 0x38a   :  { %v137_v38 = vpop.permute.xlu0 %136  ;;  %17559 = vpow2.f32 %v1872_v4 }
 0x38b   :  { %v524_v10 = vadd.f32 %v18180_v57, %v367_v31  ;;  %v357_v13 = vadd.f32 %v18172_v40, %v137_v38  ;;  %v24426_v40 = vld [vmem:[#allocation13_spill] sm:$0xff] }
 0x38c   :  { %v132_v50 = vpop.permute.xlu1 %131 }
 0x38d   :  { %v681_v54 = vadd.f32 %v18194_v41, %v524_v10  ;;  %v518_v14 = vadd.f32 %v18184_v59, %v357_v13  ;;  %v347_v9 = vadd.f32 %v24422_v43, %v132_v50  ;;  %v24428_v41 = vld [vmem:[#allocation4_spill] sm:$0xff] }
 0x38f   :  { %v846_v63 = vadd.f32 %v24423_v18, %v681_v54  ;;  %v674_v20 = vadd.f32 %v24424_v44, %v518_v14  ;;  %v512_v17 = vadd.f32 %v24425_v60, %v347_v9 }
 0x390   :  { %v18470_v34 = vpop.eup %17553  ;;  %v127_v48 = vpop.permute.xlu1 %126 }
 0x391   :  { %v995_v57 = vadd.f32 %v18411_v6, %v846_v63  ;;  %v838_v49 = vadd.f32 %v24426_v40, %v674_v20  ;;  %v667_v35 = vadd.f32 %v24427_v29, %v512_v17  ;;  %v337_v3 = vadd.f32 %v24428_v41, %v127_v48 }
 0x392   :  { %v18476_v59 = vpop.eup %17555  ;;  %v1877_v12 = vsel %vm144_vm0, %v18470_v34, 0.0 }
 0x393   :  { %v18481_v61 = vadd.f32 %v18417_v22, %v995_v57  ;;  %v989_v1 = vadd.f32 %v18415_v11, %v838_v49  ;;  %v830_v56 = vadd.f32 %v24429_v5, %v667_v35  ;;  %v506_v6 = vadd.f32 %v24430_v62, %v337_v3  ;;  %1878 = vadd.xlane.f32.xlu1 %v1877_v12 }
 0x394   :  { %v1874_v7 = vsel %vm144_vm0, %v18476_v59, 0.0 }
 0x395   :  { %v18489_v23 = vadd.f32 %v18419_v0, %v989_v1  ;;  %v983_v8 = vadd.f32 %v18405_v46, %v830_v56  ;;  %v660_v15 = vadd.f32 %v24431_v2, %v506_v6  ;;  %1875 = vadd.xlane.f32.xlu0 %v1874_v7  ;;  %v18494_v22 = vand.u32 4294901760, %v18481_v61 }
 0x396   :  { %v18496_v11 = vpop.eup %17557 }
 0x397   :  { %v18499_v39 = vadd.f32 %v18409_v16, %v983_v8  ;;  %v822_v4 = vadd.f32 %v24432_v55, %v660_v15  ;;  %15825 = vmatprep.subr.mxu0 %v18494_v22  ;;  %v1880_v0 = vsel %vm144_vm0, %v18496_v11, 0.0  ;;  %v18506_v46 = vand.u32 4294901760, %v18489_v23  ;;  %v18513_v31 = vpop.eup %17559 }
 0x398   :  { %15826 = vmatpush3.msra.mxu0 %v18494_v22  ;;  %v18511_v30 = vsub.f32 %v18481_v61, %v18494_v22  ;;  %v1883_v14 = vsel %vm144_vm0, %v18513_v31, 0.0 }
 0x399   :  { %v977_v16 = vadd.f32 %v18407_v27, %v822_v4  ;;  %1881 = vadd.xlane.f32.xlu0 %v1880_v0  ;;  %15827 = vmatprep.subr.mxu0 %v18506_v46  ;;  %v18518_v38 = vand.u32 4294901760, %v18499_v39  ;;  %v18522_v10 = vsub.f32 %v18489_v23, %v18506_v46 }
 0x39a   :  { %15828 = vmatpush3.msra.mxu0 %v18506_v46  ;;  %v18526_v13 = vand.u32 4294901760, %v18511_v30 }
 0x39b   :  { %v18529_v50 = vadd.f32 %v18413_v28, %v977_v16  ;;  %15829 = vmatprep.subr.mxu0 %v18518_v38  ;;  %v18533_v27 = vand.u32 4294901760, %v18522_v10  ;;  %v18537_v54 = vsub.f32 %v18499_v39, %v18518_v38 }
 0x39c   :  { %15830 = vmatpush3.msra.mxu0 %v18518_v38  ;;  %v2043_v43 = vsub.f32 %v18511_v30, %v18526_v13 }
 0x39d   :  { %1884 = vadd.xlane.f32.xlu0 %v1883_v14  ;;  %v18545_v28 = vand.u32 4294901760, %v18529_v50  ;;  %v2050_v9 = vsub.f32 %v18522_v10, %v18533_v27  ;;  %v18550_v18 = vand.u32 4294901760, %v18537_v54 }
 0x39e   :  { %v2044_v63 = vand.u32 4294901760, %v2043_v43 }
 0x39f   :  { %15831 = vmatprep.subr.mxu0 %v18545_v28  ;;  %v2051_v44 = vand.u32 4294901760, %v2050_v9  ;;  %v2057_v20 = vsub.f32 %v18537_v54, %v18550_v18  ;;  %v18557_v60 = vsub.f32 %v18529_v50, %v18545_v28 }
 0x3a0   :  { %15839 = vmatprep.subr.mxu1 %v2044_v63  ;;  %15832 = vmatpush3.msra.mxu0 %v18545_v28 }
 0x3a1   :  { %15840 = vmatpush3.msra.mxu1 %v2044_v63  ;;  %15853 = vmatprep.subr.mxu0 %v18511_v30  ;;  %v2058_v17 = vand.u32 4294901760, %v2057_v20  ;;  %v18562_v48 = vand.u32 4294901760, %v18557_v60 }
 0x3a2   :  { %15841 = vmatprep.subr.mxu1 %v2051_v44 }
 0x3a3   :  { %15842 = vmatpush3.msra.mxu1 %v2051_v44  ;;  %v2064_v57 = vsub.f32 %v18557_v60, %v18562_v48 }
 0x3a4   :  { %2534 = vrot.lane.b32.xlu1 %v18481_v61, %s17770_s9  ;;  %15843 = vmatprep.subr.mxu1 %v2058_v17 }
 0x3a5   :  { %15844 = vmatpush3.msra.mxu1 %v2058_v17  ;;  %v2065_v40 = vand.u32 4294901760, %v2064_v57 }
 0x3a7   :  { %15845 = vmatprep.subr.mxu1 %v2065_v40 }
 0x3a8   :  { %2530 = vrot.lane.b32.xlu1 %v18499_v39, %s17770_s9  ;;  %15846 = vmatpush3.msra.mxu1 %v2065_v40 }
 0x3a9   :  { %15867 = vmatprep.subr.mxu1 %v18494_v22 }
 0x3ac   :  { %2528 = vrot.lane.b32.xlu1 %v18529_v50, %s17770_s9 }
 0x3b0   :  { %4522 = vrot.lane.b32.xlu1 %v18239_v45, %s17771_s10 }
 0x3b3   :  { %2532 = vrot.lane.b32.xlu0 %v18489_v23, %s17770_s9 }
 0x3b4   :  { %4518 = vrot.lane.b32.xlu1 %v18263_v58, %s17771_s10 }
 0x3b7   :  { %4524 = vrot.lane.b32.xlu0 %v18230_v32, %s17771_s10 }
 0x3b8   :  { %4480 = vrot.lane.b32.xlu1 %v18279_v36, %s17771_s10 }
 0x3bb   :  { %4520 = vrot.lane.b32.xlu0 %v18243_v21, %s17771_s10 }
 0x3bc   :  { %4484 = vrot.lane.b32.xlu1 %v18287_v37, %s17771_s10 }
 0x3bf   :  { %4478 = vrot.lane.b32.xlu0 %v18254_v42, %s17771_s10 }
 0x3c3   :  { %4482 = vrot.lane.b32.xlu0 %v18270_v53, %s17771_s10 }
 0x41c   :  { %v1879_v45 = vpop.xlane.xlu1 %1878 }
 0x41d   :  { %17561 = vrcp.f32 %v1879_v45 }
 0x41e   :  { %v1876_v58 = vpop.xlane.xlu0 %1875 }
 0x41f   :  { %17563 = vrcp.f32 %v1876_v58 }
 0x420   :  { %v18587_v32 = vpop.permute.xlu1 %2534 }
 0x421   :  { %v18637_v57 = vand.u32 4294901760, %v18587_v32 }
 0x422   :  { %v1882_v49 = vpop.xlane.xlu0 %1881 }
 0x423   :  { %17565 = vrcp.f32 %v1882_v49 }
 0x424   :  { %v18589_v36 = vpop.permute.xlu1 %2530 }
 0x426   :  { %v1885_v21 = vpop.xlane.xlu0 %1884 }
 0x427   :  { %17567 = vrcp.f32 %v1885_v21 }
 0x428   :  { %v18591_v29 = vpop.permute.xlu1 %2528 }
 0x42a   :  { %v17562_v37 = vpop.eup %17561  ;;  %v18593_v35 = vpop.permute.xlu0 %2532 }
 0x42b   :  { %v1891_v42 = vmul.f32 %v17562_v37, %v18470_v34 }
 0x42c   :  { %v17564_v53 = vpop.eup %17563  ;;  %v4523_v41 = vpop.permute.xlu1 %4522 }
 0x42d   :  { %v1898_v3 = vsel %vm144_vm0, %v1891_v42, 0  ;;  %v1890_v12 = vmul.f32 %v17564_v53, %v18476_v59  ;;  %v4536_v1 = vsel %vm1151_vm1, %v4523_v41, 0.0 }
 0x42e   :  { %v18599_v5 = vand.u32 4294901760, %v1898_v3  ;;  %v4525_v56 = vpop.permute.xlu0 %4524  ;;  %4537 = vadd.xlane.f32.xlu1 %v4536_v1 }
 0x42f   :  { %v1895_v62 = vsel %vm144_vm0, %v1890_v12, 0  ;;  %v4539_v6 = vsel %vm1151_vm1, %v4525_v56, 0.0  ;;  %v18662_v12 = vand.u32 4294901760, %v18593_v35  ;;  %v18669_v56 = vsub.f32 %v18587_v32, %v18637_v57 }
 0x430   :  { %v17566_v7 = vpop.eup %17565  ;;  %v18604_v8 = vsub.f32 %v1898_v3, %v18599_v5  ;;  %v18606_v34 = vand.u32 4294901760, %v1895_v62  ;;  %4540 = vadd.xlane.f32.xlu0 %v4539_v6  ;;  %v4519_v43 = vpop.permute.xlu1 %4518 }
 0x431   :  { %v1892_v2 = vmul.f32 %v17566_v7, %v18496_v11  ;;  %v4530_v58 = vsel %vm1151_vm1, %v4519_v43, 0.0  ;;  %v18679_v7 = vand.u32 4294901760, %v18589_v36 }
 0x432   :  { %15847 = vmatprep.mubr.f32.mxu1 %v18606_v34  ;;  %v4521_v59 = vpop.permute.xlu0 %4520  ;;  %v18611_v15 = vsub.f32 %v1895_v62, %v18606_v34  ;;  %v18614_v55 = vand.u32 4294901760, %v18604_v8 }
 0x433   :  { %v1901_v4 = vsel %vm144_vm0, %v1892_v2, 0  ;;  %15848 = vmatmul.mubr.f32.vlgmr.msra.gmra.mxu1 %v18599_v5  ;;  %v4533_v0 = vsel %vm1151_vm1, %v4521_v59, 0.0  ;;  %v18688_v59 = vsub.f32 %v18593_v35, %v18662_v12 }
 0x434   :  { %v17568_v16 = vpop.eup %17567  ;;  %v18619_v14 = vand.u32 4294901760, %v1901_v4  ;;  %15868 = vmatpush3.msra.mxu1 %v18494_v22  ;;  %4534 = vadd.xlane.f32.xlu0 %v4533_v0  ;;  %v18623_v11 = vand.u32 4294901760, %v18611_v15  ;;  %v1988_v20 = vsub.f32 %v18604_v8, %v18614_v55  ;;  %v4481_v37 = vpop.permute.xlu1 %4480  ;;  %v18699_v0 = vsub.f32 %v18589_v36, %v18679_v7 }
 0x435   :  { %v1893_v9 = vmul.f32 %v17568_v16, %v18513_v31  ;;  %15869 = vmatprep.subr.mxu1 %v18506_v46  ;;  %v4493_v2 = vsel %vm1151_vm1, %v4481_v37, 0.0  ;;  %v18702_v16 = vand.u32 4294901760, %v18591_v29  ;;  %v18714_v35 = vand.u32 4294901760, %v18688_v59 }
 0x436   :  { %15870 = vmatpush3.msra.mxu1 %v18506_v46  ;;  %v4479_v63 = vpop.permute.xlu0 %4478  ;;  %15850 = vmatprep.mubr.f32.mxu1 %v18619_v14  ;;  %v1978_v44 = vsub.f32 %v18611_v15, %v18623_v11  ;;  %v18634_v17 = vsub.f32 %v1901_v4, %v18619_v14  ;;  %v18654_v53 = vand.u32 4294901760, %v1988_v20 }
 0x437   :  { %v1904_v31 = vsel %vm144_vm0, %v1893_v9, 0  ;;  %15871 = vmatprep.subr.mxu1 %v18518_v38  ;;  %v4490_v40 = vsel %vm1151_vm1, %v4479_v63, 0.0 }
 0x438   :  { %v18642_v45 = vand.u32 4294901760, %v1904_v31  ;;  %15872 = vmatpush3.msra.mxu1 %v18518_v38  ;;  %4491 = vadd.xlane.f32.xlu1 %v4490_v40  ;;  %v18646_v49 = vand.u32 4294901760, %v1978_v44  ;;  %v18649_v21 = vand.u32 4294901760, %v18634_v17  ;;  %v4485_v4 = vpop.permute.xlu1 %4484 }
 0x439   :  { %15873 = vmatprep.subr.mxu1 %v18545_v28  ;;  %4531 = vadd.xlane.f32.xlu0 %v4530_v58  ;;  %v4499_v36 = vsel %vm1151_vm1, %v4485_v4, 0.0 }
 0x43a   :  { %15874 = vmatpush3.msra.mxu1 %v18545_v28  ;;  %15833 = vmatprep.mubr.f32.mxu0 %v18646_v49  ;;  %v4483_v42 = vpop.permute.xlu0 %4482  ;;  %v1998_v41 = vsub.f32 %v18634_v17, %v18649_v21  ;;  %v18659_v3 = vsub.f32 %v1904_v31, %v18642_v45 }
 0x43b   :  { %15851 = vmatmul.mubr.f32.gmra.mxu1 %v18642_v45  ;;  %15895 = vmatprep.subr.mxu1 %v18494_v22  ;;  %v4496_v1 = vsel %vm1151_vm1, %v4483_v42, 0.0 }
 0x43c   :  { %15834 = vmatmul.mubr.f32.vlgmr.msra.gmra.mxu0 %v18654_v53  ;;  %15875 = vmatprep.mubr.f32.mxu1 %v18623_v11  ;;  %v18673_v62 = vand.u32 4294901760, %v1998_v41  ;;  %v18676_v6 = vand.u32 4294901760, %v18659_v3 }
 0x43d   :  { %15854 = vmatpush3.msra.mxu0 %v18511_v30  ;;  %4497 = vadd.xlane.f32.xlu1 %v4496_v1  ;;  %v18695_v30 = vand.u32 4294901760, %v18669_v56 }
 0x43e   :  { %15855 = vmatprep.subr.mxu0 %v18522_v10  ;;  %4494 = vadd.xlane.f32.xlu0 %v4493_v2  ;;  %v2008_v32 = vsub.f32 %v18659_v3, %v18676_v6 }
 0x43f   :  { %15856 = vmatpush3.msra.mxu0 %v18522_v10  ;;  %15836 = vmatprep.mubr.f32.mxu0 %v18673_v62 }
 0x440   :  { %15857 = vmatprep.subr.mxu0 %v18537_v54  ;;  %15876 = vmatmul.mubr.f32.vlgmr.msra.gmra.mxu1 %v18614_v55  ;;  %v18706_v10 = vand.u32 4294901760, %v2008_v32 }
 0x441   :  { %15896 = vmatpush3.msra.mxu1 %v18494_v22  ;;  %15858 = vmatpush3.msra.mxu0 %v18537_v54  ;;  %v2677_v22 = vsub.f32 %v18669_v56, %v18695_v30  ;;  %v18721_v54 = vsub.f32 %v18591_v29, %v18702_v16 }
 0x442   :  { %15878 = vmatprep.mubr.f32.mxu1 %v18649_v21  ;;  %15897 = vmatprep.subr.mxu1 %v18506_v46 }
 0x443   :  { %15859 = vmatprep.subr.mxu0 %v18557_v60  ;;  %15898 = vmatpush3.msra.mxu1 %v18506_v46  ;;  %v18726_v46 = vand.u32 4294901760, %v18699_v0  ;;  %v2678_v29 = vand.u32 4294901760, %v2677_v22  ;;  %v18741_v9 = vand.u32 4294901760, %v18721_v54 }
 0x444   :  { %4500 = vadd.xlane.f32.xlu0 %v4499_v36  ;;  %15860 = vmatpush3.msra.mxu0 %v18557_v60  ;;  %v2684_v60 = vsub.f32 %v18688_v59, %v18714_v35 }
 0x445   :  { %15899 = vmatprep.subr.mxu1 %v18518_v38  ;;  %15837 = vmatmul.mubr.f32.gmra.mxu0 %v18706_v10  ;;  %v2691_v43 = vsub.f32 %v18699_v0, %v18726_v46  ;;  %v2698_v63 = vsub.f32 %v18721_v54, %v18741_v9 }
 0x446   :  { %15879 = vmatmul.mubr.f32.gmra.mxu1 %v18676_v6  ;;  %15881 = vmatprep.subr.mxu0 %v18526_v13 }
 0x447   :  { %15900 = vmatpush3.msra.mxu1 %v18518_v38  ;;  %15861 = vmatprep.mubr.f32.mxu0 %v18611_v15  ;;  %v2685_v38 = vand.u32 4294901760, %v2684_v60 }
 0x448   :  { %15901 = vmatprep.subr.mxu1 %v18545_v28  ;;  %15903 = vmatprep.mubr.f32.mxu1 %v18606_v34 }
 0x449   :  { %15902 = vmatpush3.msra.mxu1 %v18545_v28  ;;  %15862 = vmatmul.mubr.f32.vlgmr.msra.gmra.mxu0 %v18604_v8  ;;  %v2692_v28 = vand.u32 4294901760, %v2691_v43 }
 0x44a   :  { %15923 = vmatprep.subr.mxu1 %v2678_v29  ;;  %15882 = vmatpush3.msra.mxu0 %v18526_v13  ;;  %v2699_v13 = vand.u32 4294901760, %v2698_v63 }
 0x44b   :  { %15904 = vmatmul.mubr.f32.vlgmr.msra.gmra.mxu1 %v18599_v5  ;;  %15864 = vmatprep.mubr.f32.mxu0 %v18634_v17 }
 0x44c   :  { %15924 = vmatpush3.msra.mxu1 %v2678_v29  ;;  %15883 = vmatprep.subr.mxu0 %v18533_v27 }
 0x44d   :  { %15906 = vmatprep.mubr.f32.mxu1 %v18619_v14  ;;  %15925 = vmatprep.subr.mxu1 %v2685_v38 }
 0x44e   :  { %15884 = vmatpush3.msra.mxu0 %v18533_v27  ;;  %15926 = vmatpush3.msra.mxu1 %v2685_v38 }
 0x44f   :  { %15885 = vmatprep.subr.mxu0 %v18550_v18  ;;  %15927 = vmatprep.subr.mxu1 %v2692_v28 }
 0x450   :  { %15865 = vmatmul.mubr.f32.gmra.mxu0 %v18659_v3  ;;  %15907 = vmatmul.mubr.f32.gmra.mxu1 %v18642_v45 }
 0x451   :  { %15886 = vmatpush3.msra.mxu0 %v18550_v18  ;;  %15928 = vmatpush3.msra.mxu1 %v2692_v28 }
 0x452   :  { %15887 = vmatprep.subr.mxu0 %v18562_v48  ;;  %15889 = vmatprep.mubr.f32.mxu0 %v18606_v34 }
 0x453   :  { %15929 = vmatprep.subr.mxu1 %v2699_v13  ;;  %15931 = vmatprep.mubr.f32.mxu1 %v18606_v34 }
 0x454   :  { %15888 = vmatpush3.msra.mxu0 %v18562_v48  ;;  %15930 = vmatpush3.msra.mxu1 %v2699_v13 }
 0x455   :  { %15909 = vmatprep.subr.mxu0 %v18637_v57  ;;  %15951 = vmatprep.subr.mxu1 %v18637_v57 }
 0x456   :  { %15890 = vmatmul.mubr.f32.vlgmr.msra.gmra.mxu0 %v18599_v5  ;;  %15932 = vmatmul.mubr.f32.vlgmr.msra.gmra.mxu1 %v18599_v5 }
 0x457   :  { %15910 = vmatpush3.msra.mxu0 %v18637_v57  ;;  %15952 = vmatpush3.msra.mxu1 %v18637_v57 }
 0x458   :  { %15892 = vmatprep.mubr.f32.mxu0 %v18619_v14  ;;  %15911 = vmatprep.subr.mxu0 %v18662_v12 }
 0x459   :  { %15934 = vmatprep.mubr.f32.mxu1 %v18619_v14  ;;  %15953 = vmatprep.subr.mxu1 %v18662_v12 }
 0x45a   :  { %15912 = vmatpush3.msra.mxu0 %v18662_v12  ;;  %15954 = vmatpush3.msra.mxu1 %v18662_v12 }
 0x45b   :  { %15913 = vmatprep.subr.mxu0 %v18679_v7  ;;  %15955 = vmatprep.subr.mxu1 %v18679_v7 }
 0x45c   :  { %15893 = vmatmul.mubr.f32.gmra.mxu0 %v18642_v45  ;;  %15935 = vmatmul.mubr.f32.gmra.mxu1 %v18642_v45 }
 0x45d   :  { %15914 = vmatpush3.msra.mxu0 %v18679_v7  ;;  %15956 = vmatpush3.msra.mxu1 %v18679_v7 }
 0x45e   :  { %15915 = vmatprep.subr.mxu0 %v18702_v16  ;;  %15917 = vmatprep.mubr.f32.mxu0 %v18646_v49 }
 0x45f   :  { %15957 = vmatprep.subr.mxu1 %v18702_v16  ;;  %15959 = vmatprep.mubr.f32.mxu1 %v18623_v11 }
 0x460   :  { %15916 = vmatpush3.msra.mxu0 %v18702_v16  ;;  %15958 = vmatpush3.msra.mxu1 %v18702_v16 }
 0x461   :  { %15937 = vmatprep.subr.mxu0 %v18669_v56  ;;  %15979 = vmatprep.subr.mxu1 %v18637_v57 }
 0x462   :  { %15918 = vmatmul.mubr.f32.vlgmr.msra.gmra.mxu0 %v18654_v53  ;;  %15960 = vmatmul.mubr.f32.vlgmr.msra.gmra.mxu1 %v18614_v55 }
 0x463   :  { %15938 = vmatpush3.msra.mxu0 %v18669_v56  ;;  %15980 = vmatpush3.msra.mxu1 %v18637_v57 }
 0x464   :  { %15920 = vmatprep.mubr.f32.mxu0 %v18673_v62  ;;  %15939 = vmatprep.subr.mxu0 %v18688_v59 }
 0x465   :  { %15962 = vmatprep.mubr.f32.mxu1 %v18649_v21  ;;  %15981 = vmatprep.subr.mxu1 %v18662_v12 }
 0x466   :  { %15940 = vmatpush3.msra.mxu0 %v18688_v59  ;;  %15982 = vmatpush3.msra.mxu1 %v18662_v12 }
 0x467   :  { %15941 = vmatprep.subr.mxu0 %v18699_v0  ;;  %15983 = vmatprep.subr.mxu1 %v18679_v7 }
 0x468   :  { %15921 = vmatmul.mubr.f32.gmra.mxu0 %v18706_v10  ;;  %15963 = vmatmul.mubr.f32.gmra.mxu1 %v18676_v6 }
 0x469   :  { %15942 = vmatpush3.msra.mxu0 %v18699_v0  ;;  %15984 = vmatpush3.msra.mxu1 %v18679_v7 }
 0x46a   :  { %15943 = vmatprep.subr.mxu0 %v18721_v54  ;;  %15945 = vmatprep.mubr.f32.mxu0 %v18611_v15 }
 0x46b   :  { %15985 = vmatprep.subr.mxu1 %v18702_v16  ;;  %15987 = vmatprep.mubr.f32.mxu1 %v18606_v34 }
 0x46c   :  { %15944 = vmatpush3.msra.mxu0 %v18721_v54  ;;  %15986 = vmatpush3.msra.mxu1 %v18702_v16 }
 0x46d   :  { %15965 = vmatprep.subr.mxu0 %v18695_v30  ;;  %15946 = vmatmul.mubr.f32.vlgmr.msra.gmra.mxu0 %v18604_v8 }
 0x46e   :  { %15966 = vmatpush3.msra.mxu0 %v18695_v30  ;;  %15988 = vmatmul.mubr.f32.vlgmr.msra.gmra.mxu1 %v18599_v5 }
 0x46f   :  { %15948 = vmatprep.mubr.f32.mxu0 %v18634_v17  ;;  %15967 = vmatprep.subr.mxu0 %v18714_v35 }
 0x470   :  { %15990 = vmatprep.mubr.f32.mxu1 %v18619_v14  ;;  %15968 = vmatpush3.msra.mxu0 %v18714_v35 }
 0x471   :  { %15969 = vmatprep.subr.mxu0 %v18726_v46  ;;  %15949 = vmatmul.mubr.f32.gmra.mxu0 %v18659_v3 }
 0x472   :  { %15970 = vmatpush3.msra.mxu0 %v18726_v46  ;;  %15991 = vmatmul.mubr.f32.gmra.mxu1 %v18642_v45 }
 0x473   :  { %15971 = vmatprep.subr.mxu0 %v18741_v9  ;;  %15973 = vmatprep.mubr.f32.mxu0 %v18606_v34 }
 0x474   :  { %15972 = vmatpush3.msra.mxu0 %v18741_v9 }
 0x475   :  { %15974 = vmatmul.mubr.f32.vlgmr.msra.gmra.mxu0 %v18599_v5 }
 0x476   :  { %15976 = vmatprep.mubr.f32.mxu0 %v18619_v14 }
 0x479   :  { %15977 = vmatmul.mubr.f32.gmra.mxu0 %v18642_v45 }
 0x4b7   :  { %v4538_v27 = vpop.xlane.xlu1 %4537 }
 0x4b8   :  { %v4544_v48 = vmax.f32 %v4538_v27, 1e-24 }
 0x4b9   :  { %v4541_v18 = vpop.xlane.xlu0 %4540 }
 0x4ba   :  { %v4545_v8 = vmax.f32 %v4541_v18, 1e-24 }
 0x4bc   :  { %17569 = vrsqrt.f32 %v4545_v8 }
 0x4bd   :  { %v4535_v15 = vpop.xlane.xlu0 %4534  ;;  %17571 = vrsqrt.f32 %v4544_v48 }
 0x4be   :  { %v4543_v55 = vmax.f32 %v4535_v15, 1e-24 }
 0x4c0   :  { %17573 = vrsqrt.f32 %v4543_v55 }
 0x4c9   :  { %v17570_v11 = vpop.eup %17569 }
 0x4ca   :  { %v4553_v34 = vmul.f32 %v17570_v11, %v18220_v51  ;;  %v17572_v44 = vpop.eup %17571 }
 0x4cb   :  { %v4552_v20 = vmul.f32 %v17572_v44, %v18226_v26 }
 0x4cc   :  { %4576 = vrot.lane.b32.xlu0 %v4553_v34, %s17771_s10 }
 0x4cd   :  { %v17574_v5 = vpop.eup %17573 }
 0x4ce   :  { %v4551_v14 = vmul.f32 %v17574_v5, %v18218_v33 }
 0x4d0   :  { %4572 = vrot.lane.b32.xlu1 %v4551_v14, %s17771_s10  ;;  %4574 = vrot.lane.b32.xlu0 %v4552_v20, %s17771_s10 }
 0x4f3   :  { %v15849_v17 = vpop.f32.mrf.mxu1 }
 0x4f5   :  { %v2102_v57 = vpop.f32.mrf.mxu1 }
 0x4fb   :  { %v15852_v31 = vpop.f32.mrf.mxu1 }
 0x4fc   :  { %v15835_v45 = vpop.f32.mrf.mxu0 }
 0x4fd   :  { %v2114_v40 = vpop.f32.mrf.mxu1  ;;  %v2109_v7 = vadd.f32 %v15849_v17, %v15835_v45 }
 0x4fe   :  { %v1981_v51 = vpop.f32.mrf.mxu0 }
 0x4ff   :  { %v2103_v56 = vadd.f32 %v2102_v57, %v1981_v51 }
 0x500   :  { %v15877_v58 = vpop.f32.mrf.mxu1 }
 0x502   :  { %v2298_v49 = vpop.f32.mrf.mxu1 }
 0x505   :  { %v15838_v21 = vpop.f32.mrf.mxu0 }
 0x506   :  { %v15880_v37 = vpop.f32.mrf.mxu1  ;;  %v2121_v54 = vadd.f32 %v15852_v31, %v15838_v21  ;;  %v3157_v31 = vld [vmem:[%s24157_s3 + $0x38] sm:$0xff]  ;;  %v3156_v21 = vld [vmem:[%s24157_s3 + $0x30] sm:$0xff] }
 0x507   :  { %v2001_v42 = vpop.f32.mrf.mxu0  ;;  %v18838_v45 = vand.u32 4294901760, %v3157_v31 }
 0x508   :  { %v2314_v53 = vpop.f32.mrf.mxu1  ;;  %v2115_v30 = vadd.f32 %v2114_v40, %v2001_v42 }
 0x509   :  { %v15863_v41 = vpop.f32.mrf.mxu0  ;;  %v18844_v42 = vsub.f32 %v3157_v31, %v18838_v45  ;;  %15993 = vmatprep.subr.mxu0 %v18838_v45 }
 0x50a   :  { %v2208_v32 = vadd.f32 %v15863_v41, %v2109_v7  ;;  %15994 = vmatpush3.msra.mxu0 %v18838_v45 }
 0x50b   :  { %v15905_v33 = vpop.f32.mrf.mxu1  ;;  %v2200_v3 = vpop.f32.mrf.mxu0 }
 0x50c   :  { %v2201_v2 = vadd.f32 %v2200_v3, %v2103_v56  ;;  %v2307_v36 = vadd.f32 %v15877_v58, %v2208_v32  ;;  %v3155_v3 = vld [vmem:[%s24157_s3 + $0x28] sm:$0xff] }
 0x50d   :  { %v2498_v26 = vpop.f32.mrf.mxu1 }
 0x50e   :  { %v2299_v0 = vadd.f32 %v2298_v49, %v2201_v2 }
 0x510   :  { %v15866_v12 = vpop.f32.mrf.mxu0  ;;  %v15908_v1 = vpop.f32.mrf.mxu1 }
 0x511   :  { %v2222_v43 = vadd.f32 %v15866_v12, %v2121_v54 }
 0x512   :  { %v2214_v62 = vpop.f32.mrf.mxu0  ;;  %v2510_v6 = vpop.f32.mrf.mxu1 }
 0x513   :  { %v2215_v10 = vadd.f32 %v2214_v62, %v2115_v30  ;;  %v2323_v27 = vadd.f32 %v15880_v37, %v2222_v43  ;;  %v18860_v62 = vand.u32 4294901760, %v3155_v3 }
 0x515   :  { %v2315_v38 = vadd.f32 %v2314_v53, %v2215_v10  ;;  %v18846_v53 = vand.u32 4294901760, %v3156_v21  ;;  %v4532_v10 = vpop.xlane.xlu0 %4531 }
 0x516   :  { %v15891_v59 = vpop.f32.mrf.mxu0  ;;  %v15933_v4 = vpop.f32.mrf.mxu1 }
 0x517   :  { %v2412_v46 = vadd.f32 %v15891_v59, %v2307_v36  ;;  %v18857_v12 = vsub.f32 %v3156_v21, %v18846_v53  ;;  %15995 = vmatprep.subr.mxu0 %v18846_v53 }
 0x518   :  { %v2405_v16 = vpop.f32.mrf.mxu0  ;;  %v2736_v22 = vpop.f32.mrf.mxu1  ;;  %15996 = vmatpush3.msra.mxu0 %v18846_v53 }
 0x519   :  { %v2406_v35 = vadd.f32 %v2405_v16, %v2299_v0  ;;  %v2505_v63 = vadd.f32 %v15905_v33, %v2412_v46  ;;  %v18869_v59 = vand.u32 4294901760, %v18857_v12  ;;  %v18872_v0 = vsub.f32 %v3155_v3, %v18860_v62  ;;  %15997 = vmatprep.subr.mxu0 %v18860_v62 }
 0x51a   :  { %15998 = vmatpush3.msra.mxu0 %v18860_v62 }
 0x51b   :  { %v2499_v60 = vadd.f32 %v2498_v26, %v2406_v35  ;;  %v18854_v26 = vand.u32 4294901760, %v18844_v42  ;;  %v3346_v54 = vsub.f32 %v18857_v12, %v18869_v59 }
 0x51c   :  { %v15894_v29 = vpop.f32.mrf.mxu0  ;;  %v18831_v9 = vpop.f32.mrf.mxu1 }
 0x51d   :  { %3816 = vxpose.xlu0.b32.start [1/4] (short) (narrow) %v2499_v60, 32  ;;  %v2424_v8 = vadd.f32 %v15894_v29, %v2323_v27  ;;  %v3339_v32 = vsub.f32 %v18844_v42, %v18854_v26  ;;  %v18881_v29 = vand.u32 4294901760, %v18872_v0 }
 0x51e   :  { %v2417_v28 = vpop.f32.mrf.mxu0  ;;  %v2748_v18 = vpop.f32.mrf.mxu1 }
 0x51f   :  { %v2418_v13 = vadd.f32 %v2417_v28, %v2315_v38  ;;  %v2517_v34 = vadd.f32 %v15908_v1, %v2424_v8  ;;  %v4542_v8 = vmax.f32 %v4532_v10, 1e-24 }
 0x521   :  { %3817 = vxpose.xlu0.b32.cont [2/4] (short) (narrow) %v2505_v63, 32  ;;  %v2511_v15 = vadd.f32 %v2510_v6, %v2418_v13  ;;  %v3154_v6 = vld [vmem:[%s24157_s3 + $0x20] sm:$0xff]  ;;  %v3347_v13 = vand.u32 4294901760, %v3346_v54  ;;  %17575 = vrsqrt.f32 %v4542_v8 }
 0x522   :  { %v15919_v48 = vpop.f32.mrf.mxu0  ;;  %v15961_v11 = vpop.f32.mrf.mxu1  ;;  %v18874_v16 = vand.u32 4294901760, %v3154_v6 }
 0x523   :  { %v2743_v58 = vadd.f32 %v15933_v4, %v15919_v48 }
 0x524   :  { %v2615_v55 = vpop.f32.mrf.mxu0  ;;  %v2932_v5 = vpop.f32.mrf.mxu1  ;;  %v18884_v43 = vsub.f32 %v3154_v6, %v18874_v16  ;;  %15999 = vmatprep.subr.mxu0 %v18874_v16 }
 0x525   :  { %3818 = vxpose.xlu0.b32.cont [3/4] (short) (narrow) %v2511_v15, 32  ;;  %v2737_v40 = vadd.f32 %v2736_v22, %v2615_v55  ;;  %v3340_v22 = vand.u32 4294901760, %v3339_v32  ;;  %16000 = vmatpush3.msra.mxu0 %v18874_v16 }
 0x526   :  { %v18892_v48 = vand.u32 4294901760, %v18884_v43  ;;  %16021 = vmatprep.subr.mxu0 %v18844_v42 }
 0x527   :  { %16007 = vmatprep.subr.mxu1 %v3340_v22 }
 0x528   :  { %v15922_v44 = vpop.f32.mrf.mxu0  ;;  %v18833_v20 = vpop.f32.mrf.mxu1  ;;  %16008 = vmatpush3.msra.mxu1 %v3340_v22 }
 0x529   :  { %3819 = vxpose.xlu0.b32.end [4/4] (short) (narrow) %v2517_v34, 32  ;;  %v2755_v38 = vadd.f32 %v18831_v9, %v15922_v44  ;;  %16009 = vmatprep.subr.mxu1 %v3347_v13  ;;  %v3360_v34 = vsub.f32 %v18884_v43, %v18892_v48 }
 0x52a   :  { %v2635_v14 = vpop.f32.mrf.mxu0  ;;  %v2948_v49 = vpop.f32.mrf.mxu1  ;;  %16010 = vmatpush3.msra.mxu1 %v3347_v13 }
 0x52b   :  { %v2749_v7 = vadd.f32 %v2748_v18, %v2635_v14  ;;  %v3353_v18 = vsub.f32 %v18872_v0, %v18881_v29  ;;  %v3361_v14 = vand.u32 4294901760, %v3360_v34 }
 0x52d   :  { %v15947_v17 = vpop.f32.mrf.mxu0 }
 0x52e   :  { %v2842_v41 = vadd.f32 %v15947_v17, %v2743_v58  ;;  %v15989_v1 = vpop.f32.mrf.mxu1 }
 0x52f   :  { %v2834_v57 = vpop.f32.mrf.mxu0 }
 0x530   :  { %v2835_v37 = vadd.f32 %v2834_v57, %v2737_v40  ;;  %v2941_v4 = vadd.f32 %v15961_v11, %v2842_v41  ;;  %v3132_v46 = vpop.f32.mrf.mxu1  ;;  %v3354_v11 = vand.u32 4294901760, %v3353_v18  ;;  %v4495_v41 = vpop.xlane.xlu0 %4494 }
 0x531   :  { %v15950_v51 = vpop.f32.mrf.mxu0 }
 0x532   :  { %v2933_v2 = vadd.f32 %v2932_v5, %v2835_v37  ;;  %v2856_v15 = vadd.f32 %v15950_v51, %v2755_v38  ;;  %v15992_v9 = vpop.f32.mrf.mxu1  ;;  %16011 = vmatprep.subr.mxu1 %v3354_v11  ;;  %v4492_v51 = vpop.xlane.xlu1 %4491 }
 0x533   :  { %v2848_v33 = vpop.f32.mrf.mxu0  ;;  %16012 = vmatpush3.msra.mxu1 %v3354_v11  ;;  %v4502_v21 = vmax.f32 %v4492_v51, 1e-24 }
 0x534   :  { %v2849_v36 = vadd.f32 %v2848_v33, %v2749_v7  ;;  %v2957_v17 = vadd.f32 %v18833_v20, %v2856_v15  ;;  %v3144_v57 = vpop.f32.mrf.mxu1  ;;  %16013 = vmatprep.subr.mxu1 %v3361_v14  ;;  %v4503_v20 = vmax.f32 %v4495_v41, 1e-24  ;;  %v2520_v41 = vld [vmem:[%s24157_s3] sm:$0xff] }
 0x535   :  { %v15975_v56 = vpop.f32.mrf.mxu0  ;;  %16014 = vmatpush3.msra.mxu1 %v3361_v14  ;;  %17577 = vrsqrt.f32 %v4502_v21 }
 0x536   :  { %v3046_v28 = vadd.f32 %v15975_v56, %v2941_v4  ;;  %v2949_v55 = vadd.f32 %v2948_v49, %v2849_v36  ;;  %16035 = vmatprep.subr.mxu1 %v18838_v45  ;;  %v17576_v49 = vpop.eup %17575  ;;  %v4498_v33 = vpop.xlane.xlu1 %4497  ;;  %17579 = vrsqrt.f32 %v4503_v20 }
 0x537   :  { %v3039_v30 = vpop.f32.mrf.mxu0  ;;  %v4550_v37 = vmul.f32 %v17576_v49, %v18233_v25  ;;  %v4504_v3 = vmax.f32 %v4498_v33, 1e-24 }
 0x538   :  { %v3040_v35 = vadd.f32 %v3039_v30, %v2933_v2  ;;  %v3139_v44 = vadd.f32 %v15989_v1, %v3046_v28  ;;  %v4501_v1 = vpop.xlane.xlu0 %4500 }
 0x539   :  { %v15978_v60 = vpop.f32.mrf.mxu0  ;;  %17581 = vrsqrt.f32 %v4504_v3  ;;  %v4505_v56 = vmax.f32 %v4501_v1, 1e-24 }
 0x53a   :  { %v3133_v63 = vadd.f32 %v3132_v46, %v3040_v35  ;;  %v3058_v31 = vadd.f32 %v15978_v60, %v2957_v17  ;;  %v2523_v60 = vld [vmem:[%s24157_s3 + $0x18] sm:$0xff]  ;;  %v2521_v17 = vld [vmem:[%s24157_s3 + $0x8] sm:$0xff] }
 0x53b   :  { %v3051_v27 = vpop.f32.mrf.mxu0  ;;  %17583 = vrsqrt.f32 %v4505_v56  ;;  %v18987_v56 = vand.u32 4294901760, %v2520_v41 }
 0x53c   :  { %3158 = vxpose.xlu1.b32.start [1/4] (short) (narrow) %v3133_v63, 32  ;;  %v3052_v5 = vadd.f32 %v3051_v27, %v2949_v55  ;;  %v3151_v58 = vadd.f32 %v15992_v9, %v3058_v31  ;;  %v18932_v27 = vand.u32 4294901760, %v2523_v60  ;;  %v2522_v9 = vld [vmem:[%s24157_s3 + $0x10] sm:$0xff] }
 0x53e   :  { %v3145_v40 = vadd.f32 %v3144_v57, %v3052_v5  ;;  %v18934_v18 = vpop.permute.xlu0 %4576  ;;  %v18952_v14 = vsub.f32 %v2523_v60, %v18932_v27 }
 0x540   :  { %3159 = vxpose.xlu1.b32.cont [2/4] (short) (narrow) %v3139_v44, 32  ;;  %v18981_v3 = vand.u32 4294901760, %v18952_v14 }
 0x542   :  { %v17578_v6 = vpop.eup %17577  ;;  %v18909_v36 = vpop.permute.xlu1 %4572 }
 0x543   :  { %v4510_v7 = vmul.f32 %v17578_v6, %v18224_v24  ;;  %v17580_v2 = vpop.eup %17579  ;;  %v18964_v49 = vpop.permute.xlu0 %4574 }
 0x544   :  { %3160 = vxpose.xlu1.b32.cont [3/4] (short) (narrow) %v3145_v40, 32  ;;  %v4511_v25 = vmul.f32 %v17580_v2, %v18257_v52 }
 0x546   :  { %v17582_v32 = vpop.eup %17581 }
 0x547   :  { %v4512_v4 = vmul.f32 %v17582_v32, %v18248_v47 }
 0x548   :  { %3161 = vxpose.xlu1.b32.end [4/4] (short) (narrow) %v3151_v58, 32  ;;  %v17584_v30 = vpop.eup %17583  ;;  %v18961_v58 = vand.u32 4294901760, %v2522_v9 }
 0x549   :  { %v4513_v10 = vmul.f32 %v17584_v30, %v18273_v19 }
 0x54a   :  { %v18984_v1 = vsub.f32 %v2522_v9, %v18961_v58  ;;  %v4590_v9 = vsel %vm1151_vm1, %v18964_v49, 0 }
 0x54c   :  { %v18999_v32 = vand.u32 4294901760, %v18984_v1 }
 0x54e   :  { %v4004_v30 = vsub.f32 %v18984_v1, %v18999_v32 }
 0x552   :  { %4570 = vrot.lane.b32.xlu0 %v4550_v37, %s17771_s10  ;;  %v18971_v37 = vand.u32 4294901760, %v2521_v17 }
 0x554   :  { %v18992_v2 = vsub.f32 %v2521_v17, %v18971_v37  ;;  %v19102_v17 = vand.u32 4294901760, %v4590_v9 }
 0x566   :  { %4558 = vrot.lane.b32.xlu1 %v4510_v7, %s17771_s10 }
 0x56a   :  { %4560 = vrot.lane.b32.xlu1 %v4511_v25, %s17771_s10  ;;  %v3997_v25 = vsub.f32 %v18952_v14, %v18981_v3 }
 0x56e   :  { %4562 = vrot.lane.b32.xlu1 %v4512_v4, %s17771_s10 }
 0x572   :  { %4564 = vrot.lane.b32.xlu1 %v4513_v10, %s17771_s10 }
 0x599   :  { %v3832_v6 = vpop.trf.xlu0 }
 0x59d   :  { %v3833_v4 = vpop.trf.xlu0 }
 0x5b8   :  { %v3174_v24 = vpop.trf.xlu1 }
 0x5b9   :  { %v3191_v35 = vsel %vm144_vm0, %v3174_v24, 0  ;;  %v4005_v24 = vand.u32 4294901760, %v4004_v30 }
 0x5ba   :  { %v18912_v22 = vand.u32 4294901760, %v3191_v35 }
 0x5bc   :  { %v18915_v52 = vsub.f32 %v3191_v35, %v18912_v22  ;;  %v3175_v54 = vpop.trf.xlu1  ;;  %16015 = vmatprep.mubr.f32.mxu1 %v18912_v22  ;;  %v3834_v35 = vpop.trf.xlu0 }
 0x5bd   :  { %v3194_v47 = vsel %vm144_vm0, %v3175_v54, 0  ;;  %v3852_v54 = vsel %vm144_vm0, %v3833_v4, 0  ;;  %v3855_v60 = vsel %vm144_vm0, %v3834_v35, 0 }
 0x5be   :  { %v3273_v46 = vand.u32 4294901760, %v18915_v52  ;;  %v18920_v19 = vand.u32 4294901760, %v3194_v47 }
 0x5c0   :  { %v18926_v38 = vsub.f32 %v3194_v47, %v18920_v19  ;;  %v3176_v28 = vpop.trf.xlu1  ;;  %16016 = vmatmul.mubr.f32.vlgmr.msra.gmra.mxu1 %v18920_v19  ;;  %v3274_v63 = vsub.f32 %v18915_v52, %v3273_v46  ;;  %v19040_v47 = vand.u32 4294901760, %v3852_v54 }
 0x5c1   :  { %v3197_v13 = vsel %vm144_vm0, %v3176_v28, 0  ;;  %16036 = vmatpush3.msra.mxu1 %v18838_v45 }
 0x5c2   :  { %v3283_v8 = vand.u32 4294901760, %v18926_v38  ;;  %v18937_v15 = vand.u32 4294901760, %v3197_v13  ;;  %16037 = vmatprep.subr.mxu1 %v18846_v53  ;;  %v3275_v55 = vand.u32 4294901760, %v3274_v63  ;;  %v19053_v28 = vsub.f32 %v3852_v54, %v19040_v47 }
 0x5c3   :  { %16038 = vmatpush3.msra.mxu1 %v18846_v53  ;;  %v19057_v63 = vand.u32 4294901760, %v3855_v60 }
 0x5c4   :  { %v3284_v11 = vsub.f32 %v18926_v38, %v3283_v8  ;;  %v18946_v34 = vsub.f32 %v3197_v13, %v18937_v15  ;;  %v3177_v44 = vpop.trf.xlu1  ;;  %16001 = vmatprep.mubr.f32.mxu0 %v3275_v55  ;;  %16018 = vmatprep.mubr.f32.mxu1 %v18937_v15 }
 0x5c5   :  { %v3200_v5 = vsel %vm144_vm0, %v3177_v44, 0  ;;  %16039 = vmatprep.subr.mxu1 %v18860_v62 }
 0x5c6   :  { %v3285_v57 = vand.u32 4294901760, %v3284_v11  ;;  %v18957_v31 = vand.u32 4294901760, %v3200_v5  ;;  %16040 = vmatpush3.msra.mxu1 %v18860_v62  ;;  %v3293_v40 = vand.u32 4294901760, %v18946_v34 }
 0x5c7   :  { %16041 = vmatprep.subr.mxu1 %v18874_v16 }
 0x5c8   :  { %v18967_v51 = vsub.f32 %v3200_v5, %v18957_v31  ;;  %16002 = vmatmul.mubr.f32.vlgmr.msra.gmra.mxu0 %v3285_v57  ;;  %16019 = vmatmul.mubr.f32.gmra.mxu1 %v18957_v31  ;;  %v3294_v21 = vsub.f32 %v18946_v34, %v3293_v40 }
 0x5c9   :  { %16043 = vmatprep.mubr.f32.mxu1 %v3273_v46  ;;  %16042 = vmatpush3.msra.mxu1 %v18874_v16 }
 0x5ca   :  { %v3303_v20 = vand.u32 4294901760, %v18967_v51  ;;  %16063 = vmatprep.subr.mxu1 %v18838_v45  ;;  %16022 = vmatpush3.msra.mxu0 %v18844_v42  ;;  %v3295_v33 = vand.u32 4294901760, %v3294_v21 }
 0x5cb   :  { %16023 = vmatprep.subr.mxu0 %v18857_v12 }
 0x5cc   :  { %16044 = vmatmul.mubr.f32.vlgmr.msra.gmra.mxu1 %v3283_v8  ;;  %16024 = vmatpush3.msra.mxu0 %v18857_v12  ;;  %v3304_v7 = vsub.f32 %v18967_v51, %v3303_v20  ;;  %v19004_v12 = vsub.f32 %v2520_v41, %v18987_v56  ;;  %v19073_v8 = vsub.f32 %v3855_v60, %v19057_v63 }
 0x5cd   :  { %16064 = vmatpush3.msra.mxu1 %v18838_v45  ;;  %16046 = vmatprep.mubr.f32.mxu1 %v3293_v40  ;;  %v19008_v45 = vand.u32 4294901760, %v18992_v2  ;;  %v19114_v41 = vsub.f32 %v4590_v9, %v19102_v17 }
 0x5ce   :  { %16065 = vmatprep.subr.mxu1 %v18846_v53  ;;  %16004 = vmatprep.mubr.f32.mxu0 %v3295_v33  ;;  %v3305_v42 = vand.u32 4294901760, %v3304_v7  ;;  %v19018_v10 = vand.u32 4294901760, %v19004_v12 }
 0x5cf   :  { %16066 = vmatpush3.msra.mxu1 %v18846_v53  ;;  %16025 = vmatprep.subr.mxu0 %v18872_v0  ;;  %v3998_v53 = vand.u32 4294901760, %v3997_v25  ;;  %v19135_v25 = vand.u32 4294901760, %v19114_v41 }
 0x5d0   :  { %16067 = vmatprep.subr.mxu1 %v18860_v62  ;;  %16005 = vmatmul.mubr.f32.gmra.mxu0 %v3305_v42 }
 0x5d1   :  { %16026 = vmatpush3.msra.mxu0 %v18872_v0  ;;  %16047 = vmatmul.mubr.f32.gmra.mxu1 %v3303_v20  ;;  %v3849_v0 = vsel %vm144_vm0, %v3832_v6, 0  ;;  %v4738_v30 = vsub.f32 %v19114_v41, %v19135_v25 }
 0x5d2   :  { %16068 = vmatpush3.msra.mxu1 %v18860_v62  ;;  %16027 = vmatprep.subr.mxu0 %v18884_v43  ;;  %v4011_v62 = vsub.f32 %v18992_v2, %v19008_v45 }
 0x5d3   :  { %16029 = vmatprep.mubr.f32.mxu0 %v18915_v52  ;;  %16069 = vmatprep.subr.mxu1 %v18874_v16  ;;  %v19033_v52 = vand.u32 4294901760, %v3849_v0 }
 0x5d4   :  { %16071 = vmatprep.mubr.f32.mxu1 %v18912_v22  ;;  %16028 = vmatpush3.msra.mxu0 %v18884_v43  ;;  %v4018_v43 = vsub.f32 %v19004_v12, %v19018_v10 }
 0x5d5   :  { %16070 = vmatpush3.msra.mxu1 %v18874_v16  ;;  %16049 = vmatprep.subr.mxu0 %v18854_v26  ;;  %v4012_v16 = vand.u32 4294901760, %v4011_v62  ;;  %v19044_v46 = vsub.f32 %v3849_v0, %v19033_v52  ;;  %v4739_v0 = vand.u32 4294901760, %v4738_v30 }
 0x5d6   :  { %16091 = vmatprep.subr.mxu1 %v3998_v53  ;;  %16030 = vmatmul.mubr.f32.vlgmr.msra.gmra.mxu0 %v18926_v38  ;;  %v3835_v38 = vpop.trf.xlu0 }
 0x5d7   :  { %16050 = vmatpush3.msra.mxu0 %v18854_v26  ;;  %16072 = vmatmul.mubr.f32.vlgmr.msra.gmra.mxu1 %v18920_v19  ;;  %v4019_v26 = vand.u32 4294901760, %v4018_v43 }
 0x5d8   :  { %16092 = vmatpush3.msra.mxu1 %v3998_v53  ;;  %16032 = vmatprep.mubr.f32.mxu0 %v18946_v34  ;;  %v3951_v34 = vand.u32 4294901760, %v19073_v8  ;;  %v4559_v49 = vpop.permute.xlu1 %4558 }
 0x5d9   :  { %16051 = vmatprep.subr.mxu0 %v18869_v59  ;;  %16074 = vmatprep.mubr.f32.mxu1 %v18937_v15 }
 0x5da   :  { %16093 = vmatprep.subr.mxu1 %v4005_v24  ;;  %16052 = vmatpush3.msra.mxu0 %v18869_v59  ;;  %v3858_v59 = vsel %vm144_vm0, %v3835_v38, 0  ;;  %v3952_v40 = vsub.f32 %v19073_v8, %v3951_v34  ;;  %v4571_v21 = vpop.permute.xlu0 %4570 }
 0x5db   :  { %16094 = vmatpush3.msra.mxu1 %v4005_v24  ;;  %16053 = vmatprep.subr.mxu0 %v18881_v29  ;;  %v19061_v13 = vand.u32 4294901760, %v3858_v59  ;;  %v4586_v6 = vsel %vm1151_vm1, %v4571_v21, 0 }
 0x5dc   :  { %16095 = vmatprep.subr.mxu1 %v4012_v16  ;;  %16033 = vmatmul.mubr.f32.gmra.mxu0 %v18967_v51  ;;  %v3953_v33 = vand.u32 4294901760, %v3952_v40  ;;  %v4561_v7 = vpop.permute.xlu1 %4560 }
 0x5dd   :  { %16054 = vmatpush3.msra.mxu0 %v18881_v29  ;;  %16075 = vmatmul.mubr.f32.gmra.mxu1 %v18957_v31  ;;  %v3931_v29 = vand.u32 4294901760, %v19044_v46  ;;  %v19079_v55 = vsub.f32 %v3858_v59, %v19061_v13 }
 0x5de   :  { %16096 = vmatpush3.msra.mxu1 %v4012_v16  ;;  %16055 = vmatprep.subr.mxu0 %v18892_v48 }
 0x5df   :  { %16057 = vmatprep.mubr.f32.mxu0 %v18912_v22  ;;  %16097 = vmatprep.subr.mxu1 %v4019_v26  ;;  %v4592_v22 = vsel %vm1151_vm1, %v18934_v18, 0  ;;  %v3961_v44 = vand.u32 4294901760, %v19079_v55 }
 0x5e0   :  { %16056 = vmatpush3.msra.mxu0 %v18892_v48  ;;  %16098 = vmatpush3.msra.mxu1 %v4019_v26  ;;  %v3941_v48 = vand.u32 4294901760, %v19053_v28  ;;  %v19085_v18 = vand.u32 4294901760, %v4592_v22  ;;  %v4563_v62 = vpop.permute.xlu1 %4562 }
 0x5e1   :  { %16077 = vmatprep.subr.mxu0 %v18932_v27  ;;  %16099 = vmatprep.mubr.f32.mxu1 %v19033_v52  ;;  %v3962_v51 = vsub.f32 %v19079_v55, %v3961_v44  ;;  %v4582_v35 = vsel %vm1151_vm1, %v4563_v62, 0 }
 0x5e2   :  { %16119 = vmatprep.subr.mxu1 %v18932_v27  ;;  %16058 = vmatmul.mubr.f32.vlgmr.msra.gmra.mxu0 %v18920_v19  ;;  %v3932_v19 = vsub.f32 %v19044_v46, %v3931_v29  ;;  %v19100_v5 = vsub.f32 %v4592_v22, %v19085_v18 }
 0x5e3   :  { %16078 = vmatpush3.msra.mxu0 %v18932_v27  ;;  %16100 = vmatmul.mubr.f32.vlgmr.msra.gmra.mxu1 %v19040_v47 }
 0x5e4   :  { %16120 = vmatpush3.msra.mxu1 %v18932_v27  ;;  %16060 = vmatprep.mubr.f32.mxu0 %v18937_v15  ;;  %v3942_v15 = vsub.f32 %v19053_v28, %v3941_v48  ;;  %v3933_v11 = vand.u32 4294901760, %v3932_v19  ;;  %v19121_v20 = vand.u32 4294901760, %v19100_v5  ;;  %v4565_v16 = vpop.permute.xlu1 %4564 }
 0x5e5   :  { %16079 = vmatprep.subr.mxu0 %v18961_v58  ;;  %16121 = vmatprep.subr.mxu1 %v18961_v58  ;;  %v4584_v60 = vsel %vm1151_vm1, %v4565_v16, 0 }
 0x5e6   :  { %16080 = vmatpush3.msra.mxu0 %v18961_v58  ;;  %16122 = vmatpush3.msra.mxu1 %v18961_v58  ;;  %v3943_v57 = vand.u32 4294901760, %v3942_v15  ;;  %v4731_v42 = vsub.f32 %v19100_v5, %v19121_v20  ;;  %v19197_v59 = vand.u32 4294901760, %v4584_v60 }
 0x5e7   :  { %16081 = vmatprep.subr.mxu0 %v18971_v37  ;;  %16102 = vmatprep.mubr.f32.mxu1 %v19057_v63 }
 0x5e8   :  { %16123 = vmatprep.subr.mxu1 %v18971_v37  ;;  %16061 = vmatmul.mubr.f32.gmra.mxu0 %v18957_v31  ;;  %v4588_v31 = vsel %vm1151_vm1, %v18909_v36, 0  ;;  %v4732_v53 = vand.u32 4294901760, %v4731_v42 }
 0x5e9   :  { %16082 = vmatpush3.msra.mxu0 %v18971_v37  ;;  %16103 = vmatmul.mubr.f32.gmra.mxu1 %v19061_v13  ;;  %v19116_v36 = vand.u32 4294901760, %v4588_v31 }
 0x5ea   :  { %16124 = vmatpush3.msra.mxu1 %v18971_v37  ;;  %16083 = vmatprep.subr.mxu0 %v18987_v56 }
 0x5eb   :  { %16085 = vmatprep.mubr.f32.mxu0 %v3933_v11  ;;  %16125 = vmatprep.subr.mxu1 %v18987_v56 }
 0x5ec   :  { %16127 = vmatprep.mubr.f32.mxu1 %v3931_v29  ;;  %16084 = vmatpush3.msra.mxu0 %v18987_v56  ;;  %v4694_v29 = vsub.f32 %v4584_v60, %v19197_v59 }
 0x5ed   :  { %16126 = vmatpush3.msra.mxu1 %v18987_v56  ;;  %16105 = vmatprep.subr.mxu0 %v18952_v14 }
 0x5ee   :  { %16147 = vmatprep.subr.mxu1 %v18932_v27  ;;  %16086 = vmatmul.mubr.f32.vlgmr.msra.gmra.mxu0 %v3943_v57 }
 0x5ef   :  { %16106 = vmatpush3.msra.mxu0 %v18952_v14  ;;  %16128 = vmatmul.mubr.f32.vlgmr.msra.gmra.mxu1 %v3941_v48  ;;  %v3963_v14 = vand.u32 4294901760, %v3962_v51 }
 0x5f0   :  { %16148 = vmatpush3.msra.mxu1 %v18932_v27  ;;  %16107 = vmatprep.subr.mxu0 %v18984_v1  ;;  %v19129_v27 = vsub.f32 %v4588_v31, %v19116_v36 }
 0x5f1   :  { %16130 = vmatprep.mubr.f32.mxu1 %v3951_v34  ;;  %16149 = vmatprep.subr.mxu1 %v18961_v58 }
 0x5f2   :  { %16108 = vmatpush3.msra.mxu0 %v18984_v1  ;;  %16150 = vmatpush3.msra.mxu1 %v18961_v58  ;;  %v19137_v1 = vand.u32 4294901760, %v4586_v6  ;;  %v4578_v58 = vsel %vm1151_vm1, %v4559_v49, 0 }
 0x5f3   :  { %16088 = vmatprep.mubr.f32.mxu0 %v3953_v33  ;;  %16109 = vmatprep.subr.mxu0 %v18992_v2  ;;  %v19145_v4 = vand.u32 4294901760, %v4578_v58 }
 0x5f4   :  { %16151 = vmatprep.subr.mxu1 %v18971_v37  ;;  %16089 = vmatmul.mubr.f32.gmra.mxu0 %v3963_v14 }
 0x5f5   :  { %16110 = vmatpush3.msra.mxu0 %v18992_v2  ;;  %16131 = vmatmul.mubr.f32.gmra.mxu1 %v3961_v44  ;;  %v19152_v2 = vand.u32 4294901760, %v19129_v27 }
 0x5f6   :  { %16152 = vmatpush3.msra.mxu1 %v18971_v37  ;;  %16111 = vmatprep.subr.mxu0 %v19004_v12  ;;  %v19155_v37 = vsub.f32 %v4586_v6, %v19137_v1 }
 0x5f7   :  { %16113 = vmatprep.mubr.f32.mxu0 %v19044_v46  ;;  %16153 = vmatprep.subr.mxu1 %v18987_v56  ;;  %v19187_v46 = vand.u32 4294901760, %v4582_v35 }
 0x5f8   :  { %16155 = vmatprep.mubr.f32.mxu1 %v19033_v52  ;;  %16112 = vmatpush3.msra.mxu0 %v19004_v12  ;;  %v19163_v12 = vsub.f32 %v4578_v58, %v19145_v4  ;;  %v19171_v24 = vand.u32 4294901760, %v19155_v37 }
 0x5f9   :  { %16154 = vmatpush3.msra.mxu1 %v18987_v56  ;;  %16133 = vmatprep.subr.mxu0 %v18981_v3  ;;  %v4745_v56 = vsub.f32 %v19129_v27, %v19152_v2 }
 0x5fa   :  { %16175 = vmatprep.subr.mxu1 %v4732_v53  ;;  %16114 = vmatmul.mubr.f32.vlgmr.msra.gmra.mxu0 %v19053_v28  ;;  %v4665_v43 = vand.u32 4294901760, %v19163_v12 }
 0x5fb   :  { %16134 = vmatpush3.msra.mxu0 %v18981_v3  ;;  %16156 = vmatmul.mubr.f32.vlgmr.msra.gmra.mxu1 %v19040_v47  ;;  %v4580_v3 = vsel %vm1151_vm1, %v4561_v7, 0  ;;  %v4746_v54 = vand.u32 4294901760, %v4745_v56 }
 0x5fc   :  { %16176 = vmatpush3.xpose.msra.mxu1 %v4732_v53  ;;  %16116 = vmatprep.mubr.f32.mxu0 %v19073_v8  ;;  %v19184_v26 = vand.u32 4294901760, %v4580_v3 }
 0x5fd   :  { %16135 = vmatprep.subr.mxu0 %v18999_v32  ;;  %16158 = vmatprep.mubr.f32.mxu1 %v19057_v63 }
 0x5fe   :  { %16177 = vmatprep.subr.mxu1 %v4739_v0  ;;  %16136 = vmatpush3.msra.mxu0 %v18999_v32  ;;  %v4752_v32 = vsub.f32 %v19155_v37, %v19171_v24 }
 0x5ff   :  { %16137 = vmatprep.subr.mxu0 %v19008_v45  ;;  %16117 = vmatmul.mubr.f32.gmra.mxu0 %v19079_v55 }
 0x600   :  { %16138 = vmatpush3.msra.mxu0 %v19008_v45  ;;  %16159 = vmatmul.mubr.f32.gmra.mxu1 %v19061_v13  ;;  %v4666_v45 = vsub.f32 %v19163_v12, %v4665_v43  ;;  %v4753_v38 = vand.u32 4294901760, %v4752_v32 }
 0x601   :  { %16178 = vmatpush3.xpose.msra.mxu1 %v4739_v0  ;;  %16139 = vmatprep.subr.mxu0 %v19018_v10 }
 0x602   :  { %16141 = vmatprep.mubr.f32.mxu0 %v19033_v52  ;;  %16179 = vmatprep.subr.mxu1 %v4746_v54  ;;  %v4674_v52 = vsub.f32 %v4580_v3, %v19184_v26 }
 0x603   :  { %16183 = vmatprep.mubr.f32.mxu1 %v19145_v4  ;;  %16140 = vmatpush3.msra.mxu0 %v19018_v10  ;;  %v4684_v10 = vsub.f32 %v4582_v35, %v19187_v46 }
 0x604   :  { %16161 = vmatprep.subr.mxu0 %v19085_v18  ;;  %16142 = vmatmul.mubr.f32.vlgmr.msra.gmra.mxu0 %v19040_v47  ;;  %v4667_v47 = vand.u32 4294901760, %v4666_v45  ;;  %v4675_v28 = vand.u32 4294901760, %v4674_v52 }
 0x605   :  { %16162 = vmatpush3.xpose.msra.mxu0 %v19085_v18  ;;  %16180 = vmatpush3.xpose.msra.mxu1 %v4746_v54  ;;  %v4685_v48 = vand.u32 4294901760, %v4684_v10 }
 0x606   :  { %16144 = vmatprep.mubr.f32.mxu0 %v19057_v63  ;;  %16163 = vmatprep.subr.mxu0 %v19102_v17  ;;  %v4676_v63 = vsub.f32 %v4674_v52, %v4675_v28 }
 0x607   :  { %16181 = vmatprep.subr.mxu1 %v4753_v38  ;;  %v4686_v22 = vsub.f32 %v4684_v10, %v4685_v48 }
 0x608   :  { %16145 = vmatmul.mubr.f32.gmra.mxu0 %v19061_v13  ;;  %v4695_v13 = vand.u32 4294901760, %v4694_v29  ;;  %v4677_v8 = vand.u32 4294901760, %v4676_v63 }
 0x609   :  { %16164 = vmatpush3.xpose.msra.mxu0 %v19102_v17  ;;  %16182 = vmatpush3.xpose.msra.mxu1 %v4753_v38  ;;  %v4687_v55 = vand.u32 4294901760, %v4686_v22 }
 0x60a   :  { %16165 = vmatprep.subr.mxu0 %v19116_v36  ;;  %16169 = vmatprep.mubr.f32.mxu0 %v4667_v47  ;;  %v4696_v19 = vsub.f32 %v4694_v29, %v4695_v13 }
 0x60b   :  { %16203 = vmatprep.subr.mxu1 %v19085_v18 }
 0x60c   :  { %16184 = vmatmul.mubr.f32.vlgmr.msra.gmra.mxu1 %v19184_v26  ;;  %v4697_v15 = vand.u32 4294901760, %v4696_v19 }
 0x60d   :  { %16166 = vmatpush3.xpose.msra.mxu0 %v19116_v36  ;;  %16186 = vmatprep.mubr.f32.mxu1 %v19187_v46 }
 0x60e   :  { %16204 = vmatpush3.xpose.msra.mxu1 %v19085_v18  ;;  %16167 = vmatprep.subr.mxu0 %v19137_v1 }
 0x60f   :  { %16205 = vmatprep.subr.mxu1 %v19102_v17 }
 0x610   :  { %16187 = vmatmul.mubr.f32.gmra.mxu1 %v19197_v59 }
 0x611   :  { %16168 = vmatpush3.xpose.msra.mxu0 %v19137_v1  ;;  %16211 = vmatprep.mubr.f32.mxu1 %v4665_v43 }
 0x612   :  { %16206 = vmatpush3.xpose.msra.mxu1 %v19102_v17  ;;  %16189 = vmatprep.subr.mxu0 %v19100_v5 }
 0x613   :  { %16207 = vmatprep.subr.mxu1 %v19116_v36 }
 0x614   :  { %16170 = vmatmul.mubr.f32.vlgmr.msra.gmra.mxu0 %v4677_v8 }
 0x615   :  { %16172 = vmatprep.mubr.f32.mxu0 %v4687_v55  ;;  %16190 = vmatpush3.xpose.msra.mxu0 %v19100_v5 }
 0x616   :  { %16208 = vmatpush3.xpose.msra.mxu1 %v19116_v36  ;;  %16191 = vmatprep.subr.mxu0 %v19114_v41 }
 0x617   :  { %16209 = vmatprep.subr.mxu1 %v19137_v1 }
 0x618   :  { %16173 = vmatmul.mubr.f32.gmra.mxu0 %v4697_v15 }
 0x619   :  { %16192 = vmatpush3.xpose.msra.mxu0 %v19114_v41  ;;  %16197 = vmatprep.mubr.f32.mxu0 %v19163_v12 }
 0x61a   :  { %16210 = vmatpush3.xpose.msra.mxu1 %v19137_v1  ;;  %16193 = vmatprep.subr.mxu0 %v19129_v27 }
 0x61b   :  { %16231 = vmatprep.subr.mxu1 %v19085_v18 }
 0x61d   :  { %16212 = vmatmul.mubr.f32.vlgmr.msra.gmra.mxu1 %v4675_v28  ;;  %16194 = vmatpush3.xpose.msra.mxu0 %v19129_v27 }
 0x61e   :  { %16214 = vmatprep.mubr.f32.mxu1 %v4685_v48  ;;  %16232 = vmatpush3.xpose.msra.mxu1 %v19085_v18 }
 0x61f   :  { %16195 = vmatprep.subr.mxu0 %v19155_v37  ;;  %16233 = vmatprep.subr.mxu1 %v19102_v17 }
 0x621   :  { %16215 = vmatmul.mubr.f32.gmra.mxu1 %v4695_v13  ;;  %16196 = vmatpush3.xpose.msra.mxu0 %v19155_v37 }
 0x622   :  { %16234 = vmatpush3.xpose.msra.mxu1 %v19102_v17  ;;  %16239 = vmatprep.mubr.f32.mxu1 %v19145_v4 }
 0x623   :  { %16217 = vmatprep.subr.mxu0 %v19121_v20  ;;  %16235 = vmatprep.subr.mxu1 %v19116_v36 }
 0x624   :  { %16198 = vmatmul.mubr.f32.vlgmr.msra.gmra.mxu0 %v4674_v52 }
 0x625   :  { %16200 = vmatprep.mubr.f32.mxu0 %v4684_v10  ;;  %16218 = vmatpush3.xpose.msra.mxu0 %v19121_v20 }
 0x626   :  { %16236 = vmatpush3.xpose.msra.mxu1 %v19116_v36  ;;  %16219 = vmatprep.subr.mxu0 %v19135_v25 }
 0x627   :  { %16237 = vmatprep.subr.mxu1 %v19137_v1 }
 0x628   :  { %16201 = vmatmul.mubr.f32.gmra.mxu0 %v4694_v29 }
 0x629   :  { %16220 = vmatpush3.xpose.msra.mxu0 %v19135_v25  ;;  %16225 = vmatprep.mubr.f32.mxu0 %v19145_v4 }
 0x62a   :  { %16238 = vmatpush3.xpose.msra.mxu1 %v19137_v1  ;;  %16221 = vmatprep.subr.mxu0 %v19152_v2 }
 0x62d   :  { %16240 = vmatmul.mubr.f32.vlgmr.msra.gmra.mxu1 %v19184_v26  ;;  %16222 = vmatpush3.xpose.msra.mxu0 %v19152_v2 }
 0x62e   :  { %16242 = vmatprep.mubr.f32.mxu1 %v19187_v46  ;;  %16223 = vmatprep.subr.mxu0 %v19171_v24 }
 0x631   :  { %16243 = vmatmul.mubr.f32.gmra.mxu1 %v19197_v59  ;;  %16224 = vmatpush3.xpose.msra.mxu0 %v19171_v24 }
 0x634   :  { %16226 = vmatmul.mubr.f32.vlgmr.msra.gmra.mxu0 %v19184_v26 }
 0x635   :  { %16228 = vmatprep.mubr.f32.mxu0 %v19187_v46 }
 0x638   :  { %16229 = vmatmul.mubr.f32.gmra.mxu0 %v19197_v59 }
 0x680   :  { %v16017_v18 = vpop.f32.mrf.mxu1 }
 0x682   :  { %v19253_v9 = vpop.f32.mrf.mxu1 }
 0x688   :  { %v16003_v11 = vpop.f32.mrf.mxu0  ;;  %v16020_v34 = vpop.f32.mrf.mxu1 }
 0x689   :  { %v3405_v44 = vadd.f32 %v16017_v18, %v16003_v11 }
 0x68a   :  { %v19255_v5 = vpop.f32.mrf.mxu1  ;;  %v19257_v57 = vpop.f32.mrf.mxu0 }
 0x68c   :  { %v16045_v17 = vpop.f32.mrf.mxu1 }
 0x68e   :  { %v19259_v31 = vpop.f32.mrf.mxu1 }
 0x690   :  { %v16006_v40 = vpop.f32.mrf.mxu0 }
 0x691   :  { %v3417_v49 = vadd.f32 %v16020_v34, %v16006_v40  ;;  %v16048_v51 = vpop.f32.mrf.mxu1 }
 0x692   :  { %v19261_v21 = vpop.f32.mrf.mxu0 }
 0x693   :  { %v19263_v41 = vpop.f32.mrf.mxu1 }
 0x694   :  { %24433 = vst [vmem:[#allocation3_spill] sm:$0xff] %v19263_v41 }
 0x696   :  { %v16031_v36 = vpop.f32.mrf.mxu0 }
 0x697   :  { %v3504_v20 = vadd.f32 %v16031_v36, %v3405_v44  ;;  %v16073_v33 = vpop.f32.mrf.mxu1 }
 0x698   :  { %v19265_v6 = vpop.f32.mrf.mxu0 }
 0x699   :  { %v19267_v14 = vpop.f32.mrf.mxu1  ;;  %v3603_v27 = vadd.f32 %v16045_v17, %v3504_v20 }
 0x69a   :  { %24434 = vst [vmem:[#allocation12_spill] sm:$0xff] %v19267_v14 }
 0x69c   :  { %v16034_v7 = vpop.f32.mrf.mxu0 }
 0x69d   :  { %v3518_v42 = vadd.f32 %v16034_v7, %v3417_v49  ;;  %v16076_v25 = vpop.f32.mrf.mxu1 }
 0x69e   :  { %v19269_v1 = vpop.f32.mrf.mxu0 }
 0x69f   :  { %v19271_v58 = vpop.f32.mrf.mxu1  ;;  %v3619_v4 = vadd.f32 %v16048_v51, %v3518_v42 }
 0x6a0   :  { %24435 = vst [vmem:[#allocation9_spill] sm:$0xff] %v19271_v58 }
 0x6a2   :  { %v16059_v53 = vpop.f32.mrf.mxu0 }
 0x6a3   :  { %v3708_v30 = vadd.f32 %v16059_v53, %v3603_v27  ;;  %v16101_v2 = vpop.f32.mrf.mxu1 }
 0x6a4   :  { %v19273_v37 = vpop.f32.mrf.mxu0 }
 0x6a5   :  { %24436 = vst [vmem:[#allocation5_spill] sm:$0xff] %v19273_v37  ;;  %v3801_v62 = vadd.f32 %v16073_v33, %v3708_v30  ;;  %v19275_v12 = vpop.f32.mrf.mxu1 }
 0x6a6   :  { %24437 = vst [vmem:[#allocation13_spill] sm:$0xff] %v19275_v12 }
 0x6a8   :  { %v16062_v0 = vpop.f32.mrf.mxu0 }
 0x6a9   :  { %v3720_v56 = vadd.f32 %v16062_v0, %v3619_v4  ;;  %v16104_v24 = vpop.f32.mrf.mxu1 }
 0x6aa   :  { %v19277_v3 = vpop.f32.mrf.mxu0 }
 0x6ab   :  { %24438 = vst [vmem:[#allocation7_spill] sm:$0xff] %v19277_v3  ;;  %v3813_v43 = vadd.f32 %v16076_v25, %v3720_v56  ;;  %v19279_v35 = vpop.f32.mrf.mxu1 }
 0x6ac   :  { %24439 = vst [vmem:[#allocation4_spill] sm:$0xff] %v19279_v35 }
 0x6ae   :  { %v16087_v16 = vpop.f32.mrf.mxu0 }
 0x6af   :  { %v3946_v54 = vadd.f32 %v16087_v16, %v3801_v62  ;;  %v16129_v46 = vpop.f32.mrf.mxu1 }
 0x6b0   :  { %v19281_v32 = vpop.f32.mrf.mxu0 }
 0x6b1   :  { %24440 = vst [vmem:[#allocation10_spill] sm:$0xff] %v19281_v32  ;;  %v4063_v26 = vadd.f32 %v16101_v2, %v3946_v54  ;;  %v19283_v38 = vpop.f32.mrf.mxu1 }
 0x6b2   :  { %24441 = vst [vmem:[#allocation6_spill] sm:$0xff] %v19283_v38 }
 0x6b4   :  { %v16090_v60 = vpop.f32.mrf.mxu0 }
 0x6b5   :  { %v3966_v45 = vadd.f32 %v16090_v60, %v3813_v43  ;;  %v16132_v10 = vpop.f32.mrf.mxu1 }
 0x6b6   :  { %v19285_v52 = vpop.f32.mrf.mxu0 }
 0x6b7   :  { %24442 = vst [vmem:[#allocation8_spill] sm:$0xff] %v19285_v52  ;;  %v4075_v59 = vadd.f32 %v16104_v24, %v3966_v45  ;;  %v19289_v63 = vpop.f32.mrf.mxu1 }
 0x6b8   :  { %24444 = vst [vmem:[#allocation14_spill] sm:$0xff] %v19289_v63 }
 0x6ba   :  { %v16115_v47 = vpop.f32.mrf.mxu0 }
 0x6bb   :  { %v4162_v28 = vadd.f32 %v16115_v47, %v4063_v26  ;;  %v16157_v19 = vpop.f32.mrf.mxu1 }
 0x6bc   :  { %v19287_v29 = vpop.f32.mrf.mxu0 }
 0x6bd   :  { %24443 = vst [vmem:[#allocation11_spill] sm:$0xff] %v19287_v29  ;;  %v4261_v48 = vadd.f32 %v16129_v46, %v4162_v28  ;;  %v19293_v11 = vpop.f32.mrf.mxu1 }
 0x6be   :  { %24446 = vst [vmem:[#allocation16_spill] sm:$0xff] %v19293_v11 }
 0x6bf   :  { %v16118_v13 = vpop.f32.mrf.mxu0 }
 0x6c0   :  { %v4176_v22 = vadd.f32 %v16118_v13, %v4075_v59  ;;  %v16160_v49 = vpop.f32.mrf.mxu1 }
 0x6c1   :  { %v19291_v8 = vpop.f32.mrf.mxu0 }
 0x6c2   :  { %24445 = vst [vmem:[#allocation15_spill] sm:$0xff] %v19291_v8  ;;  %v4277_v55 = vadd.f32 %v16132_v10, %v4176_v22  ;;  %v19301_v36 = vpop.f32.mrf.mxu1 }
 0x6c3   :  { %24448 = vst [vmem:[#allocation18_spill] sm:$0xff] %v19301_v36 }
 0x6c4   :  { %v16143_v15 = vpop.f32.mrf.mxu0 }
 0x6c5   :  { %v4366_v18 = vadd.f32 %v16143_v15, %v4261_v48 }
 0x6c6   :  { %v19295_v34 = vpop.f32.mrf.mxu0 }
 0x6c7   :  { %24447 = vst [vmem:[#allocation17_spill] sm:$0xff] %v19295_v34  ;;  %v19297_v44 = vadd.f32 %v16157_v19, %v4366_v18 }
 0x6c8   :  { %v16146_v17 = vpop.f32.mrf.mxu0 }
 0x6c9   :  { %v4378_v40 = vadd.f32 %v16146_v17, %v4277_v55 }
 0x6ca   :  { %v19303_v33 = vpop.f32.mrf.mxu0 }
 0x6cb   :  { %v19299_v51 = vadd.f32 %v16160_v49, %v4378_v40  ;;  %24449 = vst [vmem:[#allocation19_spill] sm:$0xff] %v19303_v33  ;;  %v5899_v33 = vld [vmem:[%s24157_s3 + $0x48] sm:$0xff] }
 0x6cc   :  { %v16185_v20 = vpop.f32.mrf.mxu1 }
 0x6ce   :  { %v4790_v27 = vpop.f32.mrf.mxu1 }
 0x6d0   :  { %v16188_v42 = vpop.f32.mrf.mxu1 }
 0x6d2   :  { %v4802_v4 = vpop.f32.mrf.mxu1 }
 0x6d4   :  { %v16171_v7 = vpop.f32.mrf.mxu0 }
 0x6d5   :  { %v4797_v43 = vadd.f32 %v16185_v20, %v16171_v7 }
 0x6d6   :  { %v4669_v25 = vpop.f32.mrf.mxu0 }
 0x6d7   :  { %v4791_v26 = vadd.f32 %v4790_v27, %v4669_v25 }
 0x6d8   :  { %v16174_v53 = vpop.f32.mrf.mxu0 }
 0x6d9   :  { %v4809_v45 = vadd.f32 %v16188_v42, %v16174_v53  ;;  %v17671_v42 = vld [vmem:[%s24155_s2 + $0x188] sm:$0xff] }
 0x6da   :  { %v4689_v2 = vpop.f32.mrf.mxu0 }
 0x6db   :  { %v4803_v47 = vadd.f32 %v4802_v4, %v4689_v2 }
 0x6dd   :  { %v16213_v30 = vpop.f32.mrf.mxu1 }
 0x6df   :  { %v4986_v62 = vpop.f32.mrf.mxu1 }
 0x6e1   :  { %v16216_v56 = vpop.f32.mrf.mxu1 }
 0x6e3   :  { %v5002_v16 = vpop.f32.mrf.mxu1 }
 0x6e4   :  { %v16199_v0 = vpop.f32.mrf.mxu0 }
 0x6e5   :  { %v4896_v46 = vadd.f32 %v16199_v0, %v4797_v43 }
 0x6e6   :  { %v4888_v24 = vpop.f32.mrf.mxu0 }
 0x6e7   :  { %v4889_v59 = vadd.f32 %v4888_v24, %v4791_v26  ;;  %v4995_v48 = vadd.f32 %v16213_v30, %v4896_v46  ;;  %v17674_v46 = vld [vmem:[%s24155_s2 + $0x1a0] sm:$0xff] }
 0x6e8   :  { %v16202_v54 = vpop.f32.mrf.mxu0 }
 0x6e9   :  { %v4910_v28 = vadd.f32 %v16202_v54, %v4809_v45  ;;  %v4987_v15 = vadd.f32 %v4986_v62, %v4889_v59  ;;  %v17672_v62 = vld [vmem:[%s24155_s2 + $0x1a8] sm:$0xff]  ;;  %v17675_v45 = vld [vmem:[%s24155_s2 + $0x198] sm:$0xff] }
 0x6ea   :  { %v4902_v10 = vpop.f32.mrf.mxu0 }
 0x6eb   :  { %v4903_v19 = vadd.f32 %v4902_v10, %v4803_v47  ;;  %v5011_v49 = vadd.f32 %v16216_v56, %v4910_v28  ;;  %v17673_v56 = vld [vmem:[%s24155_s2 + $0x180] sm:$0xff]  ;;  %v17676_v47 = vld [vmem:[%s24155_s2 + $0x1b8] sm:$0xff] }
 0x6ed   :  { %v16241_v60 = vpop.f32.mrf.mxu1  ;;  %v5003_v0 = vadd.f32 %v5002_v16, %v4903_v19 }
 0x6ef   :  { %v5186_v13 = vpop.f32.mrf.mxu1 }
 0x6f1   :  { %v16244_v20 = vpop.f32.mrf.mxu1 }
 0x6f3   :  { %v5198_v54 = vpop.f32.mrf.mxu1 }
 0x6f4   :  { %v16227_v22 = vpop.f32.mrf.mxu0 }
 0x6f5   :  { %v5100_v55 = vadd.f32 %v16227_v22, %v4995_v48  ;;  %v17677_v48 = vld [vmem:[%s24155_s2 + $0x190] sm:$0xff] }
 0x6f6   :  { %v5093_v18 = vpop.f32.mrf.mxu0  ;;  %v17678_v22 = vld [vmem:[%s24155_s2 + $0x1b0] sm:$0xff] }
 0x6f7   :  { %v5193_v17 = vadd.f32 %v16241_v60, %v5100_v55  ;;  %v5094_v40 = vadd.f32 %v5093_v18, %v4987_v15 }
 0x6f8   :  { %v16230_v7 = vpop.f32.mrf.mxu0 }
 0x6f9   :  { %v5187_v27 = vadd.f32 %v5186_v13, %v5094_v40  ;;  %v5112_v25 = vadd.f32 %v16230_v7, %v5011_v49  ;;  %v5209_v4 = vmul.f32 %v17671_v42, %v5193_v17 }
 0x6fa   :  { %v5105_v53 = vpop.f32.mrf.mxu0 }
 0x6fb   :  { %v5205_v30 = vadd.f32 %v16244_v20, %v5112_v25  ;;  %v5106_v2 = vadd.f32 %v5105_v53, %v5003_v0  ;;  %v5213_v24 = vadd.f32 %v17672_v62, %v5209_v4  ;;  %v5208_v43 = vmul.f32 %v17673_v56, %v5187_v27 }
 0x6fd   :  { %v5199_v16 = vadd.f32 %v5198_v54, %v5106_v2  ;;  %v5219_v26 = vsel %vm144_vm0, %v5213_v24, -inf  ;;  %v5212_v60 = vadd.f32 %v17674_v46, %v5208_v43  ;;  %v5211_v59 = vmul.f32 %v17675_v45, %v5205_v30 }
 0x6fe   :  { %5220 = vmax.xlane.f32.xlu0 %v5219_v26 }
 0x6ff   :  { %v5216_v10 = vsel %vm144_vm0, %v5212_v60, -inf  ;;  %v5215_v28 = vadd.f32 %v17676_v47, %v5211_v59  ;;  %v5210_v13 = vmul.f32 %v17677_v48, %v5199_v16 }
 0x700   :  { %5217 = vmax.xlane.f32.xlu1 %v5216_v10 }
 0x701   :  { %v5214_v19 = vadd.f32 %v17678_v22, %v5210_v13  ;;  %v5225_v55 = vsel %vm144_vm0, %v5215_v28, -inf }
 0x703   :  { %v5222_v15 = vsel %vm144_vm0, %v5214_v19, -inf }
 0x704   :  { %5226 = vmax.xlane.f32.xlu1 %v5225_v55  ;;  %5223 = vmax.xlane.f32.xlu0 %v5222_v15 }
 0x715   :  { %5264 = vrot.lane.b32.xlu1 %v18489_v23, %s17771_s10 }
 0x71a   :  { %5266 = vrot.lane.b32.xlu0 %v18481_v61, %s17771_s10 }
 0x787   :  { %v5221_v18 = vpop.xlane.xlu0 %5220 }
 0x788   :  { %v5229_v17 = vsub.f32 %v5213_v24, %v5221_v18 }
 0x789   :  { %v5218_v40 = vpop.xlane.xlu1 %5217 }
 0x78a   :  { %v5234_v49 = vmul.f32 1.442695, %v5229_v17  ;;  %v5228_v20 = vsub.f32 %v5212_v60, %v5218_v40 }
 0x78c   :  { %17585 = vpow2.f32 %v5234_v49  ;;  %v5232_v7 = vmul.f32 1.442695, %v5228_v20 }
 0x78d   :  { %v5227_v27 = vpop.xlane.xlu1 %5226  ;;  %v5224_v25 = vpop.xlane.xlu0 %5223 }
 0x78e   :  { %17587 = vpow2.f32 %v5232_v7  ;;  %v5231_v0 = vsub.f32 %v5215_v28, %v5227_v27  ;;  %v5230_v42 = vsub.f32 %v5214_v19, %v5224_v25 }
 0x790   :  { %v5238_v4 = vmul.f32 1.442695, %v5231_v0  ;;  %v5236_v53 = vmul.f32 1.442695, %v5230_v42 }
 0x791   :  { %v5265_v30 = vpop.permute.xlu1 %5264  ;;  %v5267_v2 = vpop.permute.xlu0 %5266 }
 0x792   :  { %17589 = vpow2.f32 %v5238_v4  ;;  %v19337_v62 = vand.u32 4294901760, %v5265_v30  ;;  %v19339_v56 = vand.u32 4294901760, %v5267_v2 }
 0x793   :  { %17591 = vpow2.f32 %v5236_v53 }
 0x794   :  { %v19342_v24 = vsub.f32 %v5265_v30, %v19337_v62  ;;  %v19345_v43 = vsub.f32 %v5267_v2, %v19339_v56  ;;  %16245 = vmatprep.subr.mxu0 %v19339_v56 }
 0x795   :  { %16246 = vmatpush3.msra.mxu0 %v19339_v56 }
 0x796   :  { %16247 = vmatprep.subr.mxu0 %v19337_v62  ;;  %v19351_v54 = vand.u32 4294901760, %v19345_v43  ;;  %v19354_v16 = vand.u32 4294901760, %v19342_v24 }
 0x797   :  { %16248 = vmatpush3.msra.mxu0 %v19337_v62 }
 0x798   :  { %v5421_v26 = vsub.f32 %v19345_v43, %v19351_v54  ;;  %v5428_v46 = vsub.f32 %v19342_v24, %v19354_v16 }
 0x799   :  { %v17586_v60 = vpop.eup %17585 }
 0x79a   :  { %v5243_v45 = vsel %vm144_vm0, %v17586_v60, 0.0  ;;  %v5422_v59 = vand.u32 4294901760, %v5421_v26  ;;  %v5429_v28 = vand.u32 4294901760, %v5428_v46 }
 0x79b   :  { %v17588_v10 = vpop.eup %17587  ;;  %5244 = vadd.xlane.f32.xlu1 %v5243_v45 }
 0x79c   :  { %16259 = vmatprep.subr.mxu1 %v5422_v59  ;;  %v5240_v47 = vsel %vm144_vm0, %v17588_v10, 0.0 }
 0x79d   :  { %5241 = vadd.xlane.f32.xlu0 %v5240_v47  ;;  %16260 = vmatpush3.msra.mxu1 %v5422_v59 }
 0x79e   :  { %16261 = vmatprep.subr.mxu1 %v5429_v28 }
 0x79f   :  { %v17590_v48 = vpop.eup %17589  ;;  %16262 = vmatpush3.msra.mxu1 %v5429_v28 }
 0x7a0   :  { %v17592_v13 = vpop.eup %17591  ;;  %v5249_v22 = vsel %vm144_vm0, %v17590_v48, 0.0 }
 0x7a1   :  { %5250 = vadd.xlane.f32.xlu1 %v5249_v22  ;;  %v5246_v19 = vsel %vm144_vm0, %v17592_v13, 0.0 }
 0x7a2   :  { %5247 = vadd.xlane.f32.xlu0 %v5246_v19 }
 0x7b2   :  { %5262 = vrot.lane.b32.xlu1 %v18499_v39, %s17771_s10 }
 0x7b6   :  { %6570 = vrot.lane.b32.xlu1 %v18481_v61, %s17772_s18 }
 0x7b8   :  { %5260 = vrot.lane.b32.xlu0 %v18529_v50, %s17771_s10 }
 0x7bc   :  { %6568 = vrot.lane.b32.xlu0 %v18489_v23, %s17772_s18 }
 0x7c0   :  { %6566 = vrot.lane.b32.xlu0 %v18499_v39, %s17772_s18 }
 0x7c4   :  { %6564 = vrot.lane.b32.xlu0 %v18529_v50, %s17772_s18 }
 0x824   :  { %v5245_v55 = vpop.xlane.xlu1 %5244 }
 0x825   :  { %17593 = vrcp.f32 %v5245_v55 }
 0x826   :  { %v5242_v15 = vpop.xlane.xlu0 %5241 }
 0x827   :  { %17595 = vrcp.f32 %v5242_v15 }
 0x82a   :  { %v5251_v18 = vpop.xlane.xlu1 %5250 }
 0x82b   :  { %17597 = vrcp.f32 %v5251_v18  ;;  %v5248_v17 = vpop.xlane.xlu0 %5247 }
 0x82c   :  { %17599 = vrcp.f32 %v5248_v17 }
 0x82e   :  { %v5263_v40 = vpop.permute.xlu1 %5262 }
 0x82f   :  { %v19373_v49 = vand.u32 4294901760, %v5263_v40  ;;  %v5261_v61 = vpop.permute.xlu0 %5260 }
 0x830   :  { %v19375_v20 = vand.u32 4294901760, %v5261_v61 }
 0x831   :  { %v19378_v23 = vsub.f32 %v5263_v40, %v19373_v49  ;;  %16249 = vmatprep.subr.mxu0 %v19373_v49 }
 0x832   :  { %v17594_v39 = vpop.eup %17593  ;;  %v19382_v50 = vsub.f32 %v5261_v61, %v19375_v20  ;;  %16250 = vmatpush3.msra.mxu0 %v19373_v49 }
 0x833   :  { %v5257_v7 = vmul.f32 %v17594_v39, %v17586_v60  ;;  %16251 = vmatprep.subr.mxu0 %v19375_v20  ;;  %v19387_v27 = vand.u32 4294901760, %v19378_v23 }
 0x834   :  { %v17596_v25 = vpop.eup %17595  ;;  %16252 = vmatpush3.msra.mxu0 %v19375_v20  ;;  %v19391_v0 = vand.u32 4294901760, %v19382_v50 }
 0x835   :  { %v5276_v42 = vsel %vm144_vm0, %v5257_v7, 0  ;;  %v5256_v4 = vmul.f32 %v17596_v25, %v17588_v10  ;;  %16273 = vmatprep.subr.mxu0 %v19345_v43  ;;  %v5435_v53 = vsub.f32 %v19378_v23, %v19387_v27 }
 0x836   :  { %v19397_v30 = vand.u32 4294901760, %v5276_v42  ;;  %v5442_v2 = vsub.f32 %v19382_v50, %v19391_v0 }
 0x837   :  { %v5273_v26 = vsel %vm144_vm0, %v5256_v4, 0  ;;  %v5436_v46 = vand.u32 4294901760, %v5435_v53 }
 0x838   :  { %v17598_v60 = vpop.eup %17597  ;;  %v19403_v45 = vsub.f32 %v5276_v42, %v19397_v30  ;;  %v19405_v59 = vand.u32 4294901760, %v5273_v26  ;;  %v5443_v28 = vand.u32 4294901760, %v5442_v2 }
 0x839   :  { %v17600_v10 = vpop.eup %17599  ;;  %v5259_v47 = vmul.f32 %v17598_v60, %v17590_v48  ;;  %16263 = vmatprep.subr.mxu1 %v5436_v46 }
 0x83a   :  { %v5258_v22 = vmul.f32 %v17600_v10, %v17592_v13  ;;  %16264 = vmatpush3.msra.mxu1 %v5436_v46  ;;  %16267 = vmatprep.mubr.f32.mxu1 %v19405_v59  ;;  %v19409_v19 = vsub.f32 %v5273_v26, %v19405_v59  ;;  %v19412_v55 = vand.u32 4294901760, %v19403_v45 }
 0x83b   :  { %v5282_v15 = vsel %vm144_vm0, %v5259_v47, 0  ;;  %16265 = vmatprep.subr.mxu1 %v5443_v28  ;;  %v5901_v47 = vld [vmem:[%s24157_s3 + $0x58] sm:$0xff] }
 0x83c   :  { %v19415_v18 = vand.u32 4294901760, %v5282_v15  ;;  %v5279_v17 = vsel %vm144_vm0, %v5258_v22, 0  ;;  %16266 = vmatpush3.msra.mxu1 %v5443_v28  ;;  %v19419_v48 = vand.u32 4294901760, %v19409_v19  ;;  %v5366_v40 = vsub.f32 %v19403_v45, %v19412_v55 }
 0x83d   :  { %v19421_v13 = vand.u32 4294901760, %v5279_v17  ;;  %16268 = vmatmul.mubr.f32.vlgmr.msra.gmra.mxu1 %v19397_v30  ;;  %16287 = vmatprep.subr.mxu1 %v19339_v56  ;;  %v19510_v28 = vand.u32 4294901760, %v5901_v47 }
 0x83e   :  { %16288 = vmatpush3.msra.mxu1 %v19339_v56  ;;  %v5356_v61 = vsub.f32 %v19409_v19, %v19419_v48  ;;  %v19431_v39 = vsub.f32 %v5282_v15, %v19415_v18  ;;  %v19446_v4 = vand.u32 4294901760, %v5366_v40  ;;  %v5900_v15 = vld [vmem:[%s24157_s3 + $0x50] sm:$0xff] }
 0x83f   :  { %16270 = vmatprep.mubr.f32.mxu1 %v19421_v13  ;;  %16289 = vmatprep.subr.mxu1 %v19337_v62  ;;  %v19436_v7 = vsub.f32 %v5279_v17, %v19421_v13 }
 0x840   :  { %16290 = vmatpush3.msra.mxu1 %v19337_v62  ;;  %v19439_v25 = vand.u32 4294901760, %v5356_v61  ;;  %v19442_v42 = vand.u32 4294901760, %v19431_v39  ;;  %v19516_v61 = vsub.f32 %v5901_v47, %v19510_v28  ;;  %v19531_v47 = vand.u32 4294901760, %v5899_v33 }
 0x841   :  { %16271 = vmatmul.mubr.f32.gmra.mxu1 %v19415_v18  ;;  %16291 = vmatprep.subr.mxu1 %v19373_v49  ;;  %v19449_v53 = vand.u32 4294901760, %v19436_v7 }
 0x842   :  { %16253 = vmatprep.mubr.f32.mxu0 %v19439_v25  ;;  %16292 = vmatpush3.msra.mxu1 %v19373_v49  ;;  %v5386_v2 = vsub.f32 %v19431_v39, %v19442_v42 }
 0x843   :  { %16295 = vmatprep.mubr.f32.mxu1 %v19419_v48  ;;  %16254 = vmatmul.mubr.f32.vlgmr.msra.gmra.mxu0 %v19446_v4  ;;  %v5376_v26 = vsub.f32 %v19436_v7, %v19449_v53 }
 0x844   :  { %16274 = vmatpush3.msra.mxu0 %v19345_v43  ;;  %16293 = vmatprep.subr.mxu1 %v19375_v20  ;;  %v19465_v60 = vand.u32 4294901760, %v5386_v2  ;;  %v19518_v2 = vand.u32 4294901760, %v5900_v15 }
 0x845   :  { %16275 = vmatprep.subr.mxu0 %v19342_v24  ;;  %16294 = vmatpush3.msra.mxu1 %v19375_v20  ;;  %v19463_v46 = vand.u32 4294901760, %v5376_v26 }
 0x846   :  { %16276 = vmatpush3.msra.mxu0 %v19342_v24  ;;  %16296 = vmatmul.mubr.f32.vlgmr.msra.gmra.mxu1 %v19412_v55  ;;  %v19529_v11 = vsub.f32 %v5900_v15, %v19518_v2  ;;  %v19544_v15 = vsub.f32 %v5899_v33, %v19531_v47 }
 0x847   :  { %16315 = vmatprep.subr.mxu1 %v19339_v56  ;;  %16256 = vmatprep.mubr.f32.mxu0 %v19463_v46 }
 0x848   :  { %16277 = vmatprep.subr.mxu0 %v19378_v23  ;;  %16298 = vmatprep.mubr.f32.mxu1 %v19449_v53  ;;  %v19541_v34 = vand.u32 4294901760, %v19529_v11  ;;  %v19553_v12 = vand.u32 4294901760, %v19544_v15 }
 0x849   :  { %16316 = vmatpush3.msra.mxu1 %v19339_v56  ;;  %16257 = vmatmul.mubr.f32.gmra.mxu0 %v19465_v60 }
 0x84a   :  { %16278 = vmatpush3.msra.mxu0 %v19378_v23  ;;  %16317 = vmatprep.subr.mxu1 %v19337_v62  ;;  %v6090_v29 = vsub.f32 %v19529_v11, %v19541_v34 }
 0x84b   :  { %16279 = vmatprep.subr.mxu0 %v19382_v50  ;;  %16281 = vmatprep.mubr.f32.mxu0 %v19409_v19 }
 0x84c   :  { %16318 = vmatpush3.msra.mxu1 %v19337_v62  ;;  %16280 = vmatpush3.msra.mxu0 %v19382_v50 }
 0x84d   :  { %16299 = vmatmul.mubr.f32.gmra.mxu1 %v19442_v42  ;;  %16319 = vmatprep.subr.mxu1 %v19373_v49 }
 0x84e   :  { %16301 = vmatprep.subr.mxu0 %v19351_v54  ;;  %16320 = vmatpush3.msra.mxu1 %v19373_v49 }
 0x84f   :  { %16323 = vmatprep.mubr.f32.mxu1 %v19405_v59  ;;  %16282 = vmatmul.mubr.f32.vlgmr.msra.gmra.mxu0 %v19403_v45 }
 0x850   :  { %16302 = vmatpush3.msra.mxu0 %v19351_v54  ;;  %16321 = vmatprep.subr.mxu1 %v19375_v20 }
 0x851   :  { %16284 = vmatprep.mubr.f32.mxu0 %v19436_v7  ;;  %16303 = vmatprep.subr.mxu0 %v19354_v16 }
 0x852   :  { %16322 = vmatpush3.msra.mxu1 %v19375_v20  ;;  %16304 = vmatpush3.msra.mxu0 %v19354_v16 }
 0x853   :  { %16324 = vmatmul.mubr.f32.vlgmr.msra.gmra.mxu1 %v19397_v30  ;;  %16305 = vmatprep.subr.mxu0 %v19387_v27 }
 0x854   :  { %16326 = vmatprep.mubr.f32.mxu1 %v19421_v13  ;;  %16285 = vmatmul.mubr.f32.gmra.mxu0 %v19431_v39 }
 0x855   :  { %16306 = vmatpush3.msra.mxu0 %v19387_v27  ;;  %16309 = vmatprep.mubr.f32.mxu0 %v19405_v59 }
 0x856   :  { %16307 = vmatprep.subr.mxu0 %v19391_v0 }
 0x857   :  { %16308 = vmatpush3.msra.mxu0 %v19391_v0  ;;  %16327 = vmatmul.mubr.f32.gmra.mxu1 %v19415_v18 }
 0x858   :  { %16310 = vmatmul.mubr.f32.vlgmr.msra.gmra.mxu0 %v19397_v30  ;;  %16329 = vmatprep.subr.mxu0 %v19510_v28 }
 0x859   :  { %16312 = vmatprep.mubr.f32.mxu0 %v19421_v13  ;;  %16330 = vmatpush3.msra.mxu0 %v19510_v28 }
 0x85a   :  { %16331 = vmatprep.subr.mxu0 %v19518_v2 }
 0x85b   :  { %16332 = vmatpush3.msra.mxu0 %v19518_v2 }
 0x85c   :  { %16313 = vmatmul.mubr.f32.gmra.mxu0 %v19415_v18  ;;  %16333 = vmatprep.subr.mxu0 %v19531_v47 }
 0x85d   :  { %16334 = vmatpush3.msra.mxu0 %v19531_v47 }
 0x8fd   :  { %v16269_v62 = vpop.f32.mrf.mxu1 }
 0x8ff   :  { %v5480_v56 = vpop.f32.mrf.mxu1 }
 0x901   :  { %v16272_v24 = vpop.f32.mrf.mxu1 }
 0x903   :  { %v16255_v43 = vpop.f32.mrf.mxu0  ;;  %v5492_v54 = vpop.f32.mrf.mxu1 }
 0x904   :  { %v5487_v26 = vadd.f32 %v16269_v62, %v16255_v43  ;;  %v5898_v62 = vld [vmem:[%s24157_s3 + $0x40] sm:$0xff] }
 0x905   :  { %v5359_v16 = vpop.f32.mrf.mxu0  ;;  %v19546_v38 = vand.u32 4294901760, %v5898_v62 }
 0x906   :  { %v16297_v49 = vpop.f32.mrf.mxu1  ;;  %v5481_v22 = vadd.f32 %v5480_v56, %v5359_v16  ;;  %v19526_v16 = vand.u32 4294901760, %v19516_v61 }
 0x907   :  { %v19556_v52 = vsub.f32 %v5898_v62, %v19546_v38  ;;  %16335 = vmatprep.subr.mxu0 %v19546_v38 }
 0x908   :  { %v5676_v50 = vpop.f32.mrf.mxu1  ;;  %16336 = vmatpush3.msra.mxu0 %v19546_v38 }
 0x909   :  { %v16258_v20 = vpop.f32.mrf.mxu0  ;;  %16357 = vmatprep.subr.mxu0 %v19516_v61 }
 0x90a   :  { %v5499_v62 = vadd.f32 %v16272_v24, %v16258_v20 }
 0x90b   :  { %v5379_v23 = vpop.f32.mrf.mxu0 }
 0x90d   :  { %v19505_v0 = vpop.f32.mrf.mxu1 }
 0x90f   :  { %v16283_v27 = vpop.f32.mrf.mxu0  ;;  %v5692_v17 = vpop.f32.mrf.mxu1 }
 0x910   :  { %v5586_v63 = vadd.f32 %v16283_v27, %v5487_v26  ;;  %v5493_v27 = vadd.f32 %v5492_v54, %v5379_v23  ;;  %v6091_v23 = vand.u32 4294901760, %v6090_v29 }
 0x911   :  { %v5578_v10 = vpop.f32.mrf.mxu0 }
 0x912   :  { %v5579_v36 = vadd.f32 %v5578_v10, %v5481_v22  ;;  %v6083_v22 = vsub.f32 %v19516_v61, %v19526_v16  ;;  %v5685_v58 = vadd.f32 %v16297_v49, %v5586_v63 }
 0x913   :  { %v16325_v43 = vpop.f32.mrf.mxu1 }
 0x914   :  { %v16286_v40 = vpop.f32.mrf.mxu0  ;;  %v5677_v26 = vadd.f32 %v5676_v50, %v5579_v36  ;;  %v6084_v35 = vand.u32 4294901760, %v6083_v22  ;;  %v6097_v50 = vsub.f32 %v19544_v15, %v19553_v12  ;;  %v19563_v22 = vand.u32 4294901760, %v19556_v52 }
 0x915   :  { %v5876_v36 = vpop.f32.mrf.mxu1 }
 0x916   :  { %v5592_v56 = vpop.f32.mrf.mxu0  ;;  %16343 = vmatprep.subr.mxu1 %v6084_v35  ;;  %v6104_v49 = vsub.f32 %v19556_v52, %v19563_v22 }
 0x917   :  { %v5593_v33 = vadd.f32 %v5592_v56, %v5493_v27  ;;  %16344 = vmatpush3.msra.mxu1 %v6084_v35  ;;  %v5600_v56 = vadd.f32 %v16286_v40, %v5499_v62  ;;  %v16328_v27 = vpop.f32.mrf.mxu1 }
 0x918   :  { %v16311_v10 = vpop.f32.mrf.mxu0  ;;  %16345 = vmatprep.subr.mxu1 %v6091_v23 }
 0x919   :  { %v5790_v14 = vadd.f32 %v16311_v10, %v5685_v58  ;;  %v5693_v29 = vadd.f32 %v5692_v17, %v5593_v33  ;;  %16346 = vmatpush3.msra.mxu1 %v6091_v23  ;;  %v5701_v58 = vadd.f32 %v19505_v0, %v5600_v56  ;;  %v5888_v35 = vpop.f32.mrf.mxu1  ;;  %v6569_v10 = vpop.permute.xlu0 %6568 }
 0x91a   :  { %v5783_v8 = vpop.f32.mrf.mxu0 }
 0x91b   :  { %v5784_v32 = vadd.f32 %v5783_v8, %v5677_v26  ;;  %v6098_v8 = vand.u32 4294901760, %v6097_v50  ;;  %v6105_v26 = vand.u32 4294901760, %v6104_v49  ;;  %v5883_v41 = vadd.f32 %v16325_v43, %v5790_v14 }
 0x91c   :  { %v16314_v54 = vpop.f32.mrf.mxu0 }
 0x91d   :  { %v5877_v3 = vadd.f32 %v5876_v36, %v5784_v32  ;;  %16347 = vmatprep.subr.mxu1 %v6098_v8  ;;  %v5802_v32 = vadd.f32 %v16314_v54, %v5701_v58  ;;  %v6567_v56 = vpop.permute.xlu0 %6566 }
 0x91e   :  { %v5795_v63 = vpop.f32.mrf.mxu0  ;;  %16348 = vmatpush3.msra.mxu1 %v6098_v8 }
 0x91f   :  { %5902 = vxpose.xlu1.b32.start [1/4] (short) (narrow) %v5877_v3, 32  ;;  %v5796_v37 = vadd.f32 %v5795_v63, %v5693_v29  ;;  %16349 = vmatprep.subr.mxu1 %v6105_v26  ;;  %v5895_v20 = vadd.f32 %v16328_v27, %v5802_v32  ;;  %v6571_v3 = vpop.permute.xlu1 %6570 }
 0x920   :  { %16350 = vmatpush3.msra.mxu1 %v6105_v26  ;;  %v19593_v49 = vand.u32 4294901760, %v6571_v3 }
 0x921   :  { %16371 = vmatprep.subr.mxu1 %v19510_v28  ;;  %v5889_v24 = vadd.f32 %v5888_v35, %v5796_v37 }
 0x923   :  { %5903 = vxpose.xlu1.b32.cont [2/4] (short) (narrow) %v5883_v41, 32 }
 0x927   :  { %5904 = vxpose.xlu1.b32.cont [3/4] (short) (narrow) %v5889_v24, 32 }
 0x92b   :  { %5905 = vxpose.xlu1.b32.end [4/4] (short) (narrow) %v5895_v20, 32  ;;  %v19608_v20 = vsub.f32 %v6571_v3, %v19593_v49 }
 0x99b   :  { %v5918_v17 = vpop.trf.xlu1 }
 0x99c   :  { %v5935_v40 = vsel %vm144_vm0, %v5918_v17, 0  ;;  %v19610_v17 = vand.u32 4294901760, %v6569_v10 }
 0x99d   :  { %v19571_v14 = vand.u32 4294901760, %v5935_v40 }
 0x99f   :  { %v19574_v43 = vsub.f32 %v5935_v40, %v19571_v14  ;;  %v5919_v0 = vpop.trf.xlu1  ;;  %16351 = vmatprep.mubr.f32.mxu1 %v19571_v14 }
 0x9a0   :  { %v5938_v41 = vsel %vm144_vm0, %v5919_v0, 0 }
 0x9a1   :  { %v6017_v37 = vand.u32 4294901760, %v19574_v43  ;;  %v19579_v33 = vand.u32 4294901760, %v5938_v41 }
 0x9a3   :  { %v19582_v36 = vsub.f32 %v5938_v41, %v19579_v33  ;;  %v5920_v54 = vpop.trf.xlu1  ;;  %16352 = vmatmul.mubr.f32.vlgmr.msra.gmra.mxu1 %v19579_v33  ;;  %v6018_v23 = vsub.f32 %v19574_v43, %v6017_v37  ;;  %v19616_v41 = vand.u32 4294901760, %v6567_v56 }
 0x9a4   :  { %v5941_v50 = vsel %vm144_vm0, %v5920_v54, 0  ;;  %16372 = vmatpush3.msra.mxu1 %v19510_v28  ;;  %v6565_v54 = vpop.permute.xlu0 %6564 }
 0x9a5   :  { %v6027_v62 = vand.u32 4294901760, %v19582_v36  ;;  %v19589_v63 = vand.u32 4294901760, %v5941_v50  ;;  %16373 = vmatprep.subr.mxu1 %v19518_v2  ;;  %v6019_v8 = vand.u32 4294901760, %v6018_v23 }
 0x9a6   :  { %16374 = vmatpush3.msra.mxu1 %v19518_v2 }
 0x9a7   :  { %v6028_v29 = vsub.f32 %v19582_v36, %v6027_v62  ;;  %v19597_v27 = vsub.f32 %v5941_v50, %v19589_v63  ;;  %v5921_v26 = vpop.trf.xlu1  ;;  %16337 = vmatprep.mubr.f32.mxu0 %v6019_v8  ;;  %16354 = vmatprep.mubr.f32.mxu1 %v19589_v63  ;;  %v19622_v50 = vsub.f32 %v6569_v10, %v19610_v17 }
 0x9a8   :  { %v5944_v58 = vsel %vm144_vm0, %v5921_v26, 0  ;;  %16375 = vmatprep.subr.mxu1 %v19531_v47 }
 0x9a9   :  { %v6029_v35 = vand.u32 4294901760, %v6028_v29  ;;  %v19602_v32 = vand.u32 4294901760, %v5944_v58  ;;  %16376 = vmatpush3.msra.mxu1 %v19531_v47  ;;  %v6037_v24 = vand.u32 4294901760, %v19597_v27  ;;  %v19628_v29 = vand.u32 4294901760, %v6565_v54 }
 0x9aa   :  { %16377 = vmatprep.subr.mxu1 %v19546_v38 }
 0x9ab   :  { %v6046_v40 = vsub.f32 %v5944_v58, %v19602_v32  ;;  %16338 = vmatmul.mubr.f32.vlgmr.msra.gmra.mxu0 %v6029_v35  ;;  %16355 = vmatmul.mubr.f32.gmra.mxu1 %v19602_v32  ;;  %v6038_v0 = vsub.f32 %v19597_v27, %v6037_v24  ;;  %v19644_v10 = vsub.f32 %v6565_v54, %v19628_v29 }
 0x9ac   :  { %16379 = vmatprep.mubr.f32.mxu1 %v6017_v37  ;;  %16378 = vmatpush3.msra.mxu1 %v19546_v38  ;;  %v19626_v37 = vand.u32 4294901760, %v19608_v20 }
 0x9ad   :  { %v6047_v23 = vand.u32 4294901760, %v6046_v40  ;;  %16399 = vmatprep.subr.mxu1 %v19510_v28  ;;  %16358 = vmatpush3.msra.mxu0 %v19516_v61  ;;  %v6039_v3 = vand.u32 4294901760, %v6038_v0  ;;  %v19632_v61 = vsub.f32 %v6567_v56, %v19616_v41 }
 0x9ae   :  { %16359 = vmatprep.subr.mxu0 %v19529_v11 }
 0x9af   :  { %v6048_v8 = vsub.f32 %v6046_v40, %v6047_v23  ;;  %16380 = vmatmul.mubr.f32.vlgmr.msra.gmra.mxu1 %v6027_v62  ;;  %16360 = vmatpush3.msra.mxu0 %v19529_v11  ;;  %v6713_v11 = vsub.f32 %v19608_v20, %v19626_v37 }
 0x9b0   :  { %16400 = vmatpush3.msra.mxu1 %v19510_v28  ;;  %16382 = vmatprep.mubr.f32.mxu1 %v6037_v24  ;;  %v19641_v28 = vand.u32 4294901760, %v19622_v50 }
 0x9b1   :  { %v6049_v26 = vand.u32 4294901760, %v6048_v8  ;;  %16401 = vmatprep.subr.mxu1 %v19518_v2  ;;  %16340 = vmatprep.mubr.f32.mxu0 %v6039_v3  ;;  %v6714_v62 = vand.u32 4294901760, %v6713_v11 }
 0x9b2   :  { %16402 = vmatpush3.msra.mxu1 %v19518_v2  ;;  %16361 = vmatprep.subr.mxu0 %v19544_v15  ;;  %v19650_v2 = vand.u32 4294901760, %v19632_v61 }
 0x9b3   :  { %16403 = vmatprep.subr.mxu1 %v19531_v47  ;;  %16341 = vmatmul.mubr.f32.gmra.mxu0 %v6049_v26 }
 0x9b4   :  { %16362 = vmatpush3.msra.mxu0 %v19544_v15  ;;  %16383 = vmatmul.mubr.f32.gmra.mxu1 %v6047_v23  ;;  %v6720_v15 = vsub.f32 %v19622_v50, %v19641_v28 }
 0x9b5   :  { %16404 = vmatpush3.msra.mxu1 %v19531_v47  ;;  %16363 = vmatprep.subr.mxu0 %v19556_v52  ;;  %v19661_v47 = vand.u32 4294901760, %v19644_v10 }
 0x9b6   :  { %16365 = vmatprep.mubr.f32.mxu0 %v19574_v43  ;;  %16405 = vmatprep.subr.mxu1 %v19546_v38  ;;  %v6727_v43 = vsub.f32 %v19632_v61, %v19650_v2 }
 0x9b7   :  { %16407 = vmatprep.mubr.f32.mxu1 %v19571_v14  ;;  %16364 = vmatpush3.msra.mxu0 %v19556_v52  ;;  %v6721_v52 = vand.u32 4294901760, %v6720_v15 }
 0x9b8   :  { %16406 = vmatpush3.msra.mxu1 %v19546_v38  ;;  %16385 = vmatprep.subr.mxu0 %v19526_v16  ;;  %v6734_v38 = vsub.f32 %v19644_v10, %v19661_v47 }
 0x9b9   :  { %16427 = vmatprep.subr.mxu1 %v6714_v62  ;;  %16366 = vmatmul.mubr.f32.vlgmr.msra.gmra.mxu0 %v19582_v36  ;;  %v6728_v36 = vand.u32 4294901760, %v6727_v43 }
 0x9ba   :  { %16386 = vmatpush3.msra.mxu0 %v19526_v16  ;;  %16408 = vmatmul.mubr.f32.vlgmr.msra.gmra.mxu1 %v19579_v33  ;;  %v6735_v16 = vand.u32 4294901760, %v6734_v38 }
 0x9bb   :  { %16428 = vmatpush3.msra.mxu1 %v6714_v62  ;;  %16368 = vmatprep.mubr.f32.mxu0 %v19597_v27  ;;  %v7193_v62 = vld [vmem:[%s24157_s3 + $0x78] sm:$0xff] }
 0x9bc   :  { %16387 = vmatprep.subr.mxu0 %v19541_v34  ;;  %16410 = vmatprep.mubr.f32.mxu1 %v19589_v63 }
 0x9bd   :  { %16429 = vmatprep.subr.mxu1 %v6721_v52  ;;  %16388 = vmatpush3.msra.mxu0 %v19541_v34 }
 0x9be   :  { %16430 = vmatpush3.msra.mxu1 %v6721_v52  ;;  %16389 = vmatprep.subr.mxu0 %v19553_v12 }
 0x9bf   :  { %16431 = vmatprep.subr.mxu1 %v6728_v36  ;;  %16369 = vmatmul.mubr.f32.gmra.mxu0 %v6046_v40 }
 0x9c0   :  { %16390 = vmatpush3.msra.mxu0 %v19553_v12  ;;  %16411 = vmatmul.mubr.f32.gmra.mxu1 %v19602_v32 }
 0x9c1   :  { %16432 = vmatpush3.msra.mxu1 %v6728_v36  ;;  %16391 = vmatprep.subr.mxu0 %v19563_v22 }
 0x9c2   :  { %16393 = vmatprep.mubr.f32.mxu0 %v19571_v14  ;;  %16433 = vmatprep.subr.mxu1 %v6735_v16 }
 0x9c3   :  { %16435 = vmatprep.mubr.f32.mxu1 %v19405_v59  ;;  %16392 = vmatpush3.msra.mxu0 %v19563_v22 }
 0x9c4   :  { %16434 = vmatpush3.msra.mxu1 %v6735_v16  ;;  %16413 = vmatprep.subr.mxu0 %v19593_v49 }
 0x9c5   :  { %16455 = vmatprep.subr.mxu1 %v19593_v49  ;;  %16394 = vmatmul.mubr.f32.vlgmr.msra.gmra.mxu0 %v19579_v33 }
 0x9c6   :  { %16414 = vmatpush3.msra.mxu0 %v19593_v49  ;;  %16436 = vmatmul.mubr.f32.vlgmr.msra.gmra.mxu1 %v19397_v30 }
 0x9c7   :  { %16456 = vmatpush3.msra.mxu1 %v19593_v49  ;;  %16396 = vmatprep.mubr.f32.mxu0 %v19589_v63 }
 0x9c8   :  { %16415 = vmatprep.subr.mxu0 %v19610_v17  ;;  %16438 = vmatprep.mubr.f32.mxu1 %v19421_v13 }
 0x9c9   :  { %16457 = vmatprep.subr.mxu1 %v19610_v17  ;;  %16416 = vmatpush3.msra.mxu0 %v19610_v17 }
 0x9ca   :  { %16458 = vmatpush3.msra.mxu1 %v19610_v17  ;;  %16417 = vmatprep.subr.mxu0 %v19616_v41 }
 0x9cb   :  { %16459 = vmatprep.subr.mxu1 %v19616_v41  ;;  %16397 = vmatmul.mubr.f32.gmra.mxu0 %v19602_v32 }
 0x9cc   :  { %16418 = vmatpush3.msra.mxu0 %v19616_v41  ;;  %16439 = vmatmul.mubr.f32.gmra.mxu1 %v19415_v18 }
 0x9cd   :  { %16460 = vmatpush3.msra.mxu1 %v19616_v41  ;;  %16419 = vmatprep.subr.mxu0 %v19628_v29 }
 0x9ce   :  { %16421 = vmatprep.mubr.f32.mxu0 %v19439_v25  ;;  %16461 = vmatprep.subr.mxu1 %v19628_v29 }
 0x9cf   :  { %16463 = vmatprep.mubr.f32.mxu1 %v19419_v48  ;;  %16420 = vmatpush3.msra.mxu0 %v19628_v29 }
 0x9d0   :  { %16462 = vmatpush3.msra.mxu1 %v19628_v29  ;;  %16441 = vmatprep.subr.mxu0 %v19608_v20 }
 0x9d1   :  { %16483 = vmatprep.subr.mxu1 %v19593_v49  ;;  %16422 = vmatmul.mubr.f32.vlgmr.msra.gmra.mxu0 %v19446_v4 }
 0x9d2   :  { %16442 = vmatpush3.msra.mxu0 %v19608_v20  ;;  %16464 = vmatmul.mubr.f32.vlgmr.msra.gmra.mxu1 %v19412_v55 }
 0x9d3   :  { %16484 = vmatpush3.msra.mxu1 %v19593_v49  ;;  %16424 = vmatprep.mubr.f32.mxu0 %v19463_v46 }
 0x9d4   :  { %16443 = vmatprep.subr.mxu0 %v19622_v50  ;;  %16466 = vmatprep.mubr.f32.mxu1 %v19449_v53 }
 0x9d5   :  { %16485 = vmatprep.subr.mxu1 %v19610_v17  ;;  %16444 = vmatpush3.msra.mxu0 %v19622_v50 }
 0x9d6   :  { %16486 = vmatpush3.msra.mxu1 %v19610_v17  ;;  %16445 = vmatprep.subr.mxu0 %v19632_v61 }
 0x9d7   :  { %16487 = vmatprep.subr.mxu1 %v19616_v41  ;;  %16425 = vmatmul.mubr.f32.gmra.mxu0 %v19465_v60 }
 0x9d8   :  { %16446 = vmatpush3.msra.mxu0 %v19632_v61  ;;  %16467 = vmatmul.mubr.f32.gmra.mxu1 %v19442_v42 }
 0x9d9   :  { %16488 = vmatpush3.msra.mxu1 %v19616_v41  ;;  %16447 = vmatprep.subr.mxu0 %v19644_v10 }
 0x9da   :  { %16449 = vmatprep.mubr.f32.mxu0 %v19409_v19  ;;  %16489 = vmatprep.subr.mxu1 %v19628_v29 }
 0x9db   :  { %16491 = vmatprep.mubr.f32.mxu1 %v19405_v59  ;;  %16448 = vmatpush3.msra.mxu0 %v19644_v10 }
 0x9dc   :  { %16490 = vmatpush3.msra.mxu1 %v19628_v29  ;;  %16469 = vmatprep.subr.mxu0 %v19626_v37 }
 0x9dd   :  { %16450 = vmatmul.mubr.f32.vlgmr.msra.gmra.mxu0 %v19403_v45  ;;  %16492 = vmatmul.mubr.f32.vlgmr.msra.gmra.mxu1 %v19397_v30 }
 0x9de   :  { %16470 = vmatpush3.msra.mxu0 %v19626_v37  ;;  %16452 = vmatprep.mubr.f32.mxu0 %v19436_v7 }
 0x9df   :  { %16471 = vmatprep.subr.mxu0 %v19641_v28  ;;  %16494 = vmatprep.mubr.f32.mxu1 %v19421_v13 }
 0x9e0   :  { %16472 = vmatpush3.msra.mxu0 %v19641_v28 }
 0x9e1   :  { %16473 = vmatprep.subr.mxu0 %v19650_v2  ;;  %16453 = vmatmul.mubr.f32.gmra.mxu0 %v19431_v39 }
 0x9e2   :  { %16474 = vmatpush3.msra.mxu0 %v19650_v2  ;;  %16495 = vmatmul.mubr.f32.gmra.mxu1 %v19415_v18 }
 0x9e3   :  { %16475 = vmatprep.subr.mxu0 %v19661_v47  ;;  %16477 = vmatprep.mubr.f32.mxu0 %v19405_v59 }
 0x9e4   :  { %16476 = vmatpush3.msra.mxu0 %v19661_v47  ;;  %v19782_v47 = vand.u32 4294901760, %v7193_v62 }
 0x9e5   :  { %16478 = vmatmul.mubr.f32.vlgmr.msra.gmra.mxu0 %v19397_v30 }
 0x9e6   :  { %16480 = vmatprep.mubr.f32.mxu0 %v19421_v13  ;;  %v19788_v36 = vsub.f32 %v7193_v62, %v19782_v47  ;;  %16497 = vmatprep.subr.mxu0 %v19782_v47 }
 0x9e7   :  { %16498 = vmatpush3.msra.mxu0 %v19782_v47 }
 0x9e9   :  { %16481 = vmatmul.mubr.f32.gmra.mxu0 %v19415_v18 }
 0xa63   :  { %v16353_v12 = vpop.f32.mrf.mxu1 }
 0xa65   :  { %v19747_v34 = vpop.f32.mrf.mxu1 }
 0xa6b   :  { %v16339_v45 = vpop.f32.mrf.mxu0  ;;  %v16356_v19 = vpop.f32.mrf.mxu1 }
 0xa6c   :  { %v6149_v55 = vadd.f32 %v16353_v12, %v16339_v45 }
 0xa6d   :  { %v19749_v48 = vpop.f32.mrf.mxu1  ;;  %v19751_v7 = vpop.f32.mrf.mxu0 }
 0xa6f   :  { %v16381_v39 = vpop.f32.mrf.mxu1 }
 0xa71   :  { %v19753_v59 = vpop.f32.mrf.mxu1 }
 0xa73   :  { %v16342_v25 = vpop.f32.mrf.mxu0 }
 0xa74   :  { %v6161_v42 = vadd.f32 %v16356_v19, %v16342_v25  ;;  %v16384_v30 = vpop.f32.mrf.mxu1  ;;  %v7191_v19 = vld [vmem:[%s24157_s3 + $0x68] sm:$0xff] }
 0xa75   :  { %v19755_v4 = vpop.f32.mrf.mxu0 }
 0xa76   :  { %v19757_v13 = vpop.f32.mrf.mxu1 }
 0xa79   :  { %v16367_v18 = vpop.f32.mrf.mxu0 }
 0xa7a   :  { %v6248_v53 = vadd.f32 %v16367_v18, %v6149_v55  ;;  %v16409_v46 = vpop.f32.mrf.mxu1  ;;  %v7190_v18 = vld [vmem:[%s24157_s3 + $0x60] sm:$0xff] }
 0xa7b   :  { %v19759_v60 = vpop.f32.mrf.mxu0 }
 0xa7c   :  { %v19761_v22 = vpop.f32.mrf.mxu1  ;;  %v6347_v14 = vadd.f32 %v16381_v39, %v6248_v53  ;;  %v19798_v39 = vand.u32 4294901760, %v19788_v36 }
 0xa7f   :  { %v16370_v33 = vpop.f32.mrf.mxu0 }
 0xa80   :  { %v6262_v63 = vadd.f32 %v16370_v33, %v6161_v42  ;;  %v16412_v49 = vpop.f32.mrf.mxu1  ;;  %v19803_v42 = vand.u32 4294901760, %v7191_v19 }
 0xa81   :  { %v19763_v56 = vpop.f32.mrf.mxu0 }
 0xa82   :  { %v19765_v27 = vpop.f32.mrf.mxu1  ;;  %v6363_v58 = vadd.f32 %v16384_v30, %v6262_v63  ;;  %v19816_v63 = vsub.f32 %v7191_v19, %v19803_v42 }
 0xa85   :  { %v16395_v35 = vpop.f32.mrf.mxu0 }
 0xa86   :  { %v6452_v32 = vadd.f32 %v16395_v35, %v6347_v14  ;;  %v16437_v24 = vpop.f32.mrf.mxu1  ;;  %v7375_v14 = vsub.f32 %v19788_v36, %v19798_v39 }
 0xa87   :  { %v19767_v20 = vpop.f32.mrf.mxu0 }
 0xa88   :  { %v6545_v17 = vadd.f32 %v16409_v46, %v6452_v32  ;;  %v6772_v40 = vpop.f32.mrf.mxu1 }
 0xa8a   :  { %v19770_v0 = vadd.f32 %v6545_v17, %v19297_v44 }
 0xa8b   :  { %v16398_v41 = vpop.f32.mrf.mxu0 }
 0xa8c   :  { %v6464_v54 = vadd.f32 %v16398_v41, %v6363_v58  ;;  %v16440_v23 = vpop.f32.mrf.mxu1 }
 0xa8d   :  { %v19772_v3 = vpop.f32.mrf.mxu0 }
 0xa8e   :  { %v6557_v50 = vadd.f32 %v16412_v49, %v6464_v54  ;;  %v6784_v37 = vpop.f32.mrf.mxu1  ;;  %v19818_v49 = vand.u32 4294901760, %v7190_v18 }
 0xa90   :  { %v19775_v8 = vadd.f32 %v6557_v50, %v19299_v51  ;;  %v7192_v51 = vld [vmem:[%s24157_s3 + $0x70] sm:$0xff]  ;;  %v19828_v41 = vsub.f32 %v7190_v18, %v19818_v49 }
 0xa91   :  { %v16423_v29 = vpop.f32.mrf.mxu0  ;;  %v19790_v16 = vand.u32 4294901760, %v7192_v51 }
 0xa92   :  { %v16465_v26 = vpop.f32.mrf.mxu1  ;;  %v6779_v12 = vadd.f32 %v16437_v24, %v16423_v29  ;;  %v7376_v24 = vand.u32 4294901760, %v7375_v14 }
 0xa93   :  { %v6651_v61 = vpop.f32.mrf.mxu0  ;;  %v19801_v25 = vsub.f32 %v7192_v51, %v19790_v16  ;;  %16499 = vmatprep.subr.mxu0 %v19790_v16 }
 0xa94   :  { %v6968_v28 = vpop.f32.mrf.mxu1  ;;  %v6773_v43 = vadd.f32 %v6772_v40, %v6651_v61  ;;  %16500 = vmatpush3.msra.mxu0 %v19790_v16  ;;  %v19825_v40 = vand.u32 4294901760, %v19816_v63  ;;  %16511 = vmatprep.subr.mxu1 %v7376_v24 }
 0xa95   :  { %v19813_v33 = vand.u32 4294901760, %v19801_v25  ;;  %16501 = vmatprep.subr.mxu0 %v19803_v42  ;;  %16512 = vmatpush3.msra.mxu1 %v7376_v24 }
 0xa96   :  { %16502 = vmatpush3.msra.mxu0 %v19803_v42 }
 0xa97   :  { %v16426_v11 = vpop.f32.mrf.mxu0  ;;  %v7382_v17 = vsub.f32 %v19801_v25, %v19813_v33  ;;  %16503 = vmatprep.subr.mxu0 %v19818_v49 }
 0xa98   :  { %v19777_v2 = vpop.f32.mrf.mxu1  ;;  %16504 = vmatpush3.msra.mxu0 %v19818_v49  ;;  %v6791_v62 = vadd.f32 %v16440_v23, %v16426_v11 }
 0xa99   :  { %v6671_v10 = vpop.f32.mrf.mxu0  ;;  %16525 = vmatprep.subr.mxu0 %v19788_v36 }
 0xa9a   :  { %v6984_v52 = vpop.f32.mrf.mxu1  ;;  %v6785_v58 = vadd.f32 %v6784_v37, %v6671_v10  ;;  %v7389_v10 = vsub.f32 %v19816_v63, %v19825_v40 }
 0xa9c   :  { %v7390_v51 = vand.u32 4294901760, %v7389_v10 }
 0xa9d   :  { %v16451_v44 = vpop.f32.mrf.mxu0  ;;  %v16493_v53 = vpop.f32.mrf.mxu1 }
 0xa9e   :  { %v6878_v30 = vadd.f32 %v16451_v44, %v6779_v12  ;;  %v19835_v44 = vand.u32 4294901760, %v19828_v41 }
 0xa9f   :  { %v6870_v15 = vpop.f32.mrf.mxu0  ;;  %v7168_v37 = vpop.f32.mrf.mxu1 }
 0xaa0   :  { %v6871_v45 = vadd.f32 %v6870_v15, %v6773_v43  ;;  %v6977_v50 = vadd.f32 %v16465_v26, %v6878_v30  ;;  %v7396_v12 = vsub.f32 %v19828_v41, %v19835_v44 }
 0xaa1   :  { %v16454_v38 = vpop.f32.mrf.mxu0 }
 0xaa2   :  { %v6969_v35 = vadd.f32 %v6968_v28, %v6871_v45  ;;  %v7383_v28 = vand.u32 4294901760, %v7382_v17  ;;  %v6892_v45 = vadd.f32 %v16454_v38, %v6791_v62  ;;  %v7397_v30 = vand.u32 4294901760, %v7396_v12 }
 0xaa3   :  { %v6884_v55 = vpop.f32.mrf.mxu0 }
 0xaa4   :  { %v6885_v54 = vadd.f32 %v6884_v55, %v6785_v58  ;;  %16513 = vmatprep.subr.mxu1 %v7383_v28  ;;  %v16496_v55 = vpop.f32.mrf.mxu1  ;;  %v6993_v23 = vadd.f32 %v19777_v2, %v6892_v45 }
 0xaa5   :  { %v16479_v46 = vpop.f32.mrf.mxu0  ;;  %16514 = vmatpush3.msra.mxu1 %v7383_v28 }
 0xaa6   :  { %v7082_v15 = vadd.f32 %v16479_v46, %v6977_v50  ;;  %v6985_v19 = vadd.f32 %v6984_v52, %v6885_v54  ;;  %16515 = vmatprep.subr.mxu1 %v7390_v51  ;;  %v7180_v11 = vpop.f32.mrf.mxu1 }
 0xaa7   :  { %v7075_v32 = vpop.f32.mrf.mxu0  ;;  %16516 = vmatpush3.msra.mxu1 %v7390_v51 }
 0xaa8   :  { %v7076_v29 = vadd.f32 %v7075_v32, %v6969_v35  ;;  %v7175_v18 = vadd.f32 %v16493_v53, %v7082_v15  ;;  %16517 = vmatprep.subr.mxu1 %v7397_v30 }
 0xaa9   :  { %v16482_v61 = vpop.f32.mrf.mxu0  ;;  %16518 = vmatpush3.msra.mxu1 %v7397_v30 }
 0xaaa   :  { %v7169_v43 = vadd.f32 %v7168_v37, %v7076_v29  ;;  %16539 = vmatprep.subr.mxu1 %v19782_v47  ;;  %v7094_v46 = vadd.f32 %v16482_v61, %v6993_v23 }
 0xaab   :  { %v7087_v26 = vpop.f32.mrf.mxu0 }
 0xaac   :  { %7194 = vxpose.xlu0.b32.start [1/4] (short) (narrow) %v7169_v43, 32  ;;  %v7088_v14 = vadd.f32 %v7087_v26, %v6985_v19  ;;  %v7187_v52 = vadd.f32 %v16496_v55, %v7094_v46  ;;  %v17682_v46 = vld [vmem:[%s24156_s1 + $0x18] sm:$0xff] }
 0xaae   :  { %v7181_v58 = vadd.f32 %v7180_v11, %v7088_v14 }
 0xab0   :  { %7195 = vxpose.xlu0.b32.cont [2/4] (short) (narrow) %v7175_v18, 32 }
 0xab4   :  { %7196 = vxpose.xlu0.b32.cont [3/4] (short) (narrow) %v7181_v58, 32  ;;  %v17775_v58 = vmov 4  }
 0xab8   :  { %7197 = vxpose.xlu0.b32.end [4/4] (short) (narrow) %v7187_v52, 32  ;;  %v17776_v52 = vmov 5  }
 0xb28   :  { %v7210_v38 = vpop.trf.xlu0 }
 0xb29   :  { %v7227_v35 = vsel %vm144_vm0, %v7210_v38, 0  ;;  %v3399_v38 = vadd.f32 %v19253_v9, %v19257_v57  ;;  %v24452_v57 = vld [vmem:[#allocation7_spill] sm:$0xff] }
 0xb2a   :  { %v19843_v32 = vand.u32 4294901760, %v7227_v35 }
 0xb2c   :  { %v7308_v53 = vsub.f32 %v7227_v35, %v19843_v32  ;;  %v7211_v24 = vpop.trf.xlu0  ;;  %16519 = vmatprep.mubr.f32.mxu1 %v19843_v32 }
 0xb2d   :  { %v7230_v2 = vsel %vm144_vm0, %v7211_v24, 0 }
 0xb2e   :  { %v7309_v17 = vand.u32 4294901760, %v7308_v53  ;;  %v19848_v54 = vand.u32 4294901760, %v7230_v2 }
 0xb30   :  { %v7318_v50 = vsub.f32 %v7230_v2, %v19848_v54  ;;  %v7212_v29 = vpop.trf.xlu0  ;;  %16520 = vmatmul.mubr.f32.vlgmr.msra.gmra.mxu1 %v19848_v54  ;;  %v7310_v37 = vsub.f32 %v7308_v53, %v7309_v17 }
 0xb31   :  { %v7233_v61 = vsel %vm144_vm0, %v7212_v29, 0  ;;  %16540 = vmatpush3.msra.mxu1 %v19782_v47 }
 0xb32   :  { %v7319_v28 = vand.u32 4294901760, %v7318_v50  ;;  %v19854_v10 = vand.u32 4294901760, %v7233_v61  ;;  %16541 = vmatprep.subr.mxu1 %v19790_v16  ;;  %v7311_v62 = vand.u32 4294901760, %v7310_v37 }
 0xb33   :  { %16542 = vmatpush3.msra.mxu1 %v19790_v16 }
 0xb34   :  { %v7320_v15 = vsub.f32 %v7318_v50, %v7319_v28  ;;  %v7328_v43 = vsub.f32 %v7233_v61, %v19854_v10  ;;  %v7213_v26 = vpop.trf.xlu0  ;;  %16505 = vmatprep.mubr.f32.mxu0 %v7311_v62  ;;  %16522 = vmatprep.mubr.f32.mxu1 %v19854_v10 }
 0xb35   :  { %v7236_v51 = vsel %vm144_vm0, %v7213_v26, 0  ;;  %16543 = vmatprep.subr.mxu1 %v19803_v42 }
 0xb36   :  { %v7321_v12 = vand.u32 4294901760, %v7320_v15  ;;  %v7337_v45 = vand.u32 4294901760, %v7236_v51  ;;  %16544 = vmatpush3.msra.mxu1 %v19803_v42  ;;  %v7329_v19 = vand.u32 4294901760, %v7328_v43  ;;  %v24453_v15 = vld [vmem:[#allocation12_spill] sm:$0xff] }
 0xb37   :  { %16545 = vmatprep.subr.mxu1 %v19818_v49 }
 0xb38   :  { %v7338_v55 = vsub.f32 %v7236_v51, %v7337_v45  ;;  %16506 = vmatmul.mubr.f32.vlgmr.msra.gmra.mxu0 %v7321_v12  ;;  %16523 = vmatmul.mubr.f32.gmra.mxu1 %v7337_v45  ;;  %v7330_v30 = vsub.f32 %v7328_v43, %v7329_v19 }
 0xb39   :  { %16547 = vmatprep.mubr.f32.mxu1 %v7309_v17  ;;  %16546 = vmatpush3.msra.mxu1 %v19818_v49 }
 0xb3a   :  { %v7339_v18 = vand.u32 4294901760, %v7338_v55  ;;  %16567 = vmatprep.subr.mxu1 %v19782_v47  ;;  %16526 = vmatpush3.msra.mxu0 %v19788_v36  ;;  %v7331_v14 = vand.u32 4294901760, %v7330_v30 }
 0xb3b   :  { %16527 = vmatprep.subr.mxu0 %v19801_v25 }
 0xb3c   :  { %v7340_v23 = vsub.f32 %v7338_v55, %v7339_v18  ;;  %16548 = vmatmul.mubr.f32.vlgmr.msra.gmra.mxu1 %v7319_v28  ;;  %16508 = vmatprep.mubr.f32.mxu0 %v7331_v14  ;;  %v24451_v28 = vld [vmem:[#allocation3_spill] sm:$0xff] }
 0xb3d   :  { %16550 = vmatprep.mubr.f32.mxu1 %v7329_v19  ;;  %16568 = vmatpush3.msra.mxu1 %v19782_v47  ;;  %v7856_v47 = vld [vmem:[%s24155_s2 + $0x60] sm:$0xff] }
 0xb3e   :  { %v7341_v11 = vand.u32 4294901760, %v7340_v23  ;;  %16569 = vmatprep.subr.mxu1 %v19790_v16  ;;  %16528 = vmatpush3.msra.mxu0 %v19801_v25  ;;  %v7877_v36 = vsel %vm144_vm0, %v7856_v47, 0  ;;  %v24458_v47 = vld [vmem:[#allocation11_spill] sm:$0xff] }
 0xb3f   :  { %16570 = vmatpush3.msra.mxu1 %v19790_v16  ;;  %16529 = vmatprep.subr.mxu0 %v19816_v63  ;;  %v19898_v16 = vand.u32 4294901760, %v7877_v36 }
 0xb40   :  { %16509 = vmatmul.mubr.f32.gmra.mxu0 %v7341_v11  ;;  %16551 = vmatmul.mubr.f32.gmra.mxu1 %v7339_v18  ;;  %v24457_v18 = vld [vmem:[#allocation13_spill] sm:$0xff] }
 0xb41   :  { %16571 = vmatprep.subr.mxu1 %v19803_v42  ;;  %16530 = vmatpush3.msra.mxu0 %v19816_v63  ;;  %v17773_v63 = vmov 2  }
 0xb42   :  { %16533 = vmatprep.mubr.f32.mxu0 %v7308_v53  ;;  %16572 = vmatpush3.msra.mxu1 %v19803_v42  ;;  %v3411_v53 = vadd.f32 %v19255_v5, %v19261_v21  ;;  %v24454_v5 = vld [vmem:[#allocation10_spill] sm:$0xff] }
 0xb43   :  { %16575 = vmatprep.mubr.f32.mxu1 %v19843_v32  ;;  %16531 = vmatprep.subr.mxu0 %v19828_v41 }
 0xb44   :  { %16573 = vmatprep.subr.mxu1 %v19818_v49  ;;  %16532 = vmatpush3.msra.mxu0 %v19828_v41  ;;  %v17681_v41 = vld [vmem:[%s24156_s1 + $0x10] sm:$0xff]  ;;  %v3511_v2 = vadd.f32 %v19269_v1, %v3411_v53 }
 0xb45   :  { %16574 = vmatpush3.msra.mxu1 %v19818_v49  ;;  %16534 = vmatmul.mubr.f32.vlgmr.msra.gmra.mxu0 %v7318_v50  ;;  %v17679_v49 = vld [vmem:[%s24156_s1 + $0x8] sm:$0xff]  ;;  %v24450_v50 = vld [vmem:[#allocation5_spill] sm:$0xff] }
 0xb46   :  { %16553 = vmatprep.subr.mxu0 %v19798_v39  ;;  %16576 = vmatmul.mubr.f32.vlgmr.msra.gmra.mxu1 %v19848_v54  ;;  %v24455_v1 = vld [vmem:[#allocation9_spill] sm:$0xff] }
 0xb47   :  { %16536 = vmatprep.mubr.f32.mxu0 %v7328_v43  ;;  %16554 = vmatpush3.msra.mxu0 %v19798_v39  ;;  %v19901_v39 = vsub.f32 %v7877_v36, %v19898_v16 }
 0xb48   :  { %16578 = vmatprep.mubr.f32.mxu1 %v19854_v10  ;;  %16555 = vmatprep.subr.mxu0 %v19813_v33 }
 0xb49   :  { %16556 = vmatpush3.msra.mxu0 %v19813_v33  ;;  %v7959_v25 = vand.u32 4294901760, %v19901_v39  ;;  %17521 = vset.pattern.permute.xlu1 %v17773_v63 }
 0xb4a   :  { %16537 = vmatmul.mubr.f32.gmra.mxu0 %v7338_v55  ;;  %16557 = vmatprep.subr.mxu0 %v19825_v40  ;;  %v24456_v55 = vld [vmem:[#allocation8_spill] sm:$0xff] }
 0xb4b   :  { %16579 = vmatmul.mubr.f32.gmra.mxu1 %v7337_v45  ;;  %16558 = vmatpush3.msra.mxu0 %v19825_v40  ;;  %v7960_v42 = vsub.f32 %v19901_v39, %v7959_v25  ;;  %v17680_v40 = vld [vmem:[%s24156_s1] sm:$0xff] }
 0xb4c   :  { %16561 = vmatprep.mubr.f32.mxu0 %v19843_v32  ;;  %16559 = vmatprep.subr.mxu0 %v19835_v44  ;;  %v3497_v32 = vadd.f32 %v19265_v6, %v3399_v38 }
 0xb4d   :  { %16560 = vmatpush3.msra.mxu0 %v19835_v44  ;;  %16603 = vmatprep.mubr.f32.mxu1 %v19898_v16  ;;  %v7961_v33 = vand.u32 4294901760, %v7960_v42  ;;  %v17774_v44 = vmov 3   ;;  %v6155_v42 = vadd.f32 %v19749_v48, %v19755_v4  ;;  %v7857_v48 = vld [vmem:[%s24155_s2 + $0x68] sm:$0xff] }
 0xb4e   :  { %16562 = vmatmul.mubr.f32.vlgmr.msra.gmra.mxu0 %v19848_v54  ;;  %17520 = vset.pattern.permute.xlu0 %v17773_v63  ;;  %v3595_v17 = vadd.f32 %v19259_v31, %v3497_v32  ;;  %v6143_v31 = vadd.f32 %v19747_v34, %v19751_v7 }
 0xb4f   :  { %16564 = vmatprep.mubr.f32.mxu0 %v19854_v10  ;;  %7865 = vperm.xlu1 %17521, %v17679_v49   ;;  %v3611_v10 = vadd.f32 %v24451_v28, %v3511_v2  ;;  %v6255_v34 = vadd.f32 %v19763_v56, %v6155_v42  ;;  %v7880_v28 = vsel %vm144_vm0, %v7857_v48, 0 }
 0xb50   :  { %7861 = vperm.xlu0 %17520, %v17680_v40   ;;  %v3702_v29 = vadd.f32 %v24450_v50, %v3595_v17  ;;  %v6241_v23 = vadd.f32 %v19759_v60, %v6143_v31  ;;  %v24461_v60 = vld [vmem:[#allocation6_spill] sm:$0xff]  ;;  %v24462_v17 = vld [vmem:[#allocation17_spill] sm:$0xff] }
 0xb51   :  { %v3714_v62 = vadd.f32 %v24452_v57, %v3611_v10  ;;  %v7858_v50 = vld [vmem:[%s24155_s2 + $0x70] sm:$0xff]  ;;  %v24463_v10 = vld [vmem:[#allocation14_spill] sm:$0xff] }
 0xb52   :  { %16565 = vmatmul.mubr.f32.gmra.mxu0 %v7337_v45  ;;  %v3795_v6 = vadd.f32 %v24453_v15, %v3702_v29  ;;  %v6339_v7 = vadd.f32 %v19753_v59, %v6241_v23  ;;  %v6355_v59 = vadd.f32 %v19757_v13, %v6255_v34 }
 0xb53   :  { %16589 = vmatprep.mubr.f32.mxu0 %v7961_v33  ;;  %7869 = vperm.xlu1 %17521, %v17681_v41   ;;  %v3807_v12 = vadd.f32 %v24455_v1, %v3714_v62  ;;  %v24465_v1 = vld [vmem:[#allocation19_spill] sm:$0xff] }
 0xb54   :  { %17523 = vset.pattern.permute.xlu0 %v17774_v44  ;;  %v3936_v21 = vadd.f32 %v24454_v5, %v3795_v6  ;;  %v6446_v32 = vadd.f32 %v19767_v20, %v6339_v7 }
 0xb55   :  { %8507 = vperm.xlu0 %17523, %v17679_v49   ;;  %v3956_v30 = vadd.f32 %v24456_v55, %v3807_v12 }
 0xb56   :  { %v4057_v14 = vadd.f32 %v24457_v18, %v3936_v21  ;;  %v6539_v62 = vadd.f32 %v19761_v22, %v6446_v32  ;;  %v7883_v21 = vsel %vm144_vm0, %v7858_v50, 0 }
 0xb57   :  { %7873 = vperm.xlu1 %17521, %v17682_v46   ;;  %v19968_v23 = vand.u32 4294901760, %v7883_v21 }
 0xb58   :  { %v4155_v36 = vadd.f32 %v24458_v47, %v4057_v14 }
 0xb59   :  { %17524 = vset.pattern.permute.xlu0 %v17775_v58 }
 0xb5a   :  { %8573 = vperm.xlu0 %17524, %v17682_v46   ;;  %v4253_v38 = vadd.f32 %v24461_v60, %v4155_v36 }
 0xb5b   :  { %17522 = vset.pattern.permute.xlu1 %v17774_v44 }
 0xb5c   :  { %8503 = vperm.xlu1 %17522, %v17680_v40   ;;  %v4360_v56 = vadd.f32 %v24462_v17, %v4253_v38 }
 0xb5e   :  { %17527 = vset.pattern.permute.xlu0 %v17776_v52 }
 0xb5f   :  { %8589 = vperm.xlu0 %17527, %v17681_v41  }
 0xb60   :  { %8511 = vperm.xlu1 %17522, %v17681_v41  }
 0xb63   :  { %17529 = vset.pattern.permute.xlu0 %v17775_v58 }
 0xb64   :  { %8561 = vperm.xlu0 %17529, %v17680_v40   ;;  %8515 = vperm.xlu1 %17522, %v17682_v46  }
 0xb68   :  { %17525 = vset.pattern.permute.xlu1 %v17776_v52 }
 0xb69   :  { %8593 = vperm.xlu1 %17525, %v17682_v46  }
 0xb6d   :  { %17526 = vset.pattern.permute.xlu1 %v17775_v58  ;;  %v24460_v58 = vld [vmem:[#allocation15_spill] sm:$0xff] }
 0xb6e   :  { %8569 = vperm.xlu1 %17526, %v17681_v41  }
 0xb72   :  { %8565 = vperm.xlu1 %17526, %v17679_v49  }
 0xb76   :  { %17528 = vset.pattern.permute.xlu1 %v17776_v52 }
 0xb77   :  { %8585 = vperm.xlu1 %17528, %v17679_v49  }
 0xb7b   :  { %8581 = vperm.xlu1 %17528, %v17680_v40   ;;  %v24459_v40 = vld [vmem:[#allocation4_spill] sm:$0xff] }
 0xb7c   :  { %v4069_v41 = vadd.f32 %v24459_v40, %v3956_v30 }
 0xb7e   :  { %v4169_v52 = vadd.f32 %v24460_v58, %v4069_v41 }
 0xb80   :  { %v4269_v57 = vadd.f32 %v24463_v10, %v4169_v52 }
 0xb82   :  { %v4372_v12 = vadd.f32 %v24465_v1, %v4269_v57 }
 0xbf0   :  { %v16521_v35 = vpop.f32.mrf.mxu1 }
 0xbf2   :  { %v7434_v24 = vpop.f32.mrf.mxu1 }
 0xbf8   :  { %v16524_v54 = vpop.f32.mrf.mxu1  ;;  %v16507_v37 = vpop.f32.mrf.mxu0 }
 0xbf9   :  { %v7441_v63 = vadd.f32 %v16521_v35, %v16507_v37 }
 0xbfa   :  { %v7446_v61 = vpop.f32.mrf.mxu1  ;;  %v7313_v43 = vpop.f32.mrf.mxu0 }
 0xbfb   :  { %v7435_v44 = vadd.f32 %v7434_v24, %v7313_v43 }
 0xbfc   :  { %v16549_v9 = vpop.f32.mrf.mxu1 }
 0xbfe   :  { %v7630_v26 = vpop.f32.mrf.mxu1 }
 0xc00   :  { %v16510_v51 = vpop.f32.mrf.mxu0  ;;  %v16552_v45 = vpop.f32.mrf.mxu1 }
 0xc01   :  { %v7453_v4 = vadd.f32 %v16524_v54, %v16510_v51  ;;  %v6458_v54 = vadd.f32 %v19772_v3, %v6355_v59 }
 0xc02   :  { %v7333_v19 = vpop.f32.mrf.mxu0  ;;  %v7646_v33 = vpop.f32.mrf.mxu1 }
 0xc03   :  { %v7447_v29 = vadd.f32 %v7446_v61, %v7333_v19  ;;  %v7859_v61 = vld [vmem:[%s24155_s2 + $0x78] sm:$0xff]  ;;  %v19965_v19 = vand.u32 4294901760, %v7880_v28  ;;  %v6551_v18 = vadd.f32 %v19765_v27, %v6458_v54 }
 0xc05   :  { %v16535_v11 = vpop.f32.mrf.mxu0  ;;  %v19974_v34 = vsub.f32 %v7880_v28, %v19965_v19 }
 0xc06   :  { %v7540_v46 = vadd.f32 %v16535_v11, %v7441_v63  ;;  %v16577_v53 = vpop.f32.mrf.mxu1  ;;  %v7886_v11 = vsel %vm144_vm0, %v7859_v61, 0 }
 0xc07   :  { %v7532_v49 = vpop.f32.mrf.mxu0  ;;  %v7969_v32 = vand.u32 4294901760, %v19974_v34 }
 0xc08   :  { %v7533_v35 = vadd.f32 %v7532_v49, %v7435_v44  ;;  %v7639_v20 = vadd.f32 %v16549_v9, %v7540_v46  ;;  %v7830_v15 = vpop.f32.mrf.mxu1  ;;  %v24464_v9 = vld [vmem:[#allocation16_spill] sm:$0xff]  ;;  %v24466_v49 = vld [vmem:[#allocation18_spill] sm:$0xff]  ;;  %v19976_v44 = vand.u32 4294901760, %v7886_v11 }
 0xc09   :  { %v4453_v51 = vadd.f32 %v24464_v9, %v4360_v56  ;;  %v4465_v40 = vadd.f32 %v24466_v49, %v4372_v12  ;;  %v7970_v59 = vsub.f32 %v19974_v34, %v7969_v32 }
 0xc0a   :  { %v16538_v2 = vpop.f32.mrf.mxu0  ;;  %v7631_v5 = vadd.f32 %v7630_v26, %v7533_v35  ;;  %v19990_v48 = vsub.f32 %v7886_v11, %v19976_v44 }
 0xc0b   :  { %v7554_v37 = vadd.f32 %v16538_v2, %v7453_v4  ;;  %v6560_v30 = vadd.f32 %v6539_v62, %v4453_v51  ;;  %v16580_v26 = vpop.f32.mrf.mxu1  ;;  %v6562_v52 = vadd.f32 %v6551_v18, %v4465_v40  ;;  %v7971_v57 = vand.u32 4294901760, %v7970_v59 }
 0xc0c   :  { %v7546_v24 = vpop.f32.mrf.mxu0 }
 0xc0d   :  { %v7547_v43 = vadd.f32 %v7546_v24, %v7447_v29  ;;  %v7655_v55 = vadd.f32 %v16552_v45, %v7554_v37  ;;  %v7842_v46 = vpop.f32.mrf.mxu1  ;;  %v7989_v29 = vand.u32 4294901760, %v19990_v48 }
 0xc0e   :  { %v16563_v6 = vpop.f32.mrf.mxu0 }
 0xc0f   :  { %v7744_v13 = vadd.f32 %v16563_v6, %v7639_v20  ;;  %v7647_v63 = vadd.f32 %v7646_v33, %v7547_v43  ;;  %v19982_v33 = vsub.f32 %v7883_v21, %v19968_v23  ;;  %v7990_v6 = vsub.f32 %v19990_v48, %v7989_v29 }
 0xc10   :  { %v7737_v31 = vpop.f32.mrf.mxu0 }
 0xc11   :  { %v7837_v22 = vadd.f32 %v16577_v53, %v7744_v13  ;;  %v7738_v3 = vadd.f32 %v7737_v31, %v7631_v5  ;;  %v7991_v61 = vand.u32 4294901760, %v7990_v6 }
 0xc12   :  { %v16566_v14 = vpop.f32.mrf.mxu0 }
 0xc13   :  { %v7853_v47 = vadd.f32 %v7837_v22, %v19770_v0  ;;  %v7831_v36 = vadd.f32 %v7830_v15, %v7738_v3  ;;  %v7756_v42 = vadd.f32 %v16566_v14, %v7655_v55  ;;  %v7866_v3 = vpop.permute.xlu1 %7865 }
 0xc14   :  { %v7749_v41 = vpop.f32.mrf.mxu0 }
 0xc15   :  { %v7852_v45 = vadd.f32 %v7831_v36, %v6560_v30  ;;  %v7849_v7 = vadd.f32 %v16580_v26, %v7756_v42  ;;  %v7750_v27 = vadd.f32 %v7749_v41, %v7647_v63  ;;  %v19978_v58 = vand.u32 4294901760, %v7853_v47  ;;  %v7862_v42 = vpop.permute.xlu0 %7861 }
 0xc17   :  { %v7855_v0 = vadd.f32 %v7849_v7, %v19775_v8  ;;  %v7843_v60 = vadd.f32 %v7842_v46, %v7750_v27  ;;  %v19984_v38 = vand.u32 4294901760, %v7852_v45  ;;  %v8037_v4 = vsub.f32 %v7853_v47, %v19978_v58  ;;  %v7870_v26 = vpop.permute.xlu1 %7869 }
 0xc18   :  { %v7979_v8 = vand.u32 4294901760, %v19982_v33 }
 0xc19   :  { %v19987_v53 = vand.u32 4294901760, %v7855_v0  ;;  %v7854_v2 = vadd.f32 %v7843_v60, %v6562_v52  ;;  %v8044_v56 = vsub.f32 %v7852_v45, %v19984_v38  ;;  %v8038_v37 = vand.u32 4294901760, %v8037_v4 }
 0xc1a   :  { %v7980_v10 = vsub.f32 %v19982_v33, %v7979_v8 }
 0xc1b   :  { %v8023_v35 = vsub.f32 %v7855_v0, %v19987_v53  ;;  %v19994_v17 = vand.u32 4294901760, %v7854_v2  ;;  %16581 = vmatprep.subr.mxu0 %v19987_v53  ;;  %v8045_v62 = vand.u32 4294901760, %v8044_v56  ;;  %v8039_v43 = vsub.f32 %v8037_v4, %v8038_v37  ;;  %v7874_v63 = vpop.permute.xlu1 %7873 }
 0xc1c   :  { %16582 = vmatpush3.msra.mxu0 %v19987_v53  ;;  %v7981_v5 = vand.u32 4294901760, %v7980_v10  ;;  %v8508_v10 = vpop.permute.xlu0 %8507 }
 0xc1d   :  { %v8030_v24 = vsub.f32 %v7854_v2, %v19994_v17  ;;  %16583 = vmatprep.subr.mxu0 %v19994_v17  ;;  %v8024_v50 = vand.u32 4294901760, %v8023_v35  ;;  %v8046_v21 = vsub.f32 %v8044_v56, %v8045_v62  ;;  %v8040_v9 = vand.u32 4294901760, %v8039_v43 }
 0xc1e   :  { %16584 = vmatpush3.msra.mxu0 %v19994_v17 }
 0xc1f   :  { %16585 = vmatprep.subr.mxu0 %v19978_v58  ;;  %v8025_v20 = vsub.f32 %v8023_v35, %v8024_v50  ;;  %v8031_v28 = vand.u32 4294901760, %v8030_v24  ;;  %v8047_v51 = vand.u32 4294901760, %v8046_v21 }
 0xc20   :  { %16586 = vmatpush3.msra.mxu0 %v19978_v58 }
 0xc21   :  { %16587 = vmatprep.subr.mxu0 %v19984_v38  ;;  %v8026_v54 = vand.u32 4294901760, %v8025_v20  ;;  %v8032_v15 = vsub.f32 %v8030_v24, %v8031_v28 }
 0xc22   :  { %16588 = vmatpush3.msra.mxu0 %v19984_v38 }
 0xc23   :  { %16595 = vmatprep.subr.mxu1 %v8026_v54  ;;  %16609 = vmatprep.subr.mxu0 %v8023_v35  ;;  %v8033_v13 = vand.u32 4294901760, %v8032_v15 }
 0xc24   :  { %16590 = vmatmul.mubr.f32.vlgmr.msra.gmra.mxu0 %v7971_v57  ;;  %16596 = vmatpush3.msra.mxu1 %v8026_v54 }
 0xc25   :  { %16610 = vmatpush3.msra.mxu0 %v8023_v35  ;;  %16597 = vmatprep.subr.mxu1 %v8033_v13 }
 0xc26   :  { %16611 = vmatprep.subr.mxu0 %v8030_v24  ;;  %16598 = vmatpush3.msra.mxu1 %v8033_v13 }
 0xc27   :  { %16612 = vmatpush3.msra.mxu0 %v8030_v24  ;;  %16592 = vmatprep.mubr.f32.mxu0 %v7981_v5 }
 0xc28   :  { %16599 = vmatprep.subr.mxu1 %v8040_v9  ;;  %16613 = vmatprep.subr.mxu0 %v8037_v4 }
 0xc29   :  { %16593 = vmatmul.mubr.f32.gmra.mxu0 %v7991_v61  ;;  %16600 = vmatpush3.msra.mxu1 %v8040_v9  ;;  %v17683_v9 = vld [vmem:[%s24154_s0] sm:$0xff] }
 0xc2a   :  { %16614 = vmatpush3.msra.mxu0 %v8037_v4  ;;  %16601 = vmatprep.subr.mxu1 %v8047_v51 }
 0xc2b   :  { %16615 = vmatprep.subr.mxu0 %v8044_v56  ;;  %16602 = vmatpush3.msra.mxu1 %v8047_v51 }
 0xc2c   :  { %16616 = vmatpush3.msra.mxu0 %v8044_v56  ;;  %16604 = vmatmul.mubr.f32.vlgmr.msra.gmra.mxu1 %v19965_v19 }
 0xc2d   :  { %16617 = vmatprep.mubr.f32.mxu0 %v19901_v39  ;;  %16623 = vmatprep.subr.mxu1 %v19987_v53  ;;  %v8600_v39 = vld [vmem:[%s24157_s3 + $0x80] sm:$0xff] }
 0xc2e   :  { %16637 = vmatprep.subr.mxu0 %v8024_v50  ;;  %16618 = vmatmul.mubr.f32.vlgmr.msra.gmra.mxu0 %v19974_v34 }
 0xc2f   :  { %16624 = vmatpush3.msra.mxu1 %v19987_v53  ;;  %16638 = vmatpush3.msra.mxu0 %v8024_v50 }
 0xc30   :  { %16625 = vmatprep.subr.mxu1 %v19994_v17  ;;  %16639 = vmatprep.subr.mxu0 %v8031_v28 }
 0xc31   :  { %16606 = vmatprep.mubr.f32.mxu1 %v19968_v23  ;;  %16626 = vmatpush3.msra.mxu1 %v19994_v17 }
 0xc32   :  { %16640 = vmatpush3.msra.mxu0 %v8031_v28  ;;  %16607 = vmatmul.mubr.f32.gmra.mxu1 %v19976_v44 }
 0xc33   :  { %16627 = vmatprep.subr.mxu1 %v19978_v58  ;;  %16641 = vmatprep.subr.mxu0 %v8038_v37 }
 0xc34   :  { %16628 = vmatpush3.msra.mxu1 %v19978_v58  ;;  %16642 = vmatpush3.msra.mxu0 %v8038_v37 }
 0xc35   :  { %16620 = vmatprep.mubr.f32.mxu0 %v19982_v33  ;;  %16629 = vmatprep.subr.mxu1 %v19984_v38 }
 0xc36   :  { %16643 = vmatprep.subr.mxu0 %v8045_v62  ;;  %16621 = vmatmul.mubr.f32.gmra.mxu0 %v19990_v48 }
 0xc37   :  { %16630 = vmatpush3.msra.mxu1 %v19984_v38  ;;  %16631 = vmatprep.mubr.f32.mxu1 %v7959_v25  ;;  %v20059_v25 = vand.u32 4294901760, %v8600_v39 }
 0xc38   :  { %16644 = vmatpush3.msra.mxu0 %v8045_v62  ;;  %16632 = vmatmul.mubr.f32.vlgmr.msra.gmra.mxu1 %v7969_v32 }
 0xc39   :  { %16651 = vmatprep.subr.mxu1 %v19987_v53  ;;  %16645 = vmatprep.mubr.f32.mxu0 %v19898_v16  ;;  %24467 = vst [vmem:[#allocation5_spill] sm:$0xff] %v20059_v25 }
 0xc3a   :  { %16652 = vmatpush3.msra.mxu1 %v19987_v53  ;;  %16634 = vmatprep.mubr.f32.mxu1 %v7979_v8  ;;  %v8504_v53 = vpop.permute.xlu1 %8503 }
 0xc3b   :  { %16653 = vmatprep.subr.mxu1 %v19994_v17  ;;  %16646 = vmatmul.mubr.f32.vlgmr.msra.gmra.mxu0 %v19965_v19 }
 0xc3c   :  { %16654 = vmatpush3.msra.mxu1 %v19994_v17  ;;  %16648 = vmatprep.mubr.f32.mxu0 %v19968_v23 }
 0xc3d   :  { %16635 = vmatmul.mubr.f32.gmra.mxu1 %v7989_v29  ;;  %16655 = vmatprep.subr.mxu1 %v19978_v58 }
 0xc3e   :  { %16656 = vmatpush3.msra.mxu1 %v19978_v58  ;;  %16659 = vmatprep.mubr.f32.mxu1 %v19898_v16  ;;  %v20062_v16 = vsub.f32 %v8600_v39, %v20059_v25  ;;  %v8512_v28 = vpop.permute.xlu1 %8511 }
 0xc3f   :  { %16657 = vmatprep.subr.mxu1 %v19984_v38  ;;  %16649 = vmatmul.mubr.f32.gmra.mxu0 %v19976_v44 }
 0xc40   :  { %16658 = vmatpush3.msra.mxu1 %v19984_v38  ;;  %24468 = vst [vmem:[#allocation3_spill] sm:$0xff] %v20062_v16  ;;  %v20066_v1 = vand.u32 4294901760, %v20062_v16 }
 0xc41   :  { %16660 = vmatmul.mubr.f32.vlgmr.msra.gmra.mxu1 %v19965_v19 }
 0xc42   :  { %16662 = vmatprep.mubr.f32.mxu1 %v19968_v23  ;;  %24469 = vst [vmem:[#allocation7_spill] sm:$0xff] %v20066_v1  ;;  %v8688_v12 = vsub.f32 %v20062_v16, %v20066_v1 }
 0xc44   :  { %v20070_v31 = vand.u32 4294901760, %v8688_v12  ;;  %v8516_v12 = vpop.permute.xlu1 %8515 }
 0xc45   :  { %16663 = vmatmul.mubr.f32.gmra.mxu1 %v19976_v44 }
 0xc46   :  { %16705 = vmatprep.mubr.f32.mxu1 %v20059_v25  ;;  %24470 = vst [vmem:[#allocation12_spill] sm:$0xff] %v20070_v31  ;;  %16673 = vmatprep.mubr.f32.mxu0 %v20070_v31 }
 0xce4   :  { %v16591_v19 = vpop.f32.mrf.mxu0 }
 0xce5   :  { %v7974_v11 = vadd.f32 %v16591_v19, %v7866_v3  ;;  %v17684_v19 = vld [vmem:[%s24154_s0 + $0x8] sm:$0xff] }
 0xce6   :  { %v7963_v22 = vpop.f32.mrf.mxu0 }
 0xce7   :  { %v7964_v41 = vadd.f32 %v7963_v22, %v7862_v42 }
 0xce9   :  { %v16594_v55 = vpop.f32.mrf.mxu0 }
 0xcea   :  { %v7994_v45 = vadd.f32 %v16594_v55, %v7874_v63 }
 0xceb   :  { %v7983_v30 = vpop.f32.mrf.mxu0 }
 0xcec   :  { %v16605_v18 = vpop.f32.mrf.mxu1  ;;  %v7984_v58 = vadd.f32 %v7983_v30, %v7870_v26 }
 0xced   :  { %v8091_v40 = vadd.f32 %v16605_v18, %v7974_v11  ;;  %v17685_v18 = vld [vmem:[%s24154_s0 + $0x10] sm:$0xff] }
 0xcee   :  { %v8084_v14 = vpop.f32.mrf.mxu1  ;;  %v16619_v23 = vpop.f32.mrf.mxu0 }
 0xcef   :  { %v8085_v7 = vadd.f32 %v8084_v14, %v7964_v41  ;;  %v8190_v46 = vadd.f32 %v16619_v23, %v8091_v40  ;;  %v17686_v14 = vld [vmem:[%s24154_s0 + $0x18] sm:$0xff] }
 0xcf0   :  { %v8182_v36 = vpop.f32.mrf.mxu0 }
 0xcf1   :  { %v8183_v32 = vadd.f32 %v8182_v36, %v8085_v7 }
 0xcf2   :  { %v16608_v47 = vpop.f32.mrf.mxu1 }
 0xcf3   :  { %v8103_v52 = vadd.f32 %v16608_v47, %v7994_v45 }
 0xcf4   :  { %v8096_v49 = vpop.f32.mrf.mxu1 }
 0xcf5   :  { %v8097_v33 = vadd.f32 %v8096_v49, %v7984_v58 }
 0xcf6   :  { %v16622_v34 = vpop.f32.mrf.mxu0 }
 0xcf7   :  { %v8204_v35 = vadd.f32 %v16622_v34, %v8103_v52 }
 0xcf8   :  { %v16633_v27 = vpop.f32.mrf.mxu1  ;;  %v8196_v44 = vpop.f32.mrf.mxu0 }
 0xcf9   :  { %v8289_v38 = vadd.f32 %v16633_v27, %v8190_v46  ;;  %v8197_v56 = vadd.f32 %v8196_v44, %v8097_v33 }
 0xcfa   :  { %v8280_v0 = vpop.f32.mrf.mxu1 }
 0xcfb   :  { %v16647_v60 = vpop.f32.mrf.mxu0  ;;  %v8281_v4 = vadd.f32 %v8280_v0, %v8183_v32 }
 0xcfc   :  { %v8394_v59 = vadd.f32 %v16647_v60, %v8289_v38 }
 0xcfd   :  { %v16636_v2 = vpop.f32.mrf.mxu1  ;;  %v8387_v48 = vpop.f32.mrf.mxu0 }
 0xcfe   :  { %v8305_v24 = vadd.f32 %v16636_v2, %v8204_v35  ;;  %v8388_v29 = vadd.f32 %v8387_v48, %v8281_v4  ;;  %v8594_v4 = vpop.permute.xlu1 %8593 }
 0xcff   :  { %v8296_v17 = vpop.f32.mrf.mxu1  ;;  %v16650_v8 = vpop.f32.mrf.mxu0 }
 0xd00   :  { %v8297_v37 = vadd.f32 %v8296_v17, %v8197_v56  ;;  %v8406_v54 = vadd.f32 %v16650_v8, %v8305_v24  ;;  %v8574_v24 = vpop.permute.xlu0 %8573 }
 0xd01   :  { %v16661_v50 = vpop.f32.mrf.mxu1  ;;  %v8399_v57 = vpop.f32.mrf.mxu0 }
 0xd02   :  { %v8487_v20 = vadd.f32 %v16661_v50, %v8394_v59  ;;  %v8400_v43 = vadd.f32 %v8399_v57, %v8297_v37  ;;  %v8570_v56 = vpop.permute.xlu1 %8569 }
 0xd03   :  { %v8480_v62 = vpop.f32.mrf.mxu1 }
 0xd04   :  { %v8481_v15 = vadd.f32 %v8480_v62, %v8388_v29  ;;  %v8519_v5 = vmul.f32 %v8508_v10, %v8487_v20  ;;  %v8590_v29 = vpop.permute.xlu0 %8589  ;;  %v8601_v20 = vld [vmem:[%s24157_s3 + $0x88] sm:$0xff] }
 0xd05   :  { %v16664_v6 = vpop.f32.mrf.mxu1 }
 0xd06   :  { %v8518_v13 = vmul.f32 %v8504_v53, %v8481_v15  ;;  %v8499_v21 = vadd.f32 %v16664_v6, %v8406_v54  ;;  %v20081_v22 = vadd.f32 %v17684_v19, %v8519_v5  ;;  %v8566_v50 = vpop.permute.xlu1 %8565 }
 0xd07   :  { %v8492_v61 = vpop.f32.mrf.mxu1 }
 0xd08   :  { %v20076_v51 = vadd.f32 %v17683_v9, %v8518_v13  ;;  %v8493_v39 = vadd.f32 %v8492_v61, %v8400_v43  ;;  %24472 = vst [vmem:[#allocation9_spill] sm:$0xff] %v20081_v22  ;;  %v8521_v3 = vmul.f32 %v8516_v12, %v8499_v21  ;;  %v8562_v10 = vpop.permute.xlu0 %8561  ;;  %v20104_v43 = vand.u32 4294901760, %v8601_v20  ;;  %v8602_v9 = vld [vmem:[%s24157_s3 + $0x90] sm:$0xff] }
 0xd0a   :  { %24471 = vst [vmem:[#allocation10_spill] sm:$0xff] %v20076_v51  ;;  %v8520_v55 = vmul.f32 %v8512_v28, %v8493_v39  ;;  %v8526_v30 = vadd.f32 %v20081_v22, %v20076_v51  ;;  %v20093_v23 = vadd.f32 %v17686_v14, %v8521_v3  ;;  %v8586_v37 = vpop.permute.xlu1 %8585  ;;  %24475 = vst [vmem:[#allocation11_spill] sm:$0xff] %v20104_v43  ;;  %v8603_v39 = vld [vmem:[%s24157_s3 + $0x98] sm:$0xff] }
 0xd0c   :  { %v20088_v26 = vadd.f32 %v17685_v18, %v8520_v55  ;;  %24474 = vst [vmem:[#allocation13_spill] sm:$0xff] %v20093_v23  ;;  %v20115_v18 = vand.u32 4294901760, %v8602_v9 }
 0xd0e   :  { %24473 = vst [vmem:[#allocation8_spill] sm:$0xff] %v20088_v26  ;;  %v8527_v11 = vadd.f32 %v8526_v30, %v20088_v26  ;;  %v8582_v6 = vpop.permute.xlu1 %8581  ;;  %v20113_v30 = vsub.f32 %v8601_v20, %v20104_v43  ;;  %24477 = vst [vmem:[#allocation15_spill] sm:$0xff] %v20115_v18  ;;  %v8609_v20 = vld [vmem:[%s24157_s3 + $0xc8] sm:$0xff] }
 0xd10   :  { %v8528_v47 = vadd.f32 %v8527_v11, %v20093_v23  ;;  %24476 = vst [vmem:[#allocation4_spill] sm:$0xff] %v20113_v30 }
 0xd12   :  { %v8529_v36 = vrot.slane %v8528_v47, 4 }
 0xd14   :  { %v8530_v42 = vadd.f32 %v8529_v36, %v8528_v47  ;;  %v20123_v36 = vand.u32 4294901760, %v8603_v39 }
 0xd16   :  { %v8531_v63 = vrot.slane %v8530_v42, 2  ;;  %24478 = vst [vmem:[#allocation6_spill] sm:$0xff] %v20123_v36 }
 0xd18   :  { %v8532_v49 = vadd.f32 %v8531_v63, %v8530_v42 }
 0xd1a   :  { %v8533_v40 = vrot.slane %v8532_v49, 1 }
 0xd1c   :  { %v8534_v41 = vadd.f32 %v8533_v40, %v8532_v49 }
 0xd1e   :  { %v8535_v34 = vmul.f32 0.03125, %v8534_v41  ;;  %v8604_v41 = vld [vmem:[%s24157_s3 + $0xa0] sm:$0xff] }
 0xd20   :  { %v8536_v45 = vsub.f32 %v20076_v51, %v8535_v34  ;;  %v8537_v7 = vsub.f32 %v20081_v22, %v8535_v34  ;;  %v8538_v27 = vsub.f32 %v20088_v26, %v8535_v34  ;;  %v8539_v44 = vsub.f32 %v20093_v23, %v8535_v34  ;;  %v8605_v34 = vld [vmem:[%s24157_s3 + $0xa8] sm:$0xff] }
 0xd22   :  { %v8540_v46 = vmul.f32 %v8536_v45, %v8536_v45  ;;  %v8541_v58 = vmul.f32 %v8537_v7, %v8537_v7  ;;  %v8542_v52 = vmul.f32 %v8538_v27, %v8538_v27  ;;  %v8543_v60 = vmul.f32 %v8539_v44, %v8539_v44 }
 0xd24   :  { %v8544_v0 = vadd.f32 %v8541_v58, %v8540_v46  ;;  %v20158_v46 = vsub.f32 %v8603_v39, %v20123_v36  ;;  %v20160_v58 = vand.u32 4294901760, %v8604_v41 }
 0xd26   :  { %v8545_v33 = vadd.f32 %v8544_v0, %v8542_v52  ;;  %24481 = vst [vmem:[#allocation16_spill] sm:$0xff] %v20158_v46  ;;  %24482 = vst [vmem:[#allocation19_spill] sm:$0xff] %v20160_v58  ;;  %v20162_v52 = vand.u32 4294901760, %v8605_v34 }
 0xd28   :  { %v8546_v38 = vadd.f32 %v8545_v33, %v8543_v60  ;;  %24483 = vst [vmem:[#allocation18_spill] sm:$0xff] %v20162_v52 }
 0xd2a   :  { %v8547_v32 = vrot.slane %v8546_v38, 4 }
 0xd2c   :  { %v8548_v53 = vadd.f32 %v8547_v32, %v8546_v38  ;;  %v8606_v32 = vld [vmem:[%s24157_s3 + $0xb0] sm:$0xff] }
 0xd2e   :  { %v8549_v2 = vrot.slane %v8548_v53, 2 }
 0xd30   :  { %v8550_v48 = vadd.f32 %v8549_v2, %v8548_v53  ;;  %v8607_v53 = vld [vmem:[%s24157_s3 + $0xb8] sm:$0xff] }
 0xd32   :  { %v8551_v35 = vrot.slane %v8550_v48, 1 }
 0xd34   :  { %v8552_v17 = vadd.f32 %v8551_v35, %v8550_v48  ;;  %v20188_v35 = vand.u32 4294901760, %v20158_v46 }
 0xd36   :  { %v8553_v8 = vmul.f32 0.03125, %v8552_v17  ;;  %24485 = vst [vmem:[#allocation21_spill] sm:$0xff] %v20188_v35  ;;  %v20191_v17 = vsub.f32 %v8604_v41, %v20160_v58 }
 0xd38   :  { %v8554_v59 = vadd.f32 1e-05, %v8553_v8  ;;  %24486 = vst [vmem:[#allocation22_spill] sm:$0xff] %v20191_v17  ;;  %v20193_v8 = vand.u32 4294901760, %v8606_v32 }
 0xd3a   :  { %17601 = vrsqrt.f32 %v8554_v59  ;;  %24487 = vst [vmem:[#allocation23_spill] sm:$0xff] %v20193_v8 }
 0xd47   :  { %v17602_v28 = vpop.eup %17601 }
 0xd48   :  { %v8558_v57 = vmul.f32 %v17602_v28, %v8538_v27  ;;  %v8559_v62 = vmul.f32 %v17602_v28, %v8539_v44  ;;  %v8557_v54 = vmul.f32 %v17602_v28, %v8537_v7  ;;  %v8556_v15 = vmul.f32 %v17602_v28, %v8536_v45 }
 0xd49   :  { %v20145_v45 = vand.u32 4294901760, %v20113_v30  ;;  %v20155_v44 = vsub.f32 %v8602_v9, %v20115_v18  ;;  %v20238_v9 = vand.u32 4294901760, %v8609_v20 }
 0xd4a   :  { %v8578_v13 = vmul.f32 %v8570_v56, %v8558_v57  ;;  %v8579_v5 = vmul.f32 %v8574_v24, %v8559_v62  ;;  %v8577_v21 = vmul.f32 %v8566_v50, %v8557_v54  ;;  %v8576_v61 = vmul.f32 %v8562_v10, %v8556_v15  ;;  %v8610_v62 = vld [vmem:[%s24157_s3 + $0xd0] sm:$0xff] }
 0xd4b   :  { %24479 = vst [vmem:[#allocation17_spill] sm:$0xff] %v20145_v45  ;;  %24480 = vst [vmem:[#allocation14_spill] sm:$0xff] %v20155_v44  ;;  %v8698_v48 = vsub.f32 %v20113_v30, %v20145_v45  ;;  %v20195_v56 = vand.u32 4294901760, %v8607_v53  ;;  %v8718_v57 = vsub.f32 %v20158_v46, %v20188_v35  ;;  %v20223_v54 = vand.u32 4294901760, %v20191_v17 }
 0xd4c   :  { %v8599_v12 = vadd.f32 %v8594_v4, %v8579_v5  ;;  %v8598_v19 = vadd.f32 %v8590_v29, %v8578_v13  ;;  %v8597_v3 = vadd.f32 %v8586_v37, %v8577_v21  ;;  %v8596_v55 = vadd.f32 %v8582_v6, %v8576_v61  ;;  %v8608_v37 = vld [vmem:[%s24157_s3 + $0xc0] sm:$0xff]  ;;  %24496 = vst [vmem:[#allocation32_spill] sm:$0xff] %v20238_v9 }
 0xd4d   :  { %v20185_v4 = vand.u32 4294901760, %v20155_v44  ;;  %24488 = vst [vmem:[#allocation24_spill] sm:$0xff] %v20195_v56  ;;  %v20203_v29 = vsub.f32 %v8605_v34, %v20162_v52  ;;  %v20213_v28 = vand.u32 4294901760, %v8698_v48  ;;  %24491 = vst [vmem:[#allocation27_spill] sm:$0xff] %v20223_v54  ;;  %v20226_v15 = vsub.f32 %v8606_v32, %v20193_v8 }
 0xd4e   :  { %v20117_v14 = vand.u32 4294901760, %v8599_v12  ;;  %v20119_v11 = vand.u32 4294901760, %v8598_v19  ;;  %v20121_v47 = vand.u32 4294901760, %v8597_v3  ;;  %v20134_v40 = vand.u32 4294901760, %v8596_v55 }
 0xd4f   :  { %24484 = vst [vmem:[#allocation20_spill] sm:$0xff] %v20185_v4  ;;  %24489 = vst [vmem:[#allocation25_spill] sm:$0xff] %v20203_v29  ;;  %v8708_v10 = vsub.f32 %v20155_v44, %v20185_v4  ;;  %v20229_v6 = vsub.f32 %v8607_v53, %v20195_v56  ;;  %v20231_v13 = vand.u32 4294901760, %v8608_v37  ;;  %v20236_v61 = vand.u32 4294901760, %v20203_v29 }
 0xd50   :  { %v20126_v42 = vsub.f32 %v8599_v12, %v20117_v14  ;;  %v20129_v63 = vsub.f32 %v8598_v19, %v20119_v11  ;;  %v20132_v49 = vsub.f32 %v8597_v3, %v20121_v47  ;;  %16665 = vmatprep.subr.mxu0 %v20117_v14  ;;  %v20165_v0 = vsub.f32 %v8596_v55, %v20134_v40  ;;  %v8611_v12 = vld [vmem:[%s24157_s3 + $0xd8] sm:$0xff]  ;;  %v8612_v55 = vld [vmem:[%s24157_s3 + $0xe0] sm:$0xff] }
 0xd51   :  { %16666 = vmatpush3.xpose.msra.mxu0 %v20117_v14  ;;  %24490 = vst [vmem:[#allocation26_spill] sm:$0xff] %v20213_v28  ;;  %24492 = vst [vmem:[#allocation28_spill] sm:$0xff] %v20226_v15  ;;  %v20241_v39 = vand.u32 4294901760, %v8610_v62  ;;  %v20247_v19 = vand.u32 4294901760, %v8708_v10  ;;  %v20249_v3 = vand.u32 4294901760, %v8718_v57  ;;  %v8728_v41 = vsub.f32 %v20191_v17, %v20223_v54 }
 0xd52   :  { %16667 = vmatprep.subr.mxu0 %v20119_v11  ;;  %v20149_v7 = vand.u32 4294901760, %v20126_v42  ;;  %v20152_v27 = vand.u32 4294901760, %v20129_v63  ;;  %v20172_v38 = vand.u32 4294901760, %v20132_v49  ;;  %v20200_v50 = vand.u32 4294901760, %v20165_v0  ;;  %24493 = vst [vmem:[#allocation29_spill] sm:$0xff] %v20229_v6  ;;  %24494 = vst [vmem:[#allocation30_spill] sm:$0xff] %v20231_v13 }
 0xd53   :  { %24495 = vst [vmem:[#allocation31_spill] sm:$0xff] %v20236_v61  ;;  %24497 = vst [vmem:[#allocation33_spill] sm:$0xff] %v20241_v39  ;;  %v20257_v34 = vand.u32 4294901760, %v20226_v15  ;;  %v8738_v53 = vsub.f32 %v20203_v29, %v20236_v61  ;;  %v20271_v48 = vand.u32 4294901760, %v8611_v12  ;;  %v20287_v10 = vand.u32 4294901760, %v8728_v41 }
 0xd54   :  { %v8873_v60 = vsub.f32 %v20126_v42, %v20149_v7  ;;  %v8880_v33 = vsub.f32 %v20129_v63, %v20152_v27  ;;  %v8887_v24 = vsub.f32 %v20132_v49, %v20172_v38  ;;  %v8894_v21 = vsub.f32 %v20165_v0, %v20200_v50  ;;  %24498 = vst [vmem:[#allocation34_spill] sm:$0xff] %v20247_v19 }
 0xd55   :  { %16668 = vmatpush3.xpose.msra.mxu0 %v20119_v11  ;;  %24499 = vst [vmem:[#allocation35_spill] sm:$0xff] %v20249_v3  ;;  %24500 = vst [vmem:[#allocation36_spill] sm:$0xff] %v20257_v34  ;;  %v20303_v23 = vsub.f32 %v8611_v12, %v20271_v48 }
 0xd56   :  { %16669 = vmatprep.subr.mxu0 %v20121_v47  ;;  %v8874_v2 = vand.u32 4294901760, %v8873_v60  ;;  %v8881_v59 = vand.u32 4294901760, %v8880_v33  ;;  %v8888_v5 = vand.u32 4294901760, %v8887_v24  ;;  %v20260_v60 = vand.u32 4294901760, %v20229_v6  ;;  %24504 = vst [vmem:[#allocation40_spill] sm:$0xff] %v20271_v48  ;;  %24507 = vst [vmem:[#allocation43_spill] sm:$0xff] %v20287_v10 }
 0xd57   :  { %v20263_v33 = vsub.f32 %v8608_v37, %v20231_v13  ;;  %v8895_v32 = vand.u32 4294901760, %v8894_v21  ;;  %v20277_v24 = vand.u32 4294901760, %v8612_v55  ;;  %v8613_v37 = vld [vmem:[%s24157_s3 + $0xe8] sm:$0xff]  ;;  %24511 = vst [vmem:[#allocation47_spill] sm:$0xff] %v20303_v23  ;;  %v20333_v31 = vand.u32 4294901760, %v20303_v23 }
 0xd58   :  { %16697 = vmatprep.subr.mxu1 %v8874_v2  ;;  %24501 = vst [vmem:[#allocation37_spill] sm:$0xff] %v20260_v60  ;;  %v8758_v57 = vsub.f32 %v20229_v6, %v20260_v60  ;;  %v20305_v41 = vand.u32 4294901760, %v8613_v37 }
 0xd59   :  { %16670 = vmatpush3.xpose.msra.mxu0 %v20121_v47  ;;  %16698 = vmatpush3.xpose.msra.mxu1 %v8874_v2  ;;  %24502 = vst [vmem:[#allocation38_spill] sm:$0xff] %v20263_v33  ;;  %v20269_v2 = vsub.f32 %v8609_v20, %v20238_v9  ;;  %24506 = vst [vmem:[#allocation42_spill] sm:$0xff] %v20277_v24  ;;  %v8614_v20 = vld [vmem:[%s24157_s3 + $0xf0] sm:$0xff]  ;;  %v20312_v22 = vsub.f32 %v8612_v55, %v20277_v24 }
 0xd5a   :  { %16671 = vmatprep.subr.mxu0 %v20134_v40  ;;  %16699 = vmatprep.subr.mxu1 %v8881_v59  ;;  %24512 = vst [vmem:[#allocation48_spill] sm:$0xff] %v20305_v41  ;;  %v20314_v51 = vand.u32 4294901760, %v8614_v20  ;;  %24518 = vst [vmem:[#allocation54_spill] sm:$0xff] %v20333_v31 }
 0xd5b   :  { %24503 = vst [vmem:[#allocation39_spill] sm:$0xff] %v20269_v2  ;;  %v20300_v21 = vand.u32 4294901760, %v20269_v2  ;;  %24514 = vst [vmem:[#allocation50_spill] sm:$0xff] %v20312_v22 }
 0xd5c   :  { %24515 = vst [vmem:[#allocation51_spill] sm:$0xff] %v20314_v51 }
 0xd5d   :  { %16672 = vmatpush3.xpose.msra.mxu0 %v20134_v40  ;;  %16700 = vmatpush3.xpose.msra.mxu1 %v8881_v59  ;;  %v20275_v59 = vsub.f32 %v8610_v62, %v20241_v39  ;;  %v20294_v62 = vand.u32 4294901760, %v20263_v33  ;;  %24510 = vst [vmem:[#allocation46_spill] sm:$0xff] %v20300_v21 }
 0xd5e   :  { %16701 = vmatprep.subr.mxu1 %v8888_v5  ;;  %16729 = vmatprep.subr.mxu0 %v20126_v42 }
 0xd5f   :  { %24505 = vst [vmem:[#allocation41_spill] sm:$0xff] %v20275_v59  ;;  %24508 = vst [vmem:[#allocation44_spill] sm:$0xff] %v20294_v62  ;;  %v20309_v26 = vand.u32 4294901760, %v20275_v59  ;;  %v8768_v55 = vsub.f32 %v20263_v33, %v20294_v62 }
 0xd60   :  { %16674 = vmatmul.mubr.f32.vlgmr.msra.gmra.mxu0 %v20213_v28  ;;  %v20336_v28 = vsub.f32 %v8613_v37, %v20305_v41 }
 0xd61   :  { %16702 = vmatpush3.xpose.msra.mxu1 %v8888_v5  ;;  %16730 = vmatpush3.xpose.msra.mxu0 %v20126_v42  ;;  %v8748_v42 = vsub.f32 %v20226_v15, %v20257_v34  ;;  %v20297_v5 = vand.u32 4294901760, %v8738_v53  ;;  %24513 = vst [vmem:[#allocation49_spill] sm:$0xff] %v20309_v26  ;;  %v8615_v53 = vld [vmem:[%s24157_s3 + $0xf8] sm:$0xff] }
 0xd62   :  { %16703 = vmatprep.subr.mxu1 %v8895_v32  ;;  %16731 = vmatprep.subr.mxu0 %v20129_v63  ;;  %24519 = vst [vmem:[#allocation55_spill] sm:$0xff] %v20336_v28 }
 0xd63   :  { %16676 = vmatprep.mubr.f32.mxu0 %v20247_v19  ;;  %24509 = vst [vmem:[#allocation45_spill] sm:$0xff] %v20297_v5  ;;  %v20322_v12 = vand.u32 4294901760, %v8748_v42  ;;  %v20338_v42 = vand.u32 4294901760, %v8615_v53  ;;  %v20345_v19 = vand.u32 4294901760, %v20312_v22 }
 0xd64   :  { %16677 = vmatmul.mubr.f32.gmra.mxu0 %v20249_v3  ;;  %v20348_v3 = vsub.f32 %v8614_v20, %v20314_v51  ;;  %v8798_v20 = vsub.f32 %v20303_v23, %v20333_v31 }
 0xd65   :  { %16704 = vmatpush3.xpose.msra.mxu1 %v8895_v32  ;;  %16732 = vmatpush3.xpose.msra.mxu0 %v20129_v63  ;;  %24516 = vst [vmem:[#allocation52_spill] sm:$0xff] %v20322_v12  ;;  %v20324_v63 = vand.u32 4294901760, %v8758_v57  ;;  %v8778_v32 = vsub.f32 %v20269_v2, %v20300_v21  ;;  %24520 = vst [vmem:[#allocation56_spill] sm:$0xff] %v20338_v42  ;;  %v8788_v57 = vsub.f32 %v20275_v59, %v20309_v26 }
 0xd66   :  { %16733 = vmatprep.subr.mxu0 %v20132_v49  ;;  %16761 = vmatprep.subr.mxu1 %v20117_v14  ;;  %24521 = vst [vmem:[#allocation57_spill] sm:$0xff] %v20345_v19  ;;  %24522 = vst [vmem:[#allocation58_spill] sm:$0xff] %v20348_v3 }
 0xd67   :  { %16679 = vmatprep.mubr.f32.mxu0 %v20287_v10  ;;  %24517 = vst [vmem:[#allocation53_spill] sm:$0xff] %v20324_v63  ;;  %v20358_v37 = vand.u32 4294901760, %v8778_v32  ;;  %v20363_v10 = vand.u32 4294901760, %v20336_v28  ;;  %v20375_v32 = vand.u32 4294901760, %v20348_v3 }
 0xd68   :  { %16680 = vmatmul.mubr.f32.gmra.mxu0 %v20297_v5  ;;  %16706 = vmatmul.mubr.f32.vlgmr.msra.gmra.mxu1 %v20104_v43  ;;  %v20366_v5 = vsub.f32 %v8615_v53, %v20338_v42 }
 0xd69   :  { %16734 = vmatpush3.xpose.msra.mxu0 %v20132_v49  ;;  %16762 = vmatpush3.xpose.msra.mxu1 %v20117_v14  ;;  %v20354_v49 = vand.u32 4294901760, %v8768_v55  ;;  %24524 = vst [vmem:[#allocation60_spill] sm:$0xff] %v20358_v37  ;;  %24525 = vst [vmem:[#allocation61_spill] sm:$0xff] %v20363_v10  ;;  %v20370_v55 = vand.u32 4294901760, %v8788_v57  ;;  %v8818_v53 = vsub.f32 %v20336_v28, %v20363_v10 }
 0xd6a   :  { %16735 = vmatprep.subr.mxu0 %v20165_v0  ;;  %16763 = vmatprep.subr.mxu1 %v20119_v11  ;;  %24526 = vst [vmem:[#allocation62_spill] sm:$0xff] %v20366_v5  ;;  %24528 = vst [vmem:[#allocation64_spill] sm:$0xff] %v20375_v32  ;;  %v20388_v57 = vand.u32 4294901760, %v20366_v5 }
 0xd6b   :  { %16682 = vmatprep.mubr.f32.mxu0 %v20322_v12  ;;  %16708 = vmatprep.mubr.f32.mxu1 %v20115_v18  ;;  %24523 = vst [vmem:[#allocation59_spill] sm:$0xff] %v20354_v49  ;;  %24527 = vst [vmem:[#allocation63_spill] sm:$0xff] %v20370_v55  ;;  %v8808_v12 = vsub.f32 %v20312_v22, %v20345_v19 }
 0xd6c   :  { %16683 = vmatmul.mubr.f32.gmra.mxu0 %v20324_v63  ;;  %16709 = vmatmul.mubr.f32.gmra.mxu1 %v20123_v36  ;;  %24529 = vst [vmem:[#allocation65_spill] sm:$0xff] %v20388_v57 }
 0xd6d   :  { %16736 = vmatpush3.xpose.msra.mxu0 %v20165_v0  ;;  %16764 = vmatpush3.xpose.msra.mxu1 %v20119_v11  ;;  %v20383_v0 = vand.u32 4294901760, %v8798_v20  ;;  %v20392_v63 = vand.u32 4294901760, %v8808_v12  ;;  %v20400_v20 = vand.u32 4294901760, %v8818_v53 }
 0xd6e   :  { %16765 = vmatprep.subr.mxu1 %v20121_v47  ;;  %16793 = vmatprep.subr.mxu0 %v20149_v7 }
 0xd6f   :  { %16685 = vmatprep.mubr.f32.mxu0 %v20354_v49  ;;  %16711 = vmatprep.mubr.f32.mxu1 %v20160_v58  ;;  %v8828_v49 = vsub.f32 %v20348_v3, %v20375_v32 }
 0xd70   :  { %16686 = vmatmul.mubr.f32.gmra.mxu0 %v20358_v37  ;;  %16712 = vmatmul.mubr.f32.gmra.mxu1 %v20162_v52  ;;  %v8838_v37 = vsub.f32 %v20366_v5, %v20388_v57 }
 0xd71   :  { %16766 = vmatpush3.xpose.msra.mxu1 %v20121_v47  ;;  %16688 = vmatprep.mubr.f32.mxu0 %v20370_v55  ;;  %v20406_v12 = vand.u32 4294901760, %v8828_v49  ;;  %v24539_v49 = vld [vmem:[#allocation26_spill] sm:$0xff] }
 0xd72   :  { %16767 = vmatprep.subr.mxu1 %v20134_v40  ;;  %16714 = vmatprep.mubr.f32.mxu1 %v20193_v8  ;;  %v20412_v55 = vand.u32 4294901760, %v8838_v37  ;;  %v24540_v37 = vld [vmem:[#allocation12_spill] sm:$0xff] }
 0xd74   :  { %16689 = vmatmul.mubr.f32.gmra.mxu0 %v20383_v0  ;;  %16715 = vmatmul.mubr.f32.gmra.mxu1 %v20195_v56 }
 0xd75   :  { %16768 = vmatpush3.xpose.msra.mxu1 %v20134_v40  ;;  %16691 = vmatprep.mubr.f32.mxu0 %v20392_v63 }
 0xd76   :  { %16825 = vmatprep.subr.mxu1 %v20117_v14  ;;  %16717 = vmatprep.mubr.f32.mxu1 %v20231_v13 }
 0xd78   :  { %16692 = vmatmul.mubr.f32.gmra.mxu0 %v20400_v20  ;;  %16718 = vmatmul.mubr.f32.gmra.mxu1 %v20238_v9 }
 0xd79   :  { %16694 = vmatprep.mubr.f32.mxu0 %v20406_v12  ;;  %16720 = vmatprep.mubr.f32.mxu1 %v20241_v39 }
 0xd7c   :  { %16695 = vmatmul.mubr.f32.gmra.mxu0 %v20412_v55  ;;  %16721 = vmatmul.mubr.f32.gmra.mxu1 %v20271_v48 }
 0xd7d   :  { %16723 = vmatprep.mubr.f32.mxu1 %v20277_v24  ;;  %16737 = vmatprep.mubr.f32.mxu0 %v20062_v16 }
 0xd80   :  { %16724 = vmatmul.mubr.f32.gmra.mxu1 %v20305_v41  ;;  %16738 = vmatmul.mubr.f32.vlgmr.msra.gmra.mxu0 %v20113_v30 }
 0xd81   :  { %16794 = vmatpush3.xpose.msra.mxu0 %v20149_v7  ;;  %16726 = vmatprep.mubr.f32.mxu1 %v20314_v51  ;;  %v24534_v7 = vld [vmem:[#allocation52_spill] sm:$0xff] }
 0xd82   :  { %16795 = vmatprep.subr.mxu0 %v20152_v27  ;;  %16740 = vmatprep.mubr.f32.mxu0 %v20155_v44 }
 0xd84   :  { %16727 = vmatmul.mubr.f32.gmra.mxu1 %v20338_v42  ;;  %16741 = vmatmul.mubr.f32.gmra.mxu0 %v20158_v46 }
 0xd85   :  { %16796 = vmatpush3.xpose.msra.mxu0 %v20152_v27  ;;  %16743 = vmatprep.mubr.f32.mxu0 %v20191_v17  ;;  %v24535_v27 = vld [vmem:[#allocation45_spill] sm:$0xff] }
 0xd86   :  { %16797 = vmatprep.subr.mxu0 %v20172_v38  ;;  %16769 = vmatprep.mubr.f32.mxu1 %v20066_v1 }
 0xd88   :  { %16744 = vmatmul.mubr.f32.gmra.mxu0 %v20203_v29  ;;  %16770 = vmatmul.mubr.f32.vlgmr.msra.gmra.mxu1 %v20145_v45 }
 0xd89   :  { %16798 = vmatpush3.xpose.msra.mxu0 %v20172_v38  ;;  %16826 = vmatpush3.xpose.msra.mxu1 %v20117_v14  ;;  %v24530_v14 = vld [vmem:[#allocation63_spill] sm:$0xff] }
 0xd8a   :  { %16799 = vmatprep.subr.mxu0 %v20200_v50  ;;  %16827 = vmatprep.subr.mxu1 %v20119_v11  ;;  %v24536_v38 = vld [vmem:[#allocation43_spill] sm:$0xff] }
 0xd8b   :  { %16746 = vmatprep.mubr.f32.mxu0 %v20226_v15  ;;  %16772 = vmatprep.mubr.f32.mxu1 %v20185_v4 }
 0xd8c   :  { %16747 = vmatmul.mubr.f32.gmra.mxu0 %v20229_v6  ;;  %16773 = vmatmul.mubr.f32.gmra.mxu1 %v20188_v35 }
 0xd8d   :  { %16800 = vmatpush3.xpose.msra.mxu0 %v20200_v50  ;;  %16828 = vmatpush3.xpose.msra.mxu1 %v20119_v11  ;;  %v24531_v11 = vld [vmem:[#allocation60_spill] sm:$0xff]  ;;  %v24537_v50 = vld [vmem:[#allocation35_spill] sm:$0xff] }
 0xd8e   :  { %16829 = vmatprep.subr.mxu1 %v20121_v47  ;;  %16749 = vmatprep.mubr.f32.mxu0 %v20263_v33  ;;  %v20649_v33 = vld [vmem:[%s24155_s2 + $0x2d8] sm:$0xff] }
 0xd8f   :  { %16775 = vmatprep.mubr.f32.mxu1 %v20223_v54  ;;  %16857 = vmatprep.subr.mxu0 %v20338_v42  ;;  %24546 = vst [vmem:[#allocation45_spill] sm:$0xff] %v20649_v33 }
 0xd90   :  { %16750 = vmatmul.mubr.f32.gmra.mxu0 %v20269_v2  ;;  %16776 = vmatmul.mubr.f32.gmra.mxu1 %v20236_v61 }
 0xd91   :  { %16830 = vmatpush3.xpose.msra.mxu1 %v20121_v47  ;;  %16752 = vmatprep.mubr.f32.mxu0 %v20275_v59  ;;  %v24532_v47 = vld [vmem:[#allocation59_spill] sm:$0xff] }
 0xd92   :  { %16831 = vmatprep.subr.mxu1 %v20134_v40  ;;  %16778 = vmatprep.mubr.f32.mxu1 %v20257_v34 }
 0xd94   :  { %16753 = vmatmul.mubr.f32.gmra.mxu0 %v20303_v23  ;;  %16779 = vmatmul.mubr.f32.gmra.mxu1 %v20260_v60 }
 0xd95   :  { %16832 = vmatpush3.xpose.msra.mxu1 %v20134_v40  ;;  %16755 = vmatprep.mubr.f32.mxu0 %v20312_v22  ;;  %v24533_v40 = vld [vmem:[#allocation53_spill] sm:$0xff]  ;;  %v14472_v22 = vld [vmem:[%s24155_s2 + $0x1cd] ss:$0 sm:$0xff] }
 0xd96   :  { %16781 = vmatprep.mubr.f32.mxu1 %v20294_v62  ;;  %16895 = vmatprep.subr.mxu1 %v20412_v55 }
 0xd98   :  { %16756 = vmatmul.mubr.f32.gmra.mxu0 %v20336_v28  ;;  %16782 = vmatmul.mubr.f32.gmra.mxu1 %v20300_v21 }
 0xd99   :  { %16758 = vmatprep.mubr.f32.mxu0 %v20348_v3  ;;  %16784 = vmatprep.mubr.f32.mxu1 %v20309_v26 }
 0xd9c   :  { %16759 = vmatmul.mubr.f32.gmra.mxu0 %v20366_v5  ;;  %16785 = vmatmul.mubr.f32.gmra.mxu1 %v20333_v31 }
 0xd9d   :  { %16787 = vmatprep.mubr.f32.mxu1 %v20345_v19  ;;  %16801 = vmatprep.mubr.f32.mxu0 %v20059_v25 }
 0xda0   :  { %16788 = vmatmul.mubr.f32.gmra.mxu1 %v20363_v10  ;;  %16802 = vmatmul.mubr.f32.vlgmr.msra.gmra.mxu0 %v20104_v43 }
 0xda1   :  { %16790 = vmatprep.mubr.f32.mxu1 %v20375_v32  ;;  %16804 = vmatprep.mubr.f32.mxu0 %v20115_v18 }
 0xda2   :  { %16858 = vmatpush3.msra.mxu0 %v20338_v42 }
 0xda3   :  { %16859 = vmatprep.subr.mxu0 %v20314_v51 }
 0xda4   :  { %16791 = vmatmul.mubr.f32.gmra.mxu1 %v20388_v57  ;;  %16805 = vmatmul.mubr.f32.gmra.mxu0 %v20123_v36 }
 0xda5   :  { %16807 = vmatprep.mubr.f32.mxu0 %v20160_v58  ;;  %16833 = vmatprep.mubr.f32.mxu1 %v20059_v25 }
 0xda6   :  { %16860 = vmatpush3.msra.mxu0 %v20314_v51 }
 0xda7   :  { %16861 = vmatprep.subr.mxu0 %v20305_v41 }
 0xda8   :  { %16808 = vmatmul.mubr.f32.gmra.mxu0 %v20162_v52  ;;  %16834 = vmatmul.mubr.f32.vlgmr.msra.gmra.mxu1 %v20104_v43 }
 0xda9   :  { %16810 = vmatprep.mubr.f32.mxu0 %v20193_v8  ;;  %16836 = vmatprep.mubr.f32.mxu1 %v20115_v18 }
 0xdaa   :  { %16896 = vmatpush3.msra.mxu1 %v20412_v55  ;;  %16862 = vmatpush3.msra.mxu0 %v20305_v41  ;;  %v17777_v55 = vmov 0.0  }
 0xdab   :  { %16897 = vmatprep.subr.mxu1 %v20406_v12  ;;  %16863 = vmatprep.subr.mxu0 %v20277_v24  ;;  %9747 = vst.msk [vmem:[#allocation2 + $0x8] sm:$0xff] %vm144_vm0, %v17777_v55  ;;  %9749 = vst.msk [vmem:[#allocation2 + $0x98] sm:$0xff] %vm144_vm0, %v17777_v55 }
 0xdac   :  { %16811 = vmatmul.mubr.f32.gmra.mxu0 %v20195_v56  ;;  %16837 = vmatmul.mubr.f32.gmra.mxu1 %v20123_v36  ;;  %9746 = vst.msk [vmem:[#allocation2] sm:$0xff] %vm144_vm0, %v17777_v55  ;;  %9748 = vst.msk [vmem:[#allocation2 + $0x90] sm:$0xff] %vm144_vm0, %v17777_v55 }
 0xdad   :  { %16813 = vmatprep.mubr.f32.mxu0 %v20231_v13  ;;  %16839 = vmatprep.mubr.f32.mxu1 %v20160_v58 }
 0xdae   :  { %16898 = vmatpush3.msra.mxu1 %v20406_v12  ;;  %16864 = vmatpush3.msra.mxu0 %v20277_v24 }
 0xdaf   :  { %16899 = vmatprep.subr.mxu1 %v20400_v20  ;;  %16865 = vmatprep.subr.mxu0 %v20271_v48 }
 0xdb0   :  { %16814 = vmatmul.mubr.f32.gmra.mxu0 %v20238_v9  ;;  %16840 = vmatmul.mubr.f32.gmra.mxu1 %v20162_v52 }
 0xdb1   :  { %16816 = vmatprep.mubr.f32.mxu0 %v20241_v39  ;;  %16842 = vmatprep.mubr.f32.mxu1 %v20193_v8 }
 0xdb2   :  { %16900 = vmatpush3.msra.mxu1 %v20400_v20  ;;  %16866 = vmatpush3.msra.mxu0 %v20271_v48 }
 0xdb3   :  { %16901 = vmatprep.subr.mxu1 %v20392_v63  ;;  %16867 = vmatprep.subr.mxu0 %v20241_v39  ;;  %v9830_v29 = vld [vmem:[#allocation2 + $0x7] sm:$0xff] }
 0xdb4   :  { %16817 = vmatmul.mubr.f32.gmra.mxu0 %v20271_v48  ;;  %16843 = vmatmul.mubr.f32.gmra.mxu1 %v20195_v56 }
 0xdb5   :  { %16819 = vmatprep.mubr.f32.mxu0 %v20277_v24  ;;  %16845 = vmatprep.mubr.f32.mxu1 %v20231_v13 }
 0xdb6   :  { %16902 = vmatpush3.msra.mxu1 %v20392_v63  ;;  %16868 = vmatpush3.msra.mxu0 %v20241_v39  ;;  %v24538_v63 = vld [vmem:[#allocation34_spill] sm:$0xff] }
 0xdb7   :  { %16903 = vmatprep.subr.mxu1 %v20383_v0  ;;  %16869 = vmatprep.subr.mxu0 %v20238_v9 }
 0xdb8   :  { %16820 = vmatmul.mubr.f32.gmra.mxu0 %v20305_v41  ;;  %16846 = vmatmul.mubr.f32.gmra.mxu1 %v20238_v9 }
 0xdb9   :  { %16822 = vmatprep.mubr.f32.mxu0 %v20314_v51  ;;  %16848 = vmatprep.mubr.f32.mxu1 %v20241_v39 }
 0xdba   :  { %16904 = vmatpush3.msra.mxu1 %v20383_v0  ;;  %16870 = vmatpush3.msra.mxu0 %v20238_v9 }
 0xdbb   :  { %16905 = vmatprep.subr.mxu1 %v24530_v14  ;;  %16871 = vmatprep.subr.mxu0 %v20231_v13 }
 0xdbc   :  { %16823 = vmatmul.mubr.f32.gmra.mxu0 %v20338_v42  ;;  %16849 = vmatmul.mubr.f32.gmra.mxu1 %v20271_v48 }
 0xdbd   :  { %16851 = vmatprep.mubr.f32.mxu1 %v20277_v24  ;;  %16906 = vmatpush3.msra.mxu1 %v24530_v14 }
 0xdbe   :  { %16907 = vmatprep.subr.mxu1 %v24531_v11  ;;  %16872 = vmatpush3.msra.mxu0 %v20231_v13 }
 0xdbf   :  { %16908 = vmatpush3.msra.mxu1 %v24531_v11  ;;  %16873 = vmatprep.subr.mxu0 %v20195_v56 }
 0xdc0   :  { %16852 = vmatmul.mubr.f32.gmra.mxu1 %v20305_v41  ;;  %16909 = vmatprep.subr.mxu1 %v24532_v47 }
 0xdc1   :  { %16854 = vmatprep.mubr.f32.mxu1 %v20314_v51  ;;  %16910 = vmatpush3.msra.mxu1 %v24532_v47 }
 0xdc2   :  { %16911 = vmatprep.subr.mxu1 %v24533_v40  ;;  %16874 = vmatpush3.msra.mxu0 %v20195_v56 }
 0xdc3   :  { %16912 = vmatpush3.msra.mxu1 %v24533_v40  ;;  %16875 = vmatprep.subr.mxu0 %v20193_v8 }
 0xdc4   :  { %16855 = vmatmul.mubr.f32.gmra.mxu1 %v20338_v42  ;;  %16913 = vmatprep.subr.mxu1 %v24534_v7 }
 0xdc5   :  { %16914 = vmatpush3.msra.mxu1 %v24534_v7  ;;  %16876 = vmatpush3.msra.mxu0 %v20193_v8 }
 0xdc6   :  { %16915 = vmatprep.subr.mxu1 %v24535_v27  ;;  %16877 = vmatprep.subr.mxu0 %v20162_v52 }
 0xdc7   :  { %16916 = vmatpush3.msra.mxu1 %v24535_v27  ;;  %16878 = vmatpush3.msra.mxu0 %v20162_v52  ;;  %v9915_v52 = vld [vmem:[#allocation2 + $0x8] sm:$0xff] }
 0xdc8   :  { %16917 = vmatprep.subr.mxu1 %v24536_v38  ;;  %16879 = vmatprep.subr.mxu0 %v20160_v58 }
 0xdc9   :  { %16918 = vmatpush3.msra.mxu1 %v24536_v38  ;;  %16880 = vmatpush3.msra.mxu0 %v20160_v58 }
 0xdca   :  { %16919 = vmatprep.subr.mxu1 %v24537_v50  ;;  %16881 = vmatprep.subr.mxu0 %v20123_v36 }
 0xdcb   :  { %16920 = vmatpush3.msra.mxu1 %v24537_v50  ;;  %16882 = vmatpush3.msra.mxu0 %v20123_v36 }
 0xdcc   :  { %16921 = vmatprep.subr.mxu1 %v24538_v63  ;;  %16883 = vmatprep.subr.mxu0 %v20115_v18 }
 0xdcd   :  { %16922 = vmatpush3.msra.mxu1 %v24538_v63  ;;  %16884 = vmatpush3.msra.mxu0 %v20115_v18 }
 0xdce   :  { %16923 = vmatprep.subr.mxu1 %v24539_v49  ;;  %16885 = vmatprep.subr.mxu0 %v20104_v43 }
 0xdcf   :  { %16924 = vmatpush3.msra.mxu1 %v24539_v49  ;;  %16886 = vmatpush3.msra.mxu0 %v20104_v43  ;;  %v20639_v43 = vld [vmem:[%s24155_s2 + $0x1d8] sm:$0xff] }
 0xdd0   :  { %16925 = vmatprep.subr.mxu1 %v24540_v37  ;;  %16887 = vmatprep.subr.mxu0 %v20059_v25  ;;  %24545 = vst [vmem:[#allocation52_spill] sm:$0xff] %v20639_v43  ;;  %v9846_v58 = vmul.f32 %v9830_v29, %v20639_v43  ;;  %v20659_v13 = vmul.f32 %v9915_v52, %v20639_v43  ;;  %v14471_v29 = vld [vmem:[%s24155_s2 + $0x1cc] ss:$0 sm:$0xff] }
 0xdd1   :  { %16926 = vmatpush3.msra.mxu1 %v24540_v37  ;;  %16888 = vmatpush3.msra.mxu0 %v20059_v25 }
 0xdd2   :  { %16971 = vmatprep.subr.mxu1 %v20338_v42  ;;  %16933 = vmatprep.subr.mxu0 %v20366_v5  ;;  %v20656_v23 = vmul.f32 %v9846_v58, %v20649_v33  ;;  %v10754_v3 = vmul.f32 %v14472_v22, %v20659_v13 }
 0xdd4   :  { %v10685_v39 = vmul.f32 %v14471_v29, %v20656_v23 }
 0xdd6   :  { %v20675_v52 = vadd.f32 %v10754_v3, %v10685_v39 }
 0xdd8   :  { %24548 = vst [vmem:[#allocation35_spill] sm:$0xff] %v20675_v52 }
 0xe20   :  { %v20570_v0 = vpop.f32.mrf.mxu0 }
 0xe22   :  { %v20572_v53 = vpop.f32.mrf.mxu0 }
 0xe24   :  { %v20574_v20 = vpop.f32.mrf.mxu0 }
 0xe26   :  { %v20576_v12 = vpop.f32.mrf.mxu0 }
 0xe28   :  { %v20578_v14 = vpop.f32.mrf.mxu0  ;;  %v20580_v11 = vpop.f32.mrf.mxu1 }
 0xe2a   :  { %v20582_v47 = vpop.f32.mrf.mxu0  ;;  %v20584_v40 = vpop.f32.mrf.mxu1 }
 0xe2c   :  { %v20586_v7 = vpop.f32.mrf.mxu0  ;;  %v20588_v27 = vpop.f32.mrf.mxu1 }
 0xe2e   :  { %v20590_v38 = vpop.f32.mrf.mxu0  ;;  %v20592_v50 = vpop.f32.mrf.mxu1 }
 0xe30   :  { %v20594_v63 = vpop.f32.mrf.mxu0  ;;  %v20596_v49 = vpop.f32.mrf.mxu1 }
 0xe32   :  { %v20598_v37 = vpop.f32.mrf.mxu0  ;;  %v20600_v55 = vpop.f32.mrf.mxu1 }
 0xe34   :  { %v20602_v1 = vpop.f32.mrf.mxu0  ;;  %v20604_v45 = vpop.f32.mrf.mxu1 }
 0xe36   :  { %v20606_v4 = vpop.f32.mrf.mxu0  ;;  %v20608_v35 = vpop.f32.mrf.mxu1 }
 0xe38   :  { %v20610_v54 = vpop.f32.mrf.mxu0  ;;  %v20612_v61 = vpop.f32.mrf.mxu1 }
 0xe3a   :  { %v20614_v34 = vpop.f32.mrf.mxu0  ;;  %v20616_v60 = vpop.f32.mrf.mxu1 }
 0xe3c   :  { %v20618_v62 = vpop.f32.mrf.mxu0  ;;  %v20620_v21 = vpop.f32.mrf.mxu1 }
 0xe3d   :  { %24541 = vst [vmem:[#allocation63_spill] sm:$0xff] %v20618_v62 }
 0xe3e   :  { %v20622_v26 = vpop.f32.mrf.mxu0  ;;  %v20624_v31 = vpop.f32.mrf.mxu1 }
 0xe3f   :  { %24542 = vst [vmem:[#allocation60_spill] sm:$0xff] %v20622_v26 }
 0xe40   :  { %v20626_v19 = vpop.f32.mrf.mxu1  ;;  %v16739_v10 = vpop.f32.mrf.mxu0 }
 0xe42   :  { %v20628_v32 = vpop.f32.mrf.mxu1  ;;  %v9102_v57 = vpop.f32.mrf.mxu0 }
 0xe44   :  { %v20630_v16 = vpop.f32.mrf.mxu1  ;;  %v16742_v30 = vpop.f32.mrf.mxu0 }
 0xe45   :  { %24543 = vst [vmem:[#allocation59_spill] sm:$0xff] %v20630_v16 }
 0xe46   :  { %v20632_v44 = vpop.f32.mrf.mxu1  ;;  %v9116_v46 = vpop.f32.mrf.mxu0 }
 0xe47   :  { %24544 = vst [vmem:[#allocation53_spill] sm:$0xff] %v20632_v44 }
 0xe48   :  { %v20634_v25 = vpop.f32.mrf.mxu0  ;;  %v16771_v17 = vpop.f32.mrf.mxu1 }
 0xe4a   :  { %v20641_v18 = vpop.f32.mrf.mxu0  ;;  %v9284_v15 = vpop.f32.mrf.mxu1 }
 0xe4c   :  { %v20643_v36 = vpop.f32.mrf.mxu0  ;;  %v16774_v6 = vpop.f32.mrf.mxu1 }
 0xe4e   :  { %v20651_v2 = vpop.f32.mrf.mxu0  ;;  %v9300_v8 = vpop.f32.mrf.mxu1 }
 0xe50   :  { %v20653_v59 = vpop.f32.mrf.mxu0  ;;  %v16777_v56 = vpop.f32.mrf.mxu1 }
 0xe52   :  { %v20667_v9 = vpop.f32.mrf.mxu0  ;;  %v9316_v28 = vpop.f32.mrf.mxu1 }
 0xe54   :  { %v20671_v58 = vpop.f32.mrf.mxu0  ;;  %v20673_v5 = vpop.f32.mrf.mxu1 }
 0xe55   :  { %24547 = vst [vmem:[#allocation43_spill] sm:$0xff] %v20671_v58 }
 0xe56   :  { %v20677_v48 = vpop.f32.mrf.mxu0  ;;  %v20679_v24 = vpop.f32.mrf.mxu1 }
 0xe57   :  { %24549 = vst [vmem:[#allocation34_spill] sm:$0xff] %v20677_v48 }
 0xe58   :  { %v20681_v41 = vpop.f32.mrf.mxu0  ;;  %v20683_v51 = vpop.f32.mrf.mxu1 }
 0xe59   :  { %24550 = vst [vmem:[#allocation26_spill] sm:$0xff] %v20681_v41  ;;  %v8939_v41 = vadd.f32 %v20580_v11, %v20570_v0  ;;  %v8945_v0 = vadd.f32 %v20592_v50, %v20576_v12  ;;  %v20735_v50 = vld [vmem:[%s24155_s2 + $0x1c1] ss:$0 sm:$0xff] }
 0xe5a   :  { %v20685_v42 = vpop.f32.mrf.mxu0  ;;  %v20687_v33 = vpop.f32.mrf.mxu1 }
 0xe5b   :  { %24551 = vst [vmem:[#allocation12_spill] sm:$0xff] %v20685_v42  ;;  %24552 = vst [vmem:[#allocation66_spill] sm:$0xff] %v20687_v33  ;;  %v8933_v42 = vadd.f32 %v20584_v40, %v20572_v53  ;;  %v9110_v33 = vadd.f32 %v16739_v10, %v8939_v41  ;;  %v8963_v10 = vadd.f32 %v20596_v49, %v20578_v14 }
 0xe5c   :  { %v20689_v29 = vpop.f32.mrf.mxu0  ;;  %v20691_v22 = vpop.f32.mrf.mxu1  ;;  %v9117_v40 = vadd.f32 %v9116_v46, %v8945_v0 }
 0xe5d   :  { %24553 = vst [vmem:[#allocation67_spill] sm:$0xff] %v20689_v29  ;;  %24554 = vst [vmem:[#allocation68_spill] sm:$0xff] %v20691_v22  ;;  %v9293_v44 = vadd.f32 %v16771_v17, %v9110_v33  ;;  %v8957_v17 = vadd.f32 %v20600_v55, %v20582_v47 }
 0xe5e   :  { %v20693_v43 = vpop.f32.mrf.mxu0  ;;  %v20695_v39 = vpop.f32.mrf.mxu1  ;;  %v9301_v12 = vadd.f32 %v9300_v8, %v9117_v40  ;;  %v9005_v40 = vadd.f32 %v20628_v32, %v20614_v34  ;;  %v24565_v34 = vld [vmem:[#allocation43_spill] sm:$0xff] }
 0xe5f   :  { %24555 = vst [vmem:[#allocation69_spill] sm:$0xff] %v20693_v43  ;;  %24556 = vst [vmem:[#allocation70_spill] sm:$0xff] %v20695_v39  ;;  %v8951_v43 = vadd.f32 %v20588_v27, %v20574_v20  ;;  %v9103_v39 = vadd.f32 %v9102_v57, %v8933_v42  ;;  %v9138_v57 = vadd.f32 %v20634_v25, %v8963_v10  ;;  %v20726_v25 = vld [vmem:[%s24155_s2 + $0x1c0] ss:$0 sm:$0xff] }
 0xe60   :  { %v20697_v3 = vpop.f32.mrf.mxu1  ;;  %v16803_v52 = vpop.f32.mrf.mxu0  ;;  %v9883_v49 = vmul.f32 %v20726_v25, %v20656_v23 }
 0xe61   :  { %24557 = vst [vmem:[#allocation71_spill] sm:$0xff] %v20697_v3  ;;  %v9124_v11 = vadd.f32 %v16742_v30, %v8951_v43  ;;  %v9494_v16 = vadd.f32 %v16803_v52, %v9293_v44  ;;  %v8975_v44 = vadd.f32 %v20604_v45, %v20586_v7 }
 0xe62   :  { %v20701_v48 = vpop.f32.mrf.mxu1  ;;  %v9487_v58 = vpop.f32.mrf.mxu0 }
 0xe63   :  { %24558 = vst [vmem:[#allocation72_spill] sm:$0xff] %v20701_v48  ;;  %v9285_v48 = vadd.f32 %v9284_v15, %v9103_v39 }
 0xe64   :  { %v20705_v29 = vpop.f32.mrf.mxu1  ;;  %v16806_v22 = vpop.f32.mrf.mxu0 }
 0xe65   :  { %24559 = vst [vmem:[#allocation73_spill] sm:$0xff] %v20705_v29  ;;  %v9309_v29 = vadd.f32 %v16774_v6, %v9124_v11  ;;  %v9488_v62 = vadd.f32 %v9487_v58, %v9285_v48  ;;  %v9131_v6 = vadd.f32 %v20641_v18, %v8957_v17  ;;  %v9952_v58 = vmul.f32 %v20735_v50, %v20659_v13  ;;  %v24561_v17 = vld [vmem:[#allocation59_spill] sm:$0xff] }
 0xe66   :  { %v20709_v3 = vpop.f32.mrf.mxu1  ;;  %v9499_v26 = vpop.f32.mrf.mxu0 }
 0xe67   :  { %v9506_v43 = vadd.f32 %v16806_v22, %v9309_v29  ;;  %v9500_v48 = vadd.f32 %v9499_v26, %v9301_v12  ;;  %v9317_v27 = vadd.f32 %v9316_v28, %v9131_v6  ;;  %v8969_v26 = vadd.f32 %v20608_v35, %v20590_v38  ;;  %v24566_v12 = vld [vmem:[#allocation34_spill] sm:$0xff]  ;;  %v20782_v6 = vld [vmem:[%s24155_s2 + $0x2e0] sm:$0xff] }
 0xe68   :  { %v16809_v41 = vpop.f32.mrf.mxu0  ;;  %v16835_v53 = vpop.f32.mrf.mxu1  ;;  %v8987_v35 = vadd.f32 %v20612_v61, %v20594_v63  ;;  %v20752_v63 = vadd.f32 %v9952_v58, %v9883_v49  ;;  %v20799_v49 = vld [vmem:[%s24155_s2 + $0x1e0] sm:$0xff] }
 0xe69   :  { %v9659_v20 = vadd.f32 %v16835_v53, %v9494_v16  ;;  %v9325_v16 = vadd.f32 %v16777_v56, %v9138_v57  ;;  %v9145_v38 = vadd.f32 %v20651_v2, %v8969_v26  ;;  %v8999_v2 = vadd.f32 %v20620_v21, %v20602_v1  ;;  %v24562_v1 = vld [vmem:[#allocation60_spill] sm:$0xff]  ;;  %v24564_v21 = vld [vmem:[#allocation66_spill] sm:$0xff] }
 0xe6a   :  { %v9511_v33 = vpop.f32.mrf.mxu0  ;;  %v9652_v42 = vpop.f32.mrf.mxu1  ;;  %v9166_v39 = vadd.f32 %v20653_v59, %v8987_v35  ;;  %v8993_v59 = vadd.f32 %v20624_v31, %v20606_v4  ;;  %v20773_v31 = vld [vmem:[%s24155_s2 + $0x1c4] ss:$0 sm:$0xff]  ;;  %24573 = vst [vmem:[#allocation60_spill] sm:$0xff] %v20799_v49 }
 0xe6b   :  { %9815 = vst.msk [vmem:[#allocation2 + $0x18] sm:$0xff] %vm144_vm0, %v9659_v20  ;;  %v9653_v30 = vadd.f32 %v9652_v42, %v9488_v62  ;;  %v9152_v62 = vadd.f32 %v20643_v36, %v8975_v44  ;;  %v9518_v45 = vadd.f32 %v16809_v41, %v9325_v16  ;;  %v9512_v28 = vadd.f32 %v9511_v33, %v9317_v27  ;;  %v24560_v20 = vld [vmem:[#allocation63_spill] sm:$0xff] }
 0xe6c   :  { %v16812_v15 = vpop.f32.mrf.mxu0  ;;  %v16838_v46 = vpop.f32.mrf.mxu1  ;;  %v9333_v0 = vadd.f32 %v20679_v24, %v9145_v38  ;;  %v9357_v41 = vadd.f32 %v20683_v51, %v9166_v39  ;;  %v9011_v24 = vadd.f32 %v20626_v19, %v20610_v54  ;;  %v9023_v33 = vadd.f32 %v24561_v17, %v24560_v20  ;;  %24569 = vst [vmem:[#allocation63_spill] sm:$0xff] %v20782_v6  ;;  %v24576_v35 = vld [vmem:[#allocation71_spill] sm:$0xff]  ;;  %v24579_v39 = vld [vmem:[#allocation73_spill] sm:$0xff] }
 0xe6d   :  { %9814 = vst.msk [vmem:[#allocation2 + $0x10] sm:$0xff] %vm144_vm0, %v9653_v30  ;;  %v9671_v14 = vadd.f32 %v16838_v46, %v9506_v43  ;;  %v9341_v36 = vadd.f32 %v20673_v5, %v9152_v62  ;;  %v8981_v5 = vadd.f32 %v20616_v60, %v20598_v37  ;;  %v9180_v32 = vadd.f32 %v24565_v34, %v8999_v2  ;;  %v24567_v30 = vld [vmem:[#allocation26_spill] sm:$0xff]  ;;  %v20821_v2 = vld [vmem:[%s24155_s2 + $0x268] sm:$0xff] }
 0xe6e   :  { %v9523_v8 = vpop.f32.mrf.mxu0  ;;  %v9664_v47 = vpop.f32.mrf.mxu1  ;;  %v9173_v43 = vadd.f32 %v24566_v12, %v8993_v59  ;;  %v9194_v44 = vadd.f32 %v24567_v30, %v9011_v24  ;;  %v20837_v24 = vld [vmem:[%s24155_s2 + $0x1c3] ss:$0 sm:$0xff]  ;;  %v20857_v34 = vld [vmem:[%s24155_s2 + $0x2e8] sm:$0xff] }
 0xe6f   :  { %9817 = vst.msk [vmem:[#allocation2 + $0x28] sm:$0xff] %vm144_vm0, %v9671_v14  ;;  %v9665_v7 = vadd.f32 %v9664_v47, %v9500_v48  ;;  %v9530_v22 = vadd.f32 %v16812_v15, %v9341_v36  ;;  %v9159_v10 = vadd.f32 %v20667_v9, %v8981_v5  ;;  %v9524_v53 = vadd.f32 %v9523_v8, %v9333_v0  ;;  %v24563_v9 = vld [vmem:[#allocation53_spill] sm:$0xff]  ;;  %v24568_v15 = vld [vmem:[#allocation12_spill] sm:$0xff]  ;;  %v24571_v14 = vld [vmem:[#allocation67_spill] sm:$0xff] }
 0xe70   :  { %v16815_v18 = vpop.f32.mrf.mxu0  ;;  %v16841_v56 = vpop.f32.mrf.mxu1  ;;  %v9017_v51 = vadd.f32 %v24563_v9, %v24562_v1  ;;  %v9187_v46 = vadd.f32 %v24568_v15, %v9005_v40  ;;  %v20789_v48 = vld [vmem:[%s24155_s2 + $0x1e8] sm:$0xff]  ;;  %v9208_v8 = vadd.f32 %v24571_v14, %v9023_v33  ;;  %v24572_v47 = vld [vmem:[#allocation69_spill] sm:$0xff]  ;;  %v9389_v38 = vadd.f32 %v24576_v35, %v9194_v44 }
 0xe71   :  { %9816 = vst.msk [vmem:[#allocation2 + $0x20] sm:$0xff] %vm144_vm0, %v9665_v7  ;;  %v9683_v55 = vadd.f32 %v16841_v56, %v9518_v45  ;;  %v9349_v42 = vadd.f32 %v24564_v21, %v9159_v10  ;;  %v9542_v4 = vadd.f32 %v16815_v18, %v9357_v41  ;;  %24570 = vst [vmem:[#allocation59_spill] sm:$0xff] %v20789_v48  ;;  %v24574_v36 = vld [vmem:[#allocation68_spill] sm:$0xff] }
 0xe72   :  { %v9535_v52 = vpop.f32.mrf.mxu0  ;;  %v9676_v29 = vpop.f32.mrf.mxu1  ;;  %v9201_v62 = vadd.f32 %v24572_v47, %v9017_v51  ;;  %v9917_v27 = vld [vmem:[#allocation2 + $0x18] sm:$0xff]  ;;  %v9405_v0 = vadd.f32 %v24579_v39, %v9208_v8  ;;  %v20917_v39 = vld [vmem:[%s24155_s2 + $0x288] sm:$0xff] }
 0xe73   :  { %9819 = vst.msk [vmem:[#allocation2 + $0x38] sm:$0xff] %vm144_vm0, %v9683_v55  ;;  %v9677_v23 = vadd.f32 %v9676_v29, %v9512_v28  ;;  %v9536_v7 = vadd.f32 %v9535_v52, %v9349_v42  ;;  %v9373_v28 = vadd.f32 %v24574_v36, %v9180_v32  ;;  %v24575_v55 = vld [vmem:[#allocation70_spill] sm:$0xff]  ;;  %v24577_v29 = vld [vmem:[#allocation72_spill] sm:$0xff]  ;;  %v20808_v52 = vld [vmem:[%s24155_s2 + $0x260] sm:$0xff]  ;;  %v20842_v17 = vmul.f32 %v9917_v27, %v20789_v48 }
 0xe74   :  { %v16818_v11 = vpop.f32.mrf.mxu0  ;;  %v16844_v13 = vpop.f32.mrf.mxu1  ;;  %v20784_v16 = vld [vmem:[#allocation2 + $0x17] sm:$0xff]  ;;  %v20793_v45 = vld [vmem:[#allocation2 + $0xf] sm:$0xff]  ;;  %v9365_v58 = vadd.f32 %v24575_v55, %v9173_v43  ;;  %24578 = vst [vmem:[#allocation53_spill] sm:$0xff] %v20808_v52 }
 0xe75   :  { %9818 = vst.msk [vmem:[#allocation2 + $0x30] sm:$0xff] %vm144_vm0, %v9677_v23  ;;  %v9695_v61 = vadd.f32 %v16844_v13, %v9530_v22  ;;  %v9381_v22 = vadd.f32 %v24577_v29, %v9187_v46  ;;  %v9916_v23 = vld [vmem:[#allocation2 + $0x10] sm:$0xff]  ;;  %v20814_v13 = vadd.f32 %v20709_v3, %v9201_v62  ;;  %v20832_v3 = vmul.f32 %v20773_v31, %v9917_v27  ;;  %v24581_v32 = vld [vmem:[#allocation52_spill] sm:$0xff] }
 0xe76   :  { %v9547_v60 = vpop.f32.mrf.mxu0  ;;  %v9688_v37 = vpop.f32.mrf.mxu1  ;;  %v20823_v10 = vld [vmem:[#allocation2 + $0x28] sm:$0xff]  ;;  %v9554_v40 = vadd.f32 %v16818_v11, %v9373_v28  ;;  %v9847_v20 = vmul.f32 %v20793_v45, %v20799_v49  ;;  %v9848_v42 = vmul.f32 %v20784_v16, %v20789_v48  ;;  %v9932_v11 = vmul.f32 %v9916_v23, %v20799_v49  ;;  %v9769_v36 = vld [vmem:[%s24155_s2 + $0x270] sm:$0xff] }
 0xe77   :  { %9821 = vst.msk [vmem:[#allocation2 + $0x48] sm:$0xff] %vm144_vm0, %v9695_v61  ;;  %v9689_v54 = vadd.f32 %v9688_v37, %v9524_v53  ;;  %v10071_v61 = vmul.f32 %v20784_v16, %v20782_v6  ;;  %24580 = vst [vmem:[#allocation66_spill] sm:$0xff] %v20823_v10  ;;  %v20829_v37 = vld [vmem:[%s24155_s2 + $0x258] sm:$0xff]  ;;  %v9984_v59 = vld [vmem:[#allocation2 + $0x9] sm:$0xff]  ;;  %v9548_v9 = vadd.f32 %v9547_v60, %v9365_v58 }
 0xe78   :  { %v16821_v19 = vpop.f32.mrf.mxu0  ;;  %v16847_v57 = vpop.f32.mrf.mxu1  ;;  %v20810_v5 = vld [vmem:[#allocation2 + $0x1f] sm:$0xff]  ;;  %v20860_v60 = vmul.f32 %v9917_v27, %v20829_v37  ;;  %v20863_v12 = vmul.f32 %v9984_v59, %v24581_v32  ;;  %v20869_v30 = vmul.f32 %v20773_v31, %v9916_v23  ;;  %v20880_v14 = vmul.f32 %v20773_v31, %v20823_v10  ;;  %v20882_v8 = vld [vmem:[#allocation2 + $0x27] sm:$0xff] }
 0xe79   :  { %9820 = vst.msk [vmem:[#allocation2 + $0x40] sm:$0xff] %vm144_vm0, %v9689_v54  ;;  %v9707_v26 = vadd.f32 %v16847_v57, %v9542_v4  ;;  %v20844_v33 = vld [vmem:[#allocation2 + $0x20] sm:$0xff]  ;;  %v10217_v1 = vmul.f32 %v20810_v5, %v20808_v52  ;;  %v10288_v4 = vmul.f32 %v20823_v10, %v20821_v2  ;;  %v9566_v54 = vadd.f32 %v16821_v19, %v9389_v38  ;;  %v20874_v19 = vld [vmem:[%s24155_s2 + $0x278] sm:$0xff] }
 0xe7a   :  { %v9559_v18 = vpop.f32.mrf.mxu0  ;;  %v9700_v56 = vpop.f32.mrf.mxu1  ;;  %v20866_v43 = vmul.f32 %v20837_v24, %v10071_v61  ;;  %v20876_v44 = vld [vmem:[#allocation2 + $0x38] sm:$0xff]  ;;  %24583 = vst [vmem:[#allocation34_spill] sm:$0xff] %v20880_v14  ;;  %v20884_v47 = vld [vmem:[#allocation2 + $0x21] sm:$0xff]  ;;  %v10287_v62 = vmul.f32 %v20844_v33, %v20808_v52  ;;  %v9863_v58 = vmul.f32 %v9847_v20, %v20782_v6  ;;  %v9864_v35 = vmul.f32 %v9848_v42, %v20857_v34 }
 0xe7b   :  { %9823 = vst.msk [vmem:[#allocation2 + $0x58] sm:$0xff] %vm144_vm0, %v9707_v26  ;;  %v9701_v41 = vadd.f32 %v9700_v56, %v9536_v7  ;;  %24582 = vst [vmem:[#allocation43_spill] sm:$0xff] %v20876_v44  ;;  %v9560_v27 = vadd.f32 %v9559_v18, %v9381_v22  ;;  %v20892_v26 = vld [vmem:[%s24155_s2 + $0x1c7] ss:$0 sm:$0xff]  ;;  %v10233_v56 = vmul.f32 %v10217_v1, %v20782_v6  ;;  %v20910_v22 = vld [vmem:[%s24155_s2 + $0x1c6] ss:$0 sm:$0xff] }
 0xe7c   :  { %v16850_v53 = vpop.f32.mrf.mxu1  ;;  %v16824_v51 = vpop.f32.mrf.mxu0  ;;  %v20898_v28 = vld [vmem:[#allocation2 + $0x30] sm:$0xff]  ;;  %v9953_v38 = vmul.f32 %v20735_v50, %v9932_v11  ;;  %v20905_v29 = vmul.f32 %v20892_v26, %v10288_v4  ;;  %v10290_v23 = vmul.f32 %v20876_v44, %v20874_v19  ;;  %v20922_v59 = vmul.f32 %v20773_v31, %v20844_v33  ;;  %v20963_v6 = vld [vmem:[#allocation2 + $0x19] sm:$0xff] }
 0xe7d   :  { %9822 = vst.msk [vmem:[#allocation2 + $0x50] sm:$0xff] %vm144_vm0, %v9701_v41  ;;  %v9719_v57 = vadd.f32 %v16850_v53, %v9554_v40  ;;  %24584 = vst [vmem:[#allocation26_spill] sm:$0xff] %v20898_v28  ;;  %v9578_v41 = vadd.f32 %v16824_v51, %v9405_v0  ;;  %v20926_v40 = vmul.f32 %v20882_v8, %v20821_v2  ;;  %v20936_v0 = vld [vmem:[#allocation2 + $0x2f] sm:$0xff]  ;;  %v9771_v51 = vld [vmem:[%s24155_s2 + $0x280] sm:$0xff] }
 0xe7e   :  { %v9712_v21 = vpop.f32.mrf.mxu1  ;;  %v9571_v55 = vpop.f32.mrf.mxu0  ;;  %v9923_v61 = vld [vmem:[#allocation2 + $0x48] sm:$0xff]  ;;  %v20930_v20 = vmul.f32 %v20884_v47, %v20808_v52  ;;  %v20934_v1 = vmul.f32 %v20773_v31, %v20876_v44  ;;  %24586 = vst [vmem:[#allocation67_spill] sm:$0xff] %v20936_v0  ;;  %v20944_v42 = vmul.f32 %v20892_v26, %v10287_v62  ;;  %v20948_v4 = vld [vmem:[#allocation2 + $0x31] sm:$0xff]  ;;  %v9885_v52 = vmul.f32 %v20726_v25, %v9864_v35 }
 0xe7f   :  { %v9713_v15 = vadd.f32 %v9712_v21, %v9548_v9  ;;  %9825 = vst.msk [vmem:[#allocation2 + $0x68] sm:$0xff] %vm144_vm0, %v9719_v57  ;;  %v20938_v9 = vld [vmem:[#allocation2 + $0x37] sm:$0xff]  ;;  %v20946_v11 = vld [vmem:[#allocation2 + $0x29] sm:$0xff]  ;;  %24588 = vst [vmem:[#allocation68_spill] sm:$0xff] %v20948_v4  ;;  %v9572_v32 = vadd.f32 %v9571_v55, %v20814_v13  ;;  %v10292_v62 = vmul.f32 %v9923_v61, %v20917_v39 }
 0xe80   :  { %v16853_v46 = vpop.f32.mrf.mxu1  ;;  %24585 = vst [vmem:[#allocation12_spill] sm:$0xff] %v20934_v1  ;;  %24587 = vst [vmem:[#allocation69_spill] sm:$0xff] %v20938_v9  ;;  %v20951_v57 = vld [vmem:[#allocation2 + $0x40] sm:$0xff]  ;;  %v20966_v1 = vmul.f32 %v20892_v26, %v10290_v23  ;;  %v20970_v13 = vmul.f32 %v20773_v31, %v20898_v28  ;;  %v20973_v55 = vmul.f32 %v20936_v0, %v9769_v36 }
 0xe81   :  { %v9731_v7 = vadd.f32 %v16853_v46, %v9566_v54  ;;  %9824 = vst.msk [vmem:[#allocation2 + $0x60] sm:$0xff] %vm144_vm0, %v9713_v15  ;;  %v10289_v54 = vmul.f32 %v20898_v28, %v9769_v36  ;;  %24589 = vst [vmem:[#allocation70_spill] sm:$0xff] %v20951_v57  ;;  %v20955_v46 = vld [vmem:[#allocation2 + $0x11] sm:$0xff]  ;;  %v20983_v23 = vmul.f32 %v20938_v9, %v20874_v19  ;;  %v20996_v44 = vld [vmem:[#allocation2 + $0x39] sm:$0xff] }
 0xe82   :  { %v9724_v18 = vpop.f32.mrf.mxu1  ;;  %24590 = vst [vmem:[#allocation71_spill] sm:$0xff] %v20966_v1  ;;  %24591 = vst [vmem:[#allocation72_spill] sm:$0xff] %v20970_v13  ;;  %v20994_v1 = vld [vmem:[#allocation2 + $0x47] sm:$0xff]  ;;  %v10001_v9 = vmul.f32 %v20955_v46, %v20799_v49 }
 0xe83   :  { %9827 = vst.msk [vmem:[#allocation2 + $0x78] sm:$0xff] %vm144_vm0, %v9731_v7  ;;  %v9725_v53 = vadd.f32 %v9724_v18, %v9560_v27  ;;  %v20958_v27 = vmul.f32 %v20910_v22, %v10233_v56  ;;  %v9884_v18 = vmul.f32 %v20726_v25, %v9863_v58  ;;  %v20978_v56 = vld [vmem:[%s24155_s2 + $0x298] sm:$0xff]  ;;  %24593 = vst [vmem:[#allocation52_spill] sm:$0xff] %v20983_v23  ;;  %v21005_v13 = vld [vmem:[#allocation2 + $0x41] sm:$0xff] }
 0xe84   :  { %v16856_v21 = vpop.f32.mrf.mxu1  ;;  %24592 = vst [vmem:[#allocation73_spill] sm:$0xff] %v20978_v56  ;;  %v9925_v58 = vld [vmem:[#allocation2 + $0x58] sm:$0xff]  ;;  %24596 = vst [vmem:[#allocation76_spill] sm:$0xff] %v20994_v1  ;;  %v21045_v23 = vmul.f32 %v20994_v1, %v20917_v39  ;;  %v21065_v1 = vmul.f32 %v21005_v13, %v9771_v51 }
 0xe85   :  { %9826 = vst.msk [vmem:[#allocation2 + $0x70] sm:$0xff] %vm144_vm0, %v9725_v53  ;;  %v9743_v15 = vadd.f32 %v16856_v21, %v9578_v41  ;;  %v20987_v41 = vmul.f32 %v20946_v11, %v20821_v2  ;;  %v20990_v53 = vmul.f32 %v20948_v4, %v9769_v36  ;;  %v20992_v21 = vld [vmem:[#allocation2 + $0x3f] sm:$0xff]  ;;  %24597 = vst [vmem:[#allocation77_spill] sm:$0xff] %v20996_v44 }
 0xe86   :  { %v9736_v7 = vpop.f32.mrf.mxu1  ;;  %24595 = vst [vmem:[#allocation75_spill] sm:$0xff] %v20992_v21  ;;  %24600 = vst [vmem:[#allocation80_spill] sm:$0xff] %v21005_v13  ;;  %v21011_v2 = vld [vmem:[%s24155_s2 + $0x358] sm:$0xff]  ;;  %v9954_v36 = vmul.f32 %v20735_v50, %v20842_v17  ;;  %v21030_v17 = vld [vmem:[%s24155_s2 + $0x360] sm:$0xff]  ;;  %v21032_v28 = vadd.f32 %v9953_v38, %v9884_v18  ;;  %v21041_v49 = vmul.f32 %v20992_v21, %v9771_v51 }
 0xe87   :  { %9829 = vst.msk [vmem:[#allocation2 + $0x88] sm:$0xff] %vm144_vm0, %v9743_v15  ;;  %v9737_v35 = vadd.f32 %v9736_v7, %v9572_v32  ;;  %24594 = vst [vmem:[#allocation74_spill] sm:$0xff] %v20990_v53  ;;  %v10291_v15 = vmul.f32 %v20951_v57, %v9771_v51  ;;  %v21000_v32 = vmul.f32 %v20892_v26, %v10289_v54  ;;  %v9839_v38 = vld [vmem:[#allocation2 + $0x4f] sm:$0xff] }
 0xe88   :  { %v21003_v7 = vmul.f32 %v20773_v31, %v9923_v61  ;;  %v21018_v54 = vmul.f32 %v20892_v26, %v10292_v62  ;;  %v10294_v61 = vmul.f32 %v9925_v58, %v20978_v56  ;;  %v10002_v62 = vmul.f32 %v20963_v6, %v20789_v48  ;;  %24603 = vst [vmem:[#allocation83_spill] sm:$0xff] %v21041_v49  ;;  %v9924_v18 = vld [vmem:[#allocation2 + $0x50] sm:$0xff]  ;;  %v21054_v48 = vld [vmem:[%s24155_s2 + $0x348] sm:$0xff] }
 0xe89   :  { %24598 = vst [vmem:[#allocation78_spill] sm:$0xff] %v21000_v32  ;;  %9828 = vst.msk [vmem:[#allocation2 + $0x80] sm:$0xff] %vm144_vm0, %v9737_v35  ;;  %v9773_v35 = vld [vmem:[%s24155_s2 + $0x290] sm:$0xff]  ;;  %v21049_v4 = vmul.f32 %v20996_v44, %v20874_v19  ;;  %v9970_v49 = vadd.f32 %v9954_v36, %v9885_v52  ;;  %v10016_v44 = vmul.f32 %v20863_v12, %v21011_v2  ;;  %v9780_v51 = vld [vmem:[%s24155_s2 + $0x2c8] sm:$0xff] }
 0xe8a   :  { %24599 = vst [vmem:[#allocation79_spill] sm:$0xff] %v21003_v7  ;;  %24601 = vst [vmem:[#allocation81_spill] sm:$0xff] %v21018_v54  ;;  %v9764_v7 = vld [vmem:[%s24155_s2 + $0x248] sm:$0xff]  ;;  %v21038_v54 = vmul.f32 %v20773_v31, %v20951_v57  ;;  %v21059_v57 = vld [vmem:[%s24155_s2 + $0x1c2] ss:$0 sm:$0xff]  ;;  %v10017_v52 = vmul.f32 %v10001_v9, %v21030_v17  ;;  %v21096_v13 = vmul.f32 %v9839_v38, %v9773_v35 }
 0xe8b   :  { %24604 = vst [vmem:[#allocation84_spill] sm:$0xff] %v21045_v23  ;;  %24605 = vst [vmem:[#allocation85_spill] sm:$0xff] %v21049_v4  ;;  %v9840_v19 = vld [vmem:[#allocation2 + $0x57] sm:$0xff]  ;;  %v21074_v4 = vmul.f32 %v20773_v31, %v9925_v58  ;;  %v21076_v32 = vld [vmem:[#allocation2 + $0x49] sm:$0xff]  ;;  %v21091_v58 = vmul.f32 %v20892_v26, %v10294_v61  ;;  %v10293_v9 = vmul.f32 %v9924_v18, %v9773_v35 }
 0xe8c   :  { %24602 = vst [vmem:[#allocation82_spill] sm:$0xff] %v21038_v54  ;;  %v21062_v54 = vmul.f32 %v20892_v26, %v10291_v15  ;;  %24607 = vst [vmem:[#allocation87_spill] sm:$0xff] %v21065_v1  ;;  %v21067_v23 = vld [vmem:[#allocation2 + $0x78] sm:$0xff]  ;;  %v24612_v36 = vld [vmem:[#allocation45_spill] sm:$0xff]  ;;  %v21100_v14 = vmul.f32 %v9840_v19, %v20978_v56  ;;  %v21109_v38 = vmul.f32 %v21076_v32, %v20917_v39 }
 0xe8d   :  { %24608 = vst [vmem:[#allocation88_spill] sm:$0xff] %v21067_v23  ;;  %v21069_v21 = vld [vmem:[#allocation2 + $0x77] sm:$0xff]  ;;  %24610 = vst [vmem:[#allocation90_spill] sm:$0xff] %v21074_v4  ;;  %v10070_v12 = vmul.f32 %v20793_v45, %v24612_v36  ;;  %v9945_v53 = vmul.f32 %v21067_v23, %v9764_v7  ;;  %v9812_v61 = vld [vmem:[%s24155_s2 + $0x3c8] sm:$0xff]  ;;  %v10038_v39 = vmul.f32 %v21059_v57, %v10017_v52 }
 0xe8e   :  { %24606 = vst [vmem:[#allocation86_spill] sm:$0xff] %v21062_v54  ;;  %24609 = vst [vmem:[#allocation89_spill] sm:$0xff] %v21069_v21  ;;  %v9860_v15 = vmul.f32 %v21069_v21, %v9764_v7  ;;  %v21085_v54 = vld [vmem:[%s24155_s2 + $0x368] sm:$0xff]  ;;  %v9993_v4 = vld [vmem:[#allocation2 + $0x51] sm:$0xff]  ;;  %v21094_v21 = vmul.f32 %v20773_v31, %v9924_v18  ;;  %v10037_v18 = vmul.f32 %v21059_v57, %v10016_v44 }
 0xe8f   :  { %24611 = vst [vmem:[#allocation91_spill] sm:$0xff] %v21076_v32  ;;  %24613 = vst [vmem:[#allocation45_spill] sm:$0xff] %v21091_v58  ;;  %v10123_v1 = vld [vmem:[#allocation2 + $0x88] sm:$0xff]  ;;  %v10018_v10 = vmul.f32 %v10002_v62, %v21085_v54  ;;  %v9966_v52 = vmul.f32 %v20735_v50, %v9945_v53 }
 0xe90   :  { %24614 = vst [vmem:[#allocation92_spill] sm:$0xff] %v21094_v21  ;;  %24615 = vst [vmem:[#allocation93_spill] sm:$0xff] %v21096_v13  ;;  %v10161_v0 = vld [vmem:[#allocation2 + $0x89] sm:$0xff]  ;;  %v9876_v45 = vmul.f32 %v9860_v15, %v21054_v48  ;;  %v10300_v21 = vmul.f32 %v10123_v1, %v9780_v51  ;;  %v21113_v13 = vld [vmem:[#allocation2 + $0x7f] sm:$0xff] }
 0xe91   :  { %24616 = vst [vmem:[#allocation94_spill] sm:$0xff] %v21100_v14  ;;  %24617 = vst [vmem:[#allocation95_spill] sm:$0xff] %v21109_v38  ;;  %v21111_v58 = vld [vmem:[#allocation2 + $0x68] sm:$0xff]  ;;  %v10354_v62 = vmul.f32 %v10161_v0, %v9780_v51  ;;  %v21115_v19 = vld [vmem:[#allocation2 + $0x79] sm:$0xff]  ;;  %v21118_v14 = vmul.f32 %v9993_v4, %v9773_v35  ;;  %v10084_v0 = vmul.f32 %v21113_v13, %v21054_v48 }
 0xe92   :  { %24618 = vst [vmem:[#allocation96_spill] sm:$0xff] %v21113_v13  ;;  %24619 = vst [vmem:[#allocation97_spill] sm:$0xff] %v21115_v19  ;;  %v9897_v15 = vmul.f32 %v20726_v25, %v9876_v45  ;;  %v21121_v23 = vld [vmem:[#allocation2 + $0x81] sm:$0xff]  ;;  %v10014_v56 = vmul.f32 %v21115_v19, %v9764_v7  ;;  %v10039_v44 = vmul.f32 %v21059_v57, %v10018_v10 }
 0xe93   :  { %24620 = vst [vmem:[#allocation98_spill] sm:$0xff] %v21118_v14  ;;  %24621 = vst [vmem:[#allocation99_spill] sm:$0xff] %v21121_v23  ;;  %v10370_v32 = vmul.f32 %v10354_v62, %v9812_v61  ;;  %v21125_v38 = vld [vmem:[#allocation2 + $0x80] sm:$0xff]  ;;  %v10072_v4 = vmul.f32 %v20810_v5, %v20857_v34  ;;  %v21135_v35 = vmul.f32 %v20892_v26, %v10293_v9  ;;  %v21149_v9 = vld [vmem:[%s24155_s2 + $0x1c8] ss:$0 sm:$0xff] }
 0xe94   :  { %24622 = vst [vmem:[#allocation100_spill] sm:$0xff] %v21125_v38  ;;  %v21127_v1 = vld [vmem:[#allocation2 + $0x87] sm:$0xff]  ;;  %v21139_v7 = vmul.f32 %v20773_v31, %v21111_v58  ;;  %v10030_v45 = vmul.f32 %v10014_v56, %v9812_v61  ;;  %v10321_v62 = vmul.f32 %v20892_v26, %v10300_v21  ;;  %v10176_v19 = vmul.f32 %v21121_v23, %v9812_v61 }
 0xe95   :  { %24623 = vst [vmem:[#allocation101_spill] sm:$0xff] %v21127_v1  ;;  %24624 = vst [vmem:[#allocation102_spill] sm:$0xff] %v21135_v35  ;;  %v10053_v13 = vadd.f32 %v10037_v18, %v20752_v63  ;;  %v10091_v10 = vmul.f32 %v20837_v24, %v10070_v12  ;;  %v9982_v35 = vadd.f32 %v9966_v52, %v9897_v15  ;;  %v21160_v63 = vld [vmem:[%s24155_s2 + $0x1c5] ss:$0 sm:$0xff] }
 0xe96   :  { %24625 = vst [vmem:[#allocation103_spill] sm:$0xff] %v21139_v7  ;;  %24626 = vst [vmem:[#allocation104_spill] sm:$0xff] %v21149_v9  ;;  %v10051_v14 = vmul.f32 %v21059_v57, %v10030_v45  ;;  %v10143_v53 = vmul.f32 %v20773_v31, %v21125_v38  ;;  %v10230_v56 = vmul.f32 %v21127_v1, %v9780_v51 }
 0xe97   :  { %v10391_v21 = vmul.f32 %v21149_v9, %v10370_v32  ;;  %v10105_v61 = vmul.f32 %v20837_v24, %v10084_v0  ;;  %24627 = vst [vmem:[#allocation105_spill] sm:$0xff] %v21160_v63  ;;  %v10054_v12 = vadd.f32 %v10038_v39, %v21032_v28  ;;  %v10055_v18 = vadd.f32 %v10039_v44, %v9970_v49 }
 0xe98   :  { %v10067_v15 = vadd.f32 %v10051_v14, %v9982_v35  ;;  %v10197_v52 = vmul.f32 %v21160_v63, %v10176_v19  ;;  %v10246_v45 = vmul.f32 %v10230_v56, %v21054_v48  ;;  %v10093_v23 = vmul.f32 %v20837_v24, %v10072_v4 }
 0xe99   :  { %v10107_v51 = vadd.f32 %v10091_v10, %v10053_v13  ;;  %v10108_v32 = vadd.f32 %v20866_v43, %v10054_v12  ;;  %v10162_v0 = vmul.f32 %v20955_v46, %v21011_v2  ;;  %v10163_v1 = vmul.f32 %v20963_v6, %v21030_v17 }
 0xe9a   :  { %v10121_v38 = vadd.f32 %v10105_v61, %v10067_v15  ;;  %v10267_v28 = vmul.f32 %v20910_v22, %v10246_v45  ;;  %v10109_v49 = vadd.f32 %v10093_v23, %v10055_v18  ;;  %v10164_v14 = vmul.f32 %v20884_v47, %v21085_v54 }
 0xe9b   :  { %v10145_v48 = vadd.f32 %v20869_v30, %v10107_v51  ;;  %v10146_v19 = vadd.f32 %v20832_v3, %v10108_v32  ;;  %v10183_v13 = vmul.f32 %v21160_v63, %v10162_v0  ;;  %v10184_v43 = vmul.f32 %v21160_v63, %v10163_v1  ;;  %v21189_v30 = vld [vmem:[%s24155_s2 + $0x1f0] sm:$0xff]  ;;  %v21222_v32 = vld [vmem:[%s24155_s2 + $0x2a8] sm:$0xff]  ;;  %v9926_v0 = vld [vmem:[#allocation2 + $0x60] sm:$0xff] }
 0xe9c   :  { %v10159_v39 = vadd.f32 %v10143_v53, %v10121_v38  ;;  %v10147_v46 = vadd.f32 %v20922_v59, %v10109_v49  ;;  %v10185_v44 = vmul.f32 %v21160_v63, %v10164_v14  ;;  %v10216_v4 = vmul.f32 %v20784_v16, %v20829_v37  ;;  %24628 = vst [vmem:[#allocation106_spill] sm:$0xff] %v21222_v32 }
 0xe9d   :  { %v10199_v23 = vadd.f32 %v10183_v13, %v10145_v48  ;;  %v10200_v35 = vadd.f32 %v10184_v43, %v10146_v19  ;;  %v10234_v10 = vmul.f32 %v20926_v40, %v20857_v34  ;;  %v10307_v3 = vmul.f32 %v20892_v26, %v20860_v60  ;;  %v21232_v19 = vld [vmem:[%s24155_s2 + $0x1c9] ss:$0 sm:$0xff] }
 0xe9e   :  { %v10213_v38 = vadd.f32 %v10197_v52, %v10159_v39  ;;  %v10201_v59 = vadd.f32 %v10185_v44, %v10147_v46  ;;  %v10232_v1 = vmul.f32 %v10216_v4, %v24612_v36  ;;  %v10340_v16 = vmul.f32 %v20963_v6, %v20829_v37 }
 0xe9f   :  { %v10255_v53 = vmul.f32 %v20910_v22, %v10234_v10  ;;  %v10270_v56 = vadd.f32 %v20958_v27, %v10200_v35  ;;  %v10357_v40 = vmul.f32 %v20930_v20, %v21030_v17  ;;  %v10358_v60 = vmul.f32 %v20987_v41, %v21085_v54  ;;  %v21210_v20 = vld [vmem:[%s24155_s2 + $0x2f0] sm:$0xff] }
 0xea0   :  { %v10283_v61 = vadd.f32 %v10267_v28, %v10213_v38  ;;  %v10253_v12 = vmul.f32 %v20910_v22, %v10232_v1  ;;  %v10356_v18 = vmul.f32 %v10340_v16, %v21011_v2  ;;  %v9849_v36 = vmul.f32 %v20810_v5, %v21189_v30  ;;  %v21216_v5 = vld [vmem:[%s24155_s2 + $0x370] sm:$0xff] }
 0xea1   :  { %v10271_v15 = vadd.f32 %v10255_v53, %v10201_v59  ;;  %v10324_v6 = vadd.f32 %v20944_v42, %v10270_v56  ;;  %v10378_v52 = vmul.f32 %v21149_v9, %v10357_v40  ;;  %v10379_v27 = vmul.f32 %v21149_v9, %v10358_v60 }
 0xea2   :  { %v10337_v41 = vadd.f32 %v10321_v62, %v10283_v61  ;;  %v10269_v45 = vadd.f32 %v10253_v12, %v10199_v23  ;;  %v10377_v51 = vmul.f32 %v21149_v9, %v10356_v18  ;;  %v9865_v42 = vmul.f32 %v9849_v36, %v21210_v20 }
 0xea3   :  { %v10325_v28 = vadd.f32 %v20905_v29, %v10271_v15  ;;  %v10394_v49 = vadd.f32 %v10378_v52, %v10324_v6  ;;  %v9934_v62 = vmul.f32 %v20844_v33, %v21189_v30  ;;  %v10003_v14 = vmul.f32 %v20884_v47, %v21189_v30  ;;  %v21240_v29 = vld [vmem:[%s24155_s2 + $0x2a0] sm:$0xff] }
 0xea4   :  { %v10407_v48 = vadd.f32 %v10391_v21, %v10337_v41  ;;  %v10323_v13 = vadd.f32 %v10307_v3, %v10269_v45  ;;  %v9886_v43 = vmul.f32 %v20726_v25, %v9865_v42  ;;  %v10073_v39 = vmul.f32 %v20882_v8, %v21210_v20  ;;  %v21275_v45 = vld [vmem:[%s24155_s2 + $0x1f8] sm:$0xff] }
 0xea5   :  { %v10395_v33 = vadd.f32 %v10379_v27, %v10325_v28  ;;  %v10415_v47 = vadd.f32 %v21232_v19, %v10394_v49  ;;  %v9955_v21 = vmul.f32 %v20735_v50, %v9934_v62  ;;  %v10019_v46 = vmul.f32 %v10003_v14, %v21216_v5 }
 0xea6   :  { %v21247_v44 = vmul.f32 %v21111_v58, %v21222_v32  ;;  %v21250_v4 = vmul.f32 %v20773_v31, %v9926_v0  ;;  %v10428_v23 = vadd.f32 %v21232_v19, %v10407_v48  ;;  %v10393_v35 = vadd.f32 %v10377_v51, %v10323_v13  ;;  %v21280_v51 = vld [vmem:[%s24155_s2 + $0x2f8] sm:$0xff] }
 0xea7   :  { %v10416_v10 = vadd.f32 %v21232_v19, %v10395_v33  ;;  %v10447_v3 = vmul.f32 0.044715, %v10415_v47  ;;  %v9971_v38 = vadd.f32 %v9955_v21, %v9886_v43  ;;  %v10165_v59 = vmul.f32 %v20946_v11, %v21216_v5  ;;  %24630 = vst [vmem:[#allocation108_spill] sm:$0xff] %v21280_v51  ;;  %v24631_v48 = vld [vmem:[#allocation74_spill] sm:$0xff] }
 0xea8   :  { %24629 = vst [vmem:[#allocation107_spill] sm:$0xff] %v21250_v4  ;;  %v21257_v1 = vmul.f32 %v9926_v0, %v21240_v29  ;;  %v10460_v16 = vmul.f32 0.044715, %v10428_v23  ;;  %v21260_v58 = vadd.f32 %v21232_v19, %v10393_v35  ;;  %v10040_v53 = vmul.f32 %v21059_v57, %v10019_v46  ;;  %v24632_v33 = vld [vmem:[#allocation34_spill] sm:$0xff] }
 0xea9   :  { %v21263_v56 = vmul.f32 0.5, %v10415_v47  ;;  %v10448_v40 = vmul.f32 0.044715, %v10416_v10  ;;  %v10463_v60 = vmul.f32 %v10447_v3, %v10415_v47  ;;  %v10094_v61 = vmul.f32 %v20837_v24, %v10073_v39 }
 0xeaa   :  { %v21266_v12 = vmul.f32 0.5, %v10428_v23  ;;  %v10476_v18 = vmul.f32 %v10460_v16, %v10428_v23  ;;  %v10446_v36 = vmul.f32 0.044715, %v21260_v58  ;;  %v10056_v15 = vadd.f32 %v10040_v53, %v9971_v38  ;;  %v24633_v38 = vld [vmem:[#allocation66_spill] sm:$0xff] }
 0xeab   :  { %v10464_v6 = vmul.f32 %v10448_v40, %v10416_v10  ;;  %v10479_v52 = vmul.f32 %v10463_v60, %v10415_v47  ;;  %v10186_v27 = vmul.f32 %v21160_v63, %v10165_v59  ;;  %v10235_v41 = vmul.f32 %v20973_v55, %v21210_v20 }
 0xeac   :  { %v10492_v42 = vmul.f32 %v10476_v18, %v10428_v23  ;;  %v10462_v0 = vmul.f32 %v10446_v36, %v21260_v58  ;;  %v10110_v28 = vadd.f32 %v10094_v61, %v10056_v15  ;;  %v9850_v49 = vmul.f32 %v20882_v8, %v21275_v45  ;;  %v24635_v15 = vld [vmem:[#allocation67_spill] sm:$0xff] }
 0xead   :  { %v10480_v62 = vmul.f32 %v10464_v6, %v10416_v10  ;;  %v10495_v14 = vadd.f32 %v10479_v52, %v10415_v47  ;;  %v10256_v55 = vmul.f32 %v20910_v22, %v10235_v41  ;;  %v10359_v13 = vmul.f32 %v24631_v48, %v21216_v5  ;;  %v21309_v52 = vld [vmem:[%s24155_s2 + $0x200] sm:$0xff] }
 0xeae   :  { %v10508_v43 = vadd.f32 %v10492_v42, %v10428_v23  ;;  %v10478_v39 = vmul.f32 %v10462_v0, %v21260_v58  ;;  %v10148_v21 = vadd.f32 %v24632_v33, %v10110_v28  ;;  %v9866_v46 = vmul.f32 %v9850_v49, %v21280_v51  ;;  %v21299_v23 = vld [vmem:[%s24155_s2 + $0x378] sm:$0xff]  ;;  %24636 = vst [vmem:[#allocation34_spill] sm:$0xff] %v21309_v52  ;;  %v21329_v33 = vld [vmem:[%s24155_s2 + $0x380] sm:$0xff] }
 0xeaf   :  { %v10496_v35 = vadd.f32 %v10480_v62, %v10416_v10  ;;  %v10511_v3 = vmul.f32 0.7978846, %v10495_v14  ;;  %v9935_v59 = vmul.f32 %v24633_v38, %v21275_v45  ;;  %v10004_v8 = vmul.f32 %v20946_v11, %v21275_v45  ;;  %24634 = vst [vmem:[#allocation74_spill] sm:$0xff] %v21299_v23  ;;  %v24637_v0 = vld [vmem:[#allocation78_spill] sm:$0xff]  ;;  %v24638_v62 = vld [vmem:[#allocation68_spill] sm:$0xff]  ;;  %24641 = vst [vmem:[#allocation67_spill] sm:$0xff] %v21329_v33 }
 0xeb0   :  { %v10524_v47 = vmul.f32 0.7978846, %v10508_v43  ;;  %v10494_v16 = vadd.f32 %v10478_v39, %v21260_v58  ;;  %v10202_v53 = vadd.f32 %v10186_v27, %v10148_v21  ;;  %v9887_v40 = vmul.f32 %v20726_v25, %v9866_v46  ;;  %v24640_v43 = vld [vmem:[#allocation52_spill] sm:$0xff]  ;;  %v24642_v46 = vld [vmem:[#allocation85_spill] sm:$0xff] }
 0xeb1   :  { %v10512_v60 = vmul.f32 0.7978846, %v10496_v35  ;;  %17603 = vtanh.f32 %v10511_v3  ;;  %v9956_v61 = vmul.f32 %v20735_v50, %v9935_v59  ;;  %v10020_v18 = vmul.f32 %v10004_v8, %v21299_v23  ;;  %v24643_v3 = vld [vmem:[#allocation26_spill] sm:$0xff] }
 0xeb2   :  { %17605 = vtanh.f32 %v10524_v47  ;;  %v10510_v36 = vmul.f32 0.7978846, %v10494_v16  ;;  %v10272_v11 = vadd.f32 %v10256_v55, %v10202_v53  ;;  %v10074_v6 = vmul.f32 %v24635_v15, %v21280_v51  ;;  %v21321_v55 = vld [vmem:[%s24155_s2 + $0x300] sm:$0xff]  ;;  %v24644_v53 = vld [vmem:[#allocation69_spill] sm:$0xff] }
 0xeb3   :  { %v21311_v27 = vmul.f32 0.5, %v10416_v10  ;;  %17607 = vtanh.f32 %v10512_v60  ;;  %v9972_v41 = vadd.f32 %v9956_v61, %v9887_v40  ;;  %v10041_v42 = vmul.f32 %v21059_v57, %v10020_v18  ;;  %24639 = vst [vmem:[#allocation66_spill] sm:$0xff] %v21321_v55 }
 0xeb4   :  { %17609 = vtanh.f32 %v10510_v36  ;;  %v10326_v28 = vadd.f32 %v24637_v0, %v10272_v11  ;;  %v10380_v49 = vmul.f32 %v21149_v9, %v10359_v13  ;;  %v10166_v14 = vmul.f32 %v24638_v62, %v21299_v23  ;;  %v24645_v36 = vld [vmem:[#allocation77_spill] sm:$0xff] }
 0xeb5   :  { %v10057_v48 = vadd.f32 %v10041_v42, %v9972_v41  ;;  %v10095_v10 = vmul.f32 %v20837_v24, %v10074_v6  ;;  %v10236_v39 = vmul.f32 %v24640_v43, %v21280_v51  ;;  %v9851_v13 = vmul.f32 %v24635_v15, %v21309_v52  ;;  %v24646_v15 = vld [vmem:[#allocation72_spill] sm:$0xff]  ;;  %v24647_v42 = vld [vmem:[#allocation83_spill] sm:$0xff] }
 0xeb6   :  { %v10396_v21 = vadd.f32 %v10380_v49, %v10326_v28  ;;  %v10360_v35 = vmul.f32 %v24642_v46, %v21299_v23  ;;  %v9936_v38 = vmul.f32 %v24643_v3, %v21309_v52  ;;  %v10005_v59 = vmul.f32 %v24638_v62, %v21309_v52  ;;  %v21358_v28 = vld [vmem:[%s24155_s2 + $0x208] sm:$0xff] }
 0xeb7   :  { %v10430_v8 = vmul.f32 0.5, %v21260_v58  ;;  %v10111_v47 = vadd.f32 %v10095_v10, %v10057_v48  ;;  %v9867_v16 = vmul.f32 %v9851_v13, %v21321_v55  ;;  %v10075_v40 = vmul.f32 %v24644_v53, %v21321_v55  ;;  %24648 = vst [vmem:[#allocation78_spill] sm:$0xff] %v21358_v28  ;;  %v21369_v46 = vld [vmem:[%s24155_s2 + $0x308] sm:$0xff] }
 0xeb8   :  { %v21344_v60 = vadd.f32 %v21232_v19, %v10396_v21  ;;  %v10187_v61 = vmul.f32 %v21160_v63, %v10166_v14  ;;  %v10021_v18 = vmul.f32 %v10005_v59, %v21329_v33  ;;  %v10167_v11 = vmul.f32 %v24645_v36, %v21329_v33  ;;  %24649 = vst [vmem:[#allocation68_spill] sm:$0xff] %v21369_v46 }
 0xeb9   :  { %v10149_v6 = vadd.f32 %v24646_v15, %v10111_v47  ;;  %v9888_v58 = vmul.f32 %v20726_v25, %v9867_v16  ;;  %v9957_v41 = vmul.f32 %v20735_v50, %v9936_v38  ;;  %v10237_v0 = vmul.f32 %v24647_v42, %v21321_v55 }
 0xeba   :  { %v10449_v49 = vmul.f32 0.044715, %v21344_v60  ;;  %v10257_v62 = vmul.f32 %v20910_v22, %v10236_v39  ;;  %v10381_v14 = vmul.f32 %v21149_v9, %v10360_v35  ;;  %v10096_v48 = vmul.f32 %v20837_v24, %v10075_v40  ;;  %v24650_v35 = vld [vmem:[#allocation43_spill] sm:$0xff] }
 0xebb   :  { %v10203_v10 = vadd.f32 %v10187_v61, %v10149_v6  ;;  %v9973_v43 = vadd.f32 %v9957_v41, %v9888_v58  ;;  %v10042_v13 = vmul.f32 %v21059_v57, %v10021_v18  ;;  %v10188_v21 = vmul.f32 %v21160_v63, %v10167_v11  ;;  %v24651_v61 = vld [vmem:[#allocation87_spill] sm:$0xff]  ;;  %v21384_v11 = vld [vmem:[%s24155_s2 + $0x388] sm:$0xff] }
 0xebc   :  { %v10465_v3 = vmul.f32 %v10449_v49, %v21344_v60  ;;  %v9852_v39 = vmul.f32 %v24644_v53, %v21358_v28  ;;  %v9937_v38 = vmul.f32 %v24650_v35, %v21358_v28  ;;  %v10006_v59 = vmul.f32 %v24645_v36, %v21358_v28  ;;  %24652 = vst [vmem:[#allocation52_spill] sm:$0xff] %v21384_v11  ;;  %v24653_v36 = vld [vmem:[#allocation75_spill] sm:$0xff] }
 0xebd   :  { %v10273_v47 = vadd.f32 %v10257_v62, %v10203_v10  ;;  %v10058_v16 = vadd.f32 %v10042_v13, %v9973_v43  ;;  %v10258_v40 = vmul.f32 %v20910_v22, %v10237_v0  ;;  %v10361_v18 = vmul.f32 %v24651_v61, %v21329_v33  ;;  %v24654_v49 = vld [vmem:[#allocation71_spill] sm:$0xff]  ;;  %v24655_v33 = vld [vmem:[#allocation12_spill] sm:$0xff] }
 0xebe   :  { %v17604_v15 = vpop.eup %17603  ;;  %v10481_v53 = vmul.f32 %v10465_v3, %v21344_v60  ;;  %v9868_v6 = vmul.f32 %v9852_v39, %v21369_v46  ;;  %v10022_v58 = vmul.f32 %v10006_v59, %v21384_v11  ;;  %v10076_v41 = vmul.f32 %v24653_v36, %v21369_v46 }
 0xebf   :  { %v17606_v42 = vpop.eup %17605  ;;  %v10543_v0 = vadd.f32 1.0, %v17604_v15  ;;  %v10327_v62 = vadd.f32 %v24654_v49, %v10273_v47  ;;  %v10112_v10 = vadd.f32 %v10096_v48, %v10058_v16  ;;  %v9958_v43 = vmul.f32 %v20735_v50, %v9937_v38  ;;  %v21402_v50 = vld [vmem:[%s24155_s2 + $0x1ca] ss:$0 sm:$0xff] }
 0xec0   :  { %v17608_v13 = vpop.eup %17607  ;;  %v10556_v35 = vadd.f32 1.0, %v17606_v42  ;;  %v10497_v61 = vadd.f32 %v10481_v53, %v21344_v60  ;;  %v9889_v3 = vmul.f32 %v20726_v25, %v9868_v6  ;;  %v10043_v39 = vmul.f32 %v21059_v57, %v10022_v58 }
 0xec1   :  { %v17610_v7 = vpop.eup %17609  ;;  %v10544_v59 = vadd.f32 1.0, %v17608_v13  ;;  %v10559_v4 = vmul.f32 %v10543_v0, %v21263_v56  ;;  %v10397_v28 = vadd.f32 %v10381_v14, %v10327_v62  ;;  %v10150_v15 = vadd.f32 %v24655_v33, %v10112_v10 }
 0xec2   :  { %v10572_v47 = vmul.f32 %v10556_v35, %v21266_v12  ;;  %v10542_v48 = vadd.f32 1.0, %v17610_v7  ;;  %v10513_v38 = vmul.f32 0.7978846, %v10497_v61  ;;  %v9974_v16 = vadd.f32 %v9958_v43, %v9889_v3  ;;  %v21413_v12 = vld [vmem:[%s24155_s2 + $0x1cb] ss:$0 sm:$0xff]  ;;  %v21438_v61 = vld [vmem:[#allocation2 + $0x61] sm:$0xff] }
 0xec3   :  { %v10560_v25 = vmul.f32 %v10544_v59, %v21311_v27  ;;  %v10580_v53 = vmul.f32 %v21402_v50, %v10559_v4  ;;  %v21407_v6 = vadd.f32 %v21232_v19, %v10397_v28  ;;  %v10204_v56 = vadd.f32 %v10188_v21, %v10150_v15  ;;  %v21419_v28 = vld [vmem:[#allocation2 + $0x5f] sm:$0xff]  ;;  %24661 = vst [vmem:[#allocation72_spill] sm:$0xff] %v21438_v61 }
 0xec4   :  { %v10593_v33 = vmul.f32 %v21402_v50, %v10572_v47  ;;  %v10558_v14 = vmul.f32 %v10542_v48, %v10430_v8  ;;  %v10059_v58 = vadd.f32 %v10043_v39, %v9974_v16  ;;  %v10097_v7 = vmul.f32 %v20837_v24, %v10076_v41  ;;  %24656 = vst [vmem:[#allocation85_spill] sm:$0xff] %v21419_v28  ;;  %v21426_v8 = vld [vmem:[%s24155_s2 + $0x210] sm:$0xff]  ;;  %v21428_v24 = vld [vmem:[#allocation2 + $0x67] sm:$0xff]  ;;  %v21430_v41 = vld [vmem:[#allocation2 + $0x59] sm:$0xff] }
 0xec5   :  { %v10581_v42 = vmul.f32 %v21402_v50, %v10560_v25  ;;  %v10601_v27 = vadd.f32 %v21413_v12, %v10580_v53  ;;  %17611 = vtanh.f32 %v10513_v38  ;;  %v10450_v4 = vmul.f32 0.044715, %v21407_v6  ;;  %24657 = vst [vmem:[#allocation26_spill] sm:$0xff] %v21426_v8  ;;  %24658 = vst [vmem:[#allocation69_spill] sm:$0xff] %v21428_v24  ;;  %v24662_v39 = vld [vmem:[#allocation86_spill] sm:$0xff]  ;;  %v24664_v48 = vld [vmem:[#allocation84_spill] sm:$0xff] }
 0xec6   :  { %v10614_v21 = vadd.f32 %v21413_v12, %v10593_v33  ;;  %v10579_v0 = vmul.f32 %v21402_v50, %v10558_v14  ;;  %v10274_v49 = vadd.f32 %v10258_v40, %v10204_v56  ;;  %v10113_v62 = vadd.f32 %v10097_v7, %v10059_v58  ;;  %24659 = vst [vmem:[#allocation77_spill] sm:$0xff] %v21430_v41  ;;  %v24660_v40 = vld [vmem:[#allocation80_spill] sm:$0xff]  ;;  %v24663_v15 = vld [vmem:[#allocation82_spill] sm:$0xff]  ;;  %v24669_v58 = vld [vmem:[#allocation73_spill] sm:$0xff] }
 0xec7   :  { %v10602_v10 = vadd.f32 %v21413_v12, %v10581_v42  ;;  %10617 = vst.msk [vmem:[#allocation2 + $0x18] sm:$0xff] %vm144_vm0, %v10601_v27  ;;  %v10466_v43 = vmul.f32 %v10450_v4, %v21407_v6  ;;  %v10382_v13 = vmul.f32 %v21149_v9, %v10361_v18  ;;  %v10168_v35 = vmul.f32 %v24660_v40, %v21384_v11  ;;  %v21453_v18 = vld [vmem:[%s24155_s2 + $0x2b8] sm:$0xff]  ;;  %v9928_v42 = vld [vmem:[#allocation2 + $0x70] sm:$0xff] }
 0xec8   :  { %10630 = vst.msk [vmem:[#allocation2 + $0x80] sm:$0xff] %vm144_vm0, %v10614_v21  ;;  %v10600_v3 = vadd.f32 %v21413_v12, %v10579_v0  ;;  %v10328_v59 = vadd.f32 %v24662_v39, %v10274_v49  ;;  %v10151_v47 = vadd.f32 %v24663_v15, %v10113_v62  ;;  %v10238_v38 = vmul.f32 %v24664_v48, %v21369_v46  ;;  %v21486_v21 = vld [vmem:[#allocation2 + $0x6f] sm:$0xff] }
 0xec9   :  { %v21448_v16 = vmul.f32 %v21419_v28, %v21240_v29  ;;  %24666 = vst [vmem:[#allocation43_spill] sm:$0xff] %v21453_v18  ;;  %10618 = vst.msk [vmem:[#allocation2 + $0x20] sm:$0xff] %vm144_vm0, %v10602_v10  ;;  %v10482_v25 = vmul.f32 %v10466_v43, %v21407_v6  ;;  %v10189_v53 = vmul.f32 %v21160_v63, %v10168_v35  ;;  %v24675_v62 = vld [vmem:[#allocation88_spill] sm:$0xff] }
 0xeca   :  { %v9853_v56 = vmul.f32 %v24653_v36, %v21426_v8  ;;  %v21462_v33 = vmul.f32 %v20892_v26, %v21247_v44  ;;  %v21466_v14 = vmul.f32 %v21428_v24, %v21222_v32  ;;  %v21470_v7 = vmul.f32 %v21430_v41, %v24669_v58  ;;  %10616 = vst.msk [vmem:[#allocation2 + $0x10] sm:$0xff] %vm144_vm0, %v10600_v3  ;;  %v21484_v36 = vld [vmem:[%s24155_s2 + $0x2b0] sm:$0xff]  ;;  %v24685_v58 = vld [vmem:[#allocation59_spill] sm:$0xff] }
 0xecb   :  { %24665 = vst [vmem:[#allocation83_spill] sm:$0xff] %v21448_v16  ;;  %v10398_v27 = vadd.f32 %v10382_v13, %v10328_v59  ;;  %v21475_v4 = vmul.f32 %v20892_v26, %v21257_v1  ;;  %v21479_v44 = vmul.f32 %v21438_v61, %v21240_v29  ;;  %24673 = vst [vmem:[#allocation86_spill] sm:$0xff] %v21484_v36  ;;  %v24677_v1 = vld [vmem:[#allocation95_spill] sm:$0xff]  ;;  %v21502_v13 = vld [vmem:[%s24155_s2 + $0x310] sm:$0xff] }
 0xecc   :  { %24667 = vst [vmem:[#allocation87_spill] sm:$0xff] %v21462_v33  ;;  %24668 = vst [vmem:[#allocation75_spill] sm:$0xff] %v21466_v14  ;;  %v10498_v0 = vadd.f32 %v10482_v25, %v21407_v6  ;;  %v10205_v49 = vadd.f32 %v10189_v53, %v10151_v47  ;;  %v21491_v10 = vmul.f32 %v24675_v62, %v21453_v18  ;;  %v24680_v59 = vld [vmem:[#allocation70_spill] sm:$0xff]  ;;  %v24682_v47 = vld [vmem:[#allocation89_spill] sm:$0xff] }
 0xecd   :  { %24670 = vst [vmem:[#allocation71_spill] sm:$0xff] %v21470_v7  ;;  %24671 = vst [vmem:[#allocation12_spill] sm:$0xff] %v21475_v4  ;;  %v21494_v26 = vadd.f32 %v21232_v19, %v10398_v27  ;;  %v10259_v29 = vmul.f32 %v20910_v22, %v10238_v38  ;;  %v10362_v43 = vmul.f32 %v24677_v1, %v21384_v11  ;;  %v10433_v27 = vmul.f32 0.5, %v21344_v60  ;;  %v21529_v62 = vld [vmem:[%s24155_s2 + $0x1d0] ss:$0 sm:$0xff]  ;;  %v17690_v14 = vld [vmem:[%s24155_s2 + $0x1d8] sm:$0xff] }
 0xece   :  { %24672 = vst [vmem:[#allocation80_spill] sm:$0xff] %v21479_v44  ;;  %24674 = vst [vmem:[#allocation82_spill] sm:$0xff] %v21486_v21  ;;  %v21505_v35 = vmul.f32 %v20773_v31, %v9928_v42  ;;  %v10514_v3 = vmul.f32 0.7978846, %v10498_v0  ;;  %v9869_v39 = vmul.f32 %v9853_v56, %v21502_v13  ;;  %v9938_v15 = vmul.f32 %v24680_v59, %v21426_v8  ;;  %v10719_v38 = vld [vmem:[#allocation2 + $0x18] sm:$0xff]  ;;  %v24689_v24 = vld [vmem:[#allocation81_spill] sm:$0xff] }
 0xecf   :  { %24676 = vst [vmem:[#allocation84_spill] sm:$0xff] %v21491_v10  ;;  %24678 = vst [vmem:[#allocation73_spill] sm:$0xff] %v21502_v13  ;;  %v21512_v22 = vmul.f32 %v21486_v21, %v21484_v36  ;;  %v21516_v48 = vmul.f32 %v24682_v47, %v21453_v18  ;;  %v10451_v25 = vmul.f32 0.044715, %v21494_v26  ;;  %v10275_v53 = vadd.f32 %v10259_v29, %v10205_v49  ;;  %v21535_v49 = vld [vmem:[%s24155_s2 + $0x1d3] ss:$0 sm:$0xff] }
 0xed0   :  { %24679 = vst [vmem:[#allocation88_spill] sm:$0xff] %v21505_v35  ;;  %v21520_v31 = vmul.f32 %v9928_v42, %v21484_v36  ;;  %v10735_v56 = vmul.f32 %v10719_v38, %v24685_v58  ;;  %17613 = vtanh.f32 %v10514_v3  ;;  %v21524_v0 = vld [vmem:[#allocation2 + $0x19] sm:$0xff]  ;;  %v11088_v1 = vmul.f32 %v10719_v38, %v20829_v37  ;;  %v24688_v21 = vld [vmem:[#allocation60_spill] sm:$0xff] }
 0xed1   :  { %24681 = vst [vmem:[#allocation95_spill] sm:$0xff] %v21512_v22  ;;  %24683 = vst [vmem:[#allocation70_spill] sm:$0xff] %v21516_v48  ;;  %v21538_v42 = vmul.f32 0.5, %v21407_v6  ;;  %v21541_v60 = vmul.f32 %v21149_v9, %v10362_v43  ;;  %v21545_v29 = vmul.f32 %v24660_v40, %v21426_v8  ;;  %v10633_v3 = vld [vmem:[#allocation2 + $0xf] sm:$0xff]  ;;  %v10634_v59 = vld [vmem:[#allocation2 + $0x17] sm:$0xff]  ;;  %v21548_v10 = vmul.f32 %v21529_v62, %v10719_v38 }
 0xed2   :  { %24684 = vst [vmem:[#allocation89_spill] sm:$0xff] %v21520_v31  ;;  %v10718_v47 = vld [vmem:[#allocation2 + $0x10] sm:$0xff]  ;;  %v21551_v35 = vmul.f32 %v10451_v25, %v21494_v26  ;;  %v21556_v6 = vld [vmem:[%s24155_s2 + $0x1c0] ss:$0 sm:$0xff]  ;;  %v21564_v40 = vld [vmem:[%s24155_s2 + $0x1c1] ss:$0 sm:$0xff]  ;;  %v17612_v38 = vpop.eup %17611  ;;  %v10804_v18 = vmul.f32 %v21524_v0, %v24685_v58  ;;  %v21575_v4 = vadd.f32 %v24689_v24, %v10275_v53  ;;  %v10649_v11 = vmul.f32 %v10633_v3, %v24688_v21 }
 0xed3   :  { %24686 = vst [vmem:[#allocation59_spill] sm:$0xff] %v21556_v6  ;;  %v21559_v43 = vmul.f32 %v21556_v6, %v9869_v39  ;;  %24687 = vst [vmem:[#allocation109_spill] sm:$0xff] %v21564_v40  ;;  %v21567_v48 = vmul.f32 %v21564_v40, %v9938_v15  ;;  %v10734_v25 = vmul.f32 %v10718_v47, %v24688_v21  ;;  %v10786_v22 = vld [vmem:[#allocation2 + $0x9] sm:$0xff]  ;;  %v10787_v33 = vld [vmem:[#allocation2 + $0x11] sm:$0xff]  ;;  %v10545_v7 = vadd.f32 1.0, %v17612_v38 }
 0xed4   :  { %v11142_v39 = vmul.f32 %v21524_v0, %v20829_v37  ;;  %v21581_v15 = vld [vmem:[%s24155_s2 + $0x1cd] ss:$0 sm:$0xff]  ;;  %v10802_v61 = vmul.f32 %v17690_v14, %v10786_v22  ;;  %v10803_v28 = vmul.f32 %v10787_v33, %v24688_v21  ;;  %v21591_v24 = vld [vmem:[%s24155_s2 + $0x1ce] ss:$0 sm:$0xff]  ;;  %v17691_v53 = vld [vmem:[%s24155_s2 + $0x2d8] sm:$0xff]  ;;  %v10964_v46 = vmul.f32 %v10787_v33, %v21011_v2 }
 0xed5   :  { %v10756_v8 = vmul.f32 %v21581_v15, %v10735_v56  ;;  %v10872_v44 = vmul.f32 %v17691_v53, %v10633_v3  ;;  %v11018_v56 = vmul.f32 %v10634_v59, %v20829_v37  ;;  %v21599_v16 = vmul.f32 %v21535_v49, %v11088_v1  ;;  %v21606_v22 = vld [vmem:[%s24155_s2 + $0x1cf] ss:$0 sm:$0xff]  ;;  %v21612_v33 = vld [vmem:[%s24155_s2 + $0x1d1] ss:$0 sm:$0xff]  ;;  %v10635_v1 = vld [vmem:[#allocation2 + $0x1f] sm:$0xff] }
 0xed6   :  { %v10818_v14 = vmul.f32 %v10802_v61, %v21011_v2  ;;  %v10819_v21 = vmul.f32 %v10803_v28, %v21030_v17  ;;  %v10931_v41 = vmul.f32 %v21529_v62, %v10718_v47  ;;  %v10650_v37 = vmul.f32 %v10634_v59, %v24685_v58  ;;  %v21622_v47 = vld [vmem:[%s24155_s2 + $0x1d4] ss:$0 sm:$0xff]  ;;  %v24690_v9 = vld [vmem:[#allocation63_spill] sm:$0xff] }
 0xed7   :  { %v10755_v3 = vmul.f32 %v21581_v15, %v10734_v25  ;;  %v10820_v61 = vmul.f32 %v10804_v18, %v21085_v54  ;;  %v11158_v28 = vmul.f32 %v11142_v39, %v21011_v2  ;;  %v11034_v6 = vmul.f32 %v17691_v53, %v11018_v56  ;;  %v21626_v55 = vld [vmem:[#allocation2 + $0x20] sm:$0xff]  ;;  %v21633_v2 = vld [vmem:[%s24155_s2 + $0x1d2] ss:$0 sm:$0xff] }
 0xed8   :  { %v10839_v40 = vmul.f32 %v21591_v24, %v10818_v14  ;;  %v10666_v31 = vmul.f32 %v10650_v37, %v20857_v34  ;;  %v10665_v58 = vmul.f32 %v10649_v11, %v24690_v9  ;;  %v10893_v25 = vmul.f32 %v21606_v22, %v10872_v44  ;;  %v24691_v53 = vld [vmem:[#allocation35_spill] sm:$0xff]  ;;  %v21640_v9 = vld [vmem:[%s24155_s2 + $0x1cc] ss:$0 sm:$0xff]  ;;  %v24692_v37 = vld [vmem:[#allocation53_spill] sm:$0xff] }
 0xed9   :  { %v10985_v18 = vmul.f32 %v21612_v33, %v10964_v46  ;;  %v10561_v38 = vmul.f32 %v10545_v7, %v10433_v27  ;;  %v10651_v39 = vmul.f32 %v10635_v1, %v21189_v30  ;;  %v10840_v44 = vmul.f32 %v21591_v24, %v10819_v21  ;;  %v17693_v46 = vld [vmem:[%s24155_s2 + $0x2e0] sm:$0xff] }
 0xeda   :  { %v10855_v56 = vadd.f32 %v10839_v40, %v24691_v53  ;;  %v10686_v11 = vmul.f32 %v21640_v9, %v10665_v58  ;;  %v10873_v14 = vmul.f32 %v17693_v46, %v10634_v59  ;;  %v11179_v7 = vmul.f32 %v21622_v47, %v11158_v28 }
 0xedb   :  { %v10582_v27 = vmul.f32 %v21402_v50, %v10561_v38  ;;  %v10736_v40 = vmul.f32 %v21626_v55, %v21189_v30  ;;  %v11019_v53 = vmul.f32 %v10635_v1, %v24692_v37  ;;  %v11055_v52 = vmul.f32 %v21633_v2, %v11034_v6 }
 0xedc   :  { %v10909_v36 = vadd.f32 %v10893_v25, %v10855_v56  ;;  %v10771_v58 = vadd.f32 %v10755_v3, %v10686_v11  ;;  %v10687_v21 = vmul.f32 %v21640_v9, %v10666_v31  ;;  %v10667_v59 = vmul.f32 %v10651_v39, %v21210_v20  ;;  %v17694_v31 = vld [vmem:[%s24155_s2 + $0x260] sm:$0xff] }
 0xedd   :  { %v17614_v63 = vpop.eup %17613  ;;  %v10603_v23 = vadd.f32 %v21413_v12, %v10582_v27  ;;  %v10894_v28 = vmul.f32 %v21606_v22, %v10873_v14  ;;  %v10965_v38 = vmul.f32 %v21524_v0, %v21030_v17  ;;  %v11035_v6 = vmul.f32 %v17693_v46, %v11019_v53 }
 0xede   :  { %v10947_v32 = vadd.f32 %v10931_v41, %v10909_v36  ;;  %v10856_v51 = vadd.f32 %v10840_v44, %v10771_v58  ;;  %v10546_v13 = vadd.f32 1.0, %v17614_v63  ;;  %v10772_v37 = vadd.f32 %v10756_v8, %v10687_v21 }
 0xedf   :  { %10619 = vst.msk [vmem:[#allocation2 + $0x28] sm:$0xff] %vm144_vm0, %v10603_v23  ;;  %v11089_v3 = vmul.f32 %v17694_v31, %v21626_v55  ;;  %v10841_v25 = vmul.f32 %v21591_v24, %v10820_v61  ;;  %v10874_v39 = vmul.f32 %v10635_v1, %v20857_v34  ;;  %v10483_v63 = vmul.f32 %v21551_v35, %v21494_v26 }
 0xee0   :  { %v11001_v56 = vadd.f32 %v10985_v18, %v10947_v32  ;;  %v10910_v11 = vadd.f32 %v10894_v28, %v10856_v51  ;;  %v10562_v41 = vmul.f32 %v10546_v13, %v21538_v42  ;;  %v10986_v23 = vmul.f32 %v21612_v33, %v10965_v38  ;;  %v21679_v51 = vld [vmem:[%s24155_s2 + $0x390] sm:$0xff] }
 0xee1   :  { %v10857_v8 = vadd.f32 %v10841_v25, %v10772_v37  ;;  %v10895_v36 = vmul.f32 %v21606_v22, %v10874_v39  ;;  %v10399_v0 = vadd.f32 %v21541_v60, %v21575_v4  ;;  %v10499_v32 = vadd.f32 %v10483_v63, %v21494_v26  ;;  %24693 = vst [vmem:[#allocation60_spill] sm:$0xff] %v21679_v51  ;;  %v21691_v18 = vld [vmem:[%s24155_s2 + $0x1d5] ss:$0 sm:$0xff] }
 0xee2   :  { %v11071_v44 = vadd.f32 %v11055_v52, %v11001_v56  ;;  %v10948_v61 = vadd.f32 %v21548_v10, %v10910_v11  ;;  %v10583_v34 = vmul.f32 %v21402_v50, %v10562_v41  ;;  %v11056_v13 = vmul.f32 %v21633_v2, %v11035_v6  ;;  %v17696_v11 = vld [vmem:[%s24155_s2 + $0x2e8] sm:$0xff] }
 0xee3   :  { %v10911_v35 = vadd.f32 %v10895_v36, %v10857_v8  ;;  %v10688_v42 = vmul.f32 %v21640_v9, %v10667_v59  ;;  %v21684_v1 = vadd.f32 %v21232_v19, %v10399_v0  ;;  %v10515_v60 = vmul.f32 0.7978846, %v10499_v32 }
 0xee4   :  { %v11125_v52 = vadd.f32 %v21599_v16, %v11071_v44  ;;  %v11002_v4 = vadd.f32 %v10986_v23, %v10948_v61  ;;  %v10604_v10 = vadd.f32 %v21413_v12, %v10583_v34  ;;  %v10757_v46 = vmul.f32 %v21581_v15, %v10736_v40  ;;  %v21721_v44 = vld [vmem:[#allocation2 + $0x69] sm:$0xff] }
 0xee5   :  { %v11110_v14 = vmul.f32 %v21535_v49, %v11089_v3  ;;  %v9975_v27 = vadd.f32 %v21567_v48, %v21559_v43  ;;  %v10023_v53 = vmul.f32 %v21545_v29, %v21679_v51  ;;  %v10933_v28 = vmul.f32 %v21529_v62, %v21626_v55  ;;  %v17695_v3 = vld [vmem:[%s24155_s2 + $0x268] sm:$0xff]  ;;  %24694 = vst [vmem:[#allocation81_spill] sm:$0xff] %v21721_v44 }
 0xee6   :  { %v11195_v16 = vadd.f32 %v11179_v7, %v11125_v52  ;;  %v10789_v58 = vld [vmem:[#allocation2 + $0x21] sm:$0xff]  ;;  %v11072_v21 = vadd.f32 %v11056_v13, %v11002_v4  ;;  %10620 = vst.msk [vmem:[#allocation2 + $0x30] sm:$0xff] %vm144_vm0, %v10604_v10  ;;  %17615 = vtanh.f32 %v10515_v60  ;;  %v10773_v6 = vadd.f32 %v10757_v46, %v10688_v42  ;;  %v24695_v13 = vld [vmem:[#allocation73_spill] sm:$0xff] }
 0xee7   :  { %v10636_v59 = vld [vmem:[#allocation2 + $0x27] sm:$0xff]  ;;  %v10805_v40 = vmul.f32 %v10789_v58, %v21189_v30  ;;  %v11143_v38 = vmul.f32 %v17694_v31, %v10789_v58  ;;  %v10452_v48 = vmul.f32 0.044715, %v21684_v1  ;;  %v10949_v29 = vadd.f32 %v10933_v28, %v10911_v35 }
 0xee8   :  { %v10721_v37 = vld [vmem:[#allocation2 + $0x28] sm:$0xff]  ;;  %v11216_v43 = vadd.f32 %v21691_v18, %v11195_v16  ;;  %v10966_v7 = vmul.f32 %v10789_v58, %v21085_v54  ;;  %v11020_v25 = vmul.f32 %v17695_v3, %v10636_v59  ;;  %v11126_v39 = vadd.f32 %v11110_v14, %v11072_v21  ;;  %v24698_v21 = vld [vmem:[#allocation106_spill] sm:$0xff] }
 0xee9   :  { %v10821_v55 = vmul.f32 %v10805_v40, %v21216_v5  ;;  %v11159_v30 = vmul.f32 %v11143_v38, %v21030_v17  ;;  %v10652_v31 = vmul.f32 %v10636_v59, %v21275_v45  ;;  %v11090_v63 = vmul.f32 %v17695_v3, %v10721_v37  ;;  %v24696_v35 = vld [vmem:[#allocation76_spill] sm:$0xff] }
 0xeea   :  { %11232 = vxpose.xlu1.b32.start [1/16] (narrow) %v11216_v43, 32  ;;  %v10987_v56 = vmul.f32 %v21612_v33, %v10966_v7  ;;  %v11036_v41 = vmul.f32 %v17696_v11, %v11020_v25  ;;  %v10044_v23 = vmul.f32 %v21059_v57, %v10023_v53  ;;  %v10875_v0 = vmul.f32 %v10636_v59, %v21210_v20  ;;  %v24697_v4 = vld [vmem:[#allocation108_spill] sm:$0xff]  ;;  %v21741_v43 = vld [vmem:[%s24155_s2 + $0x1c3] ss:$0 sm:$0xff]  ;;  %v24700_v25 = vld [vmem:[#allocation74_spill] sm:$0xff] }
 0xeeb   :  { %v11180_v8 = vmul.f32 %v21622_v47, %v11159_v30  ;;  %v10842_v36 = vmul.f32 %v21591_v24, %v10821_v55  ;;  %v10468_v17 = vmul.f32 %v10452_v48, %v21684_v1  ;;  %v10077_v42 = vmul.f32 %v24696_v35, %v24695_v13  ;;  %v24699_v7 = vld [vmem:[#allocation91_spill] sm:$0xff]  ;;  %v24701_v11 = vld [vmem:[#allocation93_spill] sm:$0xff] }
 0xeec   :  { %v11003_v61 = vadd.f32 %v10987_v56, %v10949_v29  ;;  %v11057_v34 = vmul.f32 %v21633_v2, %v11036_v41  ;;  %v10060_v32 = vadd.f32 %v10044_v23, %v9975_v27  ;;  %v10668_v57 = vmul.f32 %v10652_v31, %v24697_v4 }
 0xeed   :  { %v11196_v52 = vadd.f32 %v11180_v8, %v11126_v39  ;;  %v10790_v10 = vld [vmem:[#allocation2 + $0x29] sm:$0xff]  ;;  %v11111_v60 = vmul.f32 %v21535_v49, %v11090_v63  ;;  %v10858_v46 = vadd.f32 %v10842_v36, %v10773_v6  ;;  %v10484_v58 = vmul.f32 %v10468_v17, %v21684_v1 }
 0xeee   :  { %v10806_v14 = vmul.f32 %v10790_v10, %v21275_v45  ;;  %v11073_v53 = vadd.f32 %v11057_v34, %v11003_v61  ;;  %v11144_v16 = vmul.f32 %v17695_v3, %v10790_v10  ;;  %v21732_v59 = vmul.f32 %v21721_v44, %v24698_v21  ;;  %v10637_v6 = vld [vmem:[#allocation2 + $0x2f] sm:$0xff] }
 0xeef   :  { %v11217_v27 = vadd.f32 %v21691_v18, %v11196_v52  ;;  %v10737_v28 = vmul.f32 %v10721_v37, %v21275_v45  ;;  %v10896_v40 = vmul.f32 %v21606_v22, %v10875_v0  ;;  %v10098_v29 = vmul.f32 %v21741_v43, %v10077_v42  ;;  %v24703_v42 = vld [vmem:[#allocation34_spill] sm:$0xff] }
 0xef0   :  { %v11127_v38 = vadd.f32 %v11111_v60, %v11073_v53  ;;  %v11160_v48 = vmul.f32 %v11144_v16, %v21085_v54  ;;  %v10169_v3 = vmul.f32 %v24699_v7, %v21679_v51  ;;  %v10822_v55 = vmul.f32 %v10806_v14, %v24700_v25  ;;  %v10722_v53 = vld [vmem:[#allocation2 + $0x30] sm:$0xff]  ;;  %v24705_v16 = vld [vmem:[#allocation79_spill] sm:$0xff]  ;;  %v24708_v7 = vld [vmem:[#allocation98_spill] sm:$0xff] }
 0xef1   :  { %11233 = vxpose.xlu1.b32.cont [2/16] (narrow) %v11217_v27, 32  ;;  %v10435_v45 = vmul.f32 0.5, %v21494_v26  ;;  %v10912_v39 = vadd.f32 %v10896_v40, %v10858_v46  ;;  %v10689_v30 = vmul.f32 %v21640_v9, %v10668_v57  ;;  %v10500_v31 = vadd.f32 %v10484_v58, %v21684_v1  ;;  %v21759_v26 = vld [vmem:[%s24155_s2 + $0x270] sm:$0xff]  ;;  %v21775_v40 = vld [vmem:[%s24155_s2 + $0x1c6] ss:$0 sm:$0xff] }
 0xef2   :  { %v11181_v54 = vmul.f32 %v21622_v47, %v11160_v48  ;;  %v10114_v56 = vadd.f32 %v10098_v29, %v10060_v32  ;;  %v10239_v41 = vmul.f32 %v24701_v11, %v24695_v13  ;;  %v10758_v23 = vmul.f32 %v21581_v15, %v10737_v28  ;;  %v24702_v32 = vld [vmem:[#allocation105_spill] sm:$0xff]  ;;  %v21781_v48 = vld [vmem:[%s24155_s2 + $0x218] sm:$0xff] }
 0xef3   :  { %v17616_v63 = vpop.eup %17615  ;;  %v10934_v8 = vmul.f32 %v21529_v62, %v10721_v37  ;;  %v10967_v36 = vmul.f32 %v10790_v10, %v21216_v5  ;;  %v11021_v0 = vmul.f32 %v21759_v26, %v10637_v6  ;;  %v10516_v34 = vmul.f32 0.7978846, %v10500_v31  ;;  %v21765_v46 = vld [vmem:[#allocation2 + $0x71] sm:$0xff]  ;;  %24706 = vst [vmem:[#allocation35_spill] sm:$0xff] %v21781_v48 }
 0xef4   :  { %v11197_v17 = vadd.f32 %v11181_v54, %v11127_v38  ;;  %v10547_v61 = vadd.f32 1.0, %v17616_v63  ;;  %v10190_v35 = vmul.f32 %v24702_v32, %v10169_v3  ;;  %v10653_v52 = vmul.f32 %v10637_v6, %v24703_v42  ;;  %24704 = vst [vmem:[#allocation63_spill] sm:$0xff] %v21765_v46  ;;  %v21786_v29 = vld [vmem:[%s24155_s2 + $0x318] sm:$0xff]  ;;  %v17702_v32 = vld [vmem:[#allocation2 + $0x49] sm:$0xff] }
 0xef5   :  { %v10950_v57 = vadd.f32 %v10934_v8, %v10912_v39  ;;  %v10774_v60 = vadd.f32 %v10758_v23, %v10689_v30  ;;  %v10843_v37 = vmul.f32 %v21591_v24, %v10822_v55  ;;  %17617 = vtanh.f32 %v10516_v34  ;;  %24707 = vst [vmem:[#allocation53_spill] sm:$0xff] %v21786_v29  ;;  %v17700_v55 = vld [vmem:[#allocation2 + $0x47] sm:$0xff]  ;;  %v24709_v39 = vld [vmem:[#allocation86_spill] sm:$0xff] }
 0xef6   :  { %v11218_v10 = vadd.f32 %v21691_v18, %v11197_v17  ;;  %v10563_v14 = vmul.f32 %v10547_v61, %v10435_v45  ;;  %v10152_v58 = vadd.f32 %v24705_v16, %v10114_v56  ;;  %v10988_v21 = vmul.f32 %v21612_v33, %v10967_v36  ;;  %v24711_v54 = vld [vmem:[#allocation66_spill] sm:$0xff]  ;;  %v17701_v61 = vld [vmem:[#allocation2 + $0x48] sm:$0xff] }
 0xef7   :  { %v11037_v27 = vmul.f32 %v11021_v0, %v21210_v20  ;;  %v10876_v28 = vmul.f32 %v10637_v6, %v24697_v4  ;;  %v10260_v38 = vmul.f32 %v21775_v40, %v10239_v41  ;;  %v10363_v3 = vmul.f32 %v24708_v7, %v21679_v51  ;;  %v21801_v41 = vld [vmem:[%s24155_s2 + $0x220] sm:$0xff]  ;;  %v17703_v16 = vld [vmem:[#allocation2 + $0x4f] sm:$0xff] }
 0xef8   :  { %11234 = vxpose.xlu1.b32.cont [3/16] (narrow) %v11218_v10, 32  ;;  %v10584_v20 = vmul.f32 %v21402_v50, %v10563_v14  ;;  %v10206_v6 = vadd.f32 %v10190_v35, %v10152_v58  ;;  %v9854_v45 = vmul.f32 %v17700_v55, %v21781_v48  ;;  %v21794_v30 = vmul.f32 %v21765_v46, %v24709_v39  ;;  %v21816_v14 = vld [vmem:[%s24155_s2 + $0x398] sm:$0xff] }
 0xef9   :  { %v10669_v31 = vmul.f32 %v10653_v52, %v24711_v54  ;;  %v10738_v56 = vmul.f32 %v10722_v53, %v24703_v42  ;;  %v11004_v11 = vadd.f32 %v10988_v21, %v10950_v57  ;;  %24712 = vst [vmem:[#allocation76_spill] sm:$0xff] %v21801_v41  ;;  %v10859_v23 = vadd.f32 %v10843_v37, %v10774_v60  ;;  %v24713_v57 = vld [vmem:[#allocation102_spill] sm:$0xff]  ;;  %v24714_v60 = vld [vmem:[#allocation104_spill] sm:$0xff]  ;;  %v21822_v21 = vld [vmem:[%s24155_s2 + $0x1c7] ss:$0 sm:$0xff] }
 0xefa   :  { %24710 = vst [vmem:[#allocation73_spill] sm:$0xff] %v21794_v30  ;;  %v10605_v63 = vadd.f32 %v21413_v12, %v10584_v20  ;;  %v10276_v8 = vadd.f32 %v10260_v38, %v10206_v6  ;;  %v9870_v36 = vmul.f32 %v9854_v45, %v21786_v29  ;;  %v11058_v0 = vmul.f32 %v21633_v2, %v11037_v27  ;;  %v24717_v27 = vld [vmem:[#allocation89_spill] sm:$0xff]  ;;  %v24719_v20 = vld [vmem:[#allocation59_spill] sm:$0xff] }
 0xefb   :  { %v11091_v17 = vmul.f32 %v21759_v26, %v10722_v53  ;;  %v9939_v34 = vmul.f32 %v17701_v61, %v21781_v48  ;;  %v10008_v35 = vmul.f32 %v17702_v32, %v21781_v48  ;;  %v10897_v52 = vmul.f32 %v21606_v22, %v10876_v28  ;;  %24715 = vst [vmem:[#allocation108_spill] sm:$0xff] %v21816_v14  ;;  %v24726_v48 = vld [vmem:[#allocation83_spill] sm:$0xff] }
 0xefc   :  { %10621 = vst.msk [vmem:[#allocation2 + $0x38] sm:$0xff] %vm144_vm0, %v10605_v63  ;;  %v10330_v10 = vadd.f32 %v24713_v57, %v10276_v8  ;;  %v10384_v37 = vmul.f32 %v24714_v60, %v10363_v3  ;;  %v9855_v58 = vmul.f32 %v17703_v16, %v21801_v41  ;;  %24716 = vst [vmem:[#allocation106_spill] sm:$0xff] %v21822_v21  ;;  %v21835_v63 = vld [vmem:[%s24155_s2 + $0x320] sm:$0xff]  ;;  %v24720_v8 = vld [vmem:[#allocation109_spill] sm:$0xff] }
 0xefd   :  { %v21826_v28 = vmul.f32 %v21822_v21, %v24717_v27  ;;  %v10759_v38 = vmul.f32 %v21581_v15, %v10738_v56  ;;  %v9891_v6 = vmul.f32 %v24719_v20, %v9870_v36  ;;  %v10024_v7 = vmul.f32 %v10008_v35, %v21816_v14  ;;  %v21841_v56 = vld [vmem:[%s24155_s2 + $0x1c2] ss:$0 sm:$0xff]  ;;  %v17706_v35 = vld [vmem:[#allocation2 + $0x51] sm:$0xff] }
 0xefe   :  { %v11074_v3 = vadd.f32 %v11058_v0, %v11004_v11  ;;  %v10913_v55 = vadd.f32 %v10897_v52, %v10859_v23  ;;  %v10400_v45 = vadd.f32 %v10384_v37, %v10330_v10  ;;  %v10690_v39 = vmul.f32 %v21640_v9, %v10669_v31  ;;  %v24721_v57 = vld [vmem:[#allocation94_spill] sm:$0xff]  ;;  %v24722_v60 = vld [vmem:[#allocation71_spill] sm:$0xff] }
 0xeff   :  { %24718 = vst [vmem:[#allocation91_spill] sm:$0xff] %v21826_v28  ;;  %v9960_v61 = vmul.f32 %v24720_v8, %v9939_v34  ;;  %v10045_v36 = vmul.f32 %v21841_v56, %v10024_v7  ;;  %v10078_v11 = vmul.f32 %v17703_v16, %v21786_v29  ;;  %v9871_v23 = vmul.f32 %v9855_v58, %v21835_v63  ;;  %v17711_v28 = vld [vmem:[#allocation2 + $0x57] sm:$0xff] }
 0xf00   :  { %v11112_v31 = vmul.f32 %v21535_v49, %v11091_v17  ;;  %v10935_v0 = vmul.f32 %v21529_v62, %v10722_v53  ;;  %v21849_v32 = vadd.f32 %v21232_v19, %v10400_v45  ;;  %v10170_v34 = vmul.f32 %v17706_v35, %v21816_v14  ;;  %v21861_v19 = vld [vmem:[%s24155_s2 + $0x3a0] sm:$0xff]  ;;  %v17707_v53 = vld [vmem:[#allocation2 + $0x50] sm:$0xff] }
 0xf01   :  { %v9976_v52 = vadd.f32 %v9960_v61, %v9891_v6  ;;  %v10240_v10 = vmul.f32 %v24721_v57, %v21786_v29  ;;  %v10364_v37 = vmul.f32 %v24722_v60, %v21816_v14  ;;  %v10009_v16 = vmul.f32 %v17706_v35, %v21801_v41 }
 0xf02   :  { %v11128_v58 = vadd.f32 %v11112_v31, %v11074_v3  ;;  %v10436_v17 = vmul.f32 0.5, %v21684_v1  ;;  %v10951_v27 = vadd.f32 %v10935_v0, %v10913_v55  ;;  %v9940_v6 = vmul.f32 %v17707_v53, %v21801_v41  ;;  %v17618_v7 = vpop.eup %17617  ;;  %v21872_v53 = vld [vmem:[%s24155_s2 + $0x1c5] ss:$0 sm:$0xff] }
 0xf03   :  { %v10791_v45 = vld [vmem:[#allocation2 + $0x31] sm:$0xff]  ;;  %v10775_v61 = vadd.f32 %v10759_v38, %v10690_v39  ;;  %v10061_v57 = vadd.f32 %v10045_v36, %v9976_v52  ;;  %v10099_v60 = vmul.f32 %v21741_v43, %v10078_v11  ;;  %v9892_v35 = vmul.f32 %v24719_v20, %v9871_v23  ;;  %v21879_v36 = vld [vmem:[%s24155_s2 + $0x1c8] ss:$0 sm:$0xff]  ;;  %v24723_v11 = vld [vmem:[#allocation67_spill] sm:$0xff] }
 0xf04   :  { %v10807_v3 = vmul.f32 %v10791_v45, %v24703_v42  ;;  %v11145_v1 = vmul.f32 %v21759_v26, %v10791_v45  ;;  %v10548_v55 = vadd.f32 1.0, %v17618_v7  ;;  %v10638_v31 = vld [vmem:[#allocation2 + $0x37] sm:$0xff]  ;;  %v10453_v0 = vmul.f32 0.044715, %v21849_v32 }
 0xf05   :  { %v10191_v38 = vmul.f32 %v21872_v53, %v10170_v34  ;;  %v10261_v39 = vmul.f32 %v21775_v40, %v10240_v10  ;;  %v10385_v26 = vmul.f32 %v21879_v36, %v10364_v37  ;;  %v10025_v42 = vmul.f32 %v10009_v16, %v21861_v19  ;;  %v17710_v10 = vld [vmem:[%s24155_s2 + $0x278] sm:$0xff] }
 0xf06   :  { %v10823_v23 = vmul.f32 %v10807_v3, %v24723_v11  ;;  %v11161_v52 = vmul.f32 %v11145_v1, %v21216_v5  ;;  %v10564_v7 = vmul.f32 %v10548_v55, %v10436_v17  ;;  %v9961_v41 = vmul.f32 %v24720_v8, %v9940_v6  ;;  %v24724_v1 = vld [vmem:[#allocation78_spill] sm:$0xff]  ;;  %v24725_v55 = vld [vmem:[#allocation77_spill] sm:$0xff] }
 0xf07   :  { %v10968_v34 = vmul.f32 %v10791_v45, %v24700_v25  ;;  %v11022_v14 = vmul.f32 %v17710_v10, %v10638_v31  ;;  %v10115_v21 = vadd.f32 %v10099_v60, %v10061_v57  ;;  %v10079_v37 = vmul.f32 %v17711_v28, %v21835_v63  ;;  %v10723_v51 = vld [vmem:[#allocation2 + $0x38] sm:$0xff] }
 0xf08   :  { %v11182_v16 = vmul.f32 %v21622_v47, %v11161_v52  ;;  %v10585_v3 = vmul.f32 %v21402_v50, %v10564_v7  ;;  %v10469_v5 = vmul.f32 %v10453_v0, %v21849_v32  ;;  %v9977_v17 = vadd.f32 %v9961_v41, %v9892_v35  ;;  %v24727_v0 = vld [vmem:[#allocation92_spill] sm:$0xff] }
 0xf09   :  { %v10654_v6 = vmul.f32 %v10638_v31, %v24724_v1  ;;  %v10046_v45 = vmul.f32 %v21841_v56, %v10025_v42  ;;  %v10171_v29 = vmul.f32 %v24725_v55, %v21861_v19  ;;  %v10241_v57 = vmul.f32 %v24726_v48, %v21835_v63 }
 0xf0a   :  { %v11198_v60 = vadd.f32 %v11182_v16, %v11128_v58  ;;  %v10606_v46 = vadd.f32 %v21413_v12, %v10585_v3  ;;  %v10485_v52 = vmul.f32 %v10469_v5, %v21849_v32  ;;  %v10844_v7 = vmul.f32 %v21591_v24, %v10823_v23 }
 0xf0b   :  { %v10989_v41 = vmul.f32 %v21612_v33, %v10968_v34  ;;  %v11038_v35 = vmul.f32 %v11022_v14, %v24697_v4  ;;  %v10153_v42 = vadd.f32 %v24727_v0, %v10115_v21  ;;  %v10100_v30 = vmul.f32 %v21741_v43, %v10079_v37  ;;  %v24728_v4 = vld [vmem:[#allocation68_spill] sm:$0xff] }
 0xf0c   :  { %v11219_v44 = vadd.f32 %v21691_v18, %v11198_v60  ;;  %10622 = vst.msk [vmem:[#allocation2 + $0x40] sm:$0xff] %vm144_vm0, %v10606_v46  ;;  %v10501_v48 = vadd.f32 %v10485_v52, %v21849_v32  ;;  %v10877_v58 = vmul.f32 %v10638_v31, %v24711_v54  ;;  %v10062_v16 = vadd.f32 %v10046_v45, %v9977_v17  ;;  %v21918_v46 = vld [vmem:[%s24155_s2 + $0x228] sm:$0xff]  ;;  %v24732_v60 = vld [vmem:[#allocation45_spill] sm:$0xff]  ;;  %v24733_v52 = vld [vmem:[#allocation90_spill] sm:$0xff] }
 0xf0d   :  { %v11005_v3 = vadd.f32 %v10989_v41, %v10951_v27  ;;  %v11092_v5 = vmul.f32 %v17710_v10, %v10723_v51  ;;  %v21912_v23 = vmul.f32 0.5, %v21849_v32  ;;  %v10207_v34 = vadd.f32 %v10191_v38, %v10153_v42  ;;  %24729 = vst [vmem:[#allocation74_spill] sm:$0xff] %v21918_v46 }
 0xf0e   :  { %11235 = vxpose.xlu1.b32.cont [4/16] (narrow) %v11219_v44, 32  ;;  %v10670_v14 = vmul.f32 %v10654_v6, %v24728_v4  ;;  %v10517_v21 = vmul.f32 0.7978846, %v10501_v48  ;;  %v10860_v37 = vadd.f32 %v10844_v7, %v10775_v61  ;;  %v10116_v0 = vadd.f32 %v10100_v30, %v10062_v16  ;;  %v24730_v61 = vld [vmem:[#allocation80_spill] sm:$0xff] }
 0xf0f   :  { %v11059_v31 = vmul.f32 %v21633_v2, %v11038_v35  ;;  %v10277_v17 = vadd.f32 %v10261_v39, %v10207_v34  ;;  %v10192_v27 = vmul.f32 %v21872_v53, %v10171_v29  ;;  %v9856_v32 = vmul.f32 %v17711_v28, %v21918_v46  ;;  %v21930_v6 = vld [vmem:[%s24155_s2 + $0x328] sm:$0xff]  ;;  %v17712_v34 = vld [vmem:[#allocation2 + $0x58] sm:$0xff] }
 0xf10   :  { %v10739_v38 = vmul.f32 %v10723_v51, %v24724_v1  ;;  %17619 = vtanh.f32 %v10517_v21  ;;  %v10898_v44 = vmul.f32 %v21606_v22, %v10877_v58  ;;  %v10365_v30 = vmul.f32 %v24730_v61, %v21861_v19  ;;  %24731 = vst [vmem:[#allocation93_spill] sm:$0xff] %v21930_v6  ;;  %v24734_v21 = vld [vmem:[#allocation85_spill] sm:$0xff] }
 0xf11   :  { %v11075_v45 = vadd.f32 %v11059_v31, %v11005_v3  ;;  %v10331_v39 = vadd.f32 %v24732_v60, %v10277_v17  ;;  %v10154_v29 = vadd.f32 %v24733_v52, %v10116_v0  ;;  %v10010_v28 = vmul.f32 %v24725_v55, %v21918_v46  ;;  %v24736_v52 = vld [vmem:[#allocation72_spill] sm:$0xff] }
 0xf12   :  { %v11113_v7 = vmul.f32 %v21535_v49, %v11092_v5  ;;  %v10914_v41 = vadd.f32 %v10898_v44, %v10860_v37  ;;  %v10691_v35 = vmul.f32 %v21640_v9, %v10670_v14  ;;  %v10262_v42 = vmul.f32 %v21775_v40, %v10241_v57  ;;  %v21949_v57 = vld [vmem:[%s24155_s2 + $0x3a8] sm:$0xff] }
 0xf13   :  { %v10792_v48 = vld [vmem:[#allocation2 + $0x39] sm:$0xff]  ;;  %v10401_v58 = vadd.f32 %v10385_v26, %v10331_v39  ;;  %v9872_v16 = vmul.f32 %v9856_v32, %v21930_v6  ;;  %v9941_v3 = vmul.f32 %v17712_v34, %v21918_v46  ;;  %v10080_v0 = vmul.f32 %v24734_v21, %v21930_v6  ;;  %24735 = vst [vmem:[#allocation105_spill] sm:$0xff] %v21949_v57  ;;  %v21954_v14 = vld [vmem:[%s24155_s2 + $0x1c9] ss:$0 sm:$0xff] }
 0xf14   :  { %v10760_v31 = vmul.f32 %v21581_v15, %v10739_v38  ;;  %v11146_v55 = vmul.f32 %v17710_v10, %v10792_v48  ;;  %v10936_v5 = vmul.f32 %v21529_v62, %v10723_v51  ;;  %v10386_v37 = vmul.f32 %v21879_v36, %v10365_v30  ;;  %v10639_v44 = vld [vmem:[#allocation2 + $0x3f] sm:$0xff] }
 0xf15   :  { %v11129_v26 = vadd.f32 %v11113_v7, %v11075_v45  ;;  %v21957_v17 = vadd.f32 %v21954_v14, %v10401_v58  ;;  %v10208_v32 = vadd.f32 %v10192_v27, %v10154_v29  ;;  %v10026_v10 = vmul.f32 %v10010_v28, %v21949_v57 }
 0xf16   :  { %v10808_v51 = vmul.f32 %v10792_v48, %v24724_v1  ;;  %v11162_v38 = vmul.f32 %v11146_v55, %v24700_v25  ;;  %v10952_v61 = vadd.f32 %v10936_v5, %v10914_v41  ;;  %v10776_v30 = vadd.f32 %v10760_v31, %v10691_v35  ;;  %v24737_v1 = vld [vmem:[#allocation75_spill] sm:$0xff]  ;;  %v21978_v41 = vld [vmem:[%s24155_s2 + $0x230] sm:$0xff]  ;;  %v24739_v35 = vld [vmem:[#allocation26_spill] sm:$0xff] }
 0xf17   :  { %v9893_v45 = vmul.f32 %v24719_v20, %v9872_v16  ;;  %v9962_v60 = vmul.f32 %v24720_v8, %v9941_v3  ;;  %v10101_v39 = vmul.f32 %v21741_v43, %v10080_v0  ;;  %v10172_v7 = vmul.f32 %v24736_v52, %v21949_v57  ;;  %24738 = vst [vmem:[#allocation34_spill] sm:$0xff] %v21978_v41  ;;  %v21981_v16 = vld [vmem:[#allocation2 + $0x40] sm:$0xff]  ;;  %v24740_v31 = vld [vmem:[#allocation52_spill] sm:$0xff] }
 0xf18   :  { %v11183_v27 = vmul.f32 %v21622_v47, %v11162_v38  ;;  %v10454_v29 = vmul.f32 0.044715, %v21957_v17  ;;  %v10242_v28 = vmul.f32 %v24737_v1, %v21930_v6  ;;  %v21973_v25 = vmul.f32 %v21732_v59, %v21949_v57  ;;  %v21989_v59 = vld [vmem:[%s24155_s2 + $0x280] sm:$0xff]  ;;  %v24741_v57 = vld [vmem:[#allocation12_spill] sm:$0xff] }
 0xf19   :  { %v10655_v58 = vmul.f32 %v10639_v44, %v24739_v35  ;;  %v10969_v34 = vmul.f32 %v10792_v48, %v24723_v11  ;;  %v10278_v3 = vadd.f32 %v10262_v42, %v10208_v32  ;;  %v10047_v0 = vmul.f32 %v21841_v56, %v10026_v10 }
 0xf1a   :  { %v10824_v55 = vmul.f32 %v10808_v51, %v24740_v31  ;;  %v11199_v5 = vadd.f32 %v11183_v27, %v11129_v26  ;;  %v11023_v38 = vmul.f32 %v21989_v59, %v10639_v44  ;;  %v10470_v1 = vmul.f32 %v10454_v29, %v21957_v17  ;;  %v22011_v31 = vld [vmem:[%s24155_s2 + $0x330] sm:$0xff] }
 0xf1b   :  { %v10332_v6 = vadd.f32 %v24741_v57, %v10278_v3  ;;  %v9978_v46 = vadd.f32 %v9962_v60, %v9893_v45  ;;  %v10193_v11 = vmul.f32 %v21872_v53, %v10172_v7  ;;  %v9857_v42 = vmul.f32 %v24734_v21, %v21978_v41  ;;  %24742 = vst [vmem:[#allocation79_spill] sm:$0xff] %v22011_v31 }
 0xf1c   :  { %v11220_v48 = vadd.f32 %v21691_v18, %v11199_v5  ;;  %v10740_v26 = vmul.f32 %v21981_v16, %v24739_v35  ;;  %v11093_v32 = vmul.f32 %v21989_v59, %v21981_v16  ;;  %v10486_v10 = vmul.f32 %v10470_v1, %v21957_v17 }
 0xf1d   :  { %v17620_v51 = vpop.eup %17619  ;;  %v10671_v27 = vmul.f32 %v10655_v58, %v24695_v13  ;;  %v10990_v57 = vmul.f32 %v21612_v33, %v10969_v34  ;;  %v10402_v45 = vadd.f32 %v10386_v37, %v10332_v6  ;;  %v10063_v60 = vadd.f32 %v10047_v0, %v9978_v46  ;;  %v22019_v46 = vld [vmem:[%s24155_s2 + $0x3b0] sm:$0xff]  ;;  %v17715_v6 = vld [vmem:[#allocation2 + $0x60] sm:$0xff] }
 0xf1e   :  { %11236 = vxpose.xlu1.b32.cont [5/16] (narrow) %v11220_v48, 32  ;;  %v10549_v7 = vadd.f32 1.0, %v17620_v51  ;;  %v11039_v21 = vmul.f32 %v11023_v38, %v24711_v54  ;;  %v10502_v29 = vadd.f32 %v10486_v10, %v21957_v17  ;;  %v10845_v3 = vmul.f32 %v21591_v24, %v10824_v55  ;;  %24743 = vst [vmem:[#allocation98_spill] sm:$0xff] %v22019_v46  ;;  %v24744_v48 = vld [vmem:[#allocation107_spill] sm:$0xff] }
 0xf1f   :  { %v22014_v5 = vadd.f32 %v21954_v14, %v10402_v45  ;;  %v10117_v58 = vadd.f32 %v10101_v39, %v10063_v60  ;;  %v9873_v54 = vmul.f32 %v9857_v42, %v22011_v31  ;;  %v9942_v37 = vmul.f32 %v17715_v6, %v21978_v41 }
 0xf20   :  { %v10565_v34 = vmul.f32 %v10549_v7, %v21912_v23  ;;  %v10518_v0 = vmul.f32 0.7978846, %v10502_v29  ;;  %v10878_v55 = vmul.f32 %v10639_v44, %v24728_v4  ;;  %v10011_v38 = vmul.f32 %v24736_v52, %v21978_v41 }
 0xf21   :  { %v11006_v1 = vadd.f32 %v10990_v57, %v10952_v61  ;;  %v10455_v39 = vmul.f32 0.044715, %v22014_v5  ;;  %v10155_v10 = vadd.f32 %v24744_v48, %v10117_v58  ;;  %v9894_v51 = vmul.f32 %v24719_v20, %v9873_v54  ;;  %v24745_v61 = vld [vmem:[#allocation69_spill] sm:$0xff] }
 0xf22   :  { %v10586_v42 = vmul.f32 %v21402_v50, %v10565_v34  ;;  %17621 = vtanh.f32 %v10518_v0  ;;  %v9963_v45 = vmul.f32 %v24720_v8, %v9942_v37  ;;  %v10027_v23 = vmul.f32 %v10011_v38, %v22019_v46  ;;  %v24746_v50 = vld [vmem:[#allocation43_spill] sm:$0xff]  ;;  %v24747_v54 = vld [vmem:[#allocation97_spill] sm:$0xff] }
 0xf23   :  { %v10471_v60 = vmul.f32 %v10455_v39, %v22014_v5  ;;  %v10209_v4 = vadd.f32 %v10193_v11, %v10155_v10  ;;  %v10263_v44 = vmul.f32 %v21775_v40, %v10242_v28  ;;  %v10081_v52 = vmul.f32 %v24745_v61, %v22011_v31  ;;  %v24749_v38 = vld [vmem:[#allocation87_spill] sm:$0xff] }
 0xf24   :  { %v10607_v57 = vadd.f32 %v21413_v12, %v10586_v42  ;;  %v10861_v7 = vadd.f32 %v10845_v3, %v10776_v30  ;;  %v9979_v29 = vadd.f32 %v9963_v45, %v9894_v51  ;;  %v10048_v58 = vmul.f32 %v21841_v56, %v10027_v23  ;;  %v22053_v3 = vld [vmem:[%s24155_s2 + $0x238] sm:$0xff] }
 0xf25   :  { %v22041_v6 = vmul.f32 %v24747_v54, %v24746_v50  ;;  %v10761_v37 = vmul.f32 %v21581_v15, %v10740_v26  ;;  %v10487_v34 = vmul.f32 %v10471_v60, %v22014_v5  ;;  %v10279_v11 = vadd.f32 %v10263_v44, %v10209_v4  ;;  %24748 = vst [vmem:[#allocation86_spill] sm:$0xff] %v22053_v3  ;;  %v22065_v42 = vld [vmem:[%s24155_s2 + $0x338] sm:$0xff]  ;;  %v24751_v4 = vld [vmem:[#allocation81_spill] sm:$0xff] }
 0xf26   :  { %10623 = vst.msk [vmem:[#allocation2 + $0x48] sm:$0xff] %vm144_vm0, %v10607_v57  ;;  %v11060_v28 = vmul.f32 %v21633_v2, %v11039_v21  ;;  %v10899_v0 = vmul.f32 %v21606_v22, %v10878_v55  ;;  %v10387_v12 = vmul.f32 %v21879_v36, %v21973_v25  ;;  %v10064_v30 = vadd.f32 %v10048_v58, %v9979_v29  ;;  %v17716_v58 = vld [vmem:[#allocation2 + $0x68] sm:$0xff] }
 0xf27   :  { %v10503_v26 = vadd.f32 %v10487_v34, %v22014_v5  ;;  %v10333_v39 = vadd.f32 %v24749_v38, %v10279_v11  ;;  %v10102_v48 = vmul.f32 %v21741_v43, %v10081_v52  ;;  %v9858_v21 = vmul.f32 %v24745_v61, %v22053_v3  ;;  %24750 = vst [vmem:[#allocation66_spill] sm:$0xff] %v22065_v42  ;;  %v24753_v52 = vld [vmem:[#allocation73_spill] sm:$0xff] }
 0xf28   :  { %v11076_v10 = vadd.f32 %v11060_v28, %v11006_v1  ;;  %v11114_v55 = vmul.f32 %v21535_v49, %v11093_v32  ;;  %v10915_v51 = vadd.f32 %v10899_v0, %v10861_v7  ;;  %v10692_v25 = vmul.f32 %v21640_v9, %v10671_v27  ;;  %v24752_v1 = vld [vmem:[#allocation95_spill] sm:$0xff]  ;;  %v22088_v0 = vld [vmem:[%s24155_s2 + $0x3b8] sm:$0xff] }
 0xf29   :  { %v10519_v45 = vmul.f32 0.7978846, %v10503_v26  ;;  %v10403_v23 = vadd.f32 %v10387_v12, %v10333_v39  ;;  %v10118_v60 = vadd.f32 %v10102_v48, %v10064_v30  ;;  %v10012_v44 = vmul.f32 %v24751_v4, %v22053_v3  ;;  %v24754_v26 = vld [vmem:[#allocation103_spill] sm:$0xff]  ;;  %v24755_v48 = vld [vmem:[#allocation82_spill] sm:$0xff] }
 0xf2a   :  { %v10937_v61 = vmul.f32 %v21529_v62, %v21981_v16  ;;  %v10173_v32 = vmul.f32 %v24751_v4, %v22019_v46  ;;  %v10243_v27 = vmul.f32 %v24752_v1, %v22011_v31  ;;  %v10367_v57 = vmul.f32 %v24753_v52, %v22019_v46  ;;  %v24756_v4 = vld [vmem:[#allocation60_spill] sm:$0xff]  ;;  %v24758_v52 = vld [vmem:[#allocation35_spill] sm:$0xff] }
 0xf2b   :  { %17623 = vtanh.f32 %v10519_v45  ;;  %v22078_v7 = vadd.f32 %v21954_v14, %v10403_v23  ;;  %v9874_v29 = vmul.f32 %v9858_v21, %v22065_v42  ;;  %v9943_v50 = vmul.f32 %v17716_v58, %v22053_v3 }
 0xf2c   :  { %v11130_v34 = vadd.f32 %v11114_v55, %v11076_v10  ;;  %v10438_v16 = vmul.f32 0.5, %v21957_v17  ;;  %v10953_v11 = vadd.f32 %v10937_v61, %v10915_v51  ;;  %v22083_v28 = vadd.f32 %v10761_v37, %v10692_v25 }
 0xf2d   :  { %v10793_v12 = vld [vmem:[#allocation2 + $0x41] sm:$0xff]  ;;  %v22091_v30 = vmul.f32 0.5, %v22014_v5  ;;  %v10156_v38 = vadd.f32 %v24754_v26, %v10118_v60  ;;  %v10028_v39 = vmul.f32 %v10012_v44, %v22088_v0  ;;  %v10082_v21 = vmul.f32 %v24755_v48, %v22065_v42 }
 0xf2e   :  { %v10809_v17 = vmul.f32 %v10793_v12, %v24739_v35  ;;  %v11147_v37 = vmul.f32 %v21989_v59, %v10793_v12  ;;  %v10640_v10 = vld [vmem:[#allocation2 + $0x47] sm:$0xff]  ;;  %v10194_v55 = vmul.f32 %v21872_v53, %v10173_v32  ;;  %v10264_v51 = vmul.f32 %v21775_v40, %v10243_v27 }
 0xf2f   :  { %v17622_v25 = vpop.eup %17621  ;;  %v10456_v5 = vmul.f32 0.044715, %v22078_v7  ;;  %v10388_v45 = vmul.f32 %v21879_v36, %v10367_v57  ;;  %v9895_v23 = vmul.f32 %v24719_v20, %v9874_v29  ;;  %v9964_v60 = vmul.f32 %v24720_v8, %v9943_v50  ;;  %v17717_v35 = vld [vmem:[%s24155_s2 + $0x380] sm:$0xff] }
 0xf30   :  { %v10825_v44 = vmul.f32 %v10809_v17, %v24756_v4  ;;  %v11163_v59 = vmul.f32 %v17717_v35, %v11147_v37  ;;  %v10550_v61 = vadd.f32 1.0, %v17622_v25  ;;  %v24757_v32 = vld [vmem:[#allocation63_spill] sm:$0xff]  ;;  %v10656_v57 = vmul.f32 %v10640_v10, %v24758_v52  ;;  %v22123_v17 = vld [vmem:[%s24155_s2 + $0x388] sm:$0xff] }
 0xf31   :  { %v10174_v1 = vmul.f32 %v24757_v32, %v22088_v0  ;;  %v22114_v27 = vld [vmem:[%s24155_s2 + $0x240] sm:$0xff]  ;;  %v10210_v29 = vadd.f32 %v10194_v55, %v10156_v38  ;;  %v10049_v8 = vmul.f32 %v21841_v56, %v10028_v39  ;;  %v10103_v58 = vmul.f32 %v21741_v43, %v10082_v21  ;;  %v22129_v25 = vld [vmem:[%s24155_s2 + $0x288] sm:$0xff]  ;;  %v24759_v55 = vld [vmem:[#allocation70_spill] sm:$0xff] }
 0xf32   :  { %v11184_v50 = vmul.f32 %v21622_v47, %v11163_v59  ;;  %v10566_v26 = vmul.f32 %v10550_v61, %v10438_v16  ;;  %v10970_v37 = vmul.f32 %v22123_v17, %v10793_v12  ;;  %v11024_v38 = vmul.f32 %v22129_v25, %v10640_v10  ;;  %v22140_v12 = vld [vmem:[%s24155_s2 + $0x1ca] ss:$0 sm:$0xff] }
 0xf33   :  { %v10472_v39 = vmul.f32 %v10456_v5, %v22078_v7  ;;  %v9980_v21 = vadd.f32 %v9964_v60, %v9895_v23  ;;  %v10244_v16 = vmul.f32 %v24759_v55, %v22065_v42  ;;  %v9859_v35 = vmul.f32 %v24755_v48, %v22114_v27  ;;  %v24760_v5 = vld [vmem:[#allocation53_spill] sm:$0xff]  ;;  %v10725_v60 = vld [vmem:[#allocation2 + $0x48] sm:$0xff] }
 0xf34   :  { %v11200_v59 = vadd.f32 %v11184_v50, %v11130_v34  ;;  %v10587_v61 = vmul.f32 %v22140_v12, %v10566_v26  ;;  %v10846_v3 = vmul.f32 %v21591_v24, %v10825_v44  ;;  %v10879_v46 = vmul.f32 %v10640_v10, %v24695_v13  ;;  %v22151_v48 = vld [vmem:[%s24155_s2 + $0x1cb] ss:$0 sm:$0xff] }
 0xf35   :  { %v10672_v23 = vmul.f32 %v10656_v57, %v24760_v5  ;;  %v10488_v55 = vmul.f32 %v10472_v39, %v22078_v7  ;;  %v10280_v42 = vadd.f32 %v10264_v51, %v10210_v29  ;;  %v10065_v31 = vadd.f32 %v10049_v8, %v9980_v21  ;;  %v17722_v13 = vld [vmem:[%s24155_s2 + $0x308] sm:$0xff]  ;;  %v24761_v51 = vld [vmem:[#allocation91_spill] sm:$0xff] }
 0xf36   :  { %v11221_v34 = vadd.f32 %v21691_v18, %v11200_v59  ;;  %v10608_v50 = vadd.f32 %v22151_v48, %v10587_v61  ;;  %v10991_v24 = vmul.f32 %v21612_v33, %v10970_v37  ;;  %v11040_v10 = vmul.f32 %v17722_v13, %v11024_v38 }
 0xf37   :  { %v10504_v44 = vadd.f32 %v10488_v55, %v22078_v7  ;;  %v10334_v57 = vadd.f32 %v24761_v51, %v10280_v42  ;;  %v10119_v29 = vadd.f32 %v10103_v58, %v10065_v31  ;;  %v10195_v8 = vmul.f32 %v21872_v53, %v10174_v1  ;;  %v24762_v55 = vld [vmem:[#allocation88_spill] sm:$0xff]  ;;  %v22169_v31 = vld [vmem:[%s24155_s2 + $0x340] sm:$0xff] }
 0xf38   :  { %v17624_v26 = vpop.eup %17623  ;;  %11237 = vxpose.xlu1.b32.cont [6/16] (narrow) %v11221_v34, 32  ;;  %10624 = vst.msk [vmem:[#allocation2 + $0x50] sm:$0xff] %vm144_vm0, %v10608_v50  ;;  %v10741_v39 = vmul.f32 %v10725_v60, %v24758_v52  ;;  %v11007_v21 = vadd.f32 %v10991_v24, %v10953_v11  ;;  %v11094_v37 = vmul.f32 %v22129_v25, %v10725_v60  ;;  %v24763_v34 = vld [vmem:[#allocation84_spill] sm:$0xff]  ;;  %v24764_v50 = vld [vmem:[#allocation106_spill] sm:$0xff] }
 0xf39   :  { %v10862_v59 = vadd.f32 %v10846_v3, %v22083_v28  ;;  %v10551_v61 = vadd.f32 1.0, %v17624_v26  ;;  %v10520_v38 = vmul.f32 0.7978846, %v10504_v44  ;;  %v10404_v13 = vadd.f32 %v10388_v45, %v10334_v57 }
 0xf3a   :  { %v10157_v41 = vadd.f32 %v24762_v55, %v10119_v29  ;;  %v11061_v42 = vmul.f32 %v21633_v2, %v11040_v10  ;;  %v10900_v1 = vmul.f32 %v21606_v22, %v10879_v46  ;;  %v10693_v11 = vmul.f32 %v21640_v9, %v10672_v23  ;;  %v17723_v10 = vld [vmem:[#allocation2 + $0x70] sm:$0xff] }
 0xf3b   :  { %v9875_v58 = vmul.f32 %v9859_v35, %v22169_v31  ;;  %v10567_v3 = vmul.f32 %v10551_v61, %v22091_v30  ;;  %17625 = vtanh.f32 %v10520_v38  ;;  %v22177_v28 = vadd.f32 %v21954_v14, %v10404_v13  ;;  %v17724_v38 = vld [vmem:[%s24155_s2 + $0x290] sm:$0xff] }
 0xf3c   :  { %v10211_v45 = vadd.f32 %v10195_v8, %v10157_v41  ;;  %v10319_v24 = vmul.f32 %v24764_v50, %v24763_v34  ;;  %v11077_v44 = vadd.f32 %v11061_v42, %v11007_v21  ;;  %v10265_v51 = vmul.f32 %v21775_v40, %v10244_v16  ;;  %v22196_v21 = vld [vmem:[%s24155_s2 + $0x3c0] sm:$0xff] }
 0xf3d   :  { %v9944_v22 = vmul.f32 %v17723_v10, %v22114_v27  ;;  %v10762_v9 = vmul.f32 %v21581_v15, %v10741_v39  ;;  %v10588_v46 = vmul.f32 %v22140_v12, %v10567_v3  ;;  %v10916_v35 = vadd.f32 %v10900_v1, %v10862_v59  ;;  %v17726_v3 = vld [vmem:[%s24155_s2 + $0x310] sm:$0xff] }
 0xf3e   :  { %v10457_v30 = vmul.f32 0.044715, %v22177_v28  ;;  %v11115_v23 = vmul.f32 %v21535_v49, %v11094_v37  ;;  %v10938_v41 = vmul.f32 %v21529_v62, %v10725_v60  ;;  %v10368_v57 = vmul.f32 %v22041_v6, %v22088_v0 }
 0xf3f   :  { %v10013_v16 = vmul.f32 %v24757_v32, %v22114_v27  ;;  %v10794_v29 = vld [vmem:[#allocation2 + $0x49] sm:$0xff]  ;;  %v10609_v8 = vadd.f32 %v22151_v48, %v10588_v46  ;;  %v10778_v15 = vadd.f32 %v10762_v9, %v10693_v11  ;;  %v10281_v39 = vadd.f32 %v10265_v51, %v10211_v45  ;;  %v22226_v51 = vld [vmem:[%s24155_s2 + $0x2c0] sm:$0xff] }
 0xf40   :  { %v10641_v26 = vld [vmem:[#allocation2 + $0x4f] sm:$0xff]  ;;  %v9896_v49 = vmul.f32 %v24719_v20, %v9875_v58  ;;  %v10810_v62 = vmul.f32 %v10794_v29, %v24758_v52  ;;  %v11131_v60 = vadd.f32 %v11115_v23, %v11077_v44  ;;  %v11148_v6 = vmul.f32 %v22129_v25, %v10794_v29  ;;  %v22212_v20 = vld [vmem:[%s24155_s2 + $0x1c1] ss:$0 sm:$0xff] }
 0xf41   :  { %v10473_v32 = vmul.f32 %v10457_v30, %v22177_v28  ;;  %10625 = vst.msk [vmem:[#allocation2 + $0x58] sm:$0xff] %vm144_vm0, %v10609_v8  ;;  %v22203_v37 = vld [vmem:[#allocation2 + $0x50] sm:$0xff]  ;;  %v10954_v59 = vadd.f32 %v10938_v41, %v10916_v35  ;;  %v10971_v61 = vmul.f32 %v10794_v29, %v24756_v4  ;;  %v11025_v13 = vmul.f32 %v17724_v38, %v10641_v26  ;;  %v24765_v25 = vld [vmem:[#allocation108_spill] sm:$0xff] }
 0xf42   :  { %v9965_v52 = vmul.f32 %v22212_v20, %v9944_v22  ;;  %v10826_v55 = vmul.f32 %v10810_v62, %v24765_v25  ;;  %v11164_v42 = vmul.f32 %v22123_v17, %v11148_v6  ;;  %v10389_v1 = vmul.f32 %v21879_v36, %v10368_v57  ;;  %v17728_v30 = vld [vmem:[#allocation2 + $0x77] sm:$0xff]  ;;  %v24766_v41 = vld [vmem:[#allocation76_spill] sm:$0xff] }
 0xf43   :  { %v10029_v11 = vmul.f32 %v10013_v16, %v22196_v21  ;;  %v10992_v58 = vmul.f32 %v21612_v33, %v10971_v61  ;;  %v11041_v45 = vmul.f32 %v17726_v3, %v11025_v13  ;;  %v10335_v34 = vadd.f32 %v10319_v24, %v10281_v39  ;;  %v22233_v33 = vld [vmem:[%s24155_s2 + $0x1ce] ss:$0 sm:$0xff] }
 0xf44   :  { %v9981_v44 = vadd.f32 %v9965_v52, %v9896_v49  ;;  %v11185_v17 = vmul.f32 %v21622_v47, %v11164_v42  ;;  %v11095_v10 = vmul.f32 %v17724_v38, %v22203_v37  ;;  %v10847_v22 = vmul.f32 %v22233_v33, %v10826_v55  ;;  %v24767_v8 = vld [vmem:[#allocation96_spill] sm:$0xff] }
 0xf45   :  { %v10489_v9 = vmul.f32 %v10473_v32, %v22177_v28  ;;  %v11008_v24 = vadd.f32 %v10992_v58, %v10954_v59  ;;  %v11062_v46 = vmul.f32 %v21633_v2, %v11041_v45  ;;  %v10880_v35 = vmul.f32 %v10641_v26, %v24760_v5 }
 0xf46   :  { %v10083_v23 = vmul.f32 %v17728_v30, %v22169_v31  ;;  %v11201_v47 = vadd.f32 %v11185_v17, %v11131_v60  ;;  %v10657_v57 = vmul.f32 %v10641_v26, %v24766_v41  ;;  %v10050_v29 = vmul.f32 %v21841_v56, %v10029_v11  ;;  %v22250_v60 = vld [vmem:[%s24155_s2 + $0x1d3] ss:$0 sm:$0xff] }
 0xf47   :  { %v10505_v16 = vadd.f32 %v10489_v9, %v22177_v28  ;;  %v10229_v39 = vmul.f32 %v24767_v8, %v22226_v51  ;;  %v11078_v49 = vadd.f32 %v11062_v46, %v11008_v24  ;;  %v10440_v62 = vmul.f32 0.5, %v22078_v7  ;;  %v22256_v7 = vld [vmem:[%s24155_s2 + $0x1cf] ss:$0 sm:$0xff] }
 0xf48   :  { %v10863_v6 = vadd.f32 %v10847_v22, %v10778_v15  ;;  %v17626_v2 = vpop.eup %17625  ;;  %v11222_v32 = vadd.f32 %v21691_v18, %v11201_v47  ;;  %v10795_v59 = vld [vmem:[#allocation2 + $0x51] sm:$0xff]  ;;  %v11116_v26 = vmul.f32 %v22250_v60, %v11095_v10  ;;  %v10405_v61 = vadd.f32 %v10389_v1, %v10335_v34  ;;  %v22265_v1 = vld [vmem:[%s24155_s2 + $0x1d0] ss:$0 sm:$0xff] }
 0xf49   :  { %v10066_v13 = vadd.f32 %v10050_v29, %v9981_v44  ;;  %v11149_v52 = vmul.f32 %v17724_v38, %v10795_v59  ;;  %v10552_v55 = vadd.f32 1.0, %v17626_v2  ;;  %v10901_v15 = vmul.f32 %v22256_v7, %v10880_v35  ;;  %v22260_v58 = vld [vmem:[#allocation2 + $0x57] sm:$0xff]  ;;  %v22281_v35 = vld [vmem:[%s24155_s2 + $0x1d4] ss:$0 sm:$0xff] }
 0xf4a   :  { %v10521_v42 = vmul.f32 0.7978846, %v10505_v16  ;;  %11238 = vxpose.xlu1.b32.cont [7/16] (narrow) %v11222_v32, 32  ;;  %v10673_v11 = vmul.f32 %v10657_v57, %v21835_v63  ;;  %v10939_v38 = vmul.f32 %v22265_v1, %v22203_v37  ;;  %v10104_v3 = vmul.f32 %v21741_v43, %v10083_v23  ;;  %v22292_v47 = vld [vmem:[%s24155_s2 + $0x250] sm:$0xff]  ;;  %v22297_v57 = vld [vmem:[%s24155_s2 + $0x1c4] ss:$0 sm:$0xff] }
 0xf4b   :  { %v10175_v45 = vmul.f32 %v24747_v54, %v22196_v21  ;;  %v11132_v34 = vadd.f32 %v11116_v26, %v11078_v49  ;;  %v11165_v44 = vmul.f32 %v11149_v52, %v24756_v4  ;;  %v10568_v17 = vmul.f32 %v10552_v55, %v10440_v62  ;;  %v17733_v4 = vld [vmem:[%s24155_s2 + $0x298] sm:$0xff] }
 0xf4c   :  { %v10917_v10 = vadd.f32 %v10901_v15, %v10863_v6  ;;  %v10811_v22 = vmul.f32 %v10795_v59, %v24766_v41  ;;  %v10972_v9 = vmul.f32 %v10795_v59, %v24765_v25  ;;  %v22276_v24 = vadd.f32 %v21954_v14, %v10405_v61  ;;  %v17735_v16 = vld [vmem:[#allocation2 + $0x78] sm:$0xff]  ;;  %v22309_v61 = vld [vmem:[%s24155_s2 + $0x1cc] ss:$0 sm:$0xff] }
 0xf4d   :  { %v10120_v46 = vadd.f32 %v10104_v3, %v10066_v13  ;;  %v11186_v54 = vmul.f32 %v22281_v35, %v11165_v44  ;;  %v10589_v30 = vmul.f32 %v22140_v12, %v10568_v17  ;;  %v11026_v23 = vmul.f32 %v17733_v4, %v22260_v58  ;;  %v24769_v3 = vld [vmem:[#allocation99_spill] sm:$0xff]  ;;  %v22337_v44 = vld [vmem:[%s24155_s2 + $0x1cd] ss:$0 sm:$0xff] }
 0xf4e   :  { %17627 = vtanh.f32 %v10521_v42  ;;  %v10142_v29 = vmul.f32 %v17735_v16, %v22297_v57  ;;  %v10196_v49 = vmul.f32 %v21872_v53, %v10175_v45  ;;  %v10245_v62 = vmul.f32 %v10229_v39, %v22169_v31  ;;  %v10727_v45 = vld [vmem:[#allocation2 + $0x58] sm:$0xff]  ;;  %v22350_v16 = vld [vmem:[%s24155_s2 + $0x1d2] ss:$0 sm:$0xff] }
 0xf4f   :  { %v10742_v6 = vmul.f32 %v22203_v37, %v24766_v41  ;;  %v11202_v2 = vadd.f32 %v11186_v54, %v11132_v34  ;;  %v10610_v32 = vadd.f32 %v22151_v48, %v10589_v30  ;;  %v10955_v59 = vadd.f32 %v10939_v38, %v10917_v10  ;;  %v22320_v41 = vld [vmem:[%s24155_s2 + $0x1d1] ss:$0 sm:$0xff] }
 0xf50   :  { %v10827_v26 = vmul.f32 %v10811_v22, %v21861_v19  ;;  %v10694_v13 = vmul.f32 %v22309_v61, %v10673_v11  ;;  %v10458_v52 = vmul.f32 0.044715, %v22276_v24  ;;  %v9861_v39 = vmul.f32 %v24767_v8, %v22292_v47  ;;  %v24768_v11 = vld [vmem:[#allocation100_spill] sm:$0xff]  ;;  %v22332_v34 = vld [vmem:[%s24155_s2 + $0x350] sm:$0xff] }
 0xf51   :  { %v11223_v37 = vadd.f32 %v21691_v18, %v11202_v2  ;;  %10626 = vst.msk [vmem:[#allocation2 + $0x60] sm:$0xff] %vm144_vm0, %v10610_v32  ;;  %v10993_v55 = vmul.f32 %v22320_v41, %v10972_v9  ;;  %v11042_v15 = vmul.f32 %v11026_v23, %v24760_v5  ;;  %v10158_v42 = vadd.f32 %v10142_v29, %v10120_v46  ;;  %v24770_v9 = vld [vmem:[#allocation74_spill] sm:$0xff] }
 0xf52   :  { %v10299_v38 = vmul.f32 %v24768_v11, %v22226_v51  ;;  %v10353_v8 = vmul.f32 %v24769_v3, %v22226_v51  ;;  %v10474_v18 = vmul.f32 %v10458_v52, %v22276_v24  ;;  %v10763_v5 = vmul.f32 %v22337_v44, %v10742_v6 }
 0xf53   :  { %11239 = vxpose.xlu1.b32.cont [8/16] (narrow) %v11223_v37, 32  ;;  %v11009_v17 = vadd.f32 %v10993_v55, %v10955_v59  ;;  %v10212_v10 = vadd.f32 %v10196_v49, %v10158_v42  ;;  %v9946_v22 = vmul.f32 %v24768_v11, %v22292_v47  ;;  %v10658_v46 = vmul.f32 %v22260_v58, %v24770_v9  ;;  %v24771_v55 = vld [vmem:[#allocation93_spill] sm:$0xff]  ;;  %v17740_v11 = vld [vmem:[%s24155_s2 + $0x1c0] ss:$0 sm:$0xff] }
 0xf54   :  { %v10490_v54 = vmul.f32 %v10474_v18, %v22276_v24  ;;  %v10266_v30 = vmul.f32 %v21775_v40, %v10245_v62  ;;  %v9877_v23 = vmul.f32 %v9861_v39, %v22332_v34  ;;  %v11063_v29 = vmul.f32 %v22350_v16, %v11042_v15 }
 0xf55   :  { %v11096_v49 = vmul.f32 %v17733_v4, %v10727_v45  ;;  %v10779_v6 = vadd.f32 %v10763_v5, %v10694_v13  ;;  %v10848_v2 = vmul.f32 %v22233_v33, %v10827_v26  ;;  %v10015_v52 = vmul.f32 %v24769_v3, %v22292_v47 }
 0xf56   :  { %v10506_v32 = vadd.f32 %v10490_v54, %v22276_v24  ;;  %v10282_v59 = vadd.f32 %v10266_v30, %v10212_v10  ;;  %v10320_v40 = vmul.f32 %v24764_v50, %v10299_v38  ;;  %v11079_v62 = vadd.f32 %v11063_v29, %v11009_v17  ;;  %v24772_v29 = vld [vmem:[#allocation101_spill] sm:$0xff] }
 0xf57   :  { %v10441_v39 = vmul.f32 0.5, %v22177_v28  ;;  %v10881_v37 = vmul.f32 %v22260_v58, %v21835_v63  ;;  %v10674_v15 = vmul.f32 %v10658_v46, %v24771_v55  ;;  %v10369_v26 = vmul.f32 %v10353_v8, %v22196_v21  ;;  %v22370_v28 = vld [vmem:[%s24155_s2 + $0x3d0] sm:$0xff] }
 0xf58   :  { %v10796_v42 = vld [vmem:[#allocation2 + $0x59] sm:$0xff]  ;;  %v10522_v13 = vmul.f32 0.7978846, %v10506_v32  ;;  %v9898_v18 = vmul.f32 %v17740_v11, %v9877_v23  ;;  %v11117_v3 = vmul.f32 %v22250_v60, %v11096_v49  ;;  %v10864_v5 = vadd.f32 %v10848_v2, %v10779_v6 }
 0xf59   :  { %v11150_v38 = vmul.f32 %v17733_v4, %v10796_v42  ;;  %v9967_v58 = vmul.f32 %v22212_v20, %v9946_v22  ;;  %v10812_v10 = vmul.f32 %v10796_v42, %v24770_v9  ;;  %v10336_v8 = vadd.f32 %v10320_v40, %v10282_v59  ;;  %v22380_v2 = vld [vmem:[#allocation2 + $0x5f] sm:$0xff] }
 0xf5a   :  { %17629 = vtanh.f32 %v10522_v13  ;;  %v10031_v46 = vmul.f32 %v10015_v52, %v22370_v28  ;;  %v11133_v54 = vadd.f32 %v11117_v3, %v11079_v62  ;;  %v10902_v4 = vmul.f32 %v22256_v7, %v10881_v37 }
 0xf5b   :  { %v17628_v17 = vpop.eup %17627  ;;  %v11166_v30 = vmul.f32 %v11150_v38, %v24765_v25  ;;  %v10085_v49 = vmul.f32 %v24772_v29, %v22332_v34  ;;  %v10743_v6 = vmul.f32 %v10727_v45, %v24770_v9  ;;  %v10390_v20 = vmul.f32 %v21879_v36, %v10369_v26  ;;  %v24773_v25 = vld [vmem:[#allocation105_spill] sm:$0xff]  ;;  %v17742_v38 = vld [vmem:[#allocation2 + $0x88] sm:$0xff] }
 0xf5c   :  { %v10553_v23 = vadd.f32 1.0, %v17628_v17  ;;  %v9983_v22 = vadd.f32 %v9967_v58, %v9898_v18  ;;  %v10918_v52 = vadd.f32 %v10902_v4, %v10864_v5  ;;  %v10940_v40 = vmul.f32 %v22265_v1, %v10727_v45  ;;  %v22391_v9 = vld [vmem:[%s24155_s2 + $0x2d0] sm:$0xff]  ;;  %v17741_v45 = vld [vmem:[%s24155_s2 + $0x2a0] sm:$0xff] }
 0xf5d   :  { %v11187_v32 = vmul.f32 %v22281_v35, %v11166_v30  ;;  %v10828_v62 = vmul.f32 %v10812_v10, %v24773_v25  ;;  %v10695_v37 = vmul.f32 %v22309_v61, %v10674_v15  ;;  %v10406_v13 = vadd.f32 %v10390_v20, %v10336_v8  ;;  %v10215_v26 = vld [vmem:[#allocation2 + $0x8f] sm:$0xff] }
 0xf5e   :  { %v10569_v59 = vmul.f32 %v10553_v23, %v10441_v39  ;;  %v10052_v11 = vmul.f32 %v21841_v56, %v10031_v46  ;;  %v10973_v39 = vmul.f32 %v10796_v42, %v21861_v19  ;;  %v11027_v15 = vmul.f32 %v17741_v45, %v22380_v2  ;;  %v22408_v42 = vld [vmem:[%s24155_s2 + $0x1d5] ss:$0 sm:$0xff] }
 0xf5f   :  { %v11203_v18 = vadd.f32 %v11187_v32, %v11133_v54  ;;  %v10144_v56 = vmul.f32 %v17742_v38, %v22297_v57  ;;  %v10764_v5 = vmul.f32 %v22337_v44, %v10743_v6  ;;  %v22402_v58 = vadd.f32 %v21954_v14, %v10406_v13  ;;  %v17744_v6 = vld [vmem:[#allocation2 + $0x89] sm:$0xff] }
 0xf60   :  { %v10590_v3 = vmul.f32 %v22140_v12, %v10569_v59  ;;  %v10068_v17 = vadd.f32 %v10052_v11, %v9983_v22  ;;  %v10106_v10 = vmul.f32 %v21741_v43, %v10085_v49  ;;  %v10956_v54 = vadd.f32 %v10940_v40, %v10918_v52  ;;  %v10728_v22 = vld [vmem:[#allocation2 + $0x60] sm:$0xff]  ;;  %v10339_v52 = vld [vmem:[#allocation2 + $0x91] sm:$0xff] }
 0xf61   :  { %v11224_v8 = vadd.f32 %v22408_v42, %v11203_v18  ;;  %v10231_v57 = vmul.f32 %v10215_v26, %v22391_v9  ;;  %v10780_v30 = vadd.f32 %v10764_v5, %v10695_v37  ;;  %v10849_v23 = vmul.f32 %v22233_v33, %v10828_v62  ;;  %v10285_v13 = vld [vmem:[#allocation2 + $0x90] sm:$0xff] }
 0xf62   :  { %v10611_v46 = vadd.f32 %v22151_v48, %v10590_v3  ;;  %v10459_v4 = vmul.f32 0.044715, %v22402_v58  ;;  %v10994_v43 = vmul.f32 %v22320_v41, %v10973_v39  ;;  %v11043_v29 = vmul.f32 %v11027_v15, %v21835_v63 }
 0xf63   :  { %11240 = vxpose.xlu1.b32.cont [9/16] (narrow) %v11224_v8, 32  ;;  %v10122_v49 = vadd.f32 %v10106_v10, %v10068_v17  ;;  %v10177_v20 = vmul.f32 %v17744_v6, %v22370_v28  ;;  %v10882_v32 = vmul.f32 %v22380_v2, %v24771_v55  ;;  %v10247_v37 = vmul.f32 %v10231_v57, %v22332_v34 }
 0xf64   :  { %10627 = vst.msk [vmem:[#allocation2 + $0x68] sm:$0xff] %vm144_vm0, %v10611_v46  ;;  %v10475_v59 = vmul.f32 %v10459_v4, %v22402_v58  ;;  %v11010_v40 = vadd.f32 %v10994_v43, %v10956_v54  ;;  %v10865_v11 = vadd.f32 %v10849_v23, %v10780_v30  ;;  %v11064_v18 = vmul.f32 %v22350_v16, %v11043_v29  ;;  %v17745_v54 = vld [vmem:[%s24155_s2 + $0x1c6] ss:$0 sm:$0xff]  ;;  %v24774_v30 = vld [vmem:[#allocation34_spill] sm:$0xff] }
 0xf65   :  { %v10160_v62 = vadd.f32 %v10144_v56, %v10122_v49  ;;  %v11097_v3 = vmul.f32 %v17741_v45, %v10728_v22  ;;  %v10198_v39 = vmul.f32 %v21872_v53, %v10177_v20  ;;  %v10355_v15 = vmul.f32 %v10339_v52, %v22391_v9 }
 0xf66   :  { %v10491_v26 = vmul.f32 %v10475_v59, %v22402_v58  ;;  %v10442_v38 = vmul.f32 0.5, %v22276_v24  ;;  %v10903_v17 = vmul.f32 %v22256_v7, %v10882_v32  ;;  %v10301_v10 = vmul.f32 %v10285_v13, %v22391_v9 }
 0xf67   :  { %v17630_v63 = vpop.eup %17629  ;;  %v11080_v8 = vadd.f32 %v11064_v18, %v11010_v40  ;;  %v10214_v46 = vadd.f32 %v10198_v39, %v10160_v62  ;;  %v10268_v57 = vmul.f32 %v17745_v54, %v10247_v37  ;;  %v10659_v53 = vmul.f32 %v22380_v2, %v24774_v30  ;;  %v17746_v2 = vld [vmem:[%s24155_s2 + $0x2a8] sm:$0xff] }
 0xf68   :  { %v10554_v5 = vadd.f32 1.0, %v17630_v63  ;;  %v10507_v56 = vadd.f32 %v10491_v26, %v22402_v58  ;;  %v10919_v43 = vadd.f32 %v10903_v17, %v10865_v11  ;;  %v11118_v29 = vmul.f32 %v22250_v60, %v11097_v3  ;;  %v24775_v11 = vld [vmem:[#allocation79_spill] sm:$0xff] }
 0xf69   :  { %v22438_v20 = vmul.f32 %v10355_v15, %v22370_v28  ;;  %v10941_v59 = vmul.f32 %v22265_v1, %v10728_v22  ;;  %v10284_v13 = vadd.f32 %v10268_v57, %v10214_v46  ;;  %v10675_v26 = vmul.f32 %v10659_v53, %v24775_v11 }
 0xf6a   :  { %v10570_v4 = vmul.f32 %v10554_v5, %v10442_v38  ;;  %v10523_v6 = vmul.f32 0.7978846, %v10507_v56  ;;  %v11134_v62 = vadd.f32 %v11118_v29, %v11080_v8  ;;  %v24776_v8 = vld [vmem:[#allocation98_spill] sm:$0xff] }
 0xf6b   :  { %v10797_v23 = vld [vmem:[#allocation2 + $0x61] sm:$0xff]  ;;  %v10957_v18 = vadd.f32 %v10941_v59, %v10919_v43  ;;  %v10392_v15 = vmul.f32 %v21879_v36, %v22438_v20  ;;  %v10696_v57 = vmul.f32 %v22309_v61, %v10675_v26  ;;  %v24777_v36 = vld [vmem:[#allocation86_spill] sm:$0xff] }
 0xf6c   :  { %v10644_v24 = vld [vmem:[#allocation2 + $0x67] sm:$0xff]  ;;  %v11151_v49 = vmul.f32 %v17741_v45, %v10797_v23  ;;  %v10591_v32 = vmul.f32 %v22140_v12, %v10570_v4  ;;  %v10974_v52 = vmul.f32 %v10797_v23, %v24773_v25  ;;  %v10322_v45 = vmul.f32 %v24764_v50, %v10301_v10 }
 0xf6d   :  { %v11028_v40 = vmul.f32 %v17746_v2, %v10644_v24  ;;  %v10813_v3 = vmul.f32 %v10797_v23, %v24774_v30  ;;  %17631 = vtanh.f32 %v10523_v6  ;;  %v10744_v50 = vmul.f32 %v10728_v22, %v24774_v30  ;;  %v10729_v17 = vld [vmem:[#allocation2 + $0x68] sm:$0xff] }
 0xf6e   :  { %v11167_v37 = vmul.f32 %v11151_v49, %v21861_v19  ;;  %v10612_v63 = vadd.f32 %v22151_v48, %v10591_v32  ;;  %v10995_v19 = vmul.f32 %v22320_v41, %v10974_v52  ;;  %v10338_v56 = vadd.f32 %v10322_v45, %v10284_v13  ;;  %v24778_v32 = vld [vmem:[#allocation66_spill] sm:$0xff] }
 0xf6f   :  { %v11044_v38 = vmul.f32 %v11028_v40, %v24771_v55  ;;  %v10829_v46 = vmul.f32 %v10813_v3, %v24776_v8  ;;  %v10660_v23 = vmul.f32 %v10644_v24, %v24777_v36  ;;  %v11098_v43 = vmul.f32 %v17746_v2, %v10729_v17 }
 0xf70   :  { %v11188_v39 = vmul.f32 %v22281_v35, %v11167_v37  ;;  %10628 = vst.msk [vmem:[#allocation2 + $0x70] sm:$0xff] %vm144_vm0, %v10612_v63  ;;  %v11011_v10 = vadd.f32 %v10995_v19, %v10957_v18  ;;  %v10408_v53 = vadd.f32 %v10392_v15, %v10338_v56  ;;  %v10765_v55 = vmul.f32 %v22337_v44, %v10744_v50 }
 0xf71   :  { %v11065_v4 = vmul.f32 %v22350_v16, %v11044_v38  ;;  %v10850_v6 = vmul.f32 %v22233_v33, %v10829_v46  ;;  %v10676_v59 = vmul.f32 %v10660_v23, %v24778_v32  ;;  %v11119_v52 = vmul.f32 %v22250_v60, %v11098_v43 }
 0xf72   :  { %v11204_v5 = vadd.f32 %v11188_v39, %v11134_v62  ;;  %v22465_v22 = vadd.f32 %v21954_v14, %v10408_v53  ;;  %v10781_v49 = vadd.f32 %v10765_v55, %v10696_v57  ;;  %v10883_v13 = vmul.f32 %v10644_v24, %v24775_v11 }
 0xf73   :  { %v11081_v30 = vadd.f32 %v11065_v4, %v11011_v10  ;;  %v10745_v45 = vmul.f32 %v10729_v17, %v24777_v36  ;;  %v10697_v39 = vmul.f32 %v22309_v61, %v10676_v59  ;;  %v10443_v19 = vmul.f32 0.5, %v22402_v58  ;;  %v17747_v4 = vld [vmem:[%s24155_s2 + $0x2b0] sm:$0xff] }
 0xf74   :  { %v11225_v54 = vadd.f32 %v22408_v42, %v11204_v5  ;;  %v10461_v62 = vmul.f32 0.044715, %v22465_v22  ;;  %v10866_v63 = vadd.f32 %v10850_v6, %v10781_v49  ;;  %v10904_v24 = vmul.f32 %v22256_v7, %v10883_v13 }
 0xf75   :  { %v11135_v14 = vadd.f32 %v11119_v52, %v11081_v30  ;;  %v10766_v50 = vmul.f32 %v22337_v44, %v10745_v45  ;;  %v10942_v57 = vmul.f32 %v22265_v1, %v10729_v17 }
 0xf76   :  { %11241 = vxpose.xlu1.b32.cont [10/16] (narrow) %v11225_v54, 32  ;;  %v10477_v15 = vmul.f32 %v10461_v62, %v22465_v22  ;;  %v10920_v46 = vadd.f32 %v10904_v24, %v10866_v63  ;;  %v10445_v24 = vmul.f32 0.5, %v22465_v22 }
 0xf77   :  { %v10798_v29 = vld [vmem:[#allocation2 + $0x69] sm:$0xff]  ;;  %v10782_v53 = vadd.f32 %v10766_v50, %v10697_v39 }
 0xf78   :  { %v11152_v40 = vmul.f32 %v17746_v2, %v10798_v29  ;;  %v10814_v37 = vmul.f32 %v10798_v29, %v24777_v36  ;;  %v10645_v56 = vld [vmem:[#allocation2 + $0x6f] sm:$0xff]  ;;  %v10975_v23 = vmul.f32 %v10798_v29, %v24776_v8  ;;  %v10958_v6 = vadd.f32 %v10942_v57, %v10920_v46 }
 0xf79   :  { %v11029_v43 = vmul.f32 %v17747_v4, %v10645_v56  ;;  %v10884_v17 = vmul.f32 %v10645_v56, %v24778_v32  ;;  %v10661_v59 = vmul.f32 %v10645_v56, %v22114_v27  ;;  %v10730_v29 = vld [vmem:[#allocation2 + $0x70] sm:$0xff] }
 0xf7a   :  { %v11168_v26 = vmul.f32 %v11152_v40, %v24773_v25  ;;  %v17632_v18 = vpop.eup %17631  ;;  %v10830_v2 = vmul.f32 %v10814_v37, %v22088_v0  ;;  %v10493_v25 = vmul.f32 %v10477_v15, %v22465_v22  ;;  %v10996_v52 = vmul.f32 %v22320_v41, %v10975_v23 }
 0xf7b   :  { %v10555_v38 = vadd.f32 1.0, %v17632_v18  ;;  %v11045_v40 = vmul.f32 %v11029_v43, %v24775_v11  ;;  %v10905_v13 = vmul.f32 %v22256_v7, %v10884_v17  ;;  %v10677_v45 = vmul.f32 %v10661_v59, %v22169_v31 }
 0xf7c   :  { %v11189_v3 = vmul.f32 %v22281_v35, %v11168_v26  ;;  %v10509_v36 = vadd.f32 %v10493_v25, %v22465_v22  ;;  %v10851_v55 = vmul.f32 %v22233_v33, %v10830_v2  ;;  %v11012_v37 = vadd.f32 %v10996_v52, %v10958_v6  ;;  %v17748_v25 = vld [vmem:[%s24155_s2 + $0x248] sm:$0xff] }
 0xf7d   :  { %v10571_v10 = vmul.f32 %v10555_v38, %v10443_v19  ;;  %v11099_v26 = vmul.f32 %v17747_v4, %v10730_v29  ;;  %v11066_v63 = vmul.f32 %v22350_v16, %v11045_v40  ;;  %v10943_v39 = vmul.f32 %v22265_v1, %v10730_v29 }
 0xf7e   :  { %v11205_v5 = vadd.f32 %v11189_v3, %v11135_v14  ;;  %v10525_v30 = vmul.f32 0.7978846, %v10509_v36  ;;  %v10867_v62 = vadd.f32 %v10851_v55, %v10782_v53  ;;  %v10746_v14 = vmul.f32 %v10730_v29, %v22114_v27  ;;  %v17749_v36 = vld [vmem:[%s24155_s2 + $0x2b8] sm:$0xff]  ;;  %v22520_v55 = vld [vmem:[%s24155_s2 + $0x348] sm:$0xff] }
 0xf7f   :  { %v10592_v58 = vmul.f32 %v22140_v12, %v10571_v10  ;;  %v11082_v3 = vadd.f32 %v11066_v63, %v11012_v37  ;;  %v11120_v11 = vmul.f32 %v22250_v60, %v11099_v26  ;;  %v10698_v50 = vmul.f32 %v22309_v61, %v10677_v45 }
 0xf80   :  { %v11226_v54 = vadd.f32 %v22408_v42, %v11205_v5  ;;  %17633 = vtanh.f32 %v10525_v30  ;;  %v10921_v18 = vadd.f32 %v10905_v13, %v10867_v62  ;;  %v10767_v15 = vmul.f32 %v22337_v44, %v10746_v14 }
 0xf81   :  { %v10613_v49 = vadd.f32 %v22151_v48, %v10592_v58  ;;  %v11136_v23 = vadd.f32 %v11120_v11, %v11082_v3 }
 0xf82   :  { %11242 = vxpose.xlu1.b32.cont [11/16] (narrow) %v11226_v54, 32  ;;  %v10959_v54 = vadd.f32 %v10943_v39, %v10921_v18  ;;  %v10783_v59 = vadd.f32 %v10767_v15, %v10698_v50 }
 0xf83   :  { %10629 = vst.msk [vmem:[#allocation2 + $0x78] sm:$0xff] %vm144_vm0, %v10613_v49 }
 0xf8a   :  { %v10799_v2 = vld [vmem:[#allocation2 + $0x71] sm:$0xff]  ;;  %v10800_v46 = vld [vmem:[#allocation2 + $0x79] sm:$0xff] }
 0xf8b   :  { %v10646_v19 = vld [vmem:[#allocation2 + $0x77] sm:$0xff]  ;;  %v11153_v5 = vmul.f32 %v17747_v4, %v10799_v2  ;;  %v10815_v56 = vmul.f32 %v10799_v2, %v22114_v27  ;;  %v10976_v53 = vmul.f32 %v10799_v2, %v22088_v0  ;;  %v11154_v58 = vmul.f32 %v17749_v36, %v10800_v46  ;;  %v10647_v17 = vld [vmem:[#allocation2 + $0x7f] sm:$0xff] }
 0xf8c   :  { %v10731_v38 = vld [vmem:[#allocation2 + $0x78] sm:$0xff]  ;;  %v10662_v10 = vmul.f32 %v17748_v25, %v10646_v19  ;;  %v11030_v22 = vmul.f32 %v17749_v36, %v10646_v19  ;;  %v10816_v40 = vmul.f32 %v17748_v25, %v10800_v46  ;;  %v10885_v2 = vmul.f32 %v10646_v19, %v22169_v31 }
 0xf8d   :  { %v10747_v57 = vmul.f32 %v17748_v25, %v10731_v38  ;;  %v11169_v4 = vmul.f32 %v11153_v5, %v24776_v8  ;;  %v10831_v27 = vmul.f32 %v10815_v56, %v22196_v21  ;;  %v11100_v43 = vmul.f32 %v17749_v36, %v10731_v38  ;;  %v17634_v29 = vpop.eup %17633 }
 0xf8e   :  { %v10678_v30 = vmul.f32 %v22520_v55, %v10662_v10  ;;  %v10997_v49 = vmul.f32 %v22320_v41, %v10976_v53  ;;  %v11046_v6 = vmul.f32 %v11030_v22, %v24778_v32  ;;  %v11170_v8 = vmul.f32 %v11154_v58, %v22088_v0  ;;  %v22534_v32 = vld [vmem:[%s24155_s2 + $0x3c8] sm:$0xff] }
 0xf8f   :  { %v11190_v52 = vmul.f32 %v22281_v35, %v11169_v4  ;;  %v10852_v62 = vmul.f32 %v22233_v33, %v10831_v27  ;;  %v10768_v37 = vmul.f32 %v22337_v44, %v10747_v57  ;;  %v10557_v14 = vadd.f32 1.0, %v17634_v29 }
 0xf90   :  { %v11013_v13 = vadd.f32 %v10997_v49, %v10959_v54  ;;  %v11067_v45 = vmul.f32 %v22350_v16, %v11046_v6  ;;  %v11121_v63 = vmul.f32 %v22250_v60, %v11100_v43  ;;  %v10832_v18 = vmul.f32 %v22534_v32, %v10816_v40 }
 0xf91   :  { %v11206_v26 = vadd.f32 %v11190_v52, %v11136_v23  ;;  %v10663_v0 = vmul.f32 %v10647_v17, %v22292_v47  ;;  %v10573_v39 = vmul.f32 %v10557_v14, %v10445_v24  ;;  %v10868_v15 = vadd.f32 %v10852_v62, %v10783_v59  ;;  %v10732_v23 = vld [vmem:[#allocation2 + $0x80] sm:$0xff] }
 0xf92   :  { %v11083_v3 = vadd.f32 %v11067_v45, %v11013_v13  ;;  %v11191_v50 = vmul.f32 %v22281_v35, %v11170_v8  ;;  %v11031_v5 = vmul.f32 %v10647_v17, %v22226_v51  ;;  %v10699_v56 = vmul.f32 %v22309_v61, %v10678_v30 }
 0xf93   :  { %v11227_v11 = vadd.f32 %v22408_v42, %v11206_v26  ;;  %v10594_v10 = vmul.f32 %v22140_v12, %v10573_v39  ;;  %v10906_v54 = vmul.f32 %v22256_v7, %v10885_v2  ;;  %v10977_v57 = vmul.f32 %v10800_v46, %v22196_v21 }
 0xf94   :  { %v11137_v25 = vadd.f32 %v11121_v63, %v11083_v3  ;;  %v10784_v24 = vadd.f32 %v10768_v37, %v10699_v56  ;;  %v10853_v53 = vmul.f32 %v22233_v33, %v10832_v18  ;;  %v10944_v58 = vmul.f32 %v22265_v1, %v10731_v38 }
 0xf95   :  { %11243 = vxpose.xlu1.b32.cont [12/16] (narrow) %v11227_v11, 32  ;;  %v10615_v36 = vadd.f32 %v22151_v48, %v10594_v10  ;;  %v10922_v22 = vadd.f32 %v10906_v54, %v10868_v15  ;;  %v11047_v4 = vmul.f32 %v11031_v5, %v22169_v31  ;;  %v10886_v27 = vmul.f32 %v22520_v55, %v10647_v17 }
 0xf96   :  { %v11207_v19 = vadd.f32 %v11191_v50, %v11137_v25  ;;  %v10679_v46 = vmul.f32 %v10663_v0, %v22332_v34  ;;  %v10998_v30 = vmul.f32 %v22320_v41, %v10977_v57  ;;  %v10869_v49 = vadd.f32 %v10853_v53, %v10784_v24  ;;  %v11087_v57 = vld [vmem:[#allocation2 + $0x90] sm:$0xff] }
 0xf97   :  { %10631 = vst.msk [vmem:[#allocation2 + $0x88] sm:$0xff] %vm144_vm0, %v10615_v36  ;;  %v10960_v43 = vadd.f32 %v10944_v58, %v10922_v22  ;;  %v10748_v48 = vmul.f32 %v10732_v23, %v22292_v47  ;;  %v11068_v38 = vmul.f32 %v22350_v16, %v11047_v4  ;;  %v11101_v31 = vmul.f32 %v10732_v23, %v22226_v51 }
 0xf98   :  { %v11228_v12 = vadd.f32 %v22408_v42, %v11207_v19  ;;  %v10907_v17 = vmul.f32 %v22256_v7, %v10886_v27  ;;  %v10700_v59 = vmul.f32 %v22309_v61, %v10679_v46  ;;  %v10945_v13 = vmul.f32 %v22265_v1, %v10732_v23 }
 0xf99   :  { %v11014_v6 = vadd.f32 %v10998_v30, %v10960_v43  ;;  %v10769_v8 = vmul.f32 %v22337_v44, %v10748_v48  ;;  %v11122_v62 = vmul.f32 %v22250_v60, %v11101_v31  ;;  %v17752_v44 = vld [vmem:[%s24155_s2 + $0x2c8] sm:$0xff]  ;;  %v11103_v4 = vmul.f32 %v11087_v57, %v22391_v9  ;;  %v24787_v57 = vld [vmem:[#allocation55_spill] sm:$0xff] }
 0xf9a   :  { %11244 = vxpose.xlu1.b32.cont [13/16] (narrow) %v11228_v12, 32  ;;  %v10923_v52 = vadd.f32 %v10907_v17, %v10869_v49 }
 0xf9b   :  { %v11084_v29 = vadd.f32 %v11068_v38, %v11014_v6  ;;  %v10785_v18 = vadd.f32 %v10769_v8, %v10700_v59  ;;  %v17778_v59 = vmov 6  }
 0xf9c   :  { %v10961_v3 = vadd.f32 %v10945_v13, %v10923_v52  ;;  %17530 = vset.pattern.permute.xlu0 %v17778_v59  ;;  %v24779_v13 = vld [vmem:[#allocation56_spill] sm:$0xff]  ;;  %v24814_v59 = vld [vmem:[#allocation57_spill] sm:$0xff] }
 0xf9d   :  { %v11138_v0 = vadd.f32 %v11122_v62, %v11084_v29 }
 0xf9e   :  { %v10801_v40 = vld [vmem:[#allocation2 + $0x81] sm:$0xff]  ;;  %v10963_v63 = vld [vmem:[#allocation2 + $0x89] sm:$0xff] }
 0xf9f   :  { %v10871_v37 = vld [vmem:[#allocation2 + $0x87] sm:$0xff]  ;;  %v11155_v45 = vmul.f32 %v10801_v40, %v22226_v51  ;;  %v10817_v14 = vmul.f32 %v10801_v40, %v22292_v47  ;;  %v10978_v61 = vmul.f32 %v22534_v32, %v10801_v40  ;;  %v11017_v15 = vld [vmem:[#allocation2 + $0x8f] sm:$0xff]  ;;  %v11156_v47 = vmul.f32 %v17752_v44, %v10963_v63 }
 0xfa0   :  { %v10925_v26 = vld [vmem:[#allocation2 + $0x88] sm:$0xff]  ;;  %v11032_v39 = vmul.f32 %v17752_v44, %v10871_v37  ;;  %v10887_v51 = vmul.f32 %v10871_v37, %v22332_v34  ;;  %v11033_v54 = vmul.f32 %v11017_v15, %v22391_v9  ;;  %v10979_v36 = vmul.f32 %v10963_v63, %v22370_v28 }
 0xfa1   :  { %v11171_v2 = vmul.f32 %v11155_v45, %v22196_v21  ;;  %v10833_v11 = vmul.f32 %v10817_v14, %v22370_v28  ;;  %v10999_v50 = vmul.f32 %v22320_v41, %v10978_v61  ;;  %v11102_v56 = vmul.f32 %v17752_v44, %v10925_v26  ;;  %v24781_v61 = vld [vmem:[#allocation48_spill] sm:$0xff] }
 0xfa2   :  { %v11048_v5 = vmul.f32 %v22520_v55, %v11032_v39  ;;  %v11172_v53 = vmul.f32 %v22534_v32, %v11156_v47  ;;  %v10908_v58 = vmul.f32 %v22256_v7, %v10887_v51  ;;  %v10946_v27 = vmul.f32 %v22265_v1, %v10925_v26  ;;  %v24780_v26 = vld [vmem:[#allocation51_spill] sm:$0xff]  ;;  %v24783_v47 = vld [vmem:[#allocation40_spill] sm:$0xff] }
 0xfa3   :  { %v11192_v25 = vmul.f32 %v22281_v35, %v11171_v2  ;;  %v10854_v10 = vmul.f32 %v22233_v33, %v10833_v11  ;;  %v11015_v24 = vadd.f32 %v10999_v50, %v10961_v3  ;;  %v11123_v23 = vmul.f32 %v22250_v60, %v11102_v56  ;;  %v24782_v2 = vld [vmem:[#allocation42_spill] sm:$0xff] }
 0xfa4   :  { %v11069_v21 = vmul.f32 %v22350_v16, %v11048_v5  ;;  %v11049_v46 = vmul.f32 %v11033_v54, %v22332_v34  ;;  %v11193_v32 = vmul.f32 %v22281_v35, %v11172_v53  ;;  %v11000_v30 = vmul.f32 %v22320_v41, %v10979_v36  ;;  %v22597_v41 = vld [vmem:[%s24156_s1] sm:$0xff]  ;;  %v24784_v50 = vld [vmem:[#allocation62_spill] sm:$0xff] }
 0xfa5   :  { %v11208_v19 = vadd.f32 %v11192_v25, %v11138_v0  ;;  %v10870_v22 = vadd.f32 %v10854_v10, %v10785_v18  ;;  %v11124_v9 = vmul.f32 %v22250_v60, %v11103_v4  ;;  %v11194_v1 = vmul.f32 %v22281_v35, %v22438_v20  ;;  %12035 = vperm.xlu0 %17530, %v22597_v41   ;;  %v22603_v60 = vld [vmem:[%s24156_s1 + $0x8] sm:$0xff]  ;;  %v22609_v35 = vld [vmem:[%s24156_s1 + $0x10] sm:$0xff]  ;;  %v24785_v25 = vld [vmem:[#allocation58_spill] sm:$0xff] }
 0xfa6   :  { %v11085_v55 = vadd.f32 %v11069_v21, %v11015_v24  ;;  %v11070_v48 = vmul.f32 %v22350_v16, %v11049_v46  ;;  %v22615_v16 = vld [vmem:[%s24156_s1 + $0x18] sm:$0xff]  ;;  %v24786_v10 = vld [vmem:[#allocation33_spill] sm:$0xff]  ;;  %v24788_v24 = vld [vmem:[#allocation32_spill] sm:$0xff] }
 0xfa7   :  { %v11229_v33 = vadd.f32 %v22408_v42, %v11208_v19  ;;  %v10924_v12 = vadd.f32 %v10908_v58, %v10870_v22  ;;  %v24789_v19 = vld [vmem:[#allocation50_spill] sm:$0xff]  ;;  %v24791_v22 = vld [vmem:[#allocation47_spill] sm:$0xff]  ;;  %v24792_v58 = vld [vmem:[#allocation24_spill] sm:$0xff] }
 0xfa8   :  { %v11139_v43 = vadd.f32 %v11123_v23, %v11085_v55  ;;  %v24790_v36 = vld [vmem:[#allocation30_spill] sm:$0xff]  ;;  %v24793_v55 = vld [vmem:[#allocation41_spill] sm:$0xff]  ;;  %v24794_v23 = vld [vmem:[#allocation23_spill] sm:$0xff] }
 0xfa9   :  { %11245 = vxpose.xlu1.b32.cont [14/16] (narrow) %v11229_v33, 32  ;;  %v10962_v28 = vadd.f32 %v10946_v27, %v10924_v12  ;;  %12039 = vperm.xlu0 %17530, %v22603_v60   ;;  %v24795_v4 = vld [vmem:[#allocation39_spill] sm:$0xff]  ;;  %v24796_v33 = vld [vmem:[#allocation18_spill] sm:$0xff]  ;;  %v24799_v46 = vld [vmem:[#allocation29_spill] sm:$0xff] }
 0xfaa   :  { %v11209_v7 = vadd.f32 %v11193_v32, %v11139_v43  ;;  %v24797_v27 = vld [vmem:[#allocation38_spill] sm:$0xff]  ;;  %v24798_v12 = vld [vmem:[#allocation19_spill] sm:$0xff]  ;;  %v24801_v32 = vld [vmem:[#allocation28_spill] sm:$0xff] }
 0xfab   :  { %v11016_v49 = vadd.f32 %v11000_v30, %v10962_v28  ;;  %v24800_v43 = vld [vmem:[#allocation6_spill] sm:$0xff]  ;;  %v24802_v28 = vld [vmem:[#allocation15_spill] sm:$0xff]  ;;  %v24803_v30 = vld [vmem:[#allocation25_spill] sm:$0xff] }
 0xfac   :  { %v11230_v6 = vadd.f32 %v22408_v42, %v11209_v7  ;;  %v24804_v7 = vld [vmem:[#allocation11_spill] sm:$0xff] }
 0xfad   :  { %v11086_v38 = vadd.f32 %v11070_v48, %v11016_v49  ;;  %12043 = vperm.xlu0 %17530, %v22609_v35   ;;  %v24805_v49 = vld [vmem:[#allocation22_spill] sm:$0xff]  ;;  %v24806_v48 = vld [vmem:[#allocation5_spill] sm:$0xff] }
 0xfae   :  { %11246 = vxpose.xlu1.b32.cont [15/16] (narrow) %v11230_v6, 32  ;;  %v24808_v6 = vld [vmem:[#allocation14_spill] sm:$0xff] }
 0xfaf   :  { %v11140_v34 = vadd.f32 %v11124_v9, %v11086_v38  ;;  %v24807_v9 = vld [vmem:[#allocation16_spill] sm:$0xff] }
 0xfb0   :  { %v24809_v38 = vld [vmem:[#allocation4_spill] sm:$0xff] }
 0xfb1   :  { %v11210_v31 = vadd.f32 %v11194_v1, %v11140_v34  ;;  %12047 = vperm.xlu0 %17530, %v22615_v16   ;;  %v24810_v1 = vld [vmem:[#allocation3_spill] sm:$0xff]  ;;  %v24811_v34 = vld [vmem:[#allocation65_spill] sm:$0xff] }
 0xfb3   :  { %v11231_v17 = vadd.f32 %v22408_v42, %v11210_v31  ;;  %v24812_v31 = vld [vmem:[#allocation64_spill] sm:$0xff] }
 0xfb5   :  { %11247 = vxpose.xlu1.b32.end [16/16] (narrow) %v11231_v17, 32  ;;  %v24813_v17 = vld [vmem:[#allocation61_spill] sm:$0xff] }
 0xff5   :  { %v11248_v42 = vpop.trf.xlu1 }
 0xff6   :  { %v22618_v20 = vand.u32 4294901760, %v11248_v42 }
 0xff8   :  { %v11346_v29 = vsub.f32 %v11248_v42, %v22618_v20  ;;  %16927 = vmatprep.mubr.f32.mxu1 %v22618_v20  ;;  %v24815_v42 = vld [vmem:[#allocation54_spill] sm:$0xff] }
 0xff9   :  { %v11249_v52 = vpop.trf.xlu1 }
 0xffa   :  { %v11347_v8 = vand.u32 4294901760, %v11346_v29  ;;  %v22622_v40 = vand.u32 4294901760, %v11249_v52 }
 0xffc   :  { %v22625_v62 = vsub.f32 %v11249_v52, %v22622_v40  ;;  %16928 = vmatmul.mubr.f32.vlgmr.msra.gmra.mxu1 %v22622_v40  ;;  %v11348_v37 = vsub.f32 %v11346_v29, %v11347_v8  ;;  %v24818_v52 = vld [vmem:[#allocation44_spill] sm:$0xff] }
 0xffd   :  { %16972 = vmatpush3.msra.mxu1 %v24779_v13  ;;  %v11250_v45 = vpop.trf.xlu1 }
 0xffe   :  { %v11357_v14 = vand.u32 4294901760, %v22625_v62  ;;  %16973 = vmatprep.subr.mxu1 %v24780_v26  ;;  %v22631_v63 = vand.u32 4294901760, %v11250_v45  ;;  %v11349_v18 = vand.u32 4294901760, %v11348_v37  ;;  %v24821_v37 = vld [vmem:[#allocation31_spill] sm:$0xff] }
 0xfff   :  { %16974 = vmatpush3.msra.mxu1 %v24780_v26 }
0x1000   :  { %v11358_v0 = vsub.f32 %v22625_v62, %v11357_v14  ;;  %v22638_v3 = vsub.f32 %v11250_v45, %v22631_v63  ;;  %16975 = vmatprep.subr.mxu1 %v24781_v61  ;;  %16889 = vmatprep.mubr.f32.mxu0 %v11349_v18  ;;  %v24823_v45 = vld [vmem:[#allocation21_spill] sm:$0xff]  ;;  %v24826_v18 = vld [vmem:[#allocation7_spill] sm:$0xff] }
0x1001   :  { %16976 = vmatpush3.msra.mxu1 %v24781_v61  ;;  %v11251_v44 = vpop.trf.xlu1  ;;  %16930 = vmatprep.mubr.f32.mxu1 %v22631_v63 }
0x1002   :  { %v11359_v39 = vand.u32 4294901760, %v11358_v0  ;;  %v11367_v15 = vand.u32 4294901760, %v22638_v3  ;;  %16977 = vmatprep.subr.mxu1 %v24782_v2  ;;  %v22645_v11 = vand.u32 4294901760, %v11251_v44  ;;  %v12092_v0 = vld [vmem:[%s24155_s2 + $0x80] sm:$0xff] }
0x1003   :  { %16978 = vmatpush3.msra.mxu1 %v24782_v2 }
0x1004   :  { %v22649_v51 = vsub.f32 %v11251_v44, %v22645_v11  ;;  %16979 = vmatprep.subr.mxu1 %v24783_v47  ;;  %16890 = vmatmul.mubr.f32.vlgmr.msra.gmra.mxu0 %v11359_v39  ;;  %v11368_v5 = vsub.f32 %v22638_v3, %v11367_v15 }
0x1005   :  { %16931 = vmatmul.mubr.f32.gmra.mxu1 %v22645_v11  ;;  %16934 = vmatpush3.msra.mxu0 %v24784_v50 }
0x1006   :  { %v11377_v56 = vand.u32 4294901760, %v22649_v51  ;;  %16980 = vmatpush3.msra.mxu1 %v24783_v47  ;;  %16935 = vmatprep.subr.mxu0 %v24785_v25  ;;  %v11369_v21 = vand.u32 4294901760, %v11368_v5 }
0x1007   :  { %16981 = vmatprep.subr.mxu1 %v24786_v10  ;;  %17003 = vmatprep.mubr.f32.mxu1 %v11347_v8  ;;  %v24819_v8 = vld [vmem:[#allocation37_spill] sm:$0xff] }
0x1008   :  { %v11378_v54 = vsub.f32 %v22649_v51, %v11377_v56  ;;  %16936 = vmatpush3.msra.mxu0 %v24785_v25  ;;  %16982 = vmatpush3.msra.mxu1 %v24786_v10 }
0x1009   :  { %16937 = vmatprep.subr.mxu0 %v24787_v57  ;;  %16983 = vmatprep.subr.mxu1 %v24788_v24 }
0x100a   :  { %v11379_v53 = vand.u32 4294901760, %v11378_v54  ;;  %16938 = vmatpush3.msra.mxu0 %v24787_v57  ;;  %16984 = vmatpush3.msra.mxu1 %v24788_v24 }
0x100b   :  { %16939 = vmatprep.subr.mxu0 %v24789_v19  ;;  %16985 = vmatprep.subr.mxu1 %v24790_v36 }
0x100c   :  { %16940 = vmatpush3.msra.mxu0 %v24789_v19  ;;  %16986 = vmatpush3.msra.mxu1 %v24790_v36 }
0x100d   :  { %16892 = vmatprep.mubr.f32.mxu0 %v11369_v21  ;;  %16941 = vmatprep.subr.mxu0 %v24791_v22 }
0x100e   :  { %16987 = vmatprep.subr.mxu1 %v24792_v58  ;;  %16893 = vmatmul.mubr.f32.gmra.mxu0 %v11379_v53 }
0x100f   :  { %16942 = vmatpush3.msra.mxu0 %v24791_v22  ;;  %16988 = vmatpush3.msra.mxu1 %v24792_v58 }
0x1010   :  { %16943 = vmatprep.subr.mxu0 %v24793_v55  ;;  %16965 = vmatprep.mubr.f32.mxu0 %v11346_v29  ;;  %v24816_v29 = vld [vmem:[#allocation49_spill] sm:$0xff] }
0x1011   :  { %16989 = vmatprep.subr.mxu1 %v24794_v23  ;;  %16944 = vmatpush3.msra.mxu0 %v24793_v55 }
0x1012   :  { %16990 = vmatpush3.msra.mxu1 %v24794_v23  ;;  %16945 = vmatprep.subr.mxu0 %v24795_v4 }
0x1013   :  { %16991 = vmatprep.subr.mxu1 %v24796_v33  ;;  %16946 = vmatpush3.msra.mxu0 %v24795_v4 }
0x1014   :  { %16992 = vmatpush3.msra.mxu1 %v24796_v33  ;;  %16947 = vmatprep.subr.mxu0 %v24797_v27 }
0x1015   :  { %16993 = vmatprep.subr.mxu1 %v24798_v12  ;;  %16948 = vmatpush3.msra.mxu0 %v24797_v27 }
0x1016   :  { %16994 = vmatpush3.msra.mxu1 %v24798_v12  ;;  %16949 = vmatprep.subr.mxu0 %v24799_v46 }
0x1017   :  { %16995 = vmatprep.subr.mxu1 %v24800_v43  ;;  %16950 = vmatpush3.msra.mxu0 %v24799_v46 }
0x1018   :  { %16996 = vmatpush3.msra.mxu1 %v24800_v43  ;;  %16951 = vmatprep.subr.mxu0 %v24801_v32 }
0x1019   :  { %16997 = vmatprep.subr.mxu1 %v24802_v28  ;;  %16952 = vmatpush3.msra.mxu0 %v24801_v32 }
0x101a   :  { %16998 = vmatpush3.msra.mxu1 %v24802_v28  ;;  %16953 = vmatprep.subr.mxu0 %v24803_v30 }
0x101b   :  { %16999 = vmatprep.subr.mxu1 %v24804_v7  ;;  %16954 = vmatpush3.msra.mxu0 %v24803_v30 }
0x101c   :  { %17000 = vmatpush3.msra.mxu1 %v24804_v7  ;;  %16955 = vmatprep.subr.mxu0 %v24805_v49 }
0x101d   :  { %17001 = vmatprep.subr.mxu1 %v24806_v48  ;;  %16956 = vmatpush3.msra.mxu0 %v24805_v49 }
0x101e   :  { %17002 = vmatpush3.msra.mxu1 %v24806_v48  ;;  %16957 = vmatprep.subr.mxu0 %v24807_v9 }
0x101f   :  { %17004 = vmatmul.mubr.f32.vlgmr.msra.gmra.mxu1 %v11357_v14  ;;  %17047 = vmatprep.subr.mxu1 %v24779_v13  ;;  %v24824_v14 = vld [vmem:[#allocation20_spill] sm:$0xff] }
0x1020   :  { %16958 = vmatpush3.msra.mxu0 %v24807_v9  ;;  %17048 = vmatpush3.msra.mxu1 %v24779_v13  ;;  %v24822_v13 = vld [vmem:[#allocation27_spill] sm:$0xff]  ;;  %v12036_v21 = vpop.permute.xlu0 %12035 }
0x1021   :  { %16959 = vmatprep.subr.mxu0 %v24808_v6  ;;  %17006 = vmatprep.mubr.f32.mxu1 %v11367_v15 }
0x1022   :  { %17049 = vmatprep.subr.mxu1 %v24780_v26  ;;  %16960 = vmatpush3.msra.mxu0 %v24808_v6 }
0x1023   :  { %17050 = vmatpush3.msra.mxu1 %v24780_v26  ;;  %16961 = vmatprep.subr.mxu0 %v24809_v38  ;;  %v24825_v26 = vld [vmem:[#allocation17_spill] sm:$0xff] }
0x1024   :  { %17007 = vmatmul.mubr.f32.gmra.mxu1 %v11377_v56  ;;  %17051 = vmatprep.subr.mxu1 %v24781_v61 }
0x1025   :  { %16962 = vmatpush3.msra.mxu0 %v24809_v38  ;;  %17052 = vmatpush3.msra.mxu1 %v24781_v61 }
0x1026   :  { %17079 = vmatprep.mubr.f32.mxu1 %v22618_v20  ;;  %16963 = vmatprep.subr.mxu0 %v24810_v1 }
0x1027   :  { %17053 = vmatprep.subr.mxu1 %v24782_v2  ;;  %16964 = vmatpush3.msra.mxu0 %v24810_v1 }
0x1028   :  { %17054 = vmatpush3.msra.mxu1 %v24782_v2  ;;  %16966 = vmatmul.mubr.f32.vlgmr.msra.gmra.mxu0 %v22625_v62  ;;  %v24820_v62 = vld [vmem:[#allocation36_spill] sm:$0xff] }
0x1029   :  { %17009 = vmatprep.subr.mxu0 %v24811_v34  ;;  %17055 = vmatprep.subr.mxu1 %v24783_v47 }
0x102a   :  { %16968 = vmatprep.mubr.f32.mxu0 %v22638_v3  ;;  %17010 = vmatpush3.msra.mxu0 %v24811_v34  ;;  %v12177_v3 = vsel %vm144_vm0, %v12092_v0, 0  ;;  %v24829_v0 = vld [vmem:[#allocation9_spill] sm:$0xff] }
0x102b   :  { %17056 = vmatpush3.msra.mxu1 %v24783_v47  ;;  %17011 = vmatprep.subr.mxu0 %v24812_v31  ;;  %v22799_v61 = vand.u32 4294901760, %v12177_v3 }
0x102c   :  { %17057 = vmatprep.subr.mxu1 %v24786_v10  ;;  %17012 = vmatpush3.msra.mxu0 %v24812_v31 }
0x102d   :  { %17058 = vmatpush3.msra.mxu1 %v24786_v10  ;;  %16969 = vmatmul.mubr.f32.gmra.mxu0 %v22649_v51  ;;  %v22802_v44 = vsub.f32 %v12177_v3, %v22799_v61 }
0x102e   :  { %17013 = vmatprep.subr.mxu0 %v24813_v17  ;;  %17059 = vmatprep.subr.mxu1 %v24788_v24 }
0x102f   :  { %17014 = vmatpush3.msra.mxu0 %v24813_v17  ;;  %17041 = vmatprep.mubr.f32.mxu0 %v22618_v20  ;;  %v24817_v20 = vld [vmem:[#allocation46_spill] sm:$0xff]  ;;  %v12295_v39 = vand.u32 4294901760, %v22802_v44 }
0x1030   :  { %17060 = vmatpush3.msra.mxu1 %v24788_v24  ;;  %17015 = vmatprep.subr.mxu0 %v24814_v59 }
0x1031   :  { %17061 = vmatprep.subr.mxu1 %v24790_v36  ;;  %17016 = vmatpush3.msra.mxu0 %v24814_v59 }
0x1032   :  { %17062 = vmatpush3.msra.mxu1 %v24790_v36  ;;  %17017 = vmatprep.subr.mxu0 %v24815_v42 }
0x1033   :  { %17063 = vmatprep.subr.mxu1 %v24792_v58  ;;  %17018 = vmatpush3.msra.mxu0 %v24815_v42 }
0x1034   :  { %17064 = vmatpush3.msra.mxu1 %v24792_v58  ;;  %17019 = vmatprep.subr.mxu0 %v24816_v29 }
0x1035   :  { %17065 = vmatprep.subr.mxu1 %v24794_v23  ;;  %17020 = vmatpush3.msra.mxu0 %v24816_v29 }
0x1036   :  { %17066 = vmatpush3.msra.mxu1 %v24794_v23  ;;  %17021 = vmatprep.subr.mxu0 %v24817_v20 }
0x1037   :  { %17067 = vmatprep.subr.mxu1 %v24796_v33  ;;  %17022 = vmatpush3.msra.mxu0 %v24817_v20 }
0x1038   :  { %17068 = vmatpush3.msra.mxu1 %v24796_v33  ;;  %17023 = vmatprep.subr.mxu0 %v24818_v52  ;;  %v12040_v33 = vpop.permute.xlu0 %12039 }
0x1039   :  { %17069 = vmatprep.subr.mxu1 %v24798_v12  ;;  %17024 = vmatpush3.msra.mxu0 %v24818_v52 }
0x103a   :  { %17070 = vmatpush3.msra.mxu1 %v24798_v12  ;;  %17025 = vmatprep.subr.mxu0 %v24819_v8 }
0x103b   :  { %17071 = vmatprep.subr.mxu1 %v24800_v43  ;;  %17026 = vmatpush3.msra.mxu0 %v24819_v8 }
0x103c   :  { %17072 = vmatpush3.msra.mxu1 %v24800_v43  ;;  %17027 = vmatprep.subr.mxu0 %v24820_v62  ;;  %v12044_v38 = vpop.permute.xlu0 %12043 }
0x103d   :  { %17073 = vmatprep.subr.mxu1 %v24802_v28  ;;  %17028 = vmatpush3.msra.mxu0 %v24820_v62 }
0x103e   :  { %17074 = vmatpush3.msra.mxu1 %v24802_v28  ;;  %17029 = vmatprep.subr.mxu0 %v24821_v37 }
0x103f   :  { %17075 = vmatprep.subr.mxu1 %v24804_v7  ;;  %17030 = vmatpush3.msra.mxu0 %v24821_v37 }
0x1040   :  { %17076 = vmatpush3.msra.mxu1 %v24804_v7  ;;  %17031 = vmatprep.subr.mxu0 %v24822_v13 }
0x1041   :  { %17077 = vmatprep.subr.mxu1 %v24806_v48  ;;  %17032 = vmatpush3.msra.mxu0 %v24822_v13  ;;  %v24827_v13 = vld [vmem:[#allocation10_spill] sm:$0xff] }
0x1042   :  { %17078 = vmatpush3.msra.mxu1 %v24806_v48  ;;  %17033 = vmatprep.subr.mxu0 %v24823_v45 }
0x1043   :  { %17080 = vmatmul.mubr.f32.vlgmr.msra.gmra.mxu1 %v22622_v40  ;;  %17034 = vmatpush3.msra.mxu0 %v24823_v45 }
0x1044   :  { %17082 = vmatprep.mubr.f32.mxu1 %v22631_v63  ;;  %17035 = vmatprep.subr.mxu0 %v24824_v14 }
0x1045   :  { %17036 = vmatpush3.msra.mxu0 %v24824_v14 }
0x1046   :  { %17037 = vmatprep.subr.mxu0 %v24825_v26 }
0x1047   :  { %17083 = vmatmul.mubr.f32.gmra.mxu1 %v22645_v11  ;;  %17038 = vmatpush3.msra.mxu0 %v24825_v26  ;;  %v17779_v26 = vmov 0  }
0x1048   :  { %17039 = vmatprep.subr.mxu0 %v24826_v18  ;;  %17125 = vmatprep.mubr.f32.mxu1 %v22799_v61 }
0x1049   :  { %17040 = vmatpush3.msra.mxu0 %v24826_v18  ;;  %17531 = vset.pattern.permute.xlu0 %v17779_v26  ;;  %v12048_v18 = vpop.permute.xlu0 %12047 }
0x104a   :  { %17042 = vmatmul.mubr.f32.vlgmr.msra.gmra.mxu0 %v22622_v40  ;;  %v12296_v40 = vsub.f32 %v22802_v44, %v12295_v39  ;;  %12109 = vperm.xlu0 %17531, %v22597_v41  }
0x104b   :  { %17044 = vmatprep.mubr.f32.mxu0 %v22631_v63 }
0x104c   :  { %v12297_v63 = vand.u32 4294901760, %v12296_v40 }
0x104e   :  { %17045 = vmatmul.mubr.f32.gmra.mxu0 %v22645_v11  ;;  %12113 = vperm.xlu0 %17531, %v22603_v60  }
0x104f   :  { %17093 = vmatprep.mubr.f32.mxu0 %v12297_v63 }
0x1052   :  { %12117 = vperm.xlu0 %17531, %v22609_v35  }
0x1056   :  { %12121 = vperm.xlu0 %17531, %v22615_v16  }
0x10bc   :  { %v16929_v15 = vpop.f32.mrf.mxu1 }
0x10be   :  { %v11532_v2 = vpop.f32.mrf.mxu1 }
0x10c4   :  { %v16891_v11 = vpop.f32.mrf.mxu0 }
0x10c5   :  { %v16932_v51 = vpop.f32.mrf.mxu1  ;;  %v11539_v53 = vadd.f32 %v16929_v15, %v16891_v11  ;;  %v24831_v15 = vld [vmem:[#allocation8_spill] sm:$0xff] }
0x10c6   :  { %v11351_v47 = vpop.f32.mrf.mxu0 }
0x10c7   :  { %v11544_v50 = vpop.f32.mrf.mxu1  ;;  %v11533_v22 = vadd.f32 %v11532_v2, %v11351_v47  ;;  %v24833_v47 = vld [vmem:[#allocation13_spill] sm:$0xff] }
0x10ce   :  { %v16894_v5 = vpop.f32.mrf.mxu0 }
0x10cf   :  { %v11551_v23 = vadd.f32 %v16932_v51, %v16894_v5 }
0x10d0   :  { %v11371_v25 = vpop.f32.mrf.mxu0 }
0x10d1   :  { %v11545_v12 = vadd.f32 %v11544_v50, %v11371_v25 }
0x10df   :  { %v17005_v56 = vpop.f32.mrf.mxu1 }
0x10e1   :  { %v11764_v10 = vpop.f32.mrf.mxu1 }
0x10e4   :  { %v17008_v57 = vpop.f32.mrf.mxu1 }
0x10e6   :  { %v11780_v19 = vpop.f32.mrf.mxu1 }
0x10e8   :  { %v16967_v54 = vpop.f32.mrf.mxu0 }
0x10e9   :  { %v11662_v58 = vadd.f32 %v16967_v54, %v11539_v53  ;;  %v17757_v54 = vld [vmem:[%s24156_s1 + $0x20] sm:$0xff] }
0x10ea   :  { %v11654_v24 = vpop.f32.mrf.mxu0  ;;  %12125 = vperm.xlu0 %17531, %v17757_v54  }
0x10eb   :  { %v11655_v4 = vadd.f32 %v11654_v24, %v11533_v22  ;;  %v11773_v43 = vadd.f32 %v17005_v56, %v11662_v58  ;;  %v17758_v24 = vld [vmem:[%s24156_s1 + $0x28] sm:$0xff] }
0x10ed   :  { %v16970_v36 = vpop.f32.mrf.mxu0  ;;  %v11765_v49 = vadd.f32 %v11764_v10, %v11655_v4  ;;  %v17760_v4 = vld [vmem:[%s24156_s1 + $0x38] sm:$0xff] }
0x10ee   :  { %v11676_v46 = vadd.f32 %v16970_v36, %v11551_v23  ;;  %12129 = vperm.xlu0 %17531, %v17758_v24  }
0x10ef   :  { %v11668_v27 = vpop.f32.mrf.mxu0 }
0x10f0   :  { %v11669_v30 = vadd.f32 %v11668_v27, %v11545_v12  ;;  %v11789_v1 = vadd.f32 %v17008_v57, %v11676_v46  ;;  %v17761_v46 = vld [vmem:[%s24156_s1 + $0x40] sm:$0xff] }
0x10f2   :  { %v11781_v42 = vadd.f32 %v11780_v19, %v11669_v30  ;;  %v17759_v19 = vld [vmem:[%s24156_s1 + $0x30] sm:$0xff] }
0x10f3   :  { %12133 = vperm.xlu0 %17531, %v17759_v19  }
0x10f7   :  { %12137 = vperm.xlu0 %17531, %v17760_v4  }
0x10fb   :  { %12141 = vperm.xlu0 %17531, %v17761_v46  }
0x1103   :  { %v17081_v55 = vpop.f32.mrf.mxu1 }
0x1105   :  { %v12012_v32 = vpop.f32.mrf.mxu1 }
0x1107   :  { %v17084_v34 = vpop.f32.mrf.mxu1 }
0x1109   :  { %v12024_v37 = vpop.f32.mrf.mxu1 }
0x110a   :  { %v17043_v28 = vpop.f32.mrf.mxu0 }
0x110b   :  { %v11914_v7 = vadd.f32 %v17043_v28, %v11773_v43  ;;  %v17762_v28 = vld [vmem:[%s24156_s1 + $0x48] sm:$0xff] }
0x110c   :  { %v11907_v48 = vpop.f32.mrf.mxu0  ;;  %12145 = vperm.xlu0 %17531, %v17762_v28  }
0x110d   :  { %v12019_v9 = vadd.f32 %v17081_v55, %v11914_v7  ;;  %v11908_v6 = vadd.f32 %v11907_v48, %v11765_v49  ;;  %v17763_v49 = vld [vmem:[%s24156_s1 + $0x50] sm:$0xff] }
0x110e   :  { %v17046_v31 = vpop.f32.mrf.mxu0 }
0x110f   :  { %v12013_v17 = vadd.f32 %v12012_v32, %v11908_v6  ;;  %v11926_v59 = vadd.f32 %v17046_v31, %v11789_v1  ;;  %v12051_v20 = vmul.f32 %v12040_v33, %v12019_v9  ;;  %v17764_v6 = vld [vmem:[%s24156_s1 + $0x58] sm:$0xff]  ;;  %v33_v1 = vld [vmem:[%s24156_s1 + $0x60] sm:$0xff]  ;;  %v12093_v31 = vld [vmem:[%s24155_s2 + $0x88] sm:$0xff] }
0x1110   :  { %v11919_v29 = vpop.f32.mrf.mxu0  ;;  %12149 = vperm.xlu0 %17531, %v17763_v49  }
0x1111   :  { %v12050_v52 = vmul.f32 %v12036_v21, %v12013_v17  ;;  %v11920_v8 = vadd.f32 %v11919_v29, %v11781_v42  ;;  %v12031_v62 = vadd.f32 %v17084_v34, %v11926_v59  ;;  %v22814_v3 = vadd.f32 %v12051_v20, %v24829_v0  ;;  %v12094_v17 = vld [vmem:[%s24155_s2 + $0x90] sm:$0xff]  ;;  %v34_v59 = vld [vmem:[%s24156_s1 + $0x68] sm:$0xff] }
0x1112   :  { %v12180_v42 = vsel %vm144_vm0, %v12093_v31, 0  ;;  %v12183_v29 = vsel %vm144_vm0, %v12094_v17, 0  ;;  %v35_v20 = vld [vmem:[%s24156_s1 + $0x70] sm:$0xff] }
0x1113   :  { %v22810_v45 = vadd.f32 %v12050_v52, %v24827_v13  ;;  %v12025_v14 = vadd.f32 %v12024_v37, %v11920_v8  ;;  %24830 = vst [vmem:[#allocation104_spill] sm:$0xff] %v22814_v3  ;;  %v12053_v63 = vmul.f32 %v12048_v18, %v12031_v62  ;;  %v22874_v52 = vand.u32 4294901760, %v12180_v42  ;;  %v12095_v8 = vld [vmem:[%s24155_s2 + $0x98] sm:$0xff]  ;;  %v12096_v37 = vld [vmem:[%s24155_s2 + $0xa0] sm:$0xff]  ;;  %v12097_v18 = vld [vmem:[%s24155_s2 + $0xa8] sm:$0xff] }
0x1114   :  { %12153 = vperm.xlu0 %17531, %v17764_v6   ;;  %v22879_v62 = vand.u32 4294901760, %v12183_v29  ;;  %v12186_v13 = vsel %vm144_vm0, %v12095_v8, 0  ;;  %v12189_v0 = vsel %vm144_vm0, %v12096_v37, 0 }
0x1115   :  { %24828 = vst [vmem:[#allocation102_spill] sm:$0xff] %v22810_v45  ;;  %v12052_v40 = vmul.f32 %v12044_v38, %v12025_v14  ;;  %v12058_v11 = vadd.f32 %v22814_v3, %v22810_v45  ;;  %v22824_v50 = vadd.f32 %v12053_v63, %v24833_v47  ;;  %v36_v14 = vld [vmem:[%s24156_s1 + $0x78] sm:$0xff]  ;;  %v22889_v26 = vsub.f32 %v12180_v42, %v22874_v52 }
0x1116   :  { %v22899_v63 = vsub.f32 %v12183_v29, %v22879_v62  ;;  %v12103_v29 = vld [vmem:[%s24155_s2 + $0xd8] sm:$0xff] }
0x1117   :  { %v22817_v2 = vadd.f32 %v12052_v40, %v24831_v15  ;;  %24834 = vst [vmem:[#allocation59_spill] sm:$0xff] %v22824_v50  ;;  %v12098_v40 = vld [vmem:[%s24155_s2 + $0xb0] sm:$0xff]  ;;  %v22901_v15 = vand.u32 4294901760, %v12186_v13 }
0x1118   :  { %12158 = vperm.xlu0 %17531, %v33_v1  }
0x1119   :  { %24832 = vst [vmem:[#allocation89_spill] sm:$0xff] %v22817_v2  ;;  %v12059_v51 = vadd.f32 %v12058_v11, %v22817_v2  ;;  %v12192_v11 = vsel %vm144_vm0, %v12097_v18, 0  ;;  %v22913_v24 = vsub.f32 %v12186_v13, %v22901_v15 }
0x111b   :  { %v12060_v41 = vadd.f32 %v12059_v51, %v22824_v50  ;;  %v12099_v51 = vld [vmem:[%s24155_s2 + $0xb8] sm:$0xff]  ;;  %v12325_v46 = vand.u32 4294901760, %v22913_v24 }
0x111c   :  { %12163 = vperm.xlu0 %17531, %v34_v59   ;;  %v12198_v19 = vsel %vm144_vm0, %v12099_v51, 0 }
0x111d   :  { %v12061_v5 = vrot.slane %v12060_v41, 4 }
0x111f   :  { %v12062_v56 = vadd.f32 %v12061_v5, %v12060_v41  ;;  %v12305_v41 = vand.u32 4294901760, %v22889_v26  ;;  %v22908_v5 = vand.u32 4294901760, %v12189_v0 }
0x1120   :  { %12168 = vperm.xlu0 %17531, %v35_v20   ;;  %v12326_v20 = vsub.f32 %v22913_v24, %v12325_v46 }
0x1121   :  { %v12063_v25 = vrot.slane %v12062_v56, 2  ;;  %v12306_v4 = vsub.f32 %v22889_v26, %v12305_v41 }
0x1123   :  { %v12064_v10 = vadd.f32 %v12063_v25, %v12062_v56  ;;  %v12195_v56 = vsel %vm144_vm0, %v12098_v40, 0  ;;  %v12307_v31 = vand.u32 4294901760, %v12306_v4  ;;  %v12327_v4 = vand.u32 4294901760, %v12326_v20 }
0x1124   :  { %12173 = vperm.xlu0 %17531, %v36_v14   ;;  %v12104_v14 = vld [vmem:[%s24155_s2 + $0xe0] sm:$0xff] }
0x1125   :  { %v12065_v60 = vrot.slane %v12064_v10, 1 }
0x1127   :  { %v12066_v57 = vadd.f32 %v12065_v60, %v12064_v10 }
0x1129   :  { %v12067_v21 = vmul.f32 0.03125, %v12066_v57  ;;  %v12315_v57 = vand.u32 4294901760, %v22899_v63 }
0x112b   :  { %v12068_v35 = vsub.f32 %v22810_v45, %v12067_v21  ;;  %v12069_v53 = vsub.f32 %v22814_v3, %v12067_v21  ;;  %v12070_v16 = vsub.f32 %v22817_v2, %v12067_v21  ;;  %v12071_v36 = vsub.f32 %v22824_v50, %v12067_v21 }
0x112c   :  { %v22915_v21 = vand.u32 4294901760, %v12192_v11  ;;  %v12316_v49 = vsub.f32 %v22899_v63, %v12315_v57 }
0x112d   :  { %v12072_v22 = vmul.f32 %v12068_v35, %v12068_v35  ;;  %v12073_v58 = vmul.f32 %v12069_v53, %v12069_v53  ;;  %v12074_v55 = vmul.f32 %v12070_v16, %v12070_v16  ;;  %v12075_v33 = vmul.f32 %v12071_v36, %v12071_v36 }
0x112f   :  { %v12076_v23 = vadd.f32 %v12073_v58, %v12072_v22 }
0x1131   :  { %v12077_v27 = vadd.f32 %v12076_v23, %v12074_v55 }
0x1133   :  { %v12078_v12 = vadd.f32 %v12077_v27, %v12075_v33 }
0x1135   :  { %v12079_v43 = vrot.slane %v12078_v12, 4 }
0x1137   :  { %v12080_v32 = vadd.f32 %v12079_v43, %v12078_v12  ;;  %v12101_v12 = vld [vmem:[%s24155_s2 + $0xc8] sm:$0xff] }
0x1139   :  { %v12081_v30 = vrot.slane %v12080_v32, 2 }
0x113b   :  { %v12082_v7 = vadd.f32 %v12081_v30, %v12080_v32  ;;  %v22953_v32 = vand.u32 4294901760, %v12198_v19 }
0x113d   :  { %v12083_v48 = vrot.slane %v12082_v7, 1  ;;  %v22997_v37 = vsub.f32 %v12198_v19, %v22953_v32  ;;  %v12213_v19 = vsel %vm144_vm0, %v12104_v14, 0 }
0x113e   :  { %v23039_v20 = vand.u32 4294901760, %v12213_v19 }
0x113f   :  { %v12084_v9 = vadd.f32 %v12083_v48, %v12082_v7  ;;  %v22966_v48 = vsub.f32 %v12192_v11, %v22915_v21 }
0x1141   :  { %v12085_v38 = vmul.f32 0.03125, %v12084_v9  ;;  %v12102_v9 = vld [vmem:[%s24155_s2 + $0xd0] sm:$0xff]  ;;  %v12345_v40 = vand.u32 4294901760, %v22966_v48 }
0x1142   :  { %v12207_v13 = vsel %vm144_vm0, %v12102_v9, 0 }
0x1143   :  { %v12086_v34 = vadd.f32 1e-05, %v12085_v38  ;;  %v12346_v9 = vsub.f32 %v22966_v48, %v12345_v40 }
0x1145   :  { %17635 = vrsqrt.f32 %v12086_v34  ;;  %v12204_v34 = vsel %vm144_vm0, %v12101_v12, 0 }
0x1146   :  { %v23005_v11 = vand.u32 4294901760, %v12204_v34 }
0x1152   :  { %v17636_v47 = vpop.eup %17635 }
0x1153   :  { %v12088_v25 = vmul.f32 %v17636_v47, %v12068_v35  ;;  %v12089_v10 = vmul.f32 %v17636_v47, %v12069_v53  ;;  %v12090_v54 = vmul.f32 %v17636_v47, %v12070_v16  ;;  %v12091_v60 = vmul.f32 %v17636_v47, %v12071_v36  ;;  %v12100_v35 = vld [vmem:[%s24155_s2 + $0xc0] sm:$0xff] }
0x1154   :  { %v22930_v53 = vsub.f32 %v12189_v0, %v22908_v5  ;;  %v22932_v16 = vand.u32 4294901760, %v12195_v56  ;;  %v12201_v28 = vsel %vm144_vm0, %v12100_v35, 0  ;;  %v12317_v0 = vand.u32 4294901760, %v12316_v49  ;;  %v12105_v35 = vld [vmem:[%s24155_s2 + $0xe8] sm:$0xff] }
0x1155   :  { %v22918_v22 = vand.u32 4294901760, %v12091_v60  ;;  %v22920_v58 = vand.u32 4294901760, %v12090_v54  ;;  %v22922_v55 = vand.u32 4294901760, %v12089_v10  ;;  %v22924_v23 = vand.u32 4294901760, %v12088_v25 }
0x1156   :  { %v12335_v38 = vand.u32 4294901760, %v22930_v53  ;;  %v22977_v1 = vsub.f32 %v12195_v56, %v22932_v16  ;;  %v22984_v42 = vand.u32 4294901760, %v12201_v28  ;;  %v24389_v49 = vand.u32 4294901760, %v22997_v37 }
0x1157   :  { %v12479_v36 = vsub.f32 %v12091_v60, %v22918_v22  ;;  %17085 = vmatprep.subr.mxu0 %v22918_v22  ;;  %v22940_v33 = vsub.f32 %v12090_v54, %v22920_v58  ;;  %v22943_v27 = vsub.f32 %v12089_v10, %v22922_v55  ;;  %v22951_v43 = vsub.f32 %v12088_v25, %v22924_v23 }
0x1158   :  { %17086 = vmatpush3.msra.mxu0 %v22918_v22  ;;  %v12336_v47 = vsub.f32 %v22930_v53, %v12335_v38  ;;  %v12355_v56 = vand.u32 4294901760, %v22977_v1  ;;  %v12210_v25 = vsel %vm144_vm0, %v12103_v29, 0  ;;  %v23016_v54 = vsub.f32 %v12201_v28, %v22984_v42  ;;  %v12106_v28 = vld [vmem:[%s24155_s2 + $0xf0] sm:$0xff] }
0x1159   :  { %17087 = vmatprep.subr.mxu0 %v22920_v58  ;;  %v22957_v30 = vand.u32 4294901760, %v12479_v36  ;;  %v22960_v7 = vand.u32 4294901760, %v22940_v33  ;;  %v22973_v6 = vand.u32 4294901760, %v22943_v27  ;;  %v22994_v8 = vand.u32 4294901760, %v22951_v43 }
0x115a   :  { %17088 = vmatpush3.msra.mxu0 %v22920_v58  ;;  %v23018_v60 = vand.u32 4294901760, %v12207_v13  ;;  %v12337_v29 = vand.u32 4294901760, %v12336_v47  ;;  %v12216_v14 = vsel %vm144_vm0, %v12105_v35, 0 }
0x115b   :  { %17089 = vmatprep.subr.mxu0 %v22922_v55  ;;  %v12481_v17 = vsub.f32 %v12479_v36, %v22957_v30  ;;  %v12488_v59 = vsub.f32 %v22940_v33, %v22960_v7  ;;  %v12495_v51 = vsub.f32 %v22943_v27, %v22973_v6  ;;  %v12502_v12 = vsub.f32 %v22951_v43, %v22994_v8 }
0x115c   :  { %17090 = vmatpush3.msra.mxu0 %v22922_v55 }
0x115d   :  { %17091 = vmatprep.subr.mxu0 %v22924_v23  ;;  %v12482_v18 = vand.u32 4294901760, %v12481_v17  ;;  %v12489_v10 = vand.u32 4294901760, %v12488_v59  ;;  %v23036_v17 = vand.u32 4294901760, %v12210_v25  ;;  %v12496_v59 = vand.u32 4294901760, %v12495_v51  ;;  %v12107_v51 = vld [vmem:[%s24155_s2 + $0xf8] sm:$0xff] }
0x115e   :  { %17092 = vmatpush3.msra.mxu0 %v22924_v23  ;;  %v12503_v47 = vand.u32 4294901760, %v12502_v12 }
0x115f   :  { %17094 = vmatmul.mubr.f32.vlgmr.msra.gmra.mxu0 %v12307_v31  ;;  %17117 = vmatprep.subr.mxu1 %v12482_v18  ;;  %v23034_v31 = vsub.f32 %v12204_v34, %v23005_v11  ;;  %v12375_v34 = vand.u32 4294901760, %v23016_v54  ;;  %v23060_v35 = vsub.f32 %v12210_v25, %v23036_v17 }
0x1160   :  { %17149 = vmatprep.subr.mxu0 %v12479_v36  ;;  %17118 = vmatpush3.msra.mxu1 %v12482_v18  ;;  %v23048_v18 = vsub.f32 %v12207_v13, %v23018_v60 }
0x1161   :  { %17150 = vmatpush3.msra.mxu0 %v12479_v36  ;;  %17119 = vmatprep.subr.mxu1 %v12489_v10  ;;  %v12356_v36 = vsub.f32 %v22977_v1, %v12355_v56  ;;  %v24390_v13 = vand.u32 4294901760, %v23034_v31  ;;  %v12376_v25 = vsub.f32 %v23016_v54, %v12375_v34 }
0x1162   :  { %17151 = vmatprep.subr.mxu0 %v22940_v33  ;;  %17096 = vmatprep.mubr.f32.mxu0 %v12317_v0  ;;  %v12219_v0 = vsel %vm144_vm0, %v12106_v28, 0  ;;  %v23062_v28 = vand.u32 4294901760, %v12216_v14 }
0x1163   :  { %17120 = vmatpush3.msra.mxu1 %v12489_v10  ;;  %17152 = vmatpush3.msra.mxu0 %v22940_v33  ;;  %v12366_v33 = vsub.f32 %v22997_v37, %v24389_v49  ;;  %v12347_v10 = vand.u32 4294901760, %v12346_v9  ;;  %v23068_v12 = vand.u32 4294901760, %v12219_v0  ;;  %v12222_v49 = vsel %vm144_vm0, %v12107_v51, 0 }
0x1164   :  { %17097 = vmatmul.mubr.f32.gmra.mxu0 %v12327_v4  ;;  %17121 = vmatprep.subr.mxu1 %v12496_v59  ;;  %v23066_v4 = vsub.f32 %v12213_v19, %v23039_v20  ;;  %v12357_v9 = vand.u32 4294901760, %v12356_v36  ;;  %v12386_v19 = vsub.f32 %v23034_v31, %v24390_v13  ;;  %v23083_v36 = vsub.f32 %v12216_v14, %v23062_v28 }
0x1165   :  { %17153 = vmatprep.subr.mxu0 %v22943_v27  ;;  %17122 = vmatpush3.msra.mxu1 %v12496_v59  ;;  %v12395_v59 = vand.u32 4294901760, %v23048_v18  ;;  %v23085_v51 = vand.u32 4294901760, %v12222_v49 }
0x1166   :  { %17154 = vmatpush3.msra.mxu0 %v22943_v27  ;;  %17123 = vmatprep.subr.mxu1 %v12503_v47  ;;  %v12367_v27 = vand.u32 4294901760, %v12366_v33  ;;  %v12377_v33 = vand.u32 4294901760, %v12376_v25  ;;  %v24393_v13 = vand.u32 4294901760, %v23083_v36 }
0x1167   :  { %17155 = vmatprep.subr.mxu0 %v22951_v43  ;;  %17099 = vmatprep.mubr.f32.mxu0 %v12337_v29  ;;  %v24391_v29 = vand.u32 4294901760, %v23060_v35  ;;  %v12396_v14 = vsub.f32 %v23048_v18, %v12395_v59 }
0x1168   :  { %17124 = vmatpush3.msra.mxu1 %v12503_v47  ;;  %17156 = vmatpush3.msra.mxu0 %v22951_v43  ;;  %v24392_v43 = vand.u32 4294901760, %v23066_v4  ;;  %v23091_v47 = vsub.f32 %v12219_v0, %v23068_v12 }
0x1169   :  { %17100 = vmatmul.mubr.f32.gmra.mxu0 %v12347_v10  ;;  %17126 = vmatmul.mubr.f32.vlgmr.msra.gmra.mxu1 %v22874_v52  ;;  %v12387_v10 = vand.u32 4294901760, %v12386_v19  ;;  %v12406_v0 = vsub.f32 %v23060_v35, %v24391_v29  ;;  %v12397_v19 = vand.u32 4294901760, %v12396_v14  ;;  %v12426_v29 = vsub.f32 %v23083_v36, %v24393_v13 }
0x116a   :  { %17181 = vmatprep.subr.mxu1 %v22918_v22  ;;  %17213 = vmatprep.subr.mxu0 %v22957_v30  ;;  %v12416_v25 = vsub.f32 %v23066_v4, %v24392_v43 }
0x116b   :  { %17182 = vmatpush3.msra.mxu1 %v22918_v22  ;;  %17102 = vmatprep.mubr.f32.mxu0 %v12357_v9  ;;  %v23105_v9 = vsub.f32 %v12222_v49, %v23085_v51  ;;  %v12407_v49 = vand.u32 4294901760, %v12406_v0 }
0x116c   :  { %17183 = vmatprep.subr.mxu1 %v22920_v58  ;;  %17128 = vmatprep.mubr.f32.mxu1 %v22879_v62 }
0x116d   :  { %17184 = vmatpush3.msra.mxu1 %v22920_v58  ;;  %17103 = vmatmul.mubr.f32.gmra.mxu0 %v12367_v27  ;;  %v12435_v27 = vand.u32 4294901760, %v23091_v47  ;;  %v12445_v43 = vand.u32 4294901760, %v23105_v9 }
0x116e   :  { %17129 = vmatmul.mubr.f32.gmra.mxu1 %v22901_v15  ;;  %17185 = vmatprep.subr.mxu1 %v22922_v55 }
0x116f   :  { %17186 = vmatpush3.msra.mxu1 %v22922_v55  ;;  %17105 = vmatprep.mubr.f32.mxu0 %v12377_v33  ;;  %v12417_v33 = vand.u32 4294901760, %v12416_v25  ;;  %v12436_v14 = vsub.f32 %v23091_v47, %v12435_v27  ;;  %v12446_v0 = vsub.f32 %v23105_v9, %v12445_v43 }
0x1170   :  { %17187 = vmatprep.subr.mxu1 %v22924_v23  ;;  %17131 = vmatprep.mubr.f32.mxu1 %v22908_v5 }
0x1171   :  { %17188 = vmatpush3.msra.mxu1 %v22924_v23  ;;  %17106 = vmatmul.mubr.f32.gmra.mxu0 %v12387_v10  ;;  %v12427_v10 = vand.u32 4294901760, %v12426_v29  ;;  %v12437_v13 = vand.u32 4294901760, %v12436_v14  ;;  %v12447_v25 = vand.u32 4294901760, %v12446_v0 }
0x1172   :  { %17132 = vmatmul.mubr.f32.gmra.mxu1 %v22915_v21  ;;  %17245 = vmatprep.subr.mxu1 %v22918_v22 }
0x1173   :  { %17108 = vmatprep.mubr.f32.mxu0 %v12397_v19  ;;  %17134 = vmatprep.mubr.f32.mxu1 %v22932_v16 }
0x1175   :  { %17109 = vmatmul.mubr.f32.gmra.mxu0 %v12407_v49 }
0x1176   :  { %17135 = vmatmul.mubr.f32.gmra.mxu1 %v22953_v32  ;;  %17111 = vmatprep.mubr.f32.mxu0 %v12417_v33 }
0x1177   :  { %17137 = vmatprep.mubr.f32.mxu1 %v22984_v42 }
0x1179   :  { %17112 = vmatmul.mubr.f32.gmra.mxu0 %v12427_v10  ;;  %v13601_v10 = vld [vmem:[%s24155_s2 + $0x140] sm:$0xff] }
0x117a   :  { %17138 = vmatmul.mubr.f32.gmra.mxu1 %v23005_v11  ;;  %17114 = vmatprep.mubr.f32.mxu0 %v12437_v13  ;;  %v13598_v13 = vld [vmem:[%s24155_s2 + $0x128] sm:$0xff] }
0x117b   :  { %17140 = vmatprep.mubr.f32.mxu1 %v23018_v60 }
0x117d   :  { %17115 = vmatmul.mubr.f32.gmra.mxu0 %v12447_v25 }
0x117e   :  { %17141 = vmatmul.mubr.f32.gmra.mxu1 %v23036_v17  ;;  %17157 = vmatprep.mubr.f32.mxu0 %v22802_v44  ;;  %v24835_v44 = vand.u32 4294901760, %v22997_v37 }
0x117f   :  { %17143 = vmatprep.mubr.f32.mxu1 %v23039_v20 }
0x1181   :  { %17158 = vmatmul.mubr.f32.vlgmr.msra.gmra.mxu0 %v22889_v26  ;;  %v24837_v26 = vand.u32 4294901760, %v23060_v35 }
0x1182   :  { %17144 = vmatmul.mubr.f32.gmra.mxu1 %v23062_v28  ;;  %17214 = vmatpush3.msra.mxu0 %v22957_v30 }
0x1183   :  { %17215 = vmatprep.subr.mxu0 %v22960_v7  ;;  %17146 = vmatprep.mubr.f32.mxu1 %v23068_v12 }
0x1184   :  { %17216 = vmatpush3.msra.mxu0 %v22960_v7  ;;  %17160 = vmatprep.mubr.f32.mxu0 %v22899_v63  ;;  %v24838_v63 = vand.u32 4294901760, %v23066_v4 }
0x1185   :  { %17217 = vmatprep.subr.mxu0 %v22973_v6  ;;  %17161 = vmatmul.mubr.f32.gmra.mxu0 %v22913_v24 }
0x1186   :  { %17147 = vmatmul.mubr.f32.gmra.mxu1 %v23085_v51  ;;  %17218 = vmatpush3.msra.mxu0 %v22973_v6 }
0x1187   :  { %17219 = vmatprep.subr.mxu0 %v22994_v8  ;;  %17163 = vmatprep.mubr.f32.mxu0 %v22930_v53 }
0x1188   :  { %17220 = vmatpush3.msra.mxu0 %v22994_v8  ;;  %17189 = vmatprep.mubr.f32.mxu1 %v12295_v39  ;;  %v24836_v39 = vand.u32 4294901760, %v23034_v31  ;;  %v13596_v8 = vld [vmem:[%s24155_s2 + $0x118] sm:$0xff] }
0x1189   :  { %17164 = vmatmul.mubr.f32.gmra.mxu0 %v22966_v48  ;;  %v13595_v48 = vld [vmem:[%s24155_s2 + $0x110] sm:$0xff] }
0x118a   :  { %17190 = vmatmul.mubr.f32.vlgmr.msra.gmra.mxu1 %v12305_v41  ;;  %17166 = vmatprep.mubr.f32.mxu0 %v22977_v1  ;;  %v24839_v41 = vand.u32 4294901760, %v23083_v36 }
0x118b   :  { %17246 = vmatpush3.msra.mxu1 %v22918_v22  ;;  %17192 = vmatprep.mubr.f32.mxu1 %v12315_v57  ;;  %v13593_v22 = vld [vmem:[%s24155_s2 + $0x100] sm:$0xff] }
0x118c   :  { %17247 = vmatprep.subr.mxu1 %v22920_v58  ;;  %13625 = vxpose.xlu0.b32.start [1/16] (narrow) %v13593_v22, 32 }
0x118d   :  { %17248 = vmatpush3.msra.mxu1 %v22920_v58  ;;  %17167 = vmatmul.mubr.f32.gmra.mxu0 %v22997_v37 }
0x118e   :  { %17249 = vmatprep.subr.mxu1 %v22922_v55  ;;  %17193 = vmatmul.mubr.f32.gmra.mxu1 %v12325_v46 }
0x118f   :  { %17250 = vmatpush3.msra.mxu1 %v22922_v55  ;;  %17169 = vmatprep.mubr.f32.mxu0 %v23016_v54 }
0x1190   :  { %17251 = vmatprep.subr.mxu1 %v22924_v23  ;;  %17195 = vmatprep.mubr.f32.mxu1 %v12335_v38 }
0x1191   :  { %17252 = vmatpush3.msra.mxu1 %v22924_v23  ;;  %17170 = vmatmul.mubr.f32.gmra.mxu0 %v23034_v31 }
0x1192   :  { %17196 = vmatmul.mubr.f32.gmra.mxu1 %v12345_v40  ;;  %17172 = vmatprep.mubr.f32.mxu0 %v23048_v18 }
0x1193   :  { %17198 = vmatprep.mubr.f32.mxu1 %v12355_v56 }
0x1195   :  { %17173 = vmatmul.mubr.f32.gmra.mxu0 %v23060_v35 }
0x1196   :  { %17199 = vmatmul.mubr.f32.gmra.mxu1 %v24835_v44  ;;  %17175 = vmatprep.mubr.f32.mxu0 %v23066_v4 }
0x1197   :  { %17201 = vmatprep.mubr.f32.mxu1 %v12375_v34 }
0x1199   :  { %17176 = vmatmul.mubr.f32.gmra.mxu0 %v23083_v36 }
0x119a   :  { %17202 = vmatmul.mubr.f32.gmra.mxu1 %v24836_v39  ;;  %17178 = vmatprep.mubr.f32.mxu0 %v23091_v47 }
0x119b   :  { %17204 = vmatprep.mubr.f32.mxu1 %v12395_v59  ;;  %v13599_v59 = vld [vmem:[%s24155_s2 + $0x130] sm:$0xff] }
0x119d   :  { %17179 = vmatmul.mubr.f32.gmra.mxu0 %v23105_v9  ;;  %v13600_v9 = vld [vmem:[%s24155_s2 + $0x138] sm:$0xff] }
0x119e   :  { %17205 = vmatmul.mubr.f32.gmra.mxu1 %v24837_v26  ;;  %17221 = vmatprep.mubr.f32.mxu0 %v22799_v61  ;;  %v13602_v26 = vld [vmem:[%s24155_s2 + $0x148] sm:$0xff] }
0x119f   :  { %17207 = vmatprep.mubr.f32.mxu1 %v24838_v63 }
0x11a1   :  { %17222 = vmatmul.mubr.f32.vlgmr.msra.gmra.mxu0 %v22874_v52 }
0x11a2   :  { %17208 = vmatmul.mubr.f32.gmra.mxu1 %v24839_v41  ;;  %17224 = vmatprep.mubr.f32.mxu0 %v22879_v62 }
0x11a3   :  { %17210 = vmatprep.mubr.f32.mxu1 %v12435_v27 }
0x11a5   :  { %17225 = vmatmul.mubr.f32.gmra.mxu0 %v22901_v15 }
0x11a6   :  { %17211 = vmatmul.mubr.f32.gmra.mxu1 %v12445_v43  ;;  %17227 = vmatprep.mubr.f32.mxu0 %v22908_v5 }
0x11a7   :  { %17253 = vmatprep.mubr.f32.mxu1 %v22799_v61  ;;  %v23233_v61 = vpop.permute.xlu0 %12109 }
0x11a9   :  { %17228 = vmatmul.mubr.f32.gmra.mxu0 %v22915_v21 }
0x11aa   :  { %17254 = vmatmul.mubr.f32.vlgmr.msra.gmra.mxu1 %v22874_v52  ;;  %17230 = vmatprep.mubr.f32.mxu0 %v22932_v16 }
0x11ab   :  { %17256 = vmatprep.mubr.f32.mxu1 %v22879_v62  ;;  %v23235_v52 = vpop.permute.xlu0 %12113 }
0x11ad   :  { %17231 = vmatmul.mubr.f32.gmra.mxu0 %v22953_v32 }
0x11ae   :  { %17257 = vmatmul.mubr.f32.gmra.mxu1 %v22901_v15  ;;  %17233 = vmatprep.mubr.f32.mxu0 %v22984_v42 }
0x11af   :  { %17259 = vmatprep.mubr.f32.mxu1 %v22908_v5  ;;  %v23237_v62 = vpop.permute.xlu0 %12117 }
0x11b1   :  { %17234 = vmatmul.mubr.f32.gmra.mxu0 %v23005_v11 }
0x11b2   :  { %17260 = vmatmul.mubr.f32.gmra.mxu1 %v22915_v21  ;;  %17236 = vmatprep.mubr.f32.mxu0 %v23018_v60 }
0x11b3   :  { %17262 = vmatprep.mubr.f32.mxu1 %v22932_v16  ;;  %v23239_v15 = vpop.permute.xlu0 %12121  ;;  %v13594_v16 = vld [vmem:[%s24155_s2 + $0x108] sm:$0xff] }
0x11b4   :  { %13626 = vxpose.xlu0.b32.cont [2/16] (narrow) %v13594_v16, 32 }
0x11b5   :  { %17237 = vmatmul.mubr.f32.gmra.mxu0 %v23036_v17 }
0x11b6   :  { %17263 = vmatmul.mubr.f32.gmra.mxu1 %v22953_v32  ;;  %17239 = vmatprep.mubr.f32.mxu0 %v23039_v20 }
0x11b7   :  { %17265 = vmatprep.mubr.f32.mxu1 %v22984_v42  ;;  %v23243_v57 = vpop.permute.xlu0 %12125 }
0x11b8   :  { %13627 = vxpose.xlu0.b32.cont [3/16] (narrow) %v13595_v48, 32 }
0x11b9   :  { %17240 = vmatmul.mubr.f32.gmra.mxu0 %v23062_v28 }
0x11ba   :  { %17266 = vmatmul.mubr.f32.gmra.mxu1 %v23005_v11  ;;  %17242 = vmatprep.mubr.f32.mxu0 %v23068_v12 }
0x11bb   :  { %17268 = vmatprep.mubr.f32.mxu1 %v23018_v60  ;;  %v23252_v58 = vpop.permute.xlu0 %12129  ;;  %v13597_v60 = vld [vmem:[%s24155_s2 + $0x120] sm:$0xff] }
0x11bc   :  { %13628 = vxpose.xlu0.b32.cont [4/16] (narrow) %v13596_v8, 32  ;;  %v13603_v8 = vld [vmem:[%s24155_s2 + $0x150] sm:$0xff] }
0x11bd   :  { %17243 = vmatmul.mubr.f32.gmra.mxu0 %v23085_v51 }
0x11be   :  { %17269 = vmatmul.mubr.f32.gmra.mxu1 %v23036_v17 }
0x11bf   :  { %17271 = vmatprep.mubr.f32.mxu1 %v23039_v20  ;;  %v23267_v30 = vpop.permute.xlu0 %12133 }
0x11c0   :  { %13629 = vxpose.xlu0.b32.cont [5/16] (narrow) %v13597_v60, 32 }
0x11c2   :  { %17272 = vmatmul.mubr.f32.gmra.mxu1 %v23062_v28 }
0x11c3   :  { %17274 = vmatprep.mubr.f32.mxu1 %v23068_v12  ;;  %v23285_v37 = vpop.permute.xlu0 %12137 }
0x11c4   :  { %13630 = vxpose.xlu0.b32.cont [6/16] (narrow) %v13598_v13, 32 }
0x11c6   :  { %17275 = vmatmul.mubr.f32.gmra.mxu1 %v23085_v51 }
0x11c7   :  { %v23302_v20 = vpop.permute.xlu0 %12141 }
0x11c8   :  { %13631 = vxpose.xlu0.b32.cont [7/16] (narrow) %v13599_v59, 32 }
0x11cb   :  { %v23322_v29 = vpop.permute.xlu0 %12145 }
0x11cc   :  { %13632 = vxpose.xlu0.b32.cont [8/16] (narrow) %v13600_v9, 32 }
0x11cf   :  { %v23339_v49 = vpop.permute.xlu0 %12149 }
0x11d0   :  { %13633 = vxpose.xlu0.b32.cont [9/16] (narrow) %v13601_v10, 32 }
0x11d3   :  { %v12154_v63 = vpop.permute.xlu0 %12153 }
0x11d4   :  { %13634 = vxpose.xlu0.b32.cont [10/16] (narrow) %v13602_v26, 32  ;;  %v13604_v26 = vld [vmem:[%s24155_s2 + $0x158] sm:$0xff] }
0x11d7   :  { %v12159_v59 = vpop.permute.xlu0 %12158 }
0x11d8   :  { %13635 = vxpose.xlu0.b32.cont [11/16] (narrow) %v13603_v8, 32  ;;  %v13605_v8 = vld [vmem:[%s24155_s2 + $0x160] sm:$0xff] }
0x11dc   :  { %13636 = vxpose.xlu0.b32.cont [12/16] (narrow) %v13604_v26, 32  ;;  %v13606_v26 = vld [vmem:[%s24155_s2 + $0x168] sm:$0xff] }
0x11e0   :  { %13637 = vxpose.xlu0.b32.cont [13/16] (narrow) %v13605_v8, 32  ;;  %v13607_v8 = vld [vmem:[%s24155_s2 + $0x170] sm:$0xff] }
0x11e4   :  { %13638 = vxpose.xlu0.b32.cont [14/16] (narrow) %v13606_v26, 32 }
0x11e8   :  { %13639 = vxpose.xlu0.b32.cont [15/16] (narrow) %v13607_v8, 32 }
0x121f   :  { %v23241_v5 = vpop.f32.mrf.mxu0 }
0x1221   :  { %v23245_v24 = vpop.f32.mrf.mxu0 }
0x1224   :  { %v23247_v21 = vpop.f32.mrf.mxu0 }
0x1225   :  { %v12330_v26 = vadd.f32 %v23247_v21, %v23239_v15 }
0x1226   :  { %v23254_v55 = vpop.f32.mrf.mxu0 }
0x1227   :  { %v12320_v15 = vadd.f32 %v23254_v55, %v23237_v62 }
0x1229   :  { %v23256_v23 = vpop.f32.mrf.mxu0  ;;  %v23258_v53 = vpop.f32.mrf.mxu1 }
0x122b   :  { %v23263_v46 = vpop.f32.mrf.mxu0  ;;  %v23265_v32 = vpop.f32.mrf.mxu1 }
0x122d   :  { %v23269_v7 = vpop.f32.mrf.mxu0 }
0x122e   :  { %v23274_v6 = vpop.f32.mrf.mxu1 }
0x122f   :  { %v23276_v38 = vpop.f32.mrf.mxu0 }
0x1230   :  { %v23278_v1 = vpop.f32.mrf.mxu1  ;;  %v12360_v8 = vadd.f32 %v23276_v38, %v23267_v30 }
0x1231   :  { %v23280_v42 = vpop.f32.mrf.mxu0  ;;  %v12553_v55 = vadd.f32 %v23278_v1, %v12320_v15 }
0x1232   :  { %v23287_v40 = vpop.f32.mrf.mxu1 }
0x1233   :  { %v23289_v11 = vpop.f32.mrf.mxu0 }
0x1234   :  { %v23291_v56 = vpop.f32.mrf.mxu1 }
0x1235   :  { %v23293_v54 = vpop.f32.mrf.mxu0 }
0x1236   :  { %v23298_v31 = vpop.f32.mrf.mxu1  ;;  %v12410_v62 = vadd.f32 %v23293_v54, %v12154_v63 }
0x1237   :  { %v23300_v17 = vpop.f32.mrf.mxu0 }
0x1238   :  { %v23304_v34 = vpop.f32.mrf.mxu1 }
0x1239   :  { %v23306_v18 = vpop.f32.mrf.mxu0  ;;  %v12577_v1 = vadd.f32 %v23304_v34, %v12360_v8 }
0x123a   :  { %v23311_v35 = vpop.f32.mrf.mxu1 }
0x123b   :  { %v23313_v28 = vpop.f32.mrf.mxu0 }
0x123c   :  { %v23315_v4 = vpop.f32.mrf.mxu1 }
0x123d   :  { %v23317_v12 = vpop.f32.mrf.mxu0 }
0x123e   :  { %v23324_v36 = vpop.f32.mrf.mxu1 }
0x123f   :  { %v23326_v51 = vpop.f32.mrf.mxu0 }
0x1240   :  { %v23328_v43 = vpop.f32.mrf.mxu1 }
0x1241   :  { %v23330_v47 = vpop.f32.mrf.mxu0 }
0x1242   :  { %v23335_v27 = vpop.f32.mrf.mxu1 }
0x1243   :  { %v23337_v19 = vpop.f32.mrf.mxu0 }
0x1244   :  { %v23341_v33 = vpop.f32.mrf.mxu1 }
0x1245   :  { %v23343_v14 = vpop.f32.mrf.mxu0 }
0x1246   :  { %v23348_v0 = vpop.f32.mrf.mxu1 }
0x1247   :  { %v23350_v25 = vpop.f32.mrf.mxu0 }
0x1248   :  { %v23352_v44 = vpop.f32.mrf.mxu1 }
0x1249   :  { %v23354_v39 = vpop.f32.mrf.mxu0 }
0x124a   :  { %v23359_v41 = vpop.f32.mrf.mxu1 }
0x124b   :  { %v23361_v22 = vpop.f32.mrf.mxu0 }
0x124c   :  { %v23363_v16 = vpop.f32.mrf.mxu1 }
0x124d   :  { %v23365_v48 = vpop.f32.mrf.mxu0 }
0x124e   :  { %24840 = vst [vmem:[#allocation109_spill] sm:$0xff] %v23365_v48  ;;  %v23370_v60 = vpop.f32.mrf.mxu1 }
0x124f   :  { %24841 = vst [vmem:[#allocation94_spill] sm:$0xff] %v23370_v60  ;;  %v23372_v13 = vpop.f32.mrf.mxu0 }
0x1250   :  { %24842 = vst [vmem:[#allocation71_spill] sm:$0xff] %v23372_v13  ;;  %v23374_v9 = vpop.f32.mrf.mxu1 }
0x1251   :  { %24843 = vst [vmem:[#allocation67_spill] sm:$0xff] %v23374_v9  ;;  %v23376_v10 = vpop.f32.mrf.mxu0  ;;  %v12164_v9 = vpop.permute.xlu0 %12163 }
0x1252   :  { %24844 = vst [vmem:[#allocation78_spill] sm:$0xff] %v23376_v10  ;;  %v23381_v2 = vpop.f32.mrf.mxu1 }
0x1253   :  { %24845 = vst [vmem:[#allocation77_spill] sm:$0xff] %v23381_v2  ;;  %v23383_v50 = vpop.f32.mrf.mxu0 }
0x1254   :  { %24846 = vst [vmem:[#allocation83_spill] sm:$0xff] %v23383_v50  ;;  %v23385_v45 = vpop.f32.mrf.mxu1 }
0x1255   :  { %24847 = vst [vmem:[#allocation92_spill] sm:$0xff] %v23385_v45  ;;  %v23387_v3 = vpop.f32.mrf.mxu0  ;;  %v12169_v50 = vpop.permute.xlu0 %12168 }
0x1256   :  { %24848 = vst [vmem:[#allocation68_spill] sm:$0xff] %v23387_v3  ;;  %v23392_v13 = vpop.f32.mrf.mxu1 }
0x1257   :  { %24849 = vst [vmem:[#allocation80_spill] sm:$0xff] %v23392_v13  ;;  %v23394_v10 = vpop.f32.mrf.mxu0 }
0x1258   :  { %24850 = vst [vmem:[#allocation45_spill] sm:$0xff] %v23394_v10  ;;  %v23396_v60 = vpop.f32.mrf.mxu1  ;;  %v12370_v10 = vadd.f32 %v23269_v7, %v23285_v37  ;;  %v12559_v37 = vadd.f32 %v23274_v6, %v12330_v26 }
0x1259   :  { %24851 = vst [vmem:[#allocation90_spill] sm:$0xff] %v23396_v60  ;;  %v23398_v2 = vpop.f32.mrf.mxu0 }
0x125a   :  { %24852 = vst [vmem:[#allocation85_spill] sm:$0xff] %v23398_v2  ;;  %v23403_v45 = vpop.f32.mrf.mxu1  ;;  %v12310_v2 = vadd.f32 %v23241_v5, %v23235_v52  ;;  %v13608_v5 = vld [vmem:[%s24155_s2 + $0x178] sm:$0xff]  ;;  %v12583_v6 = vadd.f32 %v23298_v31, %v12370_v10  ;;  %v12607_v31 = vadd.f32 %v23324_v36, %v12410_v62 }
0x125b   :  { %24853 = vst [vmem:[#allocation72_spill] sm:$0xff] %v23403_v45  ;;  %v23405_v3 = vpop.f32.mrf.mxu0  ;;  %13640 = vxpose.xlu0.b32.end [16/16] (narrow) %v13608_v5, 32 }
0x125c   :  { %24854 = vst [vmem:[#allocation75_spill] sm:$0xff] %v23405_v3  ;;  %v23407_v48 = vpop.f32.mrf.mxu1  ;;  %v12547_v21 = vadd.f32 %v23258_v53, %v12310_v2  ;;  %v12380_v53 = vadd.f32 %v23289_v11, %v23302_v20  ;;  %v12420_v20 = vadd.f32 %v23313_v28, %v12159_v59  ;;  %v24858_v59 = vld [vmem:[#allocation94_spill] sm:$0xff]  ;;  %v24864_v8 = vld [vmem:[#allocation92_spill] sm:$0xff] }
0x125d   :  { %24855 = vst [vmem:[#allocation26_spill] sm:$0xff] %v23407_v48  ;;  %v23409_v13 = vpop.f32.mrf.mxu0  ;;  %v12350_v48 = vadd.f32 %v23256_v23, %v23252_v58  ;;  %v12340_v58 = vadd.f32 %v23263_v46, %v23243_v57  ;;  %v12390_v23 = vadd.f32 %v23280_v42, %v23322_v29  ;;  %v12430_v46 = vadd.f32 %v23306_v18, %v12164_v9 }
0x125e   :  { %24856 = vst [vmem:[#allocation52_spill] sm:$0xff] %v23409_v13  ;;  %v23416_v60 = vpop.f32.mrf.mxu1  ;;  %v12300_v13 = vadd.f32 %v23245_v24, %v23233_v61  ;;  %v12174_v61 = vpop.permute.xlu0 %12173  ;;  %v12718_v30 = vadd.f32 %v23330_v47, %v12547_v21  ;;  %v12613_v63 = vadd.f32 %v23341_v33, %v12420_v20 }
0x125f   :  { %v23420_v45 = vpop.f32.mrf.mxu0  ;;  %v12571_v57 = vadd.f32 %v23287_v40, %v12350_v48  ;;  %v12450_v38 = vadd.f32 %v23317_v12, %v12174_v61  ;;  %v12400_v40 = vadd.f32 %v23300_v17, %v23339_v49  ;;  %v12595_v11 = vadd.f32 %v23311_v35, %v12390_v23 }
0x1260   :  { %v23424_v3 = vpop.f32.mrf.mxu1  ;;  %v12541_v7 = vadd.f32 %v23265_v32, %v12300_v13  ;;  %v12565_v32 = vadd.f32 %v23291_v56, %v12340_v58  ;;  %v12589_v56 = vadd.f32 %v23315_v4, %v12380_v53  ;;  %v12901_v12 = vadd.f32 %v23359_v41, %v12718_v30  ;;  %v24863_v58 = vld [vmem:[#allocation83_spill] sm:$0xff]  ;;  %v24868_v30 = vld [vmem:[#allocation90_spill] sm:$0xff] }
0x1261   :  { %v17223_v52 = vpop.f32.mrf.mxu0  ;;  %v12601_v34 = vadd.f32 %v23328_v43, %v12400_v40  ;;  %v12440_v17 = vadd.f32 %v23326_v51, %v12169_v50  ;;  %v12619_v35 = vadd.f32 %v23335_v27, %v12430_v46  ;;  %v12732_v49 = vadd.f32 %v23343_v14, %v12559_v37  ;;  %v24857_v27 = vld [vmem:[#allocation109_spill] sm:$0xff] }
0x1262   :  { %v23440_v24 = vpop.f32.mrf.mxu1  ;;  %v12711_v29 = vadd.f32 %v23337_v19, %v12541_v7  ;;  %v12631_v36 = vadd.f32 %v23348_v0, %v12450_v38  ;;  %v13102_v19 = vadd.f32 %v17223_v52, %v12901_v12  ;;  %v12725_v41 = vadd.f32 %v23350_v25, %v12553_v55  ;;  %v24859_v0 = vld [vmem:[#allocation71_spill] sm:$0xff]  ;;  %v24861_v25 = vld [vmem:[#allocation78_spill] sm:$0xff]  ;;  %v24867_v46 = vld [vmem:[#allocation45_spill] sm:$0xff] }
0x1263   :  { %v13095_v2 = vpop.f32.mrf.mxu0  ;;  %v12746_v43 = vadd.f32 %v23354_v39, %v12571_v57  ;;  %v12739_v33 = vadd.f32 %v23361_v22, %v12565_v32  ;;  %v12625_v50 = vadd.f32 %v23352_v44, %v12440_v17  ;;  %v12760_v13 = vadd.f32 %v24857_v27, %v12583_v6  ;;  %v24860_v52 = vld [vmem:[#allocation67_spill] sm:$0xff]  ;;  %v24862_v39 = vld [vmem:[#allocation77_spill] sm:$0xff]  ;;  %v24866_v57 = vld [vmem:[#allocation80_spill] sm:$0xff] }
0x1264   :  { %v23452_v42 = vpop.f32.mrf.mxu1  ;;  %v12893_v4 = vadd.f32 %v23363_v16, %v12711_v29  ;;  %v12917_v9 = vadd.f32 %v24858_v59, %v12732_v49  ;;  %v12753_v26 = vadd.f32 %v24859_v0, %v12577_v1  ;;  %v12909_v5 = vadd.f32 %v24860_v52, %v12725_v41  ;;  %v24869_v20 = vld [vmem:[#allocation85_spill] sm:$0xff]  ;;  %v24870_v29 = vld [vmem:[#allocation72_spill] sm:$0xff]  ;;  %v24871_v17 = vld [vmem:[#allocation75_spill] sm:$0xff] }
0x1265   :  { %v17226_v54 = vpop.f32.mrf.mxu0  ;;  %v12774_v15 = vadd.f32 %v24861_v25, %v12595_v11  ;;  %v12933_v21 = vadd.f32 %v24862_v39, %v12746_v43  ;;  %v12767_v44 = vadd.f32 %v24863_v58, %v12589_v56  ;;  %v12925_v62 = vadd.f32 %v24864_v8, %v12739_v33 }
0x1266   :  { %v23463_v18 = vpop.f32.mrf.mxu1  ;;  %v13096_v14 = vadd.f32 %v13095_v2, %v12893_v4  ;;  %v13114_v23 = vadd.f32 %v17226_v54, %v12917_v9  ;;  %v24865_v2 = vld [vmem:[#allocation68_spill] sm:$0xff]  ;;  %v12949_v53 = vadd.f32 %v24866_v57, %v12760_v13  ;;  %v12781_v32 = vadd.f32 %v24867_v46, %v12601_v34 }
0x1267   :  { %v13107_v47 = vpop.f32.mrf.mxu0  ;;  %v12788_v55 = vadd.f32 %v24865_v2, %v12607_v31  ;;  %v12941_v38 = vadd.f32 %v24868_v30, %v12753_v26  ;;  %v12802_v56 = vadd.f32 %v24869_v20, %v12619_v35  ;;  %v12965_v12 = vadd.f32 %v24870_v29, %v12774_v15  ;;  %v24873_v13 = vld [vmem:[#allocation52_spill] sm:$0xff] }
0x1268   :  { %v23473_v28 = vpop.f32.mrf.mxu1  ;;  %v12795_v31 = vadd.f32 %v24871_v17, %v12613_v63  ;;  %v13108_v49 = vadd.f32 %v13107_v47, %v12909_v5  ;;  %v12816_v59 = vadd.f32 %v24873_v13, %v12631_v36  ;;  %v12809_v52 = vadd.f32 %v23420_v45, %v12625_v50 }
0x1269   :  { %v17229_v48 = vpop.f32.mrf.mxu0  ;;  %v12981_v35 = vadd.f32 %v23416_v60, %v12788_v55  ;;  %v23521_v5 = vadd.f32 %v23424_v3, %v12781_v32 }
0x126a   :  { %v17255_v51 = vpop.f32.mrf.mxu1 }
0x126b   :  { %v23484_v10 = vadd.f32 %v17255_v51, %v13102_v19  ;;  %v13119_v16 = vpop.f32.mrf.mxu0  ;;  %v13126_v19 = vadd.f32 %v17229_v48, %v12933_v21  ;;  %v24872_v51 = vld [vmem:[#allocation26_spill] sm:$0xff] }
0x126c   :  { %v13260_v22 = vpop.f32.mrf.mxu1  ;;  %v12957_v27 = vadd.f32 %v24872_v51, %v12767_v44  ;;  %v13120_v36 = vadd.f32 %v13119_v16, %v12925_v62  ;;  %v23527_v44 = vadd.f32 %v23440_v24, %v12802_v56  ;;  %v12989_v62 = vadd.f32 %v23452_v42, %v12795_v31 }
0x126d   :  { %v13371_v61 = vmul.f32 0.044715, %v23484_v10  ;;  %v23492_v7 = vadd.f32 %v13260_v22, %v13096_v14  ;;  %v17232_v37 = vpop.f32.mrf.mxu0  ;;  %v23545_v56 = vadd.f32 %v23463_v18, %v12816_v59 }
0x126e   :  { %v17258_v6 = vpop.f32.mrf.mxu1  ;;  %v13138_v21 = vadd.f32 %v17232_v37, %v12949_v53 }
0x126f   :  { %v13387_v1 = vmul.f32 %v13371_v61, %v23484_v10  ;;  %v13370_v54 = vmul.f32 0.044715, %v23492_v7  ;;  %v23501_v40 = vadd.f32 %v17258_v6, %v13114_v23  ;;  %v13131_v11 = vpop.f32.mrf.mxu0 }
0x1270   :  { %v13272_v4 = vpop.f32.mrf.mxu1  ;;  %v13132_v46 = vadd.f32 %v13131_v11, %v12941_v38 }
0x1271   :  { %v13403_v34 = vmul.f32 %v13387_v1, %v23484_v10  ;;  %v13386_v41 = vmul.f32 %v13370_v54, %v23492_v7  ;;  %v13373_v43 = vmul.f32 0.044715, %v23501_v40  ;;  %v17235_v33 = vpop.f32.mrf.mxu0  ;;  %v23512_v9 = vadd.f32 %v13272_v4, %v13108_v49 }
0x1272   :  { %v17261_v14 = vpop.f32.mrf.mxu1  ;;  %v13150_v30 = vadd.f32 %v17235_v33, %v12965_v12  ;;  %v13005_v4 = vadd.f32 %v23473_v28, %v12809_v52  ;;  %v13355_v28 = vmul.f32 0.5, %v23484_v10  ;;  %v13354_v52 = vmul.f32 0.5, %v23492_v7 }
0x1273   :  { %v13419_v47 = vadd.f32 %v13403_v34, %v23484_v10  ;;  %v13402_v63 = vmul.f32 %v13386_v41, %v23492_v7  ;;  %v13389_v48 = vmul.f32 %v13373_v43, %v23501_v40  ;;  %v23517_v0 = vadd.f32 %v17261_v14, %v13126_v19  ;;  %v13143_v26 = vpop.f32.mrf.mxu0 }
0x1274   :  { %v13372_v60 = vmul.f32 0.044715, %v23512_v9  ;;  %v13284_v25 = vpop.f32.mrf.mxu1  ;;  %v13144_v19 = vadd.f32 %v13143_v26, %v12957_v27 }
0x1275   :  { %v13435_v15 = vmul.f32 0.7978846, %v13419_v47  ;;  %v13418_v39 = vadd.f32 %v13402_v63, %v23492_v7  ;;  %v13405_v22 = vmul.f32 %v13389_v48, %v23501_v40  ;;  %v17238_v58 = vpop.f32.mrf.mxu0  ;;  %v13375_v45 = vmul.f32 0.044715, %v23517_v0 }
0x1276   :  { %v13388_v23 = vmul.f32 %v13372_v60, %v23512_v9  ;;  %v23531_v3 = vadd.f32 %v13284_v25, %v13120_v36  ;;  %v17264_v50 = vpop.f32.mrf.mxu1  ;;  %v13162_v33 = vadd.f32 %v17238_v58, %v12981_v35 }
0x1277   :  { %17637 = vtanh.f32 %v13435_v15  ;;  %v13434_v16 = vmul.f32 0.7978846, %v13418_v39  ;;  %v13421_v61 = vadd.f32 %v13405_v22, %v23501_v40  ;;  %v23534_v8 = vadd.f32 %v17264_v50, %v13138_v21  ;;  %v13155_v37 = vpop.f32.mrf.mxu0 }
0x1278   :  { %v13404_v2 = vmul.f32 %v13388_v23, %v23512_v9  ;;  %v13391_v24 = vmul.f32 %v13375_v45, %v23517_v0  ;;  %v13374_v55 = vmul.f32 0.044715, %v23531_v3  ;;  %v13296_v57 = vpop.f32.mrf.mxu1  ;;  %v13156_v25 = vadd.f32 %v13155_v37, %v23521_v5 }
0x1279   :  { %17639 = vtanh.f32 %v13434_v16  ;;  %v13437_v53 = vmul.f32 0.7978846, %v13421_v61  ;;  %v13377_v32 = vmul.f32 0.044715, %v23534_v8  ;;  %v17241_v42 = vpop.f32.mrf.mxu0  ;;  %v23548_v17 = vadd.f32 %v13296_v57, %v13132_v46 }
0x127a   :  { %v13420_v6 = vadd.f32 %v13404_v2, %v23512_v9  ;;  %v13407_v1 = vmul.f32 %v13391_v24, %v23517_v0  ;;  %v13390_v54 = vmul.f32 %v13374_v55, %v23531_v3  ;;  %v17267_v20 = vpop.f32.mrf.mxu1  ;;  %v13357_v22 = vmul.f32 0.5, %v23501_v40 }
0x127b   :  { %17641 = vtanh.f32 %v13437_v53  ;;  %v13393_v29 = vmul.f32 %v13377_v32, %v23534_v8  ;;  %v23552_v12 = vadd.f32 %v17267_v20, %v13150_v30  ;;  %v13376_v18 = vmul.f32 0.044715, %v23548_v17  ;;  %v13167_v51 = vpop.f32.mrf.mxu0 }
0x127c   :  { %v13436_v38 = vmul.f32 0.7978846, %v13420_v6  ;;  %v13423_v11 = vadd.f32 %v13407_v1, %v23517_v0  ;;  %v13406_v31 = vmul.f32 %v13390_v54, %v23531_v3  ;;  %v13308_v49 = vpop.f32.mrf.mxu1  ;;  %v13174_v7 = vadd.f32 %v17241_v42, %v23527_v44 }
0x127d   :  { %v13409_v34 = vmul.f32 %v13393_v29, %v23534_v8  ;;  %v13392_v14 = vmul.f32 %v13376_v18, %v23548_v17  ;;  %v13379_v47 = vmul.f32 0.044715, %v23552_v12  ;;  %v23561_v63 = vadd.f32 %v13308_v49, %v13144_v19  ;;  %v17244_v39 = vpop.f32.mrf.mxu0 }
0x127e   :  { %17643 = vtanh.f32 %v13436_v38  ;;  %v13439_v41 = vmul.f32 0.7978846, %v13423_v11  ;;  %v13422_v43 = vadd.f32 %v13406_v31, %v23531_v3  ;;  %v17270_v13 = vpop.f32.mrf.mxu1  ;;  %v13168_v50 = vadd.f32 %v13167_v51, %v12989_v62 }
0x127f   :  { %v13425_v59 = vadd.f32 %v13409_v34, %v23534_v8  ;;  %v23564_v48 = vadd.f32 %v17270_v13, %v13162_v33  ;;  %v13408_v36 = vmul.f32 %v13392_v14, %v23548_v17  ;;  %v13395_v60 = vmul.f32 %v13379_v47, %v23552_v12  ;;  %v13179_v62 = vpop.f32.mrf.mxu0 }
0x1280   :  { %17645 = vtanh.f32 %v13439_v41  ;;  %v13438_v27 = vmul.f32 0.7978846, %v13422_v43  ;;  %v13320_v26 = vpop.f32.mrf.mxu1  ;;  %v13378_v15 = vmul.f32 0.044715, %v23561_v63  ;;  %v13356_v42 = vmul.f32 0.5, %v23512_v9 }
0x1281   :  { %v13441_v35 = vmul.f32 0.7978846, %v13425_v59  ;;  %v13381_v10 = vmul.f32 0.044715, %v23564_v48  ;;  %v13424_v58 = vadd.f32 %v13408_v36, %v23548_v17  ;;  %v13411_v23 = vmul.f32 %v13395_v60, %v23552_v12 }
0x1282   :  { %17647 = vtanh.f32 %v13438_v27  ;;  %v17273_v21 = vpop.f32.mrf.mxu1  ;;  %v13394_v16 = vmul.f32 %v13378_v15, %v23561_v63  ;;  %v23578_v61 = vadd.f32 %v13320_v26, %v13156_v25  ;;  %v13186_v31 = vadd.f32 %v17244_v39, %v23545_v56 }
0x1283   :  { %v13397_v5 = vmul.f32 %v13381_v10, %v23564_v48  ;;  %17649 = vtanh.f32 %v13441_v35  ;;  %v13440_v2 = vmul.f32 0.7978846, %v13424_v58  ;;  %v13427_v24 = vadd.f32 %v13411_v23, %v23552_v12 }
0x1284   :  { %v17638_v45 = vpop.eup %17637  ;;  %v13332_v37 = vpop.f32.mrf.mxu1  ;;  %v23581_v40 = vadd.f32 %v17273_v21, %v13174_v7  ;;  %v13410_v44 = vmul.f32 %v13394_v16, %v23561_v63  ;;  %v13380_v46 = vmul.f32 0.044715, %v23578_v61  ;;  %v13180_v49 = vadd.f32 %v13179_v62, %v13005_v4 }
0x1285   :  { %v13467_v57 = vadd.f32 1.0, %v17638_v45  ;;  %v13413_v53 = vmul.f32 %v13397_v5, %v23564_v48  ;;  %17651 = vtanh.f32 %v13440_v2  ;;  %v13443_v6 = vmul.f32 0.7978846, %v13427_v24 }
0x1286   :  { %v17640_v55 = vpop.eup %17639  ;;  %v23586_v30 = vadd.f32 %v13332_v37, %v13168_v50  ;;  %v17276_v1 = vpop.f32.mrf.mxu1  ;;  %v13426_v20 = vadd.f32 %v13410_v44, %v23561_v63  ;;  %v13396_v38 = vmul.f32 %v13380_v46, %v23578_v61  ;;  %v13383_v19 = vmul.f32 0.044715, %v23581_v40 }
0x1287   :  { %v13466_v32 = vadd.f32 1.0, %v17640_v55  ;;  %v13429_v29 = vadd.f32 %v13413_v53, %v23564_v48  ;;  %17653 = vtanh.f32 %v13443_v6  ;;  %v23597_v9 = vmul.f32 %v13467_v57, %v13355_v28 }
0x1288   :  { %v17642_v54 = vpop.eup %17641  ;;  %v13442_v34 = vmul.f32 0.7978846, %v13426_v20  ;;  %v13412_v41 = vmul.f32 %v13396_v38, %v23578_v61  ;;  %v13399_v51 = vmul.f32 %v13383_v19, %v23581_v40  ;;  %v13382_v13 = vmul.f32 0.044715, %v23586_v30  ;;  %v13344_v59 = vpop.f32.mrf.mxu1 }
0x1289   :  { %v23592_v11 = vmul.f32 %v13466_v32, %v13354_v52  ;;  %v13445_v18 = vmul.f32 0.7978846, %v13429_v29  ;;  %v13469_v33 = vadd.f32 1.0, %v17642_v54  ;;  %v23602_v4 = vadd.f32 %v17276_v1, %v13186_v31 }
0x128a   :  { %17655 = vtanh.f32 %v13442_v34  ;;  %v13428_v56 = vadd.f32 %v13412_v41, %v23578_v61  ;;  %v13358_v26 = vmul.f32 0.5, %v23531_v3  ;;  %v13415_v28 = vmul.f32 %v13399_v51, %v23581_v40 }
0x128b   :  { %v17644_v43 = vpop.eup %17643  ;;  %v13498_v27 = vadd.f32 %v23597_v9, %v23592_v11  ;;  %v13398_v52 = vmul.f32 %v13382_v13, %v23586_v30  ;;  %17657 = vtanh.f32 %v13445_v18  ;;  %v23611_v60 = vadd.f32 %v13344_v59, %v13180_v49 }
0x128c   :  { %v13468_v14 = vadd.f32 1.0, %v17644_v43  ;;  %v13444_v36 = vmul.f32 0.7978846, %v13428_v56  ;;  %v23613_v15 = vmul.f32 %v13469_v33, %v13357_v22  ;;  %v13431_v39 = vadd.f32 %v13415_v28, %v23581_v40 }
0x128d   :  { %v17646_v47 = vpop.eup %17645  ;;  %v13414_v10 = vmul.f32 %v13398_v52, %v23586_v30  ;;  %v13385_v21 = vmul.f32 0.044715, %v23602_v4  ;;  %v13359_v22 = vmul.f32 0.5, %v23517_v0  ;;  %v13384_v2 = vmul.f32 0.044715, %v23611_v60 }
0x128e   :  { %v23609_v35 = vmul.f32 %v13468_v14, %v13356_v42  ;;  %v13471_v58 = vadd.f32 1.0, %v17646_v47  ;;  %17659 = vtanh.f32 %v13444_v36  ;;  %v13447_v23 = vmul.f32 0.7978846, %v13431_v39 }
0x128f   :  { %v17648_v25 = vpop.eup %17647  ;;  %v13430_v45 = vadd.f32 %v13414_v10, %v23586_v30  ;;  %v13401_v50 = vmul.f32 %v13385_v21, %v23602_v4  ;;  %v13360_v24 = vmul.f32 0.5, %v23548_v17  ;;  %v13400_v46 = vmul.f32 %v13384_v2, %v23611_v60 }
0x1290   :  { %v13499_v3 = vadd.f32 %v13498_v27, %v23609_v35  ;;  %v13470_v7 = vadd.f32 1.0, %v17648_v25  ;;  %v17650_v16 = vpop.eup %17649  ;;  %v23628_v53 = vmul.f32 %v13471_v58, %v13359_v22  ;;  %17661 = vtanh.f32 %v13447_v23 }
0x1291   :  { %v13446_v55 = vmul.f32 0.7978846, %v13430_v45  ;;  %v13417_v57 = vmul.f32 %v13401_v50, %v23602_v4  ;;  %v13473_v0 = vadd.f32 1.0, %v17650_v16  ;;  %v13416_v17 = vmul.f32 %v13400_v46, %v23611_v60 }
0x1292   :  { %v23622_v5 = vmul.f32 %v13470_v7, %v13358_v26  ;;  %v13500_v37 = vadd.f32 %v13499_v3, %v23613_v15  ;;  %v17652_v44 = vpop.eup %17651  ;;  %v13361_v42 = vmul.f32 0.5, %v23534_v8  ;;  %v13362_v34 = vmul.f32 0.5, %v23561_v63 }
0x1293   :  { %v13472_v32 = vadd.f32 1.0, %v17652_v44  ;;  %17663 = vtanh.f32 %v13446_v55  ;;  %v13433_v6 = vadd.f32 %v13417_v57, %v23602_v4  ;;  %v13432_v38 = vadd.f32 %v13416_v17, %v23611_v60 }
0x1294   :  { %v13501_v62 = vadd.f32 %v13500_v37, %v23622_v5  ;;  %v17654_v54 = vpop.eup %17653  ;;  %v23639_v49 = vmul.f32 %v13473_v0, %v13361_v42  ;;  %v13363_v8 = vmul.f32 0.5, %v23552_v12  ;;  %v13364_v14 = vmul.f32 0.5, %v23578_v61 }
0x1295   :  { %v23636_v20 = vmul.f32 %v13472_v32, %v13360_v24  ;;  %v13449_v29 = vmul.f32 0.7978846, %v13433_v6  ;;  %v13475_v18 = vadd.f32 1.0, %v17654_v54  ;;  %v13448_v43 = vmul.f32 0.7978846, %v13432_v38 }
0x1296   :  { %v13502_v1 = vadd.f32 %v13501_v62, %v23628_v53  ;;  %v13365_v26 = vmul.f32 0.5, %v23564_v48  ;;  %v13366_v61 = vmul.f32 0.5, %v23586_v30  ;;  %v13367_v45 = vmul.f32 0.5, %v23581_v40 }
0x1297   :  { %v17656_v31 = vpop.eup %17655  ;;  %17665 = vtanh.f32 %v13449_v29  ;;  %v23648_v56 = vmul.f32 %v13475_v18, %v13363_v8  ;;  %v13368_v55 = vmul.f32 0.5, %v23611_v60  ;;  %v13369_v46 = vmul.f32 0.5, %v23602_v4 }
0x1298   :  { %v13503_v19 = vadd.f32 %v13502_v1, %v23636_v20  ;;  %v13474_v41 = vadd.f32 1.0, %v17656_v31  ;;  %v17658_v33 = vpop.eup %17657  ;;  %17667 = vtanh.f32 %v13448_v43 }
0x1299   :  { %v13477_v63 = vadd.f32 1.0, %v17658_v33 }
0x129a   :  { %v13504_v51 = vadd.f32 %v13503_v19, %v23639_v49  ;;  %v23645_v13 = vmul.f32 %v13474_v41, %v13362_v34 }
0x129b   :  { %v17660_v59 = vpop.eup %17659  ;;  %v23655_v25 = vmul.f32 %v13477_v63, %v13365_v26  ;;  %v13641_v10 = vpop.trf.xlu0 }
0x129c   :  { %v13505_v47 = vadd.f32 %v13504_v51, %v23645_v13  ;;  %v13476_v27 = vadd.f32 1.0, %v17660_v59  ;;  %v23659_v3 = vand.u32 4294901760, %v13641_v10 }
0x129d   :  { %v17662_v36 = vpop.eup %17661 }
0x129e   :  { %v23652_v28 = vmul.f32 %v13476_v27, %v13364_v14  ;;  %v13506_v52 = vadd.f32 %v13505_v47, %v23648_v56  ;;  %v13479_v58 = vadd.f32 1.0, %v17662_v36  ;;  %v23663_v23 = vsub.f32 %v13641_v10, %v23659_v3  ;;  %17347 = vmatprep.mubr.f32.mxu1 %v23659_v3 }
0x12a0   :  { %v17664_v12 = vpop.eup %17663  ;;  %v13507_v39 = vadd.f32 %v13506_v52, %v23652_v28  ;;  %v24398_v22 = vand.u32 4294901760, %v23663_v23  ;;  %v13495_v37 = vmul.f32 %v13479_v58, %v13367_v45 }
0x12a1   :  { %v13478_v21 = vadd.f32 1.0, %v17664_v12 }
0x12a2   :  { %v13508_v7 = vadd.f32 %v13507_v39, %v23655_v25  ;;  %v13741_v2 = vsub.f32 %v23663_v23, %v24398_v22 }
0x12a3   :  { %v13494_v48 = vmul.f32 %v13478_v21, %v13366_v61 }
0x12a4   :  { %v17666_v50 = vpop.eup %17665  ;;  %v13742_v62 = vand.u32 4294901760, %v13741_v2 }
0x12a5   :  { %v13509_v16 = vadd.f32 %v13508_v7, %v13494_v48  ;;  %v17668_v30 = vpop.eup %17667  ;;  %v13481_v24 = vadd.f32 1.0, %v17666_v50 }
0x12a6   :  { %v13480_v57 = vadd.f32 1.0, %v17668_v30  ;;  %17309 = vmatprep.mubr.f32.mxu0 %v13742_v62 }
0x12a7   :  { %v13510_v44 = vadd.f32 %v13509_v16, %v13495_v37  ;;  %v13497_v40 = vmul.f32 %v13481_v24, %v13369_v46 }
0x12a8   :  { %v13496_v0 = vmul.f32 %v13480_v57, %v13368_v55 }
0x12aa   :  { %v13511_v32 = vadd.f32 %v13510_v44, %v13496_v0 }
0x12ac   :  { %v13512_v6 = vadd.f32 %v13511_v32, %v13497_v40 }
0x12ae   :  { %v13513_v1 = vrot.slane %v13512_v6, 4 }
0x12b0   :  { %v13514_v17 = vadd.f32 %v13513_v1, %v13512_v6 }
0x12b2   :  { %v13515_v54 = vrot.slane %v13514_v17, 2 }
0x12b4   :  { %v13516_v42 = vadd.f32 %v13515_v54, %v13514_v17 }
0x12b6   :  { %v13517_v29 = vrot.slane %v13516_v42, 1 }
0x12b8   :  { %v13518_v38 = vadd.f32 %v13517_v29, %v13516_v42  ;;  %v17766_v42 = vld [vmem:[%s24156_s1 + $0x8] sm:$0xff]  ;;  %v17781_v29 = vmov 8  }
0x12b9   :  { %17534 = vset.pattern.permute.xlu0 %v17781_v29 }
0x12ba   :  { %v13520_v31 = vmul.f32 0.0078125, %v13518_v38  ;;  %v23730_v38 = vld [vmem:[%s24156_s1 + $0x10] sm:$0xff] }
0x12bb   :  { %24874 = vst [vmem:[#allocation12_spill] sm:$0xff] %v23730_v38 }
0x12bc   :  { %v23674_v19 = vsub.f32 %v23592_v11, %v13520_v31  ;;  %v23677_v60 = vsub.f32 %v23597_v9, %v13520_v31  ;;  %v23680_v4 = vsub.f32 %v23609_v35, %v13520_v31  ;;  %v23687_v41 = vsub.f32 %v23613_v15, %v13520_v31 }
0x12bd   :  { %v23690_v43 = vsub.f32 %v23622_v5, %v13520_v31  ;;  %v23695_v33 = vsub.f32 %v23628_v53, %v13520_v31  ;;  %v23700_v8 = vsub.f32 %v23636_v20, %v13520_v31  ;;  %v23705_v5 = vsub.f32 %v23639_v49, %v13520_v31 }
0x12be   :  { %v13537_v34 = vmul.f32 %v23674_v19, %v23674_v19  ;;  %v13538_v18 = vmul.f32 %v23677_v60, %v23677_v60  ;;  %v13539_v11 = vmul.f32 %v23680_v4, %v23680_v4  ;;  %v13540_v35 = vmul.f32 %v23687_v41, %v23687_v41 }
0x12bf   :  { %v13541_v15 = vmul.f32 %v23690_v43, %v23690_v43  ;;  %v13542_v14 = vmul.f32 %v23695_v33, %v23695_v33  ;;  %v23710_v53 = vsub.f32 %v23645_v13, %v13520_v31  ;;  %v13543_v63 = vmul.f32 %v23700_v8, %v23700_v8 }
0x12c0   :  { %v13553_v9 = vadd.f32 %v13538_v18, %v13537_v34  ;;  %v13530_v20 = vsub.f32 %v23648_v56, %v13520_v31  ;;  %v13544_v26 = vmul.f32 %v23705_v5, %v23705_v5  ;;  %v13531_v49 = vsub.f32 %v23652_v28, %v13520_v31  ;;  %v23738_v34 = vld [vmem:[%s24156_s1 + $0x18] sm:$0xff] }
0x12c1   :  { %v13545_v36 = vmul.f32 %v23710_v53, %v23710_v53  ;;  %v13532_v39 = vsub.f32 %v23655_v25, %v13520_v31  ;;  %v13533_v61 = vsub.f32 %v13494_v48, %v13520_v31  ;;  %v13534_v7 = vsub.f32 %v13495_v37, %v13520_v31  ;;  %24875 = vst [vmem:[#allocation107_spill] sm:$0xff] %v23738_v34 }
0x12c2   :  { %v13554_v51 = vadd.f32 %v13553_v9, %v13539_v11  ;;  %v13546_v13 = vmul.f32 %v13530_v20, %v13530_v20  ;;  %v13547_v21 = vmul.f32 %v13531_v49, %v13531_v49  ;;  %v13535_v50 = vsub.f32 %v13496_v0, %v13520_v31 }
0x12c3   :  { %v13548_v45 = vmul.f32 %v13532_v39, %v13532_v39  ;;  %v13549_v16 = vmul.f32 %v13533_v61, %v13533_v61  ;;  %v13536_v2 = vsub.f32 %v13497_v40, %v13520_v31  ;;  %v13550_v24 = vmul.f32 %v13534_v7, %v13534_v7  ;;  %v17765_v40 = vld [vmem:[%s24156_s1] sm:$0xff] }
0x12c4   :  { %v13555_v59 = vadd.f32 %v13554_v51, %v13540_v35  ;;  %v13551_v55 = vmul.f32 %v13535_v50, %v13535_v50  ;;  %v17780_v0 = vmov 7  }
0x12c5   :  { %v13552_v44 = vmul.f32 %v13536_v2, %v13536_v2  ;;  %17532 = vset.pattern.permute.xlu1 %v17780_v0 }
0x12c6   :  { %v13556_v47 = vadd.f32 %v13555_v59, %v13541_v15  ;;  %13610 = vperm.xlu1 %17532, %v17765_v40  }
0x12c8   :  { %v13557_v27 = vadd.f32 %v13556_v47, %v13542_v14 }
0x12ca   :  { %v13558_v52 = vadd.f32 %v13557_v27, %v13543_v63  ;;  %13614 = vperm.xlu1 %17532, %v17766_v42  }
0x12cc   :  { %v13559_v12 = vadd.f32 %v13558_v52, %v13544_v26 }
0x12ce   :  { %v13560_v10 = vadd.f32 %v13559_v12, %v13545_v36  ;;  %13618 = vperm.xlu1 %17532, %v23730_v38  }
0x12d0   :  { %v13561_v58 = vadd.f32 %v13560_v10, %v13546_v13 }
0x12d2   :  { %v13562_v56 = vadd.f32 %v13561_v58, %v13547_v21  ;;  %13622 = vperm.xlu1 %17532, %v23738_v34  }
0x12d4   :  { %v13563_v30 = vadd.f32 %v13562_v56, %v13548_v45 }
0x12d6   :  { %v13564_v28 = vadd.f32 %v13563_v30, %v13549_v16  ;;  %17533 = vset.pattern.permute.xlu1 %v17781_v29 }
0x12d7   :  { %14428 = vperm.xlu1 %17533, %v17765_v40  }
0x12d8   :  { %v13565_v57 = vadd.f32 %v13564_v28, %v13550_v24 }
0x12da   :  { %v13566_v62 = vadd.f32 %v13565_v57, %v13551_v55 }
0x12db   :  { %14432 = vperm.xlu1 %17533, %v17766_v42  }
0x12dc   :  { %v13567_v46 = vadd.f32 %v13566_v62, %v13552_v44 }
0x12de   :  { %v13568_v25 = vrot.slane %v13567_v46, 4 }
0x12e0   :  { %v13569_v32 = vadd.f32 %v13568_v25, %v13567_v46 }
0x12e2   :  { %v13570_v6 = vrot.slane %v13569_v32, 2 }
0x12e4   :  { %v13571_v48 = vadd.f32 %v13570_v6, %v13569_v32 }
0x12e6   :  { %v13572_v1 = vrot.slane %v13571_v48, 1 }
0x12e8   :  { %v13573_v17 = vadd.f32 %v13572_v1, %v13571_v48 }
0x12ea   :  { %v13574_v37 = vmul.f32 0.0078125, %v13573_v17 }
0x12ec   :  { %v13575_v54 = vadd.f32 1e-05, %v13574_v37 }
0x12ee   :  { %17669 = vrsqrt.f32 %v13575_v54 }
0x12fb   :  { %v23733_v31 = vpop.eup %17669 }
0x12fc   :  { %v13591_v18 = vmul.f32 %v23733_v31, %v13535_v50  ;;  %v13592_v11 = vmul.f32 %v23733_v31, %v13536_v2  ;;  %v13590_v9 = vmul.f32 %v23733_v31, %v13534_v7  ;;  %v13589_v35 = vmul.f32 %v23733_v31, %v13533_v61  ;;  %v13642_v7 = vpop.trf.xlu0 }
0x12fd   :  { %v13588_v51 = vmul.f32 %v23733_v31, %v13532_v39  ;;  %v13587_v15 = vmul.f32 %v23733_v31, %v13531_v49  ;;  %v13586_v59 = vmul.f32 %v23733_v31, %v13530_v20  ;;  %v13585_v36 = vmul.f32 %v23733_v31, %v23710_v53 }
0x12fe   :  { %v23748_v14 = vand.u32 4294901760, %v13591_v18  ;;  %v23750_v47 = vand.u32 4294901760, %v13592_v11  ;;  %v23752_v63 = vand.u32 4294901760, %v13590_v9  ;;  %v23754_v27 = vand.u32 4294901760, %v13589_v35 }
0x12ff   :  { %v23756_v26 = vand.u32 4294901760, %v13588_v51  ;;  %v23758_v52 = vand.u32 4294901760, %v13587_v15  ;;  %v23776_v13 = vand.u32 4294901760, %v13586_v59  ;;  %v13584_v58 = vmul.f32 %v23733_v31, %v23705_v5 }
0x1300   :  { %17277 = vmatprep.subr.mxu0 %v23750_v47  ;;  %v23764_v20 = vsub.f32 %v13592_v11, %v23750_v47  ;;  %v23767_v49 = vsub.f32 %v13591_v18, %v23748_v14  ;;  %v23770_v12 = vsub.f32 %v13590_v9, %v23752_v63  ;;  %v23773_v39 = vsub.f32 %v13589_v35, %v23754_v27  ;;  %v13643_v32 = vpop.trf.xlu0 }
0x1301   :  { %17278 = vmatpush3.msra.mxu0 %v23750_v47  ;;  %v23779_v53 = vsub.f32 %v13588_v51, %v23756_v26  ;;  %v23798_v56 = vsub.f32 %v13587_v15, %v23758_v52  ;;  %v23805_v30 = vand.u32 4294901760, %v13585_v36  ;;  %v13583_v5 = vmul.f32 %v23733_v31, %v23700_v8 }
0x1302   :  { %17279 = vmatprep.subr.mxu0 %v23748_v14  ;;  %v23783_v10 = vand.u32 4294901760, %v23764_v20  ;;  %v23786_v61 = vand.u32 4294901760, %v23767_v49  ;;  %v23789_v21 = vand.u32 4294901760, %v23770_v12  ;;  %v23795_v45 = vand.u32 4294901760, %v23773_v39 }
0x1303   :  { %17280 = vmatpush3.msra.mxu0 %v23748_v14  ;;  %v23811_v2 = vand.u32 4294901760, %v23779_v53  ;;  %v23814_v24 = vsub.f32 %v13586_v59, %v23776_v13  ;;  %v23819_v57 = vand.u32 4294901760, %v13584_v58  ;;  %v13582_v44 = vmul.f32 %v23733_v31, %v23695_v33 }
0x1304   :  { %17281 = vmatprep.subr.mxu0 %v23752_v63  ;;  %v13782_v50 = vsub.f32 %v23764_v20, %v23783_v10  ;;  %v13789_v16 = vsub.f32 %v23767_v49, %v23786_v61  ;;  %v13796_v55 = vsub.f32 %v23770_v12, %v23789_v21  ;;  %v13803_v8 = vsub.f32 %v23773_v39, %v23795_v45  ;;  %v13644_v59 = vpop.trf.xlu0 }
0x1305   :  { %17282 = vmatpush3.msra.mxu0 %v23752_v63  ;;  %v23827_v62 = vand.u32 4294901760, %v23798_v56  ;;  %v23830_v25 = vand.u32 4294901760, %v13583_v5  ;;  %v13581_v6 = vmul.f32 %v23733_v31, %v23690_v43  ;;  %v23835_v33 = vsub.f32 %v13585_v36, %v23805_v30 }
0x1306   :  { %17283 = vmatprep.subr.mxu0 %v23754_v27  ;;  %v13783_v28 = vand.u32 4294901760, %v13782_v50  ;;  %v13790_v46 = vand.u32 4294901760, %v13789_v16  ;;  %v13810_v48 = vsub.f32 %v23779_v53, %v23811_v2  ;;  %v23841_v1 = vand.u32 4294901760, %v23814_v24 }
0x1307   :  { %17284 = vmatpush3.msra.mxu0 %v23754_v27  ;;  %v13797_v17 = vand.u32 4294901760, %v13796_v55  ;;  %v23844_v37 = vand.u32 4294901760, %v13582_v44  ;;  %v13580_v43 = vmul.f32 %v23733_v31, %v23687_v41  ;;  %v23849_v54 = vsub.f32 %v13584_v58, %v23819_v57 }
0x1308   :  { %17285 = vmatprep.subr.mxu0 %v23756_v26  ;;  %17315 = vmatprep.subr.mxu1 %v13783_v28  ;;  %v13804_v0 = vand.u32 4294901760, %v13803_v8  ;;  %v23852_v40 = vand.u32 4294901760, %v13642_v7  ;;  %v13817_v42 = vsub.f32 %v23798_v56, %v23827_v62  ;;  %v23857_v29 = vand.u32 4294901760, %v13581_v6 }
0x1309   :  { %17286 = vmatpush3.msra.mxu0 %v23756_v26  ;;  %17316 = vmatpush3.msra.mxu1 %v13783_v28  ;;  %v23860_v18 = vand.u32 4294901760, %v23835_v33  ;;  %v13579_v41 = vmul.f32 %v23733_v31, %v23680_v4  ;;  %v23865_v11 = vsub.f32 %v13583_v5, %v23830_v25  ;;  %v13824_v9 = vsub.f32 %v23814_v24, %v23841_v1 }
0x130a   :  { %17287 = vmatprep.subr.mxu0 %v23758_v52  ;;  %17317 = vmatprep.subr.mxu1 %v13790_v46  ;;  %v13811_v35 = vand.u32 4294901760, %v13810_v48  ;;  %v23871_v51 = vand.u32 4294901760, %v13580_v43  ;;  %v23874_v15 = vand.u32 4294901760, %v23849_v54  ;;  %v23877_v4 = vsub.f32 %v13582_v44, %v23844_v37 }
0x130b   :  { %17288 = vmatpush3.msra.mxu0 %v23758_v52  ;;  %17318 = vmatpush3.msra.mxu1 %v13790_v46  ;;  %v23881_v36 = vsub.f32 %v13642_v7, %v23852_v40  ;;  %v13818_v58 = vand.u32 4294901760, %v13817_v42  ;;  %v23883_v50 = vand.u32 4294901760, %v13643_v32  ;;  %v13578_v16 = vmul.f32 %v23733_v31, %v23677_v60 }
0x130c   :  { %17289 = vmatprep.subr.mxu0 %v23776_v13  ;;  %17319 = vmatprep.subr.mxu1 %v13797_v17  ;;  %v13831_v5 = vsub.f32 %v23835_v33, %v23860_v18  ;;  %v23890_v28 = vand.u32 4294901760, %v13579_v41  ;;  %v23893_v55 = vand.u32 4294901760, %v23865_v11  ;;  %v23896_v7 = vsub.f32 %v13581_v6, %v23857_v29 }
0x130d   :  { %17290 = vmatpush3.msra.mxu0 %v23776_v13  ;;  %17320 = vmatpush3.msra.mxu1 %v13797_v17  ;;  %v13825_v44 = vand.u32 4294901760, %v13824_v9  ;;  %v23899_v8 = vand.u32 4294901760, %v13644_v59  ;;  %v13838_v60 = vsub.f32 %v23849_v54, %v23874_v15  ;;  %v23905_v46 = vand.u32 4294901760, %v23877_v4 }
0x130e   :  { %17291 = vmatprep.subr.mxu0 %v23805_v30  ;;  %17321 = vmatprep.subr.mxu1 %v13804_v0  ;;  %v13577_v48 = vmul.f32 %v23733_v31, %v23674_v19  ;;  %v23910_v6 = vsub.f32 %v13580_v43, %v23871_v51  ;;  %v24401_v17 = vand.u32 4294901760, %v23881_v36  ;;  %v23917_v42 = vand.u32 4294901760, %v13578_v16 }
0x130f   :  { %17292 = vmatpush3.msra.mxu0 %v23805_v30  ;;  %17322 = vmatpush3.msra.mxu1 %v13804_v0  ;;  %24876 = vst [vmem:[#allocation69_spill] sm:$0xff] %v23905_v46  ;;  %v23915_v0 = vsub.f32 %v13643_v32, %v23883_v50  ;;  %v13832_v9 = vand.u32 4294901760, %v13831_v5  ;;  %v13845_v19 = vsub.f32 %v23865_v11, %v23893_v55  ;;  %v23923_v31 = vand.u32 4294901760, %v23896_v7 }
0x1310   :  { %17293 = vmatprep.subr.mxu0 %v23819_v57  ;;  %17323 = vmatprep.subr.mxu1 %v13811_v35  ;;  %v23926_v43 = vsub.f32 %v13579_v41, %v23890_v28  ;;  %v23930_v32 = vsub.f32 %v13644_v59, %v23899_v8  ;;  %v23935_v5 = vand.u32 4294901760, %v13577_v48  ;;  %v23938_v22 = vand.u32 4294901760, %v23910_v6 }
0x1311   :  { %17294 = vmatpush3.msra.mxu0 %v23819_v57  ;;  %17324 = vmatpush3.msra.mxu1 %v13811_v35  ;;  %24877 = vst [vmem:[#allocation43_spill] sm:$0xff] %v23923_v31  ;;  %v13839_v35 = vand.u32 4294901760, %v13838_v60  ;;  %v24408_v41 = vand.u32 4294901760, %v23915_v0  ;;  %v23943_v59 = vsub.f32 %v13578_v16, %v23917_v42  ;;  %v13846_v60 = vand.u32 4294901760, %v13845_v19 }
0x1312   :  { %17295 = vmatprep.subr.mxu0 %v23830_v25  ;;  %17325 = vmatprep.subr.mxu1 %v13818_v58  ;;  %24878 = vst [vmem:[#allocation97_spill] sm:$0xff] %v23938_v22  ;;  %v13859_v34 = vsub.f32 %v23896_v7, %v23923_v31  ;;  %v23952_v38 = vand.u32 4294901760, %v23926_v43  ;;  %v23960_v19 = vsub.f32 %v13577_v48, %v23935_v5  ;;  %v24880_v48 = vand.u32 4294901760, %v23930_v32 }
0x1313   :  { %17296 = vmatpush3.msra.mxu0 %v23830_v25  ;;  %17326 = vmatpush3.msra.mxu1 %v13818_v58  ;;  %v13852_v58 = vsub.f32 %v23877_v4, %v23905_v46  ;;  %v13761_v31 = vsub.f32 %v23915_v0, %v24408_v41 }
0x1314   :  { %17297 = vmatprep.subr.mxu0 %v23844_v37  ;;  %17327 = vmatprep.subr.mxu1 %v13825_v44  ;;  %24879 = vst [vmem:[#allocation87_spill] sm:$0xff] %v23952_v38  ;;  %v13771_v46 = vsub.f32 %v23930_v32, %v24880_v48 }
0x1315   :  { %17298 = vmatpush3.msra.mxu0 %v23844_v37  ;;  %17328 = vmatpush3.msra.mxu1 %v13825_v44  ;;  %v13751_v44 = vsub.f32 %v23881_v36, %v24401_v17  ;;  %v13866_v17 = vsub.f32 %v23910_v6, %v23938_v22  ;;  %v13873_v22 = vsub.f32 %v23926_v43, %v23952_v38 }
0x1316   :  { %17299 = vmatprep.subr.mxu0 %v23857_v29  ;;  %17329 = vmatprep.subr.mxu1 %v13832_v9  ;;  %v13772_v38 = vand.u32 4294901760, %v13771_v46 }
0x1317   :  { %17300 = vmatpush3.msra.mxu0 %v23857_v29  ;;  %17330 = vmatpush3.msra.mxu1 %v13832_v9  ;;  %v13853_v9 = vand.u32 4294901760, %v13852_v58  ;;  %v13752_v16 = vand.u32 4294901760, %v13751_v44  ;;  %v13860_v58 = vand.u32 4294901760, %v13859_v34  ;;  %v23978_v44 = vand.u32 4294901760, %v23960_v19 }
0x1318   :  { %17301 = vmatprep.subr.mxu0 %v23871_v51  ;;  %17331 = vmatprep.subr.mxu1 %v13839_v35  ;;  %v13762_v34 = vand.u32 4294901760, %v13761_v31  ;;  %v13874_v48 = vand.u32 4294901760, %v13873_v22 }
0x1319   :  { %17302 = vmatpush3.msra.mxu0 %v23871_v51  ;;  %17332 = vmatpush3.msra.mxu1 %v13839_v35  ;;  %v23967_v35 = vand.u32 4294901760, %v23943_v59 }
0x131a   :  { %17303 = vmatprep.subr.mxu0 %v23890_v28  ;;  %17333 = vmatprep.subr.mxu1 %v13846_v60 }
0x131b   :  { %17304 = vmatpush3.msra.mxu0 %v23890_v28  ;;  %17334 = vmatpush3.msra.mxu1 %v13846_v60  ;;  %v13867_v60 = vand.u32 4294901760, %v13866_v17  ;;  %v13880_v41 = vsub.f32 %v23943_v59, %v23967_v35  ;;  %v13887_v17 = vsub.f32 %v23960_v19, %v23978_v44 }
0x131c   :  { %17305 = vmatprep.subr.mxu0 %v23917_v42  ;;  %17335 = vmatprep.subr.mxu1 %v13853_v9 }
0x131d   :  { %17306 = vmatpush3.msra.mxu0 %v23917_v42  ;;  %17336 = vmatpush3.msra.mxu1 %v13853_v9  ;;  %v13881_v31 = vand.u32 4294901760, %v13880_v41  ;;  %v13888_v22 = vand.u32 4294901760, %v13887_v17 }
0x131e   :  { %17307 = vmatprep.subr.mxu0 %v23935_v5  ;;  %17337 = vmatprep.subr.mxu1 %v13860_v58 }
0x131f   :  { %17308 = vmatpush3.msra.mxu0 %v23935_v5  ;;  %17338 = vmatpush3.msra.mxu1 %v13860_v58 }
0x1320   :  { %17310 = vmatmul.mubr.f32.vlgmr.msra.gmra.mxu0 %v13752_v16  ;;  %17339 = vmatprep.subr.mxu1 %v13867_v60 }
0x1321   :  { %17353 = vmatprep.subr.mxu0 %v23764_v20  ;;  %17340 = vmatpush3.msra.mxu1 %v13867_v60 }
0x1322   :  { %17354 = vmatpush3.msra.mxu0 %v23764_v20  ;;  %17341 = vmatprep.subr.mxu1 %v13874_v48  ;;  %v24883_v20 = vand.u32 4294901760, %v23915_v0 }
0x1323   :  { %17355 = vmatprep.subr.mxu0 %v23767_v49  ;;  %17312 = vmatprep.mubr.f32.mxu0 %v13762_v34 }
0x1324   :  { %17342 = vmatpush3.msra.mxu1 %v13874_v48  ;;  %17356 = vmatpush3.msra.mxu0 %v23767_v49  ;;  %v24884_v49 = vand.u32 4294901760, %v23930_v32 }
0x1325   :  { %17313 = vmatmul.mubr.f32.gmra.mxu0 %v13772_v38  ;;  %17343 = vmatprep.subr.mxu1 %v13881_v31  ;;  %v24881_v38 = vand.u32 4294901760, %v23663_v23 }
0x1326   :  { %17357 = vmatprep.subr.mxu0 %v23770_v12  ;;  %17344 = vmatpush3.msra.mxu1 %v13881_v31 }
0x1327   :  { %17358 = vmatpush3.msra.mxu0 %v23770_v12  ;;  %17385 = vmatprep.mubr.f32.mxu0 %v23663_v23  ;;  %v24882_v23 = vand.u32 4294901760, %v23881_v36 }
0x1328   :  { %17345 = vmatprep.subr.mxu1 %v13888_v22  ;;  %17359 = vmatprep.subr.mxu0 %v23773_v39 }
0x1329   :  { %17346 = vmatpush3.msra.mxu1 %v13888_v22  ;;  %17360 = vmatpush3.msra.mxu0 %v23773_v39  ;;  %v24891_v22 = vld [vmem:[#allocation104_spill] sm:$0xff] }
0x132a   :  { %17348 = vmatmul.mubr.f32.vlgmr.msra.gmra.mxu1 %v23852_v40  ;;  %17361 = vmatprep.subr.mxu0 %v23779_v53 }
0x132b   :  { %17391 = vmatprep.subr.mxu1 %v23750_v47  ;;  %17362 = vmatpush3.msra.mxu0 %v23779_v53 }
0x132c   :  { %17392 = vmatpush3.msra.mxu1 %v23750_v47  ;;  %17363 = vmatprep.subr.mxu0 %v23798_v56 }
0x132d   :  { %17393 = vmatprep.subr.mxu1 %v23748_v14  ;;  %17350 = vmatprep.mubr.f32.mxu1 %v23883_v50 }
0x132e   :  { %17364 = vmatpush3.msra.mxu0 %v23798_v56  ;;  %17394 = vmatpush3.msra.mxu1 %v23748_v14 }
0x132f   :  { %17351 = vmatmul.mubr.f32.gmra.mxu1 %v23899_v8  ;;  %17365 = vmatprep.subr.mxu0 %v23814_v24 }
0x1330   :  { %17395 = vmatprep.subr.mxu1 %v23752_v63  ;;  %17366 = vmatpush3.msra.mxu0 %v23814_v24 }
0x1331   :  { %17396 = vmatpush3.msra.mxu1 %v23752_v63  ;;  %17423 = vmatprep.mubr.f32.mxu1 %v24881_v38 }
0x1332   :  { %17367 = vmatprep.subr.mxu0 %v23835_v33  ;;  %17397 = vmatprep.subr.mxu1 %v23754_v27 }
0x1333   :  { %17368 = vmatpush3.msra.mxu0 %v23835_v33  ;;  %17398 = vmatpush3.msra.mxu1 %v23754_v27 }
0x1334   :  { %17369 = vmatprep.subr.mxu0 %v23849_v54  ;;  %17399 = vmatprep.subr.mxu1 %v23756_v26 }
0x1335   :  { %17370 = vmatpush3.msra.mxu0 %v23849_v54  ;;  %17400 = vmatpush3.msra.mxu1 %v23756_v26 }
0x1336   :  { %17371 = vmatprep.subr.mxu0 %v23865_v11  ;;  %17401 = vmatprep.subr.mxu1 %v23758_v52 }
0x1337   :  { %17372 = vmatpush3.msra.mxu0 %v23865_v11  ;;  %17402 = vmatpush3.msra.mxu1 %v23758_v52 }
0x1338   :  { %17373 = vmatprep.subr.mxu0 %v23877_v4  ;;  %17403 = vmatprep.subr.mxu1 %v23776_v13 }
0x1339   :  { %17374 = vmatpush3.msra.mxu0 %v23877_v4  ;;  %17404 = vmatpush3.msra.mxu1 %v23776_v13 }
0x133a   :  { %17375 = vmatprep.subr.mxu0 %v23896_v7  ;;  %17405 = vmatprep.subr.mxu1 %v23805_v30 }
0x133b   :  { %17376 = vmatpush3.msra.mxu0 %v23896_v7  ;;  %17406 = vmatpush3.msra.mxu1 %v23805_v30 }
0x133c   :  { %17377 = vmatprep.subr.mxu0 %v23910_v6  ;;  %17407 = vmatprep.subr.mxu1 %v23819_v57 }
0x133d   :  { %17378 = vmatpush3.msra.mxu0 %v23910_v6  ;;  %17408 = vmatpush3.msra.mxu1 %v23819_v57 }
0x133e   :  { %17379 = vmatprep.subr.mxu0 %v23926_v43  ;;  %17409 = vmatprep.subr.mxu1 %v23830_v25 }
0x133f   :  { %17380 = vmatpush3.msra.mxu0 %v23926_v43  ;;  %17410 = vmatpush3.msra.mxu1 %v23830_v25 }
0x1340   :  { %17381 = vmatprep.subr.mxu0 %v23943_v59  ;;  %17411 = vmatprep.subr.mxu1 %v23844_v37 }
0x1341   :  { %17382 = vmatpush3.msra.mxu0 %v23943_v59  ;;  %17412 = vmatpush3.msra.mxu1 %v23844_v37  ;;  %v13611_v12 = vpop.permute.xlu1 %13610 }
0x1342   :  { %17383 = vmatprep.subr.mxu0 %v23960_v19  ;;  %17413 = vmatprep.subr.mxu1 %v23857_v29 }
0x1343   :  { %17384 = vmatpush3.msra.mxu0 %v23960_v19  ;;  %17414 = vmatpush3.msra.mxu1 %v23857_v29 }
0x1344   :  { %17386 = vmatmul.mubr.f32.vlgmr.msra.gmra.mxu0 %v23881_v36  ;;  %17415 = vmatprep.subr.mxu1 %v23871_v51 }
0x1345   :  { %17429 = vmatprep.subr.mxu0 %v23783_v10  ;;  %17388 = vmatprep.mubr.f32.mxu0 %v23915_v0  ;;  %v13615_v53 = vpop.permute.xlu1 %13614 }
0x1346   :  { %17416 = vmatpush3.msra.mxu1 %v23871_v51  ;;  %17430 = vmatpush3.msra.mxu0 %v23783_v10 }
0x1347   :  { %17417 = vmatprep.subr.mxu1 %v23890_v28  ;;  %17431 = vmatprep.subr.mxu0 %v23786_v61 }
0x1348   :  { %17418 = vmatpush3.msra.mxu1 %v23890_v28  ;;  %17432 = vmatpush3.msra.mxu0 %v23786_v61 }
0x1349   :  { %17389 = vmatmul.mubr.f32.gmra.mxu0 %v23930_v32  ;;  %17419 = vmatprep.subr.mxu1 %v23917_v42 }
0x134a   :  { %17433 = vmatprep.subr.mxu0 %v23789_v21  ;;  %17420 = vmatpush3.msra.mxu1 %v23917_v42 }
0x134b   :  { %17434 = vmatpush3.msra.mxu0 %v23789_v21  ;;  %17461 = vmatprep.mubr.f32.mxu0 %v23659_v3  ;;  %v13619_v21 = vpop.permute.xlu1 %13618 }
0x134c   :  { %17421 = vmatprep.subr.mxu1 %v23935_v5  ;;  %17435 = vmatprep.subr.mxu0 %v23795_v45 }
0x134d   :  { %17422 = vmatpush3.msra.mxu1 %v23935_v5  ;;  %17436 = vmatpush3.msra.mxu0 %v23795_v45 }
0x134e   :  { %17424 = vmatmul.mubr.f32.vlgmr.msra.gmra.mxu1 %v24882_v23  ;;  %17437 = vmatprep.subr.mxu0 %v23811_v2 }
0x134f   :  { %17467 = vmatprep.subr.mxu1 %v23750_v47  ;;  %17426 = vmatprep.mubr.f32.mxu1 %v24883_v20  ;;  %v13623_v24 = vpop.permute.xlu1 %13622 }
0x1350   :  { %17438 = vmatpush3.msra.mxu0 %v23811_v2  ;;  %17468 = vmatpush3.msra.mxu1 %v23750_v47  ;;  %v24887_v47 = vld [vmem:[#allocation97_spill] sm:$0xff] }
0x1351   :  { %17439 = vmatprep.subr.mxu0 %v23827_v62  ;;  %17469 = vmatprep.subr.mxu1 %v23748_v14 }
0x1352   :  { %17440 = vmatpush3.msra.mxu0 %v23827_v62  ;;  %17470 = vmatpush3.msra.mxu1 %v23748_v14  ;;  %v24886_v14 = vld [vmem:[#allocation43_spill] sm:$0xff] }
0x1353   :  { %17427 = vmatmul.mubr.f32.gmra.mxu1 %v24884_v49  ;;  %17441 = vmatprep.subr.mxu0 %v23841_v1  ;;  %v14429_v33 = vpop.permute.xlu1 %14428 }
0x1354   :  { %17471 = vmatprep.subr.mxu1 %v23752_v63  ;;  %17442 = vmatpush3.msra.mxu0 %v23841_v1 }
0x1355   :  { %17472 = vmatpush3.msra.mxu1 %v23752_v63  ;;  %17499 = vmatprep.mubr.f32.mxu1 %v23659_v3  ;;  %v24885_v3 = vld [vmem:[#allocation69_spill] sm:$0xff]  ;;  %v24888_v63 = vld [vmem:[#allocation87_spill] sm:$0xff] }
0x1356   :  { %17443 = vmatprep.subr.mxu0 %v23860_v18  ;;  %17473 = vmatprep.subr.mxu1 %v23754_v27 }
0x1357   :  { %17444 = vmatpush3.msra.mxu0 %v23860_v18  ;;  %17474 = vmatpush3.msra.mxu1 %v23754_v27  ;;  %v24889_v27 = vld [vmem:[#allocation12_spill] sm:$0xff] }
0x1358   :  { %17445 = vmatprep.subr.mxu0 %v23874_v15  ;;  %17475 = vmatprep.subr.mxu1 %v23756_v26 }
0x1359   :  { %17446 = vmatpush3.msra.mxu0 %v23874_v15  ;;  %17476 = vmatpush3.msra.mxu1 %v23756_v26  ;;  %v24890_v26 = vld [vmem:[#allocation107_spill] sm:$0xff] }
0x135a   :  { %17447 = vmatprep.subr.mxu0 %v23893_v55  ;;  %17477 = vmatprep.subr.mxu1 %v23758_v52 }
0x135b   :  { %17448 = vmatpush3.msra.mxu0 %v23893_v55  ;;  %17478 = vmatpush3.msra.mxu1 %v23758_v52 }
0x135c   :  { %17449 = vmatprep.subr.mxu0 %v24885_v3  ;;  %17479 = vmatprep.subr.mxu1 %v23776_v13 }
0x135d   :  { %17450 = vmatpush3.msra.mxu0 %v24885_v3  ;;  %17480 = vmatpush3.msra.mxu1 %v23776_v13 }
0x135e   :  { %17451 = vmatprep.subr.mxu0 %v24886_v14  ;;  %17481 = vmatprep.subr.mxu1 %v23805_v30 }
0x135f   :  { %17452 = vmatpush3.msra.mxu0 %v24886_v14  ;;  %17482 = vmatpush3.msra.mxu1 %v23805_v30  ;;  %v24892_v14 = vld [vmem:[#allocation102_spill] sm:$0xff] }
0x1360   :  { %17453 = vmatprep.subr.mxu0 %v24887_v47  ;;  %17483 = vmatprep.subr.mxu1 %v23819_v57 }
0x1361   :  { %17454 = vmatpush3.msra.mxu0 %v24887_v47  ;;  %17484 = vmatpush3.msra.mxu1 %v23819_v57 }
0x1362   :  { %17455 = vmatprep.subr.mxu0 %v24888_v63  ;;  %17485 = vmatprep.subr.mxu1 %v23830_v25 }
0x1363   :  { %17456 = vmatpush3.msra.mxu0 %v24888_v63  ;;  %17486 = vmatpush3.msra.mxu1 %v23830_v25 }
0x1364   :  { %17457 = vmatprep.subr.mxu0 %v23967_v35  ;;  %17487 = vmatprep.subr.mxu1 %v23844_v37 }
0x1365   :  { %17458 = vmatpush3.msra.mxu0 %v23967_v35  ;;  %17488 = vmatpush3.msra.mxu1 %v23844_v37 }
0x1366   :  { %17459 = vmatprep.subr.mxu0 %v23978_v44  ;;  %17489 = vmatprep.subr.mxu1 %v23857_v29 }
0x1367   :  { %17460 = vmatpush3.msra.mxu0 %v23978_v44  ;;  %17490 = vmatpush3.msra.mxu1 %v23857_v29 }
0x1368   :  { %17462 = vmatmul.mubr.f32.vlgmr.msra.gmra.mxu0 %v23852_v40  ;;  %17491 = vmatprep.subr.mxu1 %v23871_v51 }
0x1369   :  { %17464 = vmatprep.mubr.f32.mxu0 %v23883_v50  ;;  %17492 = vmatpush3.msra.mxu1 %v23871_v51  ;;  %v14433_v51 = vpop.permute.xlu1 %14432 }
0x136a   :  { %17493 = vmatprep.subr.mxu1 %v23890_v28  ;;  %14436 = vperm.xlu1 %17533, %v24889_v27  }
0x136b   :  { %17494 = vmatpush3.msra.mxu1 %v23890_v28 }
0x136c   :  { %17465 = vmatmul.mubr.f32.gmra.mxu0 %v23899_v8  ;;  %17495 = vmatprep.subr.mxu1 %v23917_v42 }
0x136d   :  { %17496 = vmatpush3.msra.mxu1 %v23917_v42 }
0x136e   :  { %17497 = vmatprep.subr.mxu1 %v23935_v5  ;;  %14440 = vperm.xlu1 %17533, %v24890_v26   ;;  %v24893_v26 = vld [vmem:[#allocation59_spill] sm:$0xff] }
0x136f   :  { %17498 = vmatpush3.msra.mxu1 %v23935_v5 }
0x1370   :  { %17500 = vmatmul.mubr.f32.vlgmr.msra.gmra.mxu1 %v23852_v40 }
0x1371   :  { %17502 = vmatprep.mubr.f32.mxu1 %v23883_v50 }
0x1374   :  { %17503 = vmatmul.mubr.f32.gmra.mxu1 %v23899_v8 }
0x13e0   :  { %v17311_v52 = vpop.f32.mrf.mxu0 }
0x13e1   :  { %v13755_v54 = vadd.f32 %v17311_v52, %v13615_v53 }
0x13e2   :  { %v13744_v39 = vpop.f32.mrf.mxu0 }
0x13e3   :  { %v13745_v29 = vadd.f32 %v13744_v39, %v13611_v12  ;;  %v24894_v39 = vld [vmem:[#allocation89_spill] sm:$0xff] }
0x13e5   :  { %v17314_v13 = vpop.f32.mrf.mxu0  ;;  %v14437_v5 = vpop.permute.xlu1 %14436 }
0x13e6   :  { %v13775_v11 = vadd.f32 %v17314_v13, %v13623_v24 }
0x13e7   :  { %v13764_v61 = vpop.f32.mrf.mxu0 }
0x13e8   :  { %v13765_v50 = vadd.f32 %v13764_v61, %v13619_v21 }
0x13e9   :  { %v14441_v49 = vpop.permute.xlu1 %14440 }
0x13ea   :  { %v17349_v10 = vpop.f32.mrf.mxu1 }
0x13eb   :  { %v13932_v18 = vadd.f32 %v17349_v10, %v13755_v54 }
0x13ec   :  { %v13925_v45 = vpop.f32.mrf.mxu1 }
0x13ed   :  { %v13926_v36 = vadd.f32 %v13925_v45, %v13745_v29 }
0x13ef   :  { %v17352_v30 = vpop.f32.mrf.mxu1 }
0x13f0   :  { %v13944_v55 = vadd.f32 %v17352_v30, %v13775_v11 }
0x13f1   :  { %v13937_v57 = vpop.f32.mrf.mxu1 }
0x13f2   :  { %v13938_v0 = vadd.f32 %v13937_v57, %v13765_v50 }
0x1404   :  { %v17387_v56 = vpop.f32.mrf.mxu0 }
0x1405   :  { %v14055_v28 = vadd.f32 %v17387_v56, %v13932_v18 }
0x1406   :  { %v14047_v2 = vpop.f32.mrf.mxu0 }
0x1407   :  { %v14048_v7 = vadd.f32 %v14047_v2, %v13926_v36 }
0x1409   :  { %v17390_v62 = vpop.f32.mrf.mxu0 }
0x140a   :  { %v14069_v42 = vadd.f32 %v17390_v62, %v13944_v55 }
0x140b   :  { %v14061_v1 = vpop.f32.mrf.mxu0 }
0x140c   :  { %v14062_v59 = vadd.f32 %v14061_v1, %v13938_v0 }
0x140e   :  { %v17425_v25 = vpop.f32.mrf.mxu1 }
0x140f   :  { %v14166_v8 = vadd.f32 %v17425_v25, %v14055_v28 }
0x1410   :  { %v14157_v37 = vpop.f32.mrf.mxu1 }
0x1411   :  { %v14158_v43 = vadd.f32 %v14157_v37, %v14048_v7 }
0x1413   :  { %v17428_v15 = vpop.f32.mrf.mxu1 }
0x1414   :  { %v14182_v16 = vadd.f32 %v17428_v15, %v14069_v42 }
0x1415   :  { %v14173_v46 = vpop.f32.mrf.mxu1 }
0x1416   :  { %v14174_v60 = vadd.f32 %v14173_v46, %v14062_v59 }
0x1428   :  { %v17463_v40 = vpop.f32.mrf.mxu0 }
0x1429   :  { %v14307_v32 = vadd.f32 %v17463_v40, %v14166_v8 }
0x142a   :  { %v14300_v4 = vpop.f32.mrf.mxu0 }
0x142b   :  { %v14301_v9 = vadd.f32 %v14300_v4, %v14158_v43 }
0x142c   :  { %v17466_v6 = vpop.f32.mrf.mxu0 }
0x142d   :  { %v14319_v44 = vadd.f32 %v17466_v6, %v14182_v16 }
0x142e   :  { %v14312_v35 = vpop.f32.mrf.mxu0 }
0x142f   :  { %v14313_v31 = vadd.f32 %v14312_v35, %v14174_v60 }
0x1430   :  { %v17501_v41 = vpop.f32.mrf.mxu1 }
0x1431   :  { %v14412_v19 = vadd.f32 %v17501_v41, %v14307_v32 }
0x1432   :  { %v14405_v58 = vpop.f32.mrf.mxu1 }
0x1433   :  { %v14444_v34 = vmul.f32 %v14433_v51, %v14412_v19  ;;  %v14406_v48 = vadd.f32 %v14405_v58, %v14301_v9 }
0x1434   :  { %v17504_v17 = vpop.f32.mrf.mxu1 }
0x1435   :  { %v14448_v38 = vadd.f32 %v14444_v34, %v24891_v22  ;;  %v14443_v23 = vmul.f32 %v14429_v33, %v14406_v48  ;;  %v14424_v20 = vadd.f32 %v17504_v17, %v14319_v44 }
0x1436   :  { %v14417_v3 = vpop.f32.mrf.mxu1 }
0x1437   :  { %14452 = vst [vmem:[%s24158_s4 + $0x8] sm:$0xff] %v14448_v38  ;;  %v14447_v47 = vadd.f32 %v14443_v23, %v24892_v14  ;;  %v14446_v63 = vmul.f32 %v14441_v49, %v14424_v20  ;;  %v14418_v27 = vadd.f32 %v14417_v3, %v14313_v31 }
0x1439   :  { %14451 = vst [vmem:[%s24158_s4] sm:$0xff] %v14447_v47  ;;  %v14450_v52 = vadd.f32 %v14446_v63, %v24893_v26  ;;  %v14445_v12 = vmul.f32 %v14437_v5, %v14418_v27 }
0x143b   :  { %14454 = vst [vmem:[%s24158_s4 + $0x18] sm:$0xff] %v14450_v52  ;;  %v14449_v13 = vadd.f32 %v14445_v12, %v24894_v39 }
0x143d   :  { %14453 = vst [vmem:[%s24158_s4 + $0x10] sm:$0xff] %v14449_v13 }

</bundles_post_ra>
